<compile_context>
chip_gen: v6e
topology: v6e:2x2x1
jax: 0.10.0
libtpu: 0.0.40
codegen_flags: <defaults>
</compile_context>

<pallas_src>
import functools

import jax
import jax.numpy as jnp
from jax.experimental import pallas as pl
from jax.experimental.pallas import tpu as pltpu

_EPS = 1e-5  # BatchNorm2d eps (training-mode batch statistics, biased variance)


# ----------------------------------------------------------------------------
# Device introspection: (multicore?, M-tile lane target, scoped-VMEM limit bytes)
# ----------------------------------------------------------------------------
@functools.lru_cache(maxsize=1)
def _device_cfg():
    try:
        kind = jax.devices()[0].device_kind.lower()
    except Exception:  # pragma: no cover - defensive
        return False, 1024, None
    if "v7" in kind or "7x" in kind:
        return True, 1024, 40 << 20          # 64 MiB physical VMEM, 2 TensorCores
    if "v5 lite" in kind or "v5lite" in kind or "v5e" in kind:
        return False, 1024, 48 << 20         # raise the 16 MiB default scoped limit
    if "v6" in kind or "v5" in kind or "v4" in kind:
        return False, 2048, 64 << 20         # 128 MiB physical VMEM, 1 TensorCore
    return False, 1024, None                 # unknown chip: keep compiler defaults


def _pick_m_tile(m, target):
    """Largest multiple of 128 that divides m and is <= target (else full m)."""
    if m <= target or m % 128 != 0:
        return m
    best = 128
    d = 128
    while d <= target:
        if m % d == 0:
            best = d
        d += 128
    return best


# ----------------------------------------------------------------------------
# Fused Pallas kernel:  sum_s lhs_s[g] @ rhs_s[g]  (+bias)  (+BatchNorm)  (+act)
# Orientation A (channels_on_rows=True):  lhs=W (Cout,K), rhs=A (K,M)  -> (Cout,M)
# Orientation B (channels_on_rows=False): lhs=A^T (M,K), rhs=W^T (K,Cout) -> (M,Cout)
# ----------------------------------------------------------------------------
def _make_kernel(G, n_seg, has_bias, has_bn, post_act, channels_on_rows):
    has_aux = has_bias or has_bn
    red_axis = 1 if channels_on_rows else 0   # per-channel reduction axis (2-D slice)

    def kernel(*refs):
        pos = 0
        lhs = refs[pos:pos + n_seg]; pos += n_seg
        rhs = refs[pos:pos + n_seg]; pos += n_seg
        aux = None
        if has_aux:
            aux = refs[pos]; pos += 1
        o_ref = refs[pos]; pos += 1
        acc_ref = refs[pos] if has_bn else None

        def matmul(g):
            # Chained accumulation over K-segments; f32 accumulation on the MXU
            # (MRB in-place accumulate on v7x, MRF+vadd elsewhere).
            acc = jnp.dot(lhs[0][g], rhs[0][g], preferred_element_type=jnp.float32)
            for s in range(1, n_seg):
                acc = acc + jnp.dot(lhs[s][g], rhs[s][g],
                                    preferred_element_type=jnp.float32)
            return acc

        def activate(y):
            if post_act == "relu":
                return jnp.maximum(y, 0.0)
            if post_act == "tanh":
                return jnp.tanh(y)
            return y

        if not has_bn:
            for g in range(G):
                y = matmul(g)
                if has_bias:
                    y = y + aux[...]            # (Cout,1) or (1,Cout) broadcast
                o_ref[g] = activate(y).astype(o_ref.dtype)
            return

        # BatchNorm path: stream the raw conv outputs into an f32 VMEM scratch,
        # then two-pass (shifted) batch statistics over all groups and positions.
        for g in range(G):
            acc_ref[g] = matmul(g)

        if channels_on_rows:
            gamma, beta = aux[:, 0:1], aux[:, 1:2]          # (Cout, 1)
        else:
            gamma, beta = aux[0:1, :], aux[1:2, :]          # (1, Cout)

        cnt = float(G * acc_ref.shape[1 + red_axis])
        s1 = acc_ref[0].sum(axis=red_axis, keepdims=True)
        for g in range(1, G):
            s1 = s1 + acc_ref[g].sum(axis=red_axis, keepdims=True)
        mean = s1 * (1.0 / cnt)

        s2 = None
        for g in range(G):
            d = acc_ref[g] - mean
            t = (d * d).sum(axis=red_axis, keepdims=True)
            s2 = t if s2 is None else s2 + t
        var = s2 * (1.0 / cnt)

        scale = jax.lax.rsqrt(var + _EPS) * gamma
        shift = beta - mean * scale
        for g in range(G):
            o_ref[g] = activate(acc_ref[g] * scale + shift).astype(o_ref.dtype)

    return kernel


def fused_conv(w_segs, a_segs, aux=None, has_bias=False, has_bn=False,
               post_act=None, out_dtype=jnp.bfloat16):
    """One pallas_call per conv layer.

    w_segs: list of (G, Cout, K_s) bf16 weight matrices (one per K-segment).
    a_segs: list of (G, K_s, M)  bf16 patch matrices (transposed im2col layout).
    aux:    (1, Cout) bias row or (2, Cout) [gamma; beta] f32, or None.
    Returns (G, Cout, M) in `out_dtype`.
    """
    assert not (has_bias and has_bn)
    n_seg = len(w_segs)
    G, Cout, _ = w_segs[0].shape
    M = a_segs[0].shape[2]
    multicore, lane_target, vmem_limit = _device_cfg()
    has_aux = has_bias or has_bn

    # Orientation: put the larger of (M, Cout) on the lane dimension.
    channels_on_rows = M >= Cout

    if channels_on_rows:
        lhs_list = list(w_segs)                                       # (G,Cout,Ks)
        rhs_list = [a.astype(jnp.bfloat16) for a in a_segs]           # (G,Ks,M)
        aux_arr = None if aux is None else jnp.transpose(aux)         # (Cout,n_aux)
    else:
        lhs_list = [jnp.transpose(a, (0, 2, 1)).astype(jnp.bfloat16)  # (G,M,Ks)
                    for a in a_segs]
        rhs_list = [jnp.transpose(w, (0, 2, 1)) for w in w_segs]      # (G,Ks,Cout)
        aux_arr = aux                                                 # (n_aux,Cout)

    # Grid selection:
    #  * no-BN layers: tile M (multiple of 128) for DMA/compute pipelining.
    #  * BN layers on multicore (v7x): split Cout (per-channel stats stay exact).
    csplit, mb = 1, M
    if channels_on_rows:
        if has_bn:
            if multicore and Cout % 32 == 0 and Cout >= 32:
                csplit = 2
        else:
            mb = _pick_m_tile(M, lane_target)
    cb = Cout // csplit
    if channels_on_rows:
        grid_n = csplit if has_bn else M // mb
    else:
        grid_n = 1

    inputs, in_specs = [], []
    if channels_on_rows:
        if csplit > 1:                       # grid over Cout
            w_idx = lambda i: (0, i, 0)
            a_idx = lambda i: (0, 0, 0)
            x_idx = lambda i: (i, 0)
            o_idx = lambda i: (0, i, 0)
        else:                                # grid over M (possibly trivial)
            w_idx = lambda i: (0, 0, 0)
            a_idx = lambda i: (0, 0, i)
            x_idx = lambda i: (0, 0)
            o_idx = lambda i: (0, 0, i)
        for w in lhs_list:
            inputs.append(w)
            in_specs.append(pl.BlockSpec((G, cb, w.shape[2]), w_idx))
        for a in rhs_list:
            inputs.append(a)
            in_specs.append(pl.BlockSpec((G, a.shape[1], mb), a_idx))
        if has_aux:
            inputs.append(aux_arr)
            in_specs.append(pl.BlockSpec((cb, aux_arr.shape[1]), x_idx))
        out_block = (G, cb, mb)
        out_spec = pl.BlockSpec(out_block, o_idx)
        out_shape = jax.ShapeDtypeStruct((G, Cout, M), out_dtype)
    else:
        triv3 = lambda i: (0, 0, 0)
        for a in lhs_list:
            inputs.append(a)
            in_specs.append(pl.BlockSpec(a.shape, triv3))
        for w in rhs_list:
            inputs.append(w)
            in_specs.append(pl.BlockSpec(w.shape, triv3))
        if has_aux:
            inputs.append(aux_arr)
            in_specs.append(pl.BlockSpec(aux_arr.shape, lambda i: (0, 0)))
        out_block = (G, M, Cout)
        out_spec = pl.BlockSpec(out_block, triv3)
        out_shape = jax.ShapeDtypeStruct((G, M, Cout), out_dtype)

    kernel = _make_kernel(G, n_seg, has_bias, has_bn, post_act, channels_on_rows)
    scratch = [pltpu.VMEM(out_block, jnp.float32)] if has_bn else []

    cp_kwargs = {"dimension_semantics": ("parallel",)}
    if vmem_limit is not None:
        cp_kwargs["vmem_limit_bytes"] = int(vmem_limit)

    out = pl.pallas_call(
        kernel,
        grid=(grid_n,),
        in_specs=in_specs,
        out_specs=out_spec,
        out_shape=out_shape,
        scratch_shapes=scratch,
        compiler_params=pltpu.CompilerParams(**cp_kwargs),
    )(*inputs)

    if not channels_on_rows:
        out = jnp.transpose(out, (0, 2, 1))          # back to (G, Cout, M)
    return out


# ----------------------------------------------------------------------------
# Plain-JAX patch / weight preparation (activations are laid out (C, N, H, W))
# ----------------------------------------------------------------------------
def _down_patches(x):
    """x: (C, N, H, W) -> A: (1, 16*C, N*Ho*Wo) for Conv2d(k=4, s=2, p=1)."""
    C, N, H, W = x.shape
    Ho, Wo = H // 2, W // 2
    xp = jnp.pad(x, ((0, 0), (0, 0), (1, 1), (1, 1)))
    taps = []
    for kh in range(4):
        for kw in range(4):
            taps.append(xp[:, :, kh:kh + 2 * Ho:2, kw:kw + 2 * Wo:2])
    a = jnp.stack(taps, axis=0).reshape(16 * C, N * Ho * Wo)
    return a[None], (N, Ho, Wo)


def _down_weight(w):
    """w: (Cout, Cin, 4, 4) -> (1, Cout, 16*Cin), columns ordered (kh, kw, ci)."""
    Cout, Cin = w.shape[0], w.shape[1]
    return jnp.transpose(w, (0, 2, 3, 1)).reshape(Cout, 16 * Cin)[None]


# 4-phase (output-parity) decomposition of ConvTranspose2d(k=4, s=2, p=1):
# output row 2*io + a uses input rows {io, io-1} (a=0, kernel taps kh=1,3)
# or {io+1, io} (a=1, kernel taps kh=0,2); same for columns.
_UP_SHIFT = {0: (1, 0), 1: (2, 1)}   # slice starts into the pad-1 input
_UP_K = {0: (1, 3), 1: (0, 2)}       # matching ConvTranspose kernel indices


def _up_patches(x):
    """x: (C, N, H, W) -> A: (4, 4*C, N*H*W); group g = 2*row_parity + col_parity."""
    C, N, H, W = x.shape
    xp = jnp.pad(x, ((0, 0), (0, 0), (1, 1), (1, 1)))
    groups = []
    for pa in range(2):
        for pb in range(2):
            taps = []
            for sr in _UP_SHIFT[pa]:
                for sc in _UP_SHIFT[pb]:
                    taps.append(xp[:, :, sr:sr + H, sc:sc + W])
            groups.append(jnp.stack(taps, 0).reshape(4 * C, N * H * W))
    return jnp.stack(groups, 0)


def _up_weight(wt):
    """wt: (Cin, Cout, 4, 4) torch ConvTranspose layout -> (4, Cout, 4*Cin)."""
    Cin, Cout = wt.shape[0], wt.shape[1]
    groups = []
    for pa in range(2):
        for pb in range(2):
            taps = []
            for kh in _UP_K[pa]:
                for kw in _UP_K[pb]:
                    taps.append(wt[:, :, kh, kw])                 # (Cin, Cout)
            wg = jnp.stack(taps, 0)                               # (4, Cin, Cout)
            groups.append(jnp.transpose(wg, (2, 0, 1)).reshape(Cout, 4 * Cin))
    return jnp.stack(groups, 0)


def _interleave_up(o, N, H, W):
    """o: (4, Cout, N*H*W) parity outputs -> (Cout, N, 2H, 2W)."""
    Cout = o.shape[1]
    o = o.reshape(2, 2, Cout, N, H, W)
    o = jnp.transpose(o, (2, 3, 4, 0, 5, 1))   # (co, n, io, pa, jo, pb)
    return o.reshape(Cout, N, 2 * H, 2 * W)


def _leaky(x):
    return jnp.where(x >= 0, x, 0.2 * x)


def _relu(x):
    return jnp.maximum(x, 0)


# ----------------------------------------------------------------------------
# Layer wrappers
# ----------------------------------------------------------------------------
def down_conv(x, w_mat, bn=None, pre_act=None, post_relu=False):
    """(LeakyReLU) -> Conv2d(k4,s2,p1,bias=False) -> (BatchNorm) (-> fused ReLU)."""
    if pre_act == "leaky":
        x = _leaky(x)                       # applied once to x, NOT per-patch
    a, (N, Ho, Wo) = _down_patches(x)
    o = fused_conv([w_mat], [a], aux=bn, has_bn=bn is not None,
                   post_act="relu" if post_relu else None)
    return o.reshape(w_mat.shape[1], N, Ho, Wo)


def up_conv(segments, w_segs, aux=None, has_bias=False, has_bn=False,
            post_act=None, out_dtype=jnp.bfloat16):
    """ReLU -> ConvTranspose2d(k4,s2,p1) -> (BatchNorm | Tanh) (-> fused ReLU).

    `segments` is a list of (tensor, relu_already_applied); they are the channel
    groups of the (never materialized) skip concat, each one K-segment of the
    fused matmul.
    """
    N, H, W = segments[0][0].shape[1:]
    a_list = []
    for s, done in segments:
        if not done:
            s = _relu(s)                    # ReLU once per tensor, not per patch
        a_list.append(_up_patches(s))
    o = fused_conv(w_segs, a_list, aux=aux, has_bias=has_bias, has_bn=has_bn,
                   post_act=post_act, out_dtype=out_dtype)
    return _interleave_up(o, N, H, W)


# ----------------------------------------------------------------------------
# Parameter construction (deterministic, pre-reshaped bf16 matmul layout)
# ----------------------------------------------------------------------------
def _init_block(key, outer_nc, inner_nc, submodule, outermost=False, innermost=False):
    ks = jax.random.split(key, 7)
    p = {"outermost": outermost, "innermost": innermost, "sub": submodule}

    dw = 0.05 * jax.random.normal(ks[0], (inner_nc, outer_nc, 4, 4), jnp.float32)
    p["down_w"] = _down_weight(dw).astype(jnp.bfloat16)          # (1, inner, 16*outer)

    up_in = inner_nc if innermost else inner_nc * 2
    uw = 0.05 * jax.random.normal(ks[1], (up_in, outer_nc, 4, 4), jnp.float32)
    if innermost:
        p["up_w_segs"] = [_up_weight(uw).astype(jnp.bfloat16)]
    else:                                   # split by input-channel group: [sub, skip]
        p["up_w_segs"] = [_up_weight(uw[:inner_nc]).astype(jnp.bfloat16),
                          _up_weight(uw[inner_nc:]).astype(jnp.bfloat16)]

    if outermost:
        b = 0.05 * jax.random.normal(ks[2], (outer_nc,), jnp.float32)
        p["up_bias"] = b.reshape(1, outer_nc)
    else:
        g = 1.0 + 0.1 * jax.random.normal(ks[3], (outer_nc,), jnp.float32)
        b = 0.1 * jax.random.normal(ks[4], (outer_nc,), jnp.float32)
        p["up_bn"] = jnp.stack([g, b], axis=0)                   # (2, outer_nc)
        if not innermost:
            g2 = 1.0 + 0.1 * jax.random.normal(ks[5], (inner_nc,), jnp.float32)
            b2 = 0.1 * jax.random.normal(ks[6], (inner_nc,), jnp.float32)
            p["down_bn"] = jnp.stack([g2, b2], axis=0)           # (2, inner_nc)
    return p


def init_unet_params(key, input_nc, output_nc, num_downs, ngf):
    assert input_nc == output_nc
    keys = iter(jax.random.split(key, num_downs + 1))
    blk = _init_block(next(keys), ngf * 8, ngf * 8, None, innermost=True)
    for _ in range(num_downs - 5):
        blk = _init_block(next(keys), ngf * 8, ngf * 8, blk)
    blk = _init_block(next(keys), ngf * 4, ngf * 8, blk)
    blk = _init_block(next(keys), ngf * 2, ngf * 4, blk)
    blk = _init_block(next(keys), ngf, ngf * 2, blk)
    blk = _init_block(next(keys), output_nc, ngf, blk, outermost=True)
    return blk


# ----------------------------------------------------------------------------
# Forward recursion (skip concat never materialized; ReLUs fused where the
# producer has a single consumer)
# ----------------------------------------------------------------------------
def block_forward(p, x):
    """x: (C, N, H, W). Returns the torch block's `model(x)` output, with the
    parent's uprelu pre-fused into the epilogue for non-outermost blocks
    (its sole consumer applies exactly that ReLU)."""
    outermost, innermost = p["outermost"], p["innermost"]
    h = down_conv(
        x, p["down_w"], bn=p.get("down_bn"),
        pre_act=None if outermost else "leaky",
        post_relu=innermost)        # innermost down output's only consumer is uprelu
    if innermost:
        segs = [(h, True)]
    else:
        y_sub = block_forward(p["sub"], h)          # already ReLU'd in its epilogue
        segs = [(y_sub, True), (h, False)]          # order matches cat([sub, h], 1)
    if outermost:
        return up_conv(segs, p["up_w_segs"], aux=p["up_bias"], has_bias=True,
                       post_act="tanh", out_dtype=jnp.float32)
    return up_conv(segs, p["up_w_segs"], aux=p["up_bn"], has_bn=True,
                   post_act="relu")                 # fuse parent's uprelu (idempotent)


def unet_forward(params, x_nchw):
    x = jnp.transpose(x_nchw, (1, 0, 2, 3)).astype(jnp.bfloat16)   # NCHW -> (C,N,H,W)
    y = block_forward(params, x)                                    # (C,N,H,W) f32
    return jnp.transpose(y, (1, 0, 2, 3))                           # -> NCHW


# ----------------------------------------------------------------------------
if __name__ == "__main__":
    key = jax.random.PRNGKey(0)
    k_param, k_input = jax.random.split(key)

    input_nc = output_nc = 4
    num_downs = 5
    ngf = 8
    N, H, W = 2, 32, 32                            # H = W = 2**num_downs

    params = init_unet_params(k_param, input_nc, output_nc, num_downs, ngf)
    x = jax.random.normal(k_input, (N, input_nc, H, W), jnp.float32)   # NCHW like PyTorch

    fwd = jax.jit(functools.partial(unet_forward, params))
    out = jax.block_until_ready(fwd(x))

    assert out.shape == (N, output_nc, H, W), out.shape
    assert bool(jnp.all(jnp.isfinite(out)))
    print("KERNEL_OK")
</pallas_src>

<mosaic_0001>
module attributes {stable_mosaic.version = 11 : i64} {
  func.func @kernel(%arg0: i32, %arg1: memref<1x8x64xbf16, #tpu.memory_space<vmem>>, %arg2: memref<1x64x512xbf16, #tpu.memory_space<vmem>>, %arg3: memref<1x8x512xbf16, #tpu.memory_space<vmem>>) attributes {dimension_semantics = [#tpu.dimension_semantics<parallel>], iteration_bounds = array<i64: 1>, scalar_prefetch = 0 : i64, scratch_operands = 0 : i64, tpu.core_type = #tpu.core_type<tc>, window_params = [{pipeline_mode = #tpu.pipeline_mode<synchronous>, transform_indices = @transform_0, window_bounds = array<i64: 1, 8, 64>}, {transform_indices = @transform_1, window_bounds = array<i64: 1, 64, 512>}, {transform_indices = @transform_2, window_bounds = array<i64: 1, 8, 512>}]} {
    %c0 = arith.constant 0 : index
    %c0_0 = arith.constant 0 : index
    %c0_1 = arith.constant 0 : index
    %0 = vector.load %arg1[%c0, %c0_0, %c0_1] : memref<1x8x64xbf16, #tpu.memory_space<vmem>>, vector<1x8x64xbf16>
    %1 = vector.shape_cast %0 : vector<1x8x64xbf16> to vector<8x64xbf16>
    %c0_2 = arith.constant 0 : index
    %c0_3 = arith.constant 0 : index
    %c0_4 = arith.constant 0 : index
    %2 = vector.load %arg2[%c0_2, %c0_3, %c0_4] : memref<1x64x512xbf16, #tpu.memory_space<vmem>>, vector<1x64x512xbf16>
    %3 = vector.shape_cast %2 : vector<1x64x512xbf16> to vector<64x512xbf16>
    %cst = arith.constant dense<0.000000e+00> : vector<8x512xf32>
    %4 = tpu.matmul %1, %3, %cst {dimension_numbers = #tpu.dot_dimension_numbers<[1], [0], [0], [1], [0, 0, 1, 1], [], []>} : vector<8x64xbf16>, vector<64x512xbf16>, vector<8x512xf32> -> vector<8x512xf32>
    %5 = arith.truncf %4 : vector<8x512xf32> to vector<8x512xbf16>
    %c0_5 = arith.constant 0 : index
    %c0_6 = arith.constant 0 : index
    %c0_7 = arith.constant 0 : index
    %6 = vector.load %arg3[%c0_5, %c0_6, %c0_7] : memref<1x8x512xbf16, #tpu.memory_space<vmem>>, vector<1x8x512xbf16>
    %7 = vector.shape_cast %6 : vector<1x8x512xbf16> to vector<8x512xbf16>
    %8 = vector.shape_cast %5 : vector<8x512xbf16> to vector<1x8x512xbf16>
    tpu.vector_store %arg3[%c0_5, %c0_6, %c0_7], %8 {strides = array<i32>} : memref<1x8x512xbf16, #tpu.memory_space<vmem>>, vector<1x8x512xbf16>,
    return
  }
  func.func @transform_0(%arg0: i32) -> (i32, i32, i32) {
    %c0_i32 = arith.constant 0 : i32
    %c0_i32_0 = arith.constant 0 : i32
    %c0_i32_1 = arith.constant 0 : i32
    %c0_i32_2 = arith.constant 0 : i32
    return %c0_i32, %c0_i32_0, %c0_i32_1 : i32, i32, i32
  }
  func.func @transform_1(%arg0: i32) -> (i32, i32, i32) {
    %c0_i32 = arith.constant 0 : i32
    %c0_i32_0 = arith.constant 0 : i32
    %c0_i32_1 = arith.constant 0 : i32
    return %c0_i32, %c0_i32_0, %arg0 : i32, i32, i32
  }
  func.func @transform_2(%arg0: i32) -> (i32, i32, i32) {
    %c0_i32 = arith.constant 0 : i32
    %c0_i32_0 = arith.constant 0 : i32
    %c0_i32_1 = arith.constant 0 : i32
    return %c0_i32, %c0_i32_0, %arg0 : i32, i32, i32
  }
}

module attributes {stable_mosaic.version = 11 : i64} {
  func.func @kernel(%arg0: i32, %arg1: memref<1x16x128xbf16, #tpu.memory_space<vmem>>, %arg2: memref<1x128x128xbf16, #tpu.memory_space<vmem>>, %arg3: memref<16x2xf32, #tpu.memory_space<vmem>>, %arg4: memref<1x16x128xbf16, #tpu.memory_space<vmem>>, %arg5: memref<1x16x128xf32, #tpu.memory_space<vmem>>) attributes {dimension_semantics = [#tpu.dimension_semantics<parallel>], iteration_bounds = array<i64: 1>, scalar_prefetch = 0 : i64, scratch_operands = 1 : i64, tpu.core_type = #tpu.core_type<tc>, window_params = [{pipeline_mode = #tpu.pipeline_mode<synchronous>, transform_indices = @transform_0, window_bounds = array<i64: 1, 16, 128>}, {transform_indices = @transform_1, window_bounds = array<i64: 1, 128, 128>}, {pipeline_mode = #tpu.pipeline_mode<synchronous>, transform_indices = @transform_2, window_bounds = array<i64: 16, 2>}, {transform_indices = @transform_3, window_bounds = array<i64: 1, 16, 128>}]} {
    %c0 = arith.constant 0 : index
    %c0_0 = arith.constant 0 : index
    %c0_1 = arith.constant 0 : index
    %0 = vector.load %arg1[%c0, %c0_0, %c0_1] : memref<1x16x128xbf16, #tpu.memory_space<vmem>>, vector<1x16x128xbf16>
    %1 = vector.shape_cast %0 : vector<1x16x128xbf16> to vector<16x128xbf16>
    %c0_2 = arith.constant 0 : index
    %c0_3 = arith.constant 0 : index
    %c0_4 = arith.constant 0 : index
    %2 = vector.load %arg2[%c0_2, %c0_3, %c0_4] : memref<1x128x128xbf16, #tpu.memory_space<vmem>>, vector<1x128x128xbf16>
    %3 = vector.shape_cast %2 : vector<1x128x128xbf16> to vector<128x128xbf16>
    %cst = arith.constant dense<0.000000e+00> : vector<16x128xf32>
    %4 = tpu.matmul %1, %3, %cst {dimension_numbers = #tpu.dot_dimension_numbers<[1], [0], [0], [1], [0, 0, 1, 1], [], []>} : vector<16x128xbf16>, vector<128x128xbf16>, vector<16x128xf32> -> vector<16x128xf32>
    %c0_5 = arith.constant 0 : index
    %c0_6 = arith.constant 0 : index
    %c0_7 = arith.constant 0 : index
    %5 = vector.load %arg5[%c0_5, %c0_6, %c0_7] : memref<1x16x128xf32, #tpu.memory_space<vmem>>, vector<1x16x128xf32>
    %6 = vector.shape_cast %5 : vector<1x16x128xf32> to vector<16x128xf32>
    %7 = vector.shape_cast %4 : vector<16x128xf32> to vector<1x16x128xf32>
    tpu.vector_store %arg5[%c0_5, %c0_6, %c0_7], %7 {strides = array<i32>} : memref<1x16x128xf32, #tpu.memory_space<vmem>>, vector<1x16x128xf32>,
    %c0_8 = arith.constant 0 : index
    %c0_9 = arith.constant 0 : index
    %8 = vector.load %arg3[%c0_8, %c0_9] : memref<16x2xf32, #tpu.memory_space<vmem>>, vector<16x1xf32>
    %c0_10 = arith.constant 0 : index
    %c1 = arith.constant 1 : index
    %9 = vector.load %arg3[%c0_10, %c1] : memref<16x2xf32, #tpu.memory_space<vmem>>, vector<16x1xf32>
    %c0_11 = arith.constant 0 : index
    %c0_12 = arith.constant 0 : index
    %c0_13 = arith.constant 0 : index
    %10 = vector.load %arg5[%c0_11, %c0_12, %c0_13] : memref<1x16x128xf32, #tpu.memory_space<vmem>>, vector<1x16x128xf32>
    %11 = vector.shape_cast %10 : vector<1x16x128xf32> to vector<16x128xf32>
    %cst_14 = arith.constant dense<0.000000e+00> : vector<16xf32>
    %12 = vector.multi_reduction <add>, %11, %cst_14 [1] : vector<16x128xf32> to vector<16xf32>
    %13 = vector.shape_cast %12 : vector<16xf32> to vector<16x1xf32>
    %cst_15 = arith.constant 7.812500e-03 : f32
    %14 = vector.broadcast %cst_15 : f32 to vector<16x1xf32>
    %15 = arith.mulf %13, %14 : vector<16x1xf32>
    %c0_16 = arith.constant 0 : index
    %c0_17 = arith.constant 0 : index
    %c0_18 = arith.constant 0 : index
    %16 = vector.load %arg5[%c0_16, %c0_17, %c0_18] : memref<1x16x128xf32, #tpu.memory_space<vmem>>, vector<1x16x128xf32>
    %17 = vector.shape_cast %16 : vector<1x16x128xf32> to vector<16x128xf32>
    %18 = vector.broadcast %15 : vector<16x1xf32> to vector<16x128xf32>
    %19 = arith.subf %17, %18 : vector<16x128xf32>
    %20 = arith.mulf %19, %19 : vector<16x128xf32>
    %cst_19 = arith.constant dense<0.000000e+00> : vector<16xf32>
    %21 = vector.multi_reduction <add>, %20, %cst_19 [1] : vector<16x128xf32> to vector<16xf32>
    %22 = vector.shape_cast %21 : vector<16xf32> to vector<16x1xf32>
    %cst_20 = arith.constant 7.812500e-03 : f32
    %23 = vector.broadcast %cst_20 : f32 to vector<16x1xf32>
    %24 = arith.mulf %22, %23 : vector<16x1xf32>
    %cst_21 = arith.constant 9.99999974E-6 : f32
    %25 = vector.broadcast %cst_21 : f32 to vector<16x1xf32>
    %26 = arith.addf %24, %25 : vector<16x1xf32>
    %27 = math.rsqrt %26 : vector<16x1xf32>
    %28 = arith.mulf %27, %8 : vector<16x1xf32>
    %29 = arith.mulf %15, %28 : vector<16x1xf32>
    %30 = arith.subf %9, %29 : vector<16x1xf32>
    %c0_22 = arith.constant 0 : index
    %c0_23 = arith.constant 0 : index
    %c0_24 = arith.constant 0 : index
    %31 = vector.load %arg5[%c0_22, %c0_23, %c0_24] : memref<1x16x128xf32, #tpu.memory_space<vmem>>, vector<1x16x128xf32>
    %32 = vector.shape_cast %31 : vector<1x16x128xf32> to vector<16x128xf32>
    %33 = vector.broadcast %28 : vector<16x1xf32> to vector<16x128xf32>
    %34 = arith.mulf %32, %33 : vector<16x128xf32>
    %35 = vector.broadcast %30 : vector<16x1xf32> to vector<16x128xf32>
    %36 = arith.addf %34, %35 : vector<16x128xf32>
    %37 = arith.truncf %36 : vector<16x128xf32> to vector<16x128xbf16>
    %c0_25 = arith.constant 0 : index
    %c0_26 = arith.constant 0 : index
    %c0_27 = arith.constant 0 : index
    %38 = vector.load %arg4[%c0_25, %c0_26, %c0_27] : memref<1x16x128xbf16, #tpu.memory_space<vmem>>, vector<1x16x128xbf16>
    %39 = vector.shape_cast %38 : vector<1x16x128xbf16> to vector<16x128xbf16>
    %40 = vector.shape_cast %37 : vector<16x128xbf16> to vector<1x16x128xbf16>
    tpu.vector_store %arg4[%c0_25, %c0_26, %c0_27], %40 {strides = array<i32>} : memref<1x16x128xbf16, #tpu.memory_space<vmem>>, vector<1x16x128xbf16>,
    return
  }
  func.func @transform_0(%arg0: i32) -> (i32, i32, i32) {
    %c0_i32 = arith.constant 0 : i32
    %c0_i32_0 = arith.constant 0 : i32
    %c0_i32_1 = arith.constant 0 : i32
    %c0_i32_2 = arith.constant 0 : i32
    return %c0_i32, %c0_i32_0, %c0_i32_1 : i32, i32, i32
  }
  func.func @transform_1(%arg0: i32) -> (i32, i32, i32) {
    %c0_i32 = arith.constant 0 : i32
    %c0_i32_0 = arith.constant 0 : i32
    %c0_i32_1 = arith.constant 0 : i32
    return %c0_i32, %c0_i32_0, %arg0 : i32, i32, i32
  }
  func.func @transform_2(%arg0: i32) -> (i32, i32) {
    %c0_i32 = arith.constant 0 : i32
    %c0_i32_0 = arith.constant 0 : i32
    %c0_i32_1 = arith.constant 0 : i32
    return %c0_i32, %c0_i32_0 : i32, i32
  }
  func.func @transform_3(%arg0: i32) -> (i32, i32, i32) {
    %c0_i32 = arith.constant 0 : i32
    %c0_i32_0 = arith.constant 0 : i32
    %c0_i32_1 = arith.constant 0 : i32
    return %c0_i32, %c0_i32_0, %arg0 : i32, i32, i32
  }
}

module attributes {stable_mosaic.version = 11 : i64} {
  func.func @kernel(%arg0: i32, %arg1: memref<1x32x256xbf16, #tpu.memory_space<vmem>>, %arg2: memref<1x256x32xbf16, #tpu.memory_space<vmem>>, %arg3: memref<32x2xf32, #tpu.memory_space<vmem>>, %arg4: memref<1x32x32xbf16, #tpu.memory_space<vmem>>, %arg5: memref<1x32x32xf32, #tpu.memory_space<vmem>>) attributes {dimension_semantics = [#tpu.dimension_semantics<parallel>], iteration_bounds = array<i64: 1>, scalar_prefetch = 0 : i64, scratch_operands = 1 : i64, tpu.core_type = #tpu.core_type<tc>, window_params = [{pipeline_mode = #tpu.pipeline_mode<synchronous>, transform_indices = @transform_0, window_bounds = array<i64: 1, 32, 256>}, {transform_indices = @transform_1, window_bounds = array<i64: 1, 256, 32>}, {pipeline_mode = #tpu.pipeline_mode<synchronous>, transform_indices = @transform_2, window_bounds = array<i64: 32, 2>}, {transform_indices = @transform_3, window_bounds = array<i64: 1, 32, 32>}]} {
    %c0 = arith.constant 0 : index
    %c0_0 = arith.constant 0 : index
    %c0_1 = arith.constant 0 : index
    %0 = vector.load %arg1[%c0, %c0_0, %c0_1] : memref<1x32x256xbf16, #tpu.memory_space<vmem>>, vector<1x32x256xbf16>
    %1 = vector.shape_cast %0 : vector<1x32x256xbf16> to vector<32x256xbf16>
    %c0_2 = arith.constant 0 : index
    %c0_3 = arith.constant 0 : index
    %c0_4 = arith.constant 0 : index
    %2 = vector.load %arg2[%c0_2, %c0_3, %c0_4] : memref<1x256x32xbf16, #tpu.memory_space<vmem>>, vector<1x256x32xbf16>
    %3 = vector.shape_cast %2 : vector<1x256x32xbf16> to vector<256x32xbf16>
    %cst = arith.constant dense<0.000000e+00> : vector<32x32xf32>
    %4 = tpu.matmul %1, %3, %cst {dimension_numbers = #tpu.dot_dimension_numbers<[1], [0], [0], [1], [0, 0, 1, 1], [], []>} : vector<32x256xbf16>, vector<256x32xbf16>, vector<32x32xf32> -> vector<32x32xf32>
    %c0_5 = arith.constant 0 : index
    %c0_6 = arith.constant 0 : index
    %c0_7 = arith.constant 0 : index
    %5 = vector.load %arg5[%c0_5, %c0_6, %c0_7] : memref<1x32x32xf32, #tpu.memory_space<vmem>>, vector<1x32x32xf32>
    %6 = vector.shape_cast %5 : vector<1x32x32xf32> to vector<32x32xf32>
    %7 = vector.shape_cast %4 : vector<32x32xf32> to vector<1x32x32xf32>
    tpu.vector_store %arg5[%c0_5, %c0_6, %c0_7], %7 {strides = array<i32>} : memref<1x32x32xf32, #tpu.memory_space<vmem>>, vector<1x32x32xf32>,
    %c0_8 = arith.constant 0 : index
    %c0_9 = arith.constant 0 : index
    %8 = vector.load %arg3[%c0_8, %c0_9] : memref<32x2xf32, #tpu.memory_space<vmem>>, vector<32x1xf32>
    %c0_10 = arith.constant 0 : index
    %c1 = arith.constant 1 : index
    %9 = vector.load %arg3[%c0_10, %c1] : memref<32x2xf32, #tpu.memory_space<vmem>>, vector<32x1xf32>
    %c0_11 = arith.constant 0 : index
    %c0_12 = arith.constant 0 : index
    %c0_13 = arith.constant 0 : index
    %10 = vector.load %arg5[%c0_11, %c0_12, %c0_13] : memref<1x32x32xf32, #tpu.memory_space<vmem>>, vector<1x32x32xf32>
    %11 = vector.shape_cast %10 : vector<1x32x32xf32> to vector<32x32xf32>
    %cst_14 = arith.constant dense<0.000000e+00> : vector<32xf32>
    %12 = vector.multi_reduction <add>, %11, %cst_14 [1] : vector<32x32xf32> to vector<32xf32>
    %13 = vector.shape_cast %12 : vector<32xf32> to vector<32x1xf32>
    %cst_15 = arith.constant 3.125000e-02 : f32
    %14 = vector.broadcast %cst_15 : f32 to vector<32x1xf32>
    %15 = arith.mulf %13, %14 : vector<32x1xf32>
    %c0_16 = arith.constant 0 : index
    %c0_17 = arith.constant 0 : index
    %c0_18 = arith.constant 0 : index
    %16 = vector.load %arg5[%c0_16, %c0_17, %c0_18] : memref<1x32x32xf32, #tpu.memory_space<vmem>>, vector<1x32x32xf32>
    %17 = vector.shape_cast %16 : vector<1x32x32xf32> to vector<32x32xf32>
    %18 = vector.broadcast %15 : vector<32x1xf32> to vector<32x32xf32>
    %19 = arith.subf %17, %18 : vector<32x32xf32>
    %20 = arith.mulf %19, %19 : vector<32x32xf32>
    %cst_19 = arith.constant dense<0.000000e+00> : vector<32xf32>
    %21 = vector.multi_reduction <add>, %20, %cst_19 [1] : vector<32x32xf32> to vector<32xf32>
    %22 = vector.shape_cast %21 : vector<32xf32> to vector<32x1xf32>
    %cst_20 = arith.constant 3.125000e-02 : f32
    %23 = vector.broadcast %cst_20 : f32 to vector<32x1xf32>
    %24 = arith.mulf %22, %23 : vector<32x1xf32>
    %cst_21 = arith.constant 9.99999974E-6 : f32
    %25 = vector.broadcast %cst_21 : f32 to vector<32x1xf32>
    %26 = arith.addf %24, %25 : vector<32x1xf32>
    %27 = math.rsqrt %26 : vector<32x1xf32>
    %28 = arith.mulf %27, %8 : vector<32x1xf32>
    %29 = arith.mulf %15, %28 : vector<32x1xf32>
    %30 = arith.subf %9, %29 : vector<32x1xf32>
    %c0_22 = arith.constant 0 : index
    %c0_23 = arith.constant 0 : index
    %c0_24 = arith.constant 0 : index
    %31 = vector.load %arg5[%c0_22, %c0_23, %c0_24] : memref<1x32x32xf32, #tpu.memory_space<vmem>>, vector<1x32x32xf32>
    %32 = vector.shape_cast %31 : vector<1x32x32xf32> to vector<32x32xf32>
    %33 = vector.broadcast %28 : vector<32x1xf32> to vector<32x32xf32>
    %34 = arith.mulf %32, %33 : vector<32x32xf32>
    %35 = vector.broadcast %30 : vector<32x1xf32> to vector<32x32xf32>
    %36 = arith.addf %34, %35 : vector<32x32xf32>
    %37 = arith.truncf %36 : vector<32x32xf32> to vector<32x32xbf16>
    %c0_25 = arith.constant 0 : index
    %c0_26 = arith.constant 0 : index
    %c0_27 = arith.constant 0 : index
    %38 = vector.load %arg4[%c0_25, %c0_26, %c0_27] : memref<1x32x32xbf16, #tpu.memory_space<vmem>>, vector<1x32x32xbf16>
    %39 = vector.shape_cast %38 : vector<1x32x32xbf16> to vector<32x32xbf16>
    %40 = vector.shape_cast %37 : vector<32x32xbf16> to vector<1x32x32xbf16>
    tpu.vector_store %arg4[%c0_25, %c0_26, %c0_27], %40 {strides = array<i32>} : memref<1x32x32xbf16, #tpu.memory_space<vmem>>, vector<1x32x32xbf16>,
    return
  }
  func.func @transform_0(%arg0: i32) -> (i32, i32, i32) {
    %c0_i32 = arith.constant 0 : i32
    %c0_i32_0 = arith.constant 0 : i32
    %c0_i32_1 = arith.constant 0 : i32
    %c0_i32_2 = arith.constant 0 : i32
    return %c0_i32, %c0_i32_0, %c0_i32_1 : i32, i32, i32
  }
  func.func @transform_1(%arg0: i32) -> (i32, i32, i32) {
    %c0_i32 = arith.constant 0 : i32
    %c0_i32_0 = arith.constant 0 : i32
    %c0_i32_1 = arith.constant 0 : i32
    return %c0_i32, %c0_i32_0, %arg0 : i32, i32, i32
  }
  func.func @transform_2(%arg0: i32) -> (i32, i32) {
    %c0_i32 = arith.constant 0 : i32
    %c0_i32_0 = arith.constant 0 : i32
    %c0_i32_1 = arith.constant 0 : i32
    return %c0_i32, %c0_i32_0 : i32, i32
  }
  func.func @transform_3(%arg0: i32) -> (i32, i32, i32) {
    %c0_i32 = arith.constant 0 : i32
    %c0_i32_0 = arith.constant 0 : i32
    %c0_i32_1 = arith.constant 0 : i32
    return %c0_i32, %c0_i32_0, %arg0 : i32, i32, i32
  }
}

module attributes {stable_mosaic.version = 11 : i64} {
  func.func @kernel(%arg0: i32, %arg1: memref<1x8x512xbf16, #tpu.memory_space<vmem>>, %arg2: memref<1x512x64xbf16, #tpu.memory_space<vmem>>, %arg3: memref<2x64xf32, #tpu.memory_space<vmem>>, %arg4: memref<1x8x64xbf16, #tpu.memory_space<vmem>>, %arg5: memref<1x8x64xf32, #tpu.memory_space<vmem>>) attributes {dimension_semantics = [#tpu.dimension_semantics<parallel>], iteration_bounds = array<i64: 1>, scalar_prefetch = 0 : i64, scratch_operands = 1 : i64, tpu.core_type = #tpu.core_type<tc>, window_params = [{pipeline_mode = #tpu.pipeline_mode<synchronous>, transform_indices = @transform_0, window_bounds = array<i64: 1, 8, 512>}, {pipeline_mode = #tpu.pipeline_mode<synchronous>, transform_indices = @transform_1, window_bounds = array<i64: 1, 512, 64>}, {pipeline_mode = #tpu.pipeline_mode<synchronous>, transform_indices = @transform_2, window_bounds = array<i64: 2, 64>}, {pipeline_mode = #tpu.pipeline_mode<synchronous>, transform_indices = @transform_3, window_bounds = array<i64: 1, 8, 64>}]} {
    %c0 = arith.constant 0 : index
    %c0_0 = arith.constant 0 : index
    %c0_1 = arith.constant 0 : index
    %0 = vector.load %arg1[%c0, %c0_0, %c0_1] : memref<1x8x512xbf16, #tpu.memory_space<vmem>>, vector<1x8x512xbf16>
    %1 = vector.shape_cast %0 : vector<1x8x512xbf16> to vector<8x512xbf16>
    %c0_2 = arith.constant 0 : index
    %c0_3 = arith.constant 0 : index
    %c0_4 = arith.constant 0 : index
    %2 = vector.load %arg2[%c0_2, %c0_3, %c0_4] : memref<1x512x64xbf16, #tpu.memory_space<vmem>>, vector<1x512x64xbf16>
    %3 = vector.shape_cast %2 : vector<1x512x64xbf16> to vector<512x64xbf16>
    %cst = arith.constant dense<0.000000e+00> : vector<8x64xf32>
    %4 = tpu.matmul %1, %3, %cst {dimension_numbers = #tpu.dot_dimension_numbers<[1], [0], [0], [1], [0, 0, 1, 1], [], []>} : vector<8x512xbf16>, vector<512x64xbf16>, vector<8x64xf32> -> vector<8x64xf32>
    %c0_5 = arith.constant 0 : index
    %c0_6 = arith.constant 0 : index
    %c0_7 = arith.constant 0 : index
    %5 = vector.load %arg5[%c0_5, %c0_6, %c0_7] : memref<1x8x64xf32, #tpu.memory_space<vmem>>, vector<1x8x64xf32>
    %6 = vector.shape_cast %5 : vector<1x8x64xf32> to vector<8x64xf32>
    %7 = vector.shape_cast %4 : vector<8x64xf32> to vector<1x8x64xf32>
    tpu.vector_store %arg5[%c0_5, %c0_6, %c0_7], %7 {strides = array<i32>} : memref<1x8x64xf32, #tpu.memory_space<vmem>>, vector<1x8x64xf32>,
    %c0_8 = arith.constant 0 : index
    %c0_9 = arith.constant 0 : index
    %8 = vector.load %arg3[%c0_8, %c0_9] : memref<2x64xf32, #tpu.memory_space<vmem>>, vector<1x64xf32>
    %c1 = arith.constant 1 : index
    %c0_10 = arith.constant 0 : index
    %9 = vector.load %arg3[%c1, %c0_10] : memref<2x64xf32, #tpu.memory_space<vmem>>, vector<1x64xf32>
    %c0_11 = arith.constant 0 : index
    %c0_12 = arith.constant 0 : index
    %c0_13 = arith.constant 0 : index
    %10 = vector.load %arg5[%c0_11, %c0_12, %c0_13] : memref<1x8x64xf32, #tpu.memory_space<vmem>>, vector<1x8x64xf32>
    %11 = vector.shape_cast %10 : vector<1x8x64xf32> to vector<8x64xf32>
    %cst_14 = arith.constant dense<0.000000e+00> : vector<64xf32>
    %12 = vector.multi_reduction <add>, %11, %cst_14 [0] : vector<8x64xf32> to vector<64xf32>
    %13 = vector.shape_cast %12 : vector<64xf32> to vector<1x64xf32>
    %cst_15 = arith.constant 1.250000e-01 : f32
    %14 = vector.broadcast %cst_15 : f32 to vector<1x64xf32>
    %15 = arith.mulf %13, %14 : vector<1x64xf32>
    %c0_16 = arith.constant 0 : index
    %c0_17 = arith.constant 0 : index
    %c0_18 = arith.constant 0 : index
    %16 = vector.load %arg5[%c0_16, %c0_17, %c0_18] : memref<1x8x64xf32, #tpu.memory_space<vmem>>, vector<1x8x64xf32>
    %17 = vector.shape_cast %16 : vector<1x8x64xf32> to vector<8x64xf32>
    %18 = vector.broadcast %15 : vector<1x64xf32> to vector<8x64xf32>
    %19 = arith.subf %17, %18 : vector<8x64xf32>
    %20 = arith.mulf %19, %19 : vector<8x64xf32>
    %cst_19 = arith.constant dense<0.000000e+00> : vector<64xf32>
    %21 = vector.multi_reduction <add>, %20, %cst_19 [0] : vector<8x64xf32> to vector<64xf32>
    %22 = vector.shape_cast %21 : vector<64xf32> to vector<1x64xf32>
    %cst_20 = arith.constant 1.250000e-01 : f32
    %23 = vector.broadcast %cst_20 : f32 to vector<1x64xf32>
    %24 = arith.mulf %22, %23 : vector<1x64xf32>
    %cst_21 = arith.constant 9.99999974E-6 : f32
    %25 = vector.broadcast %cst_21 : f32 to vector<1x64xf32>
    %26 = arith.addf %24, %25 : vector<1x64xf32>
    %27 = math.rsqrt %26 : vector<1x64xf32>
    %28 = arith.mulf %27, %8 : vector<1x64xf32>
    %29 = arith.mulf %15, %28 : vector<1x64xf32>
    %30 = arith.subf %9, %29 : vector<1x64xf32>
    %c0_22 = arith.constant 0 : index
    %c0_23 = arith.constant 0 : index
    %c0_24 = arith.constant 0 : index
    %31 = vector.load %arg5[%c0_22, %c0_23, %c0_24] : memref<1x8x64xf32, #tpu.memory_space<vmem>>, vector<1x8x64xf32>
    %32 = vector.shape_cast %31 : vector<1x8x64xf32> to vector<8x64xf32>
    %33 = vector.broadcast %28 : vector<1x64xf32> to vector<8x64xf32>
    %34 = arith.mulf %32, %33 : vector<8x64xf32>
    %35 = vector.broadcast %30 : vector<1x64xf32> to vector<8x64xf32>
    %36 = arith.addf %34, %35 : vector<8x64xf32>
    %37 = arith.truncf %36 : vector<8x64xf32> to vector<8x64xbf16>
    %c0_25 = arith.constant 0 : index
    %c0_26 = arith.constant 0 : index
    %c0_27 = arith.constant 0 : index
    %38 = vector.load %arg4[%c0_25, %c0_26, %c0_27] : memref<1x8x64xbf16, #tpu.memory_space<vmem>>, vector<1x8x64xbf16>
    %39 = vector.shape_cast %38 : vector<1x8x64xbf16> to vector<8x64xbf16>
    %40 = vector.shape_cast %37 : vector<8x64xbf16> to vector<1x8x64xbf16>
    tpu.vector_store %arg4[%c0_25, %c0_26, %c0_27], %40 {strides = array<i32>} : memref<1x8x64xbf16, #tpu.memory_space<vmem>>, vector<1x8x64xbf16>,
    return
  }
  func.func @transform_0(%arg0: i32) -> (i32, i32, i32) {
    %c0_i32 = arith.constant 0 : i32
    %c0_i32_0 = arith.constant 0 : i32
    %c0_i32_1 = arith.constant 0 : i32
    %c0_i32_2 = arith.constant 0 : i32
    return %c0_i32, %c0_i32_0, %c0_i32_1 : i32, i32, i32
  }
  func.func @transform_1(%arg0: i32) -> (i32, i32, i32) {
    %c0_i32 = arith.constant 0 : i32
    %c0_i32_0 = arith.constant 0 : i32
    %c0_i32_1 = arith.constant 0 : i32
    %c0_i32_2 = arith.constant 0 : i32
    return %c0_i32, %c0_i32_0, %c0_i32_1 : i32, i32, i32
  }
  func.func @transform_2(%arg0: i32) -> (i32, i32) {
    %c0_i32 = arith.constant 0 : i32
    %c0_i32_0 = arith.constant 0 : i32
    %c0_i32_1 = arith.constant 0 : i32
    return %c0_i32, %c0_i32_0 : i32, i32
  }
  func.func @transform_3(%arg0: i32) -> (i32, i32, i32) {
    %c0_i32 = arith.constant 0 : i32
    %c0_i32_0 = arith.constant 0 : i32
    %c0_i32_1 = arith.constant 0 : i32
    %c0_i32_2 = arith.constant 0 : i32
    return %c0_i32, %c0_i32_0, %c0_i32_1 : i32, i32, i32
  }
}

module attributes {stable_mosaic.version = 11 : i64} {
  func.func @kernel(%arg0: i32, %arg1: memref<1x2x1024xbf16, #tpu.memory_space<vmem>>, %arg2: memref<1x1024x64xbf16, #tpu.memory_space<vmem>>, %arg3: memref<1x2x64xbf16, #tpu.memory_space<vmem>>) attributes {dimension_semantics = [#tpu.dimension_semantics<parallel>], iteration_bounds = array<i64: 1>, scalar_prefetch = 0 : i64, scratch_operands = 0 : i64, tpu.core_type = #tpu.core_type<tc>, window_params = [{pipeline_mode = #tpu.pipeline_mode<synchronous>, transform_indices = @transform_0, window_bounds = array<i64: 1, 2, 1024>}, {pipeline_mode = #tpu.pipeline_mode<synchronous>, transform_indices = @transform_1, window_bounds = array<i64: 1, 1024, 64>}, {pipeline_mode = #tpu.pipeline_mode<synchronous>, transform_indices = @transform_2, window_bounds = array<i64: 1, 2, 64>}]} {
    %c0 = arith.constant 0 : index
    %c0_0 = arith.constant 0 : index
    %c0_1 = arith.constant 0 : index
    %0 = vector.load %arg1[%c0, %c0_0, %c0_1] : memref<1x2x1024xbf16, #tpu.memory_space<vmem>>, vector<1x2x1024xbf16>
    %1 = vector.shape_cast %0 : vector<1x2x1024xbf16> to vector<2x1024xbf16>
    %c0_2 = arith.constant 0 : index
    %c0_3 = arith.constant 0 : index
    %c0_4 = arith.constant 0 : index
    %2 = vector.load %arg2[%c0_2, %c0_3, %c0_4] : memref<1x1024x64xbf16, #tpu.memory_space<vmem>>, vector<1x1024x64xbf16>
    %3 = vector.shape_cast %2 : vector<1x1024x64xbf16> to vector<1024x64xbf16>
    %cst = arith.constant dense<0.000000e+00> : vector<2x64xf32>
    %4 = tpu.matmul %1, %3, %cst {dimension_numbers = #tpu.dot_dimension_numbers<[1], [0], [0], [1], [0, 0, 1, 1], [], []>} : vector<2x1024xbf16>, vector<1024x64xbf16>, vector<2x64xf32> -> vector<2x64xf32>
    %cst_5 = arith.constant 0.000000e+00 : f32
    %5 = vector.broadcast %cst_5 : f32 to vector<2x64xf32>
    %6 = arith.maximumf %4, %5 : vector<2x64xf32>
    %7 = arith.truncf %6 : vector<2x64xf32> to vector<2x64xbf16>
    %c0_6 = arith.constant 0 : index
    %c0_7 = arith.constant 0 : index
    %c0_8 = arith.constant 0 : index
    %8 = vector.load %arg3[%c0_6, %c0_7, %c0_8] : memref<1x2x64xbf16, #tpu.memory_space<vmem>>, vector<1x2x64xbf16>
    %9 = vector.shape_cast %8 : vector<1x2x64xbf16> to vector<2x64xbf16>
    %10 = vector.shape_cast %7 : vector<2x64xbf16> to vector<1x2x64xbf16>
    tpu.vector_store %arg3[%c0_6, %c0_7, %c0_8], %10 {strides = array<i32>} : memref<1x2x64xbf16, #tpu.memory_space<vmem>>, vector<1x2x64xbf16>,
    return
  }
  func.func @transform_0(%arg0: i32) -> (i32, i32, i32) {
    %c0_i32 = arith.constant 0 : i32
    %c0_i32_0 = arith.constant 0 : i32
    %c0_i32_1 = arith.constant 0 : i32
    %c0_i32_2 = arith.constant 0 : i32
    return %c0_i32, %c0_i32_0, %c0_i32_1 : i32, i32, i32
  }
  func.func @transform_1(%arg0: i32) -> (i32, i32, i32) {
    %c0_i32 = arith.constant 0 : i32
    %c0_i32_0 = arith.constant 0 : i32
    %c0_i32_1 = arith.constant 0 : i32
    %c0_i32_2 = arith.constant 0 : i32
    return %c0_i32, %c0_i32_0, %c0_i32_1 : i32, i32, i32
  }
  func.func @transform_2(%arg0: i32) -> (i32, i32, i32) {
    %c0_i32 = arith.constant 0 : i32
    %c0_i32_0 = arith.constant 0 : i32
    %c0_i32_1 = arith.constant 0 : i32
    %c0_i32_2 = arith.constant 0 : i32
    return %c0_i32, %c0_i32_0, %c0_i32_1 : i32, i32, i32
  }
}

module attributes {stable_mosaic.version = 11 : i64} {
  func.func @kernel(%arg0: i32, %arg1: memref<4x2x256xbf16, #tpu.memory_space<vmem>>, %arg2: memref<4x256x64xbf16, #tpu.memory_space<vmem>>, %arg3: memref<2x64xf32, #tpu.memory_space<vmem>>, %arg4: memref<4x2x64xbf16, #tpu.memory_space<vmem>>, %arg5: memref<4x2x64xf32, #tpu.memory_space<vmem>>) attributes {dimension_semantics = [#tpu.dimension_semantics<parallel>], iteration_bounds = array<i64: 1>, scalar_prefetch = 0 : i64, scratch_operands = 1 : i64, tpu.core_type = #tpu.core_type<tc>, window_params = [{pipeline_mode = #tpu.pipeline_mode<synchronous>, transform_indices = @transform_0, window_bounds = array<i64: 4, 2, 256>}, {pipeline_mode = #tpu.pipeline_mode<synchronous>, transform_indices = @transform_1, window_bounds = array<i64: 4, 256, 64>}, {pipeline_mode = #tpu.pipeline_mode<synchronous>, transform_indices = @transform_2, window_bounds = array<i64: 2, 64>}, {pipeline_mode = #tpu.pipeline_mode<synchronous>, transform_indices = @transform_3, window_bounds = array<i64: 4, 2, 64>}]} {
    %c0 = arith.constant 0 : index
    %c0_0 = arith.constant 0 : index
    %c0_1 = arith.constant 0 : index
    %0 = vector.load %arg1[%c0, %c0_0, %c0_1] : memref<4x2x256xbf16, #tpu.memory_space<vmem>>, vector<1x2x256xbf16>
    %1 = vector.shape_cast %0 : vector<1x2x256xbf16> to vector<2x256xbf16>
    %c0_2 = arith.constant 0 : index
    %c0_3 = arith.constant 0 : index
    %c0_4 = arith.constant 0 : index
    %2 = vector.load %arg2[%c0_2, %c0_3, %c0_4] : memref<4x256x64xbf16, #tpu.memory_space<vmem>>, vector<1x256x64xbf16>
    %3 = vector.shape_cast %2 : vector<1x256x64xbf16> to vector<256x64xbf16>
    %cst = arith.constant dense<0.000000e+00> : vector<2x64xf32>
    %4 = tpu.matmul %1, %3, %cst {dimension_numbers = #tpu.dot_dimension_numbers<[1], [0], [0], [1], [0, 0, 1, 1], [], []>} : vector<2x256xbf16>, vector<256x64xbf16>, vector<2x64xf32> -> vector<2x64xf32>
    %c0_5 = arith.constant 0 : index
    %c0_6 = arith.constant 0 : index
    %c0_7 = arith.constant 0 : index
    %5 = vector.load %arg5[%c0_5, %c0_6, %c0_7] : memref<4x2x64xf32, #tpu.memory_space<vmem>>, vector<1x2x64xf32>
    %6 = vector.shape_cast %5 : vector<1x2x64xf32> to vector<2x64xf32>
    %7 = vector.shape_cast %4 : vector<2x64xf32> to vector<1x2x64xf32>
    tpu.vector_store %arg5[%c0_5, %c0_6, %c0_7], %7 {strides = array<i32>} : memref<4x2x64xf32, #tpu.memory_space<vmem>>, vector<1x2x64xf32>,
    %c1 = arith.constant 1 : index
    %c0_8 = arith.constant 0 : index
    %c0_9 = arith.constant 0 : index
    %8 = vector.load %arg1[%c1, %c0_8, %c0_9] : memref<4x2x256xbf16, #tpu.memory_space<vmem>>, vector<1x2x256xbf16>
    %9 = vector.shape_cast %8 : vector<1x2x256xbf16> to vector<2x256xbf16>
    %c1_10 = arith.constant 1 : index
    %c0_11 = arith.constant 0 : index
    %c0_12 = arith.constant 0 : index
    %10 = vector.load %arg2[%c1_10, %c0_11, %c0_12] : memref<4x256x64xbf16, #tpu.memory_space<vmem>>, vector<1x256x64xbf16>
    %11 = vector.shape_cast %10 : vector<1x256x64xbf16> to vector<256x64xbf16>
    %cst_13 = arith.constant dense<0.000000e+00> : vector<2x64xf32>
    %12 = tpu.matmul %9, %11, %cst_13 {dimension_numbers = #tpu.dot_dimension_numbers<[1], [0], [0], [1], [0, 0, 1, 1], [], []>} : vector<2x256xbf16>, vector<256x64xbf16>, vector<2x64xf32> -> vector<2x64xf32>
    %c1_14 = arith.constant 1 : index
    %c0_15 = arith.constant 0 : index
    %c0_16 = arith.constant 0 : index
    %13 = vector.load %arg5[%c1_14, %c0_15, %c0_16] : memref<4x2x64xf32, #tpu.memory_space<vmem>>, vector<1x2x64xf32>
    %14 = vector.shape_cast %13 : vector<1x2x64xf32> to vector<2x64xf32>
    %15 = vector.shape_cast %12 : vector<2x64xf32> to vector<1x2x64xf32>
    tpu.vector_store %arg5[%c1_14, %c0_15, %c0_16], %15 {strides = array<i32>} : memref<4x2x64xf32, #tpu.memory_space<vmem>>, vector<1x2x64xf32>,
    %c2 = arith.constant 2 : index
    %c0_17 = arith.constant 0 : index
    %c0_18 = arith.constant 0 : index
    %16 = vector.load %arg1[%c2, %c0_17, %c0_18] : memref<4x2x256xbf16, #tpu.memory_space<vmem>>, vector<1x2x256xbf16>
    %17 = vector.shape_cast %16 : vector<1x2x256xbf16> to vector<2x256xbf16>
    %c2_19 = arith.constant 2 : index
    %c0_20 = arith.constant 0 : index
    %c0_21 = arith.constant 0 : index
    %18 = vector.load %arg2[%c2_19, %c0_20, %c0_21] : memref<4x256x64xbf16, #tpu.memory_space<vmem>>, vector<1x256x64xbf16>
    %19 = vector.shape_cast %18 : vector<1x256x64xbf16> to vector<256x64xbf16>
    %cst_22 = arith.constant dense<0.000000e+00> : vector<2x64xf32>
    %20 = tpu.matmul %17, %19, %cst_22 {dimension_numbers = #tpu.dot_dimension_numbers<[1], [0], [0], [1], [0, 0, 1, 1], [], []>} : vector<2x256xbf16>, vector<256x64xbf16>, vector<2x64xf32> -> vector<2x64xf32>
    %c2_23 = arith.constant 2 : index
    %c0_24 = arith.constant 0 : index
    %c0_25 = arith.constant 0 : index
    %21 = vector.load %arg5[%c2_23, %c0_24, %c0_25] : memref<4x2x64xf32, #tpu.memory_space<vmem>>, vector<1x2x64xf32>
    %22 = vector.shape_cast %21 : vector<1x2x64xf32> to vector<2x64xf32>
    %23 = vector.shape_cast %20 : vector<2x64xf32> to vector<1x2x64xf32>
    tpu.vector_store %arg5[%c2_23, %c0_24, %c0_25], %23 {strides = array<i32>} : memref<4x2x64xf32, #tpu.memory_space<vmem>>, vector<1x2x64xf32>,
    %c3 = arith.constant 3 : index
    %c0_26 = arith.constant 0 : index
    %c0_27 = arith.constant 0 : index
    %24 = vector.load %arg1[%c3, %c0_26, %c0_27] : memref<4x2x256xbf16, #tpu.memory_space<vmem>>, vector<1x2x256xbf16>
    %25 = vector.shape_cast %24 : vector<1x2x256xbf16> to vector<2x256xbf16>
    %c3_28 = arith.constant 3 : index
    %c0_29 = arith.constant 0 : index
    %c0_30 = arith.constant 0 : index
    %26 = vector.load %arg2[%c3_28, %c0_29, %c0_30] : memref<4x256x64xbf16, #tpu.memory_space<vmem>>, vector<1x256x64xbf16>
    %27 = vector.shape_cast %26 : vector<1x256x64xbf16> to vector<256x64xbf16>
    %cst_31 = arith.constant dense<0.000000e+00> : vector<2x64xf32>
    %28 = tpu.matmul %25, %27, %cst_31 {dimension_numbers = #tpu.dot_dimension_numbers<[1], [0], [0], [1], [0, 0, 1, 1], [], []>} : vector<2x256xbf16>, vector<256x64xbf16>, vector<2x64xf32> -> vector<2x64xf32>
    %c3_32 = arith.constant 3 : index
    %c0_33 = arith.constant 0 : index
    %c0_34 = arith.constant 0 : index
    %29 = vector.load %arg5[%c3_32, %c0_33, %c0_34] : memref<4x2x64xf32, #tpu.memory_space<vmem>>, vector<1x2x64xf32>
    %30 = vector.shape_cast %29 : vector<1x2x64xf32> to vector<2x64xf32>
    %31 = vector.shape_cast %28 : vector<2x64xf32> to vector<1x2x64xf32>
    tpu.vector_store %arg5[%c3_32, %c0_33, %c0_34], %31 {strides = array<i32>} : memref<4x2x64xf32, #tpu.memory_space<vmem>>, vector<1x2x64xf32>,
    %c0_35 = arith.constant 0 : index
    %c0_36 = arith.constant 0 : index
    %32 = vector.load %arg3[%c0_35, %c0_36] : memref<2x64xf32, #tpu.memory_space<vmem>>, vector<1x64xf32>
    %c1_37 = arith.constant 1 : index
    %c0_38 = arith.constant 0 : index
    %33 = vector.load %arg3[%c1_37, %c0_38] : memref<2x64xf32, #tpu.memory_space<vmem>>, vector<1x64xf32>
    %c0_39 = arith.constant 0 : index
    %c0_40 = arith.constant 0 : index
    %c0_41 = arith.constant 0 : index
    %34 = vector.load %arg5[%c0_39, %c0_40, %c0_41] : memref<4x2x64xf32, #tpu.memory_space<vmem>>, vector<1x2x64xf32>
    %35 = vector.shape_cast %34 : vector<1x2x64xf32> to vector<2x64xf32>
    %cst_42 = arith.constant dense<0.000000e+00> : vector<64xf32>
    %36 = vector.multi_reduction <add>, %35, %cst_42 [0] : vector<2x64xf32> to vector<64xf32>
    %37 = vector.shape_cast %36 : vector<64xf32> to vector<1x64xf32>
    %c1_43 = arith.constant 1 : index
    %c0_44 = arith.constant 0 : index
    %c0_45 = arith.constant 0 : index
    %38 = vector.load %arg5[%c1_43, %c0_44, %c0_45] : memref<4x2x64xf32, #tpu.memory_space<vmem>>, vector<1x2x64xf32>
    %39 = vector.shape_cast %38 : vector<1x2x64xf32> to vector<2x64xf32>
    %cst_46 = arith.constant dense<0.000000e+00> : vector<64xf32>
    %40 = vector.multi_reduction <add>, %39, %cst_46 [0] : vector<2x64xf32> to vector<64xf32>
    %41 = vector.shape_cast %40 : vector<64xf32> to vector<1x64xf32>
    %42 = arith.addf %37, %41 : vector<1x64xf32>
    %c2_47 = arith.constant 2 : index
    %c0_48 = arith.constant 0 : index
    %c0_49 = arith.constant 0 : index
    %43 = vector.load %arg5[%c2_47, %c0_48, %c0_49] : memref<4x2x64xf32, #tpu.memory_space<vmem>>, vector<1x2x64xf32>
    %44 = vector.shape_cast %43 : vector<1x2x64xf32> to vector<2x64xf32>
    %cst_50 = arith.constant dense<0.000000e+00> : vector<64xf32>
    %45 = vector.multi_reduction <add>, %44, %cst_50 [0] : vector<2x64xf32> to vector<64xf32>
    %46 = vector.shape_cast %45 : vector<64xf32> to vector<1x64xf32>
    %47 = arith.addf %42, %46 : vector<1x64xf32>
    %c3_51 = arith.constant 3 : index
    %c0_52 = arith.constant 0 : index
    %c0_53 = arith.constant 0 : index
    %48 = vector.load %arg5[%c3_51, %c0_52, %c0_53] : memref<4x2x64xf32, #tpu.memory_space<vmem>>, vector<1x2x64xf32>
    %49 = vector.shape_cast %48 : vector<1x2x64xf32> to vector<2x64xf32>
    %cst_54 = arith.constant dense<0.000000e+00> : vector<64xf32>
    %50 = vector.multi_reduction <add>, %49, %cst_54 [0] : vector<2x64xf32> to vector<64xf32>
    %51 = vector.shape_cast %50 : vector<64xf32> to vector<1x64xf32>
    %52 = arith.addf %47, %51 : vector<1x64xf32>
    %cst_55 = arith.constant 1.250000e-01 : f32
    %53 = vector.broadcast %cst_55 : f32 to vector<1x64xf32>
    %54 = arith.mulf %52, %53 : vector<1x64xf32>
    %c0_56 = arith.constant 0 : index
    %c0_57 = arith.constant 0 : index
    %c0_58 = arith.constant 0 : index
    %55 = vector.load %arg5[%c0_56, %c0_57, %c0_58] : memref<4x2x64xf32, #tpu.memory_space<vmem>>, vector<1x2x64xf32>
    %56 = vector.shape_cast %55 : vector<1x2x64xf32> to vector<2x64xf32>
    %57 = vector.broadcast %54 : vector<1x64xf32> to vector<2x64xf32>
    %58 = arith.subf %56, %57 : vector<2x64xf32>
    %59 = arith.mulf %58, %58 : vector<2x64xf32>
    %cst_59 = arith.constant dense<0.000000e+00> : vector<64xf32>
    %60 = vector.multi_reduction <add>, %59, %cst_59 [0] : vector<2x64xf32> to vector<64xf32>
    %61 = vector.shape_cast %60 : vector<64xf32> to vector<1x64xf32>
    %c1_60 = arith.constant 1 : index
    %c0_61 = arith.constant 0 : index
    %c0_62 = arith.constant 0 : index
    %62 = vector.load %arg5[%c1_60, %c0_61, %c0_62] : memref<4x2x64xf32, #tpu.memory_space<vmem>>, vector<1x2x64xf32>
    %63 = vector.shape_cast %62 : vector<1x2x64xf32> to vector<2x64xf32>
    %64 = vector.broadcast %54 : vector<1x64xf32> to vector<2x64xf32>
    %65 = arith.subf %63, %64 : vector<2x64xf32>
    %66 = arith.mulf %65, %65 : vector<2x64xf32>
    %cst_63 = arith.constant dense<0.000000e+00> : vector<64xf32>
    %67 = vector.multi_reduction <add>, %66, %cst_63 [0] : vector<2x64xf32> to vector<64xf32>
    %68 = vector.shape_cast %67 : vector<64xf32> to vector<1x64xf32>
    %69 = arith.addf %61, %68 : vector<1x64xf32>
    %c2_64 = arith.constant 2 : index
    %c0_65 = arith.constant 0 : index
    %c0_66 = arith.constant 0 : index
    %70 = vector.load %arg5[%c2_64, %c0_65, %c0_66] : memref<4x2x64xf32, #tpu.memory_space<vmem>>, vector<1x2x64xf32>
    %71 = vector.shape_cast %70 : vector<1x2x64xf32> to vector<2x64xf32>
    %72 = vector.broadcast %54 : vector<1x64xf32> to vector<2x64xf32>
    %73 = arith.subf %71, %72 : vector<2x64xf32>
    %74 = arith.mulf %73, %73 : vector<2x64xf32>
    %cst_67 = arith.constant dense<0.000000e+00> : vector<64xf32>
    %75 = vector.multi_reduction <add>, %74, %cst_67 [0] : vector<2x64xf32> to vector<64xf32>
    %76 = vector.shape_cast %75 : vector<64xf32> to vector<1x64xf32>
    %77 = arith.addf %69, %76 : vector<1x64xf32>
    %c3_68 = arith.constant 3 : index
    %c0_69 = arith.constant 0 : index
    %c0_70 = arith.constant 0 : index
    %78 = vector.load %arg5[%c3_68, %c0_69, %c0_70] : memref<4x2x64xf32, #tpu.memory_space<vmem>>, vector<1x2x64xf32>
    %79 = vector.shape_cast %78 : vector<1x2x64xf32> to vector<2x64xf32>
    %80 = vector.broadcast %54 : vector<1x64xf32> to vector<2x64xf32>
    %81 = arith.subf %79, %80 : vector<2x64xf32>
    %82 = arith.mulf %81, %81 : vector<2x64xf32>
    %cst_71 = arith.constant dense<0.000000e+00> : vector<64xf32>
    %83 = vector.multi_reduction <add>, %82, %cst_71 [0] : vector<2x64xf32> to vector<64xf32>
    %84 = vector.shape_cast %83 : vector<64xf32> to vector<1x64xf32>
    %85 = arith.addf %77, %84 : vector<1x64xf32>
    %cst_72 = arith.constant 1.250000e-01 : f32
    %86 = vector.broadcast %cst_72 : f32 to vector<1x64xf32>
    %87 = arith.mulf %85, %86 : vector<1x64xf32>
    %cst_73 = arith.constant 9.99999974E-6 : f32
    %88 = vector.broadcast %cst_73 : f32 to vector<1x64xf32>
    %89 = arith.addf %87, %88 : vector<1x64xf32>
    %90 = math.rsqrt %89 : vector<1x64xf32>
    %91 = arith.mulf %90, %32 : vector<1x64xf32>
    %92 = arith.mulf %54, %91 : vector<1x64xf32>
    %93 = arith.subf %33, %92 : vector<1x64xf32>
    %c0_74 = arith.constant 0 : index
    %c0_75 = arith.constant 0 : index
    %c0_76 = arith.constant 0 : index
    %94 = vector.load %arg5[%c0_74, %c0_75, %c0_76] : memref<4x2x64xf32, #tpu.memory_space<vmem>>, vector<1x2x64xf32>
    %95 = vector.shape_cast %94 : vector<1x2x64xf32> to vector<2x64xf32>
    %96 = vector.broadcast %91 : vector<1x64xf32> to vector<2x64xf32>
    %97 = arith.mulf %95, %96 : vector<2x64xf32>
    %98 = vector.broadcast %93 : vector<1x64xf32> to vector<2x64xf32>
    %99 = arith.addf %97, %98 : vector<2x64xf32>
    %cst_77 = arith.constant 0.000000e+00 : f32
    %100 = vector.broadcast %cst_77 : f32 to vector<2x64xf32>
    %101 = arith.maximumf %99, %100 : vector<2x64xf32>
    %102 = arith.truncf %101 : vector<2x64xf32> to vector<2x64xbf16>
    %c0_78 = arith.constant 0 : index
    %c0_79 = arith.constant 0 : index
    %c0_80 = arith.constant 0 : index
    %103 = vector.load %arg4[%c0_78, %c0_79, %c0_80] : memref<4x2x64xbf16, #tpu.memory_space<vmem>>, vector<1x2x64xbf16>
    %104 = vector.shape_cast %103 : vector<1x2x64xbf16> to vector<2x64xbf16>
    %105 = vector.shape_cast %102 : vector<2x64xbf16> to vector<1x2x64xbf16>
    tpu.vector_store %arg4[%c0_78, %c0_79, %c0_80], %105 {strides = array<i32>} : memref<4x2x64xbf16, #tpu.memory_space<vmem>>, vector<1x2x64xbf16>,
    %c1_81 = arith.constant 1 : index
    %c0_82 = arith.constant 0 : index
    %c0_83 = arith.constant 0 : index
    %106 = vector.load %arg5[%c1_81, %c0_82, %c0_83] : memref<4x2x64xf32, #tpu.memory_space<vmem>>, vector<1x2x64xf32>
    %107 = vector.shape_cast %106 : vector<1x2x64xf32> to vector<2x64xf32>
    %108 = vector.broadcast %91 : vector<1x64xf32> to vector<2x64xf32>
    %109 = arith.mulf %107, %108 : vector<2x64xf32>
    %110 = vector.broadcast %93 : vector<1x64xf32> to vector<2x64xf32>
    %111 = arith.addf %109, %110 : vector<2x64xf32>
    %cst_84 = arith.constant 0.000000e+00 : f32
    %112 = vector.broadcast %cst_84 : f32 to vector<2x64xf32>
    %113 = arith.maximumf %111, %112 : vector<2x64xf32>
    %114 = arith.truncf %113 : vector<2x64xf32> to vector<2x64xbf16>
    %c1_85 = arith.constant 1 : index
    %c0_86 = arith.constant 0 : index
    %c0_87 = arith.constant 0 : index
    %115 = vector.load %arg4[%c1_85, %c0_86, %c0_87] : memref<4x2x64xbf16, #tpu.memory_space<vmem>>, vector<1x2x64xbf16>
    %116 = vector.shape_cast %115 : vector<1x2x64xbf16> to vector<2x64xbf16>
    %117 = vector.shape_cast %114 : vector<2x64xbf16> to vector<1x2x64xbf16>
    tpu.vector_store %arg4[%c1_85, %c0_86, %c0_87], %117 {strides = array<i32>} : memref<4x2x64xbf16, #tpu.memory_space<vmem>>, vector<1x2x64xbf16>,
    %c2_88 = arith.constant 2 : index
    %c0_89 = arith.constant 0 : index
    %c0_90 = arith.constant 0 : index
    %118 = vector.load %arg5[%c2_88, %c0_89, %c0_90] : memref<4x2x64xf32, #tpu.memory_space<vmem>>, vector<1x2x64xf32>
    %119 = vector.shape_cast %118 : vector<1x2x64xf32> to vector<2x64xf32>
    %120 = vector.broadcast %91 : vector<1x64xf32> to vector<2x64xf32>
    %121 = arith.mulf %119, %120 : vector<2x64xf32>
    %122 = vector.broadcast %93 : vector<1x64xf32> to vector<2x64xf32>
    %123 = arith.addf %121, %122 : vector<2x64xf32>
    %cst_91 = arith.constant 0.000000e+00 : f32
    %124 = vector.broadcast %cst_91 : f32 to vector<2x64xf32>
    %125 = arith.maximumf %123, %124 : vector<2x64xf32>
    %126 = arith.truncf %125 : vector<2x64xf32> to vector<2x64xbf16>
    %c2_92 = arith.constant 2 : index
    %c0_93 = arith.constant 0 : index
    %c0_94 = arith.constant 0 : index
    %127 = vector.load %arg4[%c2_92, %c0_93, %c0_94] : memref<4x2x64xbf16, #tpu.memory_space<vmem>>, vector<1x2x64xbf16>
    %128 = vector.shape_cast %127 : vector<1x2x64xbf16> to vector<2x64xbf16>
    %129 = vector.shape_cast %126 : vector<2x64xbf16> to vector<1x2x64xbf16>
    tpu.vector_store %arg4[%c2_92, %c0_93, %c0_94], %129 {strides = array<i32>} : memref<4x2x64xbf16, #tpu.memory_space<vmem>>, vector<1x2x64xbf16>,
    %c3_95 = arith.constant 3 : index
    %c0_96 = arith.constant 0 : index
    %c0_97 = arith.constant 0 : index
    %130 = vector.load %arg5[%c3_95, %c0_96, %c0_97] : memref<4x2x64xf32, #tpu.memory_space<vmem>>, vector<1x2x64xf32>
    %131 = vector.shape_cast %130 : vector<1x2x64xf32> to vector<2x64xf32>
    %132 = vector.broadcast %91 : vector<1x64xf32> to vector<2x64xf32>
    %133 = arith.mulf %131, %132 : vector<2x64xf32>
    %134 = vector.broadcast %93 : vector<1x64xf32> to vector<2x64xf32>
    %135 = arith.addf %133, %134 : vector<2x64xf32>
    %cst_98 = arith.constant 0.000000e+00 : f32
    %136 = vector.broadcast %cst_98 : f32 to vector<2x64xf32>
    %137 = arith.maximumf %135, %136 : vector<2x64xf32>
    %138 = arith.truncf %137 : vector<2x64xf32> to vector<2x64xbf16>
    %c3_99 = arith.constant 3 : index
    %c0_100 = arith.constant 0 : index
    %c0_101 = arith.constant 0 : index
    %139 = vector.load %arg4[%c3_99, %c0_100, %c0_101] : memref<4x2x64xbf16, #tpu.memory_space<vmem>>, vector<1x2x64xbf16>
    %140 = vector.shape_cast %139 : vector<1x2x64xbf16> to vector<2x64xbf16>
    %141 = vector.shape_cast %138 : vector<2x64xbf16> to vector<1x2x64xbf16>
    tpu.vector_store %arg4[%c3_99, %c0_100, %c0_101], %141 {strides = array<i32>} : memref<4x2x64xbf16, #tpu.memory_space<vmem>>, vector<1x2x64xbf16>,
    return
  }
  func.func @transform_0(%arg0: i32) -> (i32, i32, i32) {
    %c0_i32 = arith.constant 0 : i32
    %c0_i32_0 = arith.constant 0 : i32
    %c0_i32_1 = arith.constant 0 : i32
    %c0_i32_2 = arith.constant 0 : i32
    return %c0_i32, %c0_i32_0, %c0_i32_1 : i32, i32, i32
  }
  func.func @transform_1(%arg0: i32) -> (i32, i32, i32) {
    %c0_i32 = arith.constant 0 : i32
    %c0_i32_0 = arith.constant 0 : i32
    %c0_i32_1 = arith.constant 0 : i32
    %c0_i32_2 = arith.constant 0 : i32
    return %c0_i32, %c0_i32_0, %c0_i32_1 : i32, i32, i32
  }
  func.func @transform_2(%arg0: i32) -> (i32, i32) {
    %c0_i32 = arith.constant 0 : i32
    %c0_i32_0 = arith.constant 0 : i32
    %c0_i32_1 = arith.constant 0 : i32
    return %c0_i32, %c0_i32_0 : i32, i32
  }
  func.func @transform_3(%arg0: i32) -> (i32, i32, i32) {
    %c0_i32 = arith.constant 0 : i32
    %c0_i32_0 = arith.constant 0 : i32
    %c0_i32_1 = arith.constant 0 : i32
    %c0_i32_2 = arith.constant 0 : i32
    return %c0_i32, %c0_i32_0, %c0_i32_1 : i32, i32, i32
  }
}

module attributes {stable_mosaic.version = 11 : i64} {
  func.func @kernel(%arg0: i32, %arg1: memref<4x8x256xbf16, #tpu.memory_space<vmem>>, %arg2: memref<4x8x256xbf16, #tpu.memory_space<vmem>>, %arg3: memref<4x256x32xbf16, #tpu.memory_space<vmem>>, %arg4: memref<4x256x32xbf16, #tpu.memory_space<vmem>>, %arg5: memref<2x32xf32, #tpu.memory_space<vmem>>, %arg6: memref<4x8x32xbf16, #tpu.memory_space<vmem>>, %arg7: memref<4x8x32xf32, #tpu.memory_space<vmem>>) attributes {dimension_semantics = [#tpu.dimension_semantics<parallel>], iteration_bounds = array<i64: 1>, scalar_prefetch = 0 : i64, scratch_operands = 1 : i64, tpu.core_type = #tpu.core_type<tc>, window_params = [{pipeline_mode = #tpu.pipeline_mode<synchronous>, transform_indices = @transform_0, window_bounds = array<i64: 4, 8, 256>}, {pipeline_mode = #tpu.pipeline_mode<synchronous>, transform_indices = @transform_1, window_bounds = array<i64: 4, 8, 256>}, {pipeline_mode = #tpu.pipeline_mode<synchronous>, transform_indices = @transform_2, window_bounds = array<i64: 4, 256, 32>}, {pipeline_mode = #tpu.pipeline_mode<synchronous>, transform_indices = @transform_3, window_bounds = array<i64: 4, 256, 32>}, {pipeline_mode = #tpu.pipeline_mode<synchronous>, transform_indices = @transform_4, window_bounds = array<i64: 2, 32>}, {pipeline_mode = #tpu.pipeline_mode<synchronous>, transform_indices = @transform_5, window_bounds = array<i64: 4, 8, 32>}]} {
    %c0 = arith.constant 0 : index
    %c0_0 = arith.constant 0 : index
    %c0_1 = arith.constant 0 : index
    %0 = vector.load %arg1[%c0, %c0_0, %c0_1] : memref<4x8x256xbf16, #tpu.memory_space<vmem>>, vector<1x8x256xbf16>
    %1 = vector.shape_cast %0 : vector<1x8x256xbf16> to vector<8x256xbf16>
    %c0_2 = arith.constant 0 : index
    %c0_3 = arith.constant 0 : index
    %c0_4 = arith.constant 0 : index
    %2 = vector.load %arg3[%c0_2, %c0_3, %c0_4] : memref<4x256x32xbf16, #tpu.memory_space<vmem>>, vector<1x256x32xbf16>
    %3 = vector.shape_cast %2 : vector<1x256x32xbf16> to vector<256x32xbf16>
    %cst = arith.constant dense<0.000000e+00> : vector<8x32xf32>
    %4 = tpu.matmul %1, %3, %cst {dimension_numbers = #tpu.dot_dimension_numbers<[1], [0], [0], [1], [0, 0, 1, 1], [], []>} : vector<8x256xbf16>, vector<256x32xbf16>, vector<8x32xf32> -> vector<8x32xf32>
    %c0_5 = arith.constant 0 : index
    %c0_6 = arith.constant 0 : index
    %c0_7 = arith.constant 0 : index
    %5 = vector.load %arg2[%c0_5, %c0_6, %c0_7] : memref<4x8x256xbf16, #tpu.memory_space<vmem>>, vector<1x8x256xbf16>
    %6 = vector.shape_cast %5 : vector<1x8x256xbf16> to vector<8x256xbf16>
    %c0_8 = arith.constant 0 : index
    %c0_9 = arith.constant 0 : index
    %c0_10 = arith.constant 0 : index
    %7 = vector.load %arg4[%c0_8, %c0_9, %c0_10] : memref<4x256x32xbf16, #tpu.memory_space<vmem>>, vector<1x256x32xbf16>
    %8 = vector.shape_cast %7 : vector<1x256x32xbf16> to vector<256x32xbf16>
    %cst_11 = arith.constant dense<0.000000e+00> : vector<8x32xf32>
    %9 = tpu.matmul %6, %8, %cst_11 {dimension_numbers = #tpu.dot_dimension_numbers<[1], [0], [0], [1], [0, 0, 1, 1], [], []>} : vector<8x256xbf16>, vector<256x32xbf16>, vector<8x32xf32> -> vector<8x32xf32>
    %10 = arith.addf %4, %9 : vector<8x32xf32>
    %c0_12 = arith.constant 0 : index
    %c0_13 = arith.constant 0 : index
    %c0_14 = arith.constant 0 : index
    %11 = vector.load %arg7[%c0_12, %c0_13, %c0_14] : memref<4x8x32xf32, #tpu.memory_space<vmem>>, vector<1x8x32xf32>
    %12 = vector.shape_cast %11 : vector<1x8x32xf32> to vector<8x32xf32>
    %13 = vector.shape_cast %10 : vector<8x32xf32> to vector<1x8x32xf32>
    tpu.vector_store %arg7[%c0_12, %c0_13, %c0_14], %13 {strides = array<i32>} : memref<4x8x32xf32, #tpu.memory_space<vmem>>, vector<1x8x32xf32>,
    %c1 = arith.constant 1 : index
    %c0_15 = arith.constant 0 : index
    %c0_16 = arith.constant 0 : index
    %14 = vector.load %arg1[%c1, %c0_15, %c0_16] : memref<4x8x256xbf16, #tpu.memory_space<vmem>>, vector<1x8x256xbf16>
    %15 = vector.shape_cast %14 : vector<1x8x256xbf16> to vector<8x256xbf16>
    %c1_17 = arith.constant 1 : index
    %c0_18 = arith.constant 0 : index
    %c0_19 = arith.constant 0 : index
    %16 = vector.load %arg3[%c1_17, %c0_18, %c0_19] : memref<4x256x32xbf16, #tpu.memory_space<vmem>>, vector<1x256x32xbf16>
    %17 = vector.shape_cast %16 : vector<1x256x32xbf16> to vector<256x32xbf16>
    %cst_20 = arith.constant dense<0.000000e+00> : vector<8x32xf32>
    %18 = tpu.matmul %15, %17, %cst_20 {dimension_numbers = #tpu.dot_dimension_numbers<[1], [0], [0], [1], [0, 0, 1, 1], [], []>} : vector<8x256xbf16>, vector<256x32xbf16>, vector<8x32xf32> -> vector<8x32xf32>
    %c1_21 = arith.constant 1 : index
    %c0_22 = arith.constant 0 : index
    %c0_23 = arith.constant 0 : index
    %19 = vector.load %arg2[%c1_21, %c0_22, %c0_23] : memref<4x8x256xbf16, #tpu.memory_space<vmem>>, vector<1x8x256xbf16>
    %20 = vector.shape_cast %19 : vector<1x8x256xbf16> to vector<8x256xbf16>
    %c1_24 = arith.constant 1 : index
    %c0_25 = arith.constant 0 : index
    %c0_26 = arith.constant 0 : index
    %21 = vector.load %arg4[%c1_24, %c0_25, %c0_26] : memref<4x256x32xbf16, #tpu.memory_space<vmem>>, vector<1x256x32xbf16>
    %22 = vector.shape_cast %21 : vector<1x256x32xbf16> to vector<256x32xbf16>
    %cst_27 = arith.constant dense<0.000000e+00> : vector<8x32xf32>
    %23 = tpu.matmul %20, %22, %cst_27 {dimension_numbers = #tpu.dot_dimension_numbers<[1], [0], [0], [1], [0, 0, 1, 1], [], []>} : vector<8x256xbf16>, vector<256x32xbf16>, vector<8x32xf32> -> vector<8x32xf32>
    %24 = arith.addf %18, %23 : vector<8x32xf32>
    %c1_28 = arith.constant 1 : index
    %c0_29 = arith.constant 0 : index
    %c0_30 = arith.constant 0 : index
    %25 = vector.load %arg7[%c1_28, %c0_29, %c0_30] : memref<4x8x32xf32, #tpu.memory_space<vmem>>, vector<1x8x32xf32>
    %26 = vector.shape_cast %25 : vector<1x8x32xf32> to vector<8x32xf32>
    %27 = vector.shape_cast %24 : vector<8x32xf32> to vector<1x8x32xf32>
    tpu.vector_store %arg7[%c1_28, %c0_29, %c0_30], %27 {strides = array<i32>} : memref<4x8x32xf32, #tpu.memory_space<vmem>>, vector<1x8x32xf32>,
    %c2 = arith.constant 2 : index
    %c0_31 = arith.constant 0 : index
    %c0_32 = arith.constant 0 : index
    %28 = vector.load %arg1[%c2, %c0_31, %c0_32] : memref<4x8x256xbf16, #tpu.memory_space<vmem>>, vector<1x8x256xbf16>
    %29 = vector.shape_cast %28 : vector<1x8x256xbf16> to vector<8x256xbf16>
    %c2_33 = arith.constant 2 : index
    %c0_34 = arith.constant 0 : index
    %c0_35 = arith.constant 0 : index
    %30 = vector.load %arg3[%c2_33, %c0_34, %c0_35] : memref<4x256x32xbf16, #tpu.memory_space<vmem>>, vector<1x256x32xbf16>
    %31 = vector.shape_cast %30 : vector<1x256x32xbf16> to vector<256x32xbf16>
    %cst_36 = arith.constant dense<0.000000e+00> : vector<8x32xf32>
    %32 = tpu.matmul %29, %31, %cst_36 {dimension_numbers = #tpu.dot_dimension_numbers<[1], [0], [0], [1], [0, 0, 1, 1], [], []>} : vector<8x256xbf16>, vector<256x32xbf16>, vector<8x32xf32> -> vector<8x32xf32>
    %c2_37 = arith.constant 2 : index
    %c0_38 = arith.constant 0 : index
    %c0_39 = arith.constant 0 : index
    %33 = vector.load %arg2[%c2_37, %c0_38, %c0_39] : memref<4x8x256xbf16, #tpu.memory_space<vmem>>, vector<1x8x256xbf16>
    %34 = vector.shape_cast %33 : vector<1x8x256xbf16> to vector<8x256xbf16>
    %c2_40 = arith.constant 2 : index
    %c0_41 = arith.constant 0 : index
    %c0_42 = arith.constant 0 : index
    %35 = vector.load %arg4[%c2_40, %c0_41, %c0_42] : memref<4x256x32xbf16, #tpu.memory_space<vmem>>, vector<1x256x32xbf16>
    %36 = vector.shape_cast %35 : vector<1x256x32xbf16> to vector<256x32xbf16>
    %cst_43 = arith.constant dense<0.000000e+00> : vector<8x32xf32>
    %37 = tpu.matmul %34, %36, %cst_43 {dimension_numbers = #tpu.dot_dimension_numbers<[1], [0], [0], [1], [0, 0, 1, 1], [], []>} : vector<8x256xbf16>, vector<256x32xbf16>, vector<8x32xf32> -> vector<8x32xf32>
    %38 = arith.addf %32, %37 : vector<8x32xf32>
    %c2_44 = arith.constant 2 : index
    %c0_45 = arith.constant 0 : index
    %c0_46 = arith.constant 0 : index
    %39 = vector.load %arg7[%c2_44, %c0_45, %c0_46] : memref<4x8x32xf32, #tpu.memory_space<vmem>>, vector<1x8x32xf32>
    %40 = vector.shape_cast %39 : vector<1x8x32xf32> to vector<8x32xf32>
    %41 = vector.shape_cast %38 : vector<8x32xf32> to vector<1x8x32xf32>
    tpu.vector_store %arg7[%c2_44, %c0_45, %c0_46], %41 {strides = array<i32>} : memref<4x8x32xf32, #tpu.memory_space<vmem>>, vector<1x8x32xf32>,
    %c3 = arith.constant 3 : index
    %c0_47 = arith.constant 0 : index
    %c0_48 = arith.constant 0 : index
    %42 = vector.load %arg1[%c3, %c0_47, %c0_48] : memref<4x8x256xbf16, #tpu.memory_space<vmem>>, vector<1x8x256xbf16>
    %43 = vector.shape_cast %42 : vector<1x8x256xbf16> to vector<8x256xbf16>
    %c3_49 = arith.constant 3 : index
    %c0_50 = arith.constant 0 : index
    %c0_51 = arith.constant 0 : index
    %44 = vector.load %arg3[%c3_49, %c0_50, %c0_51] : memref<4x256x32xbf16, #tpu.memory_space<vmem>>, vector<1x256x32xbf16>
    %45 = vector.shape_cast %44 : vector<1x256x32xbf16> to vector<256x32xbf16>
    %cst_52 = arith.constant dense<0.000000e+00> : vector<8x32xf32>
    %46 = tpu.matmul %43, %45, %cst_52 {dimension_numbers = #tpu.dot_dimension_numbers<[1], [0], [0], [1], [0, 0, 1, 1], [], []>} : vector<8x256xbf16>, vector<256x32xbf16>, vector<8x32xf32> -> vector<8x32xf32>
    %c3_53 = arith.constant 3 : index
    %c0_54 = arith.constant 0 : index
    %c0_55 = arith.constant 0 : index
    %47 = vector.load %arg2[%c3_53, %c0_54, %c0_55] : memref<4x8x256xbf16, #tpu.memory_space<vmem>>, vector<1x8x256xbf16>
    %48 = vector.shape_cast %47 : vector<1x8x256xbf16> to vector<8x256xbf16>
    %c3_56 = arith.constant 3 : index
    %c0_57 = arith.constant 0 : index
    %c0_58 = arith.constant 0 : index
    %49 = vector.load %arg4[%c3_56, %c0_57, %c0_58] : memref<4x256x32xbf16, #tpu.memory_space<vmem>>, vector<1x256x32xbf16>
    %50 = vector.shape_cast %49 : vector<1x256x32xbf16> to vector<256x32xbf16>
    %cst_59 = arith.constant dense<0.000000e+00> : vector<8x32xf32>
    %51 = tpu.matmul %48, %50, %cst_59 {dimension_numbers = #tpu.dot_dimension_numbers<[1], [0], [0], [1], [0, 0, 1, 1], [], []>} : vector<8x256xbf16>, vector<256x32xbf16>, vector<8x32xf32> -> vector<8x32xf32>
    %52 = arith.addf %46, %51 : vector<8x32xf32>
    %c3_60 = arith.constant 3 : index
    %c0_61 = arith.constant 0 : index
    %c0_62 = arith.constant 0 : index
    %53 = vector.load %arg7[%c3_60, %c0_61, %c0_62] : memref<4x8x32xf32, #tpu.memory_space<vmem>>, vector<1x8x32xf32>
    %54 = vector.shape_cast %53 : vector<1x8x32xf32> to vector<8x32xf32>
    %55 = vector.shape_cast %52 : vector<8x32xf32> to vector<1x8x32xf32>
    tpu.vector_store %arg7[%c3_60, %c0_61, %c0_62], %55 {strides = array<i32>} : memref<4x8x32xf32, #tpu.memory_space<vmem>>, vector<1x8x32xf32>,
    %c0_63 = arith.constant 0 : index
    %c0_64 = arith.constant 0 : index
    %56 = vector.load %arg5[%c0_63, %c0_64] : memref<2x32xf32, #tpu.memory_space<vmem>>, vector<1x32xf32>
    %c1_65 = arith.constant 1 : index
    %c0_66 = arith.constant 0 : index
    %57 = vector.load %arg5[%c1_65, %c0_66] : memref<2x32xf32, #tpu.memory_space<vmem>>, vector<1x32xf32>
    %c0_67 = arith.constant 0 : index
    %c0_68 = arith.constant 0 : index
    %c0_69 = arith.constant 0 : index
    %58 = vector.load %arg7[%c0_67, %c0_68, %c0_69] : memref<4x8x32xf32, #tpu.memory_space<vmem>>, vector<1x8x32xf32>
    %59 = vector.shape_cast %58 : vector<1x8x32xf32> to vector<8x32xf32>
    %cst_70 = arith.constant dense<0.000000e+00> : vector<32xf32>
    %60 = vector.multi_reduction <add>, %59, %cst_70 [0] : vector<8x32xf32> to vector<32xf32>
    %61 = vector.shape_cast %60 : vector<32xf32> to vector<1x32xf32>
    %c1_71 = arith.constant 1 : index
    %c0_72 = arith.constant 0 : index
    %c0_73 = arith.constant 0 : index
    %62 = vector.load %arg7[%c1_71, %c0_72, %c0_73] : memref<4x8x32xf32, #tpu.memory_space<vmem>>, vector<1x8x32xf32>
    %63 = vector.shape_cast %62 : vector<1x8x32xf32> to vector<8x32xf32>
    %cst_74 = arith.constant dense<0.000000e+00> : vector<32xf32>
    %64 = vector.multi_reduction <add>, %63, %cst_74 [0] : vector<8x32xf32> to vector<32xf32>
    %65 = vector.shape_cast %64 : vector<32xf32> to vector<1x32xf32>
    %66 = arith.addf %61, %65 : vector<1x32xf32>
    %c2_75 = arith.constant 2 : index
    %c0_76 = arith.constant 0 : index
    %c0_77 = arith.constant 0 : index
    %67 = vector.load %arg7[%c2_75, %c0_76, %c0_77] : memref<4x8x32xf32, #tpu.memory_space<vmem>>, vector<1x8x32xf32>
    %68 = vector.shape_cast %67 : vector<1x8x32xf32> to vector<8x32xf32>
    %cst_78 = arith.constant dense<0.000000e+00> : vector<32xf32>
    %69 = vector.multi_reduction <add>, %68, %cst_78 [0] : vector<8x32xf32> to vector<32xf32>
    %70 = vector.shape_cast %69 : vector<32xf32> to vector<1x32xf32>
    %71 = arith.addf %66, %70 : vector<1x32xf32>
    %c3_79 = arith.constant 3 : index
    %c0_80 = arith.constant 0 : index
    %c0_81 = arith.constant 0 : index
    %72 = vector.load %arg7[%c3_79, %c0_80, %c0_81] : memref<4x8x32xf32, #tpu.memory_space<vmem>>, vector<1x8x32xf32>
    %73 = vector.shape_cast %72 : vector<1x8x32xf32> to vector<8x32xf32>
    %cst_82 = arith.constant dense<0.000000e+00> : vector<32xf32>
    %74 = vector.multi_reduction <add>, %73, %cst_82 [0] : vector<8x32xf32> to vector<32xf32>
    %75 = vector.shape_cast %74 : vector<32xf32> to vector<1x32xf32>
    %76 = arith.addf %71, %75 : vector<1x32xf32>
    %cst_83 = arith.constant 3.125000e-02 : f32
    %77 = vector.broadcast %cst_83 : f32 to vector<1x32xf32>
    %78 = arith.mulf %76, %77 : vector<1x32xf32>
    %c0_84 = arith.constant 0 : index
    %c0_85 = arith.constant 0 : index
    %c0_86 = arith.constant 0 : index
    %79 = vector.load %arg7[%c0_84, %c0_85, %c0_86] : memref<4x8x32xf32, #tpu.memory_space<vmem>>, vector<1x8x32xf32>
    %80 = vector.shape_cast %79 : vector<1x8x32xf32> to vector<8x32xf32>
    %81 = vector.broadcast %78 : vector<1x32xf32> to vector<8x32xf32>
    %82 = arith.subf %80, %81 : vector<8x32xf32>
    %83 = arith.mulf %82, %82 : vector<8x32xf32>
    %cst_87 = arith.constant dense<0.000000e+00> : vector<32xf32>
    %84 = vector.multi_reduction <add>, %83, %cst_87 [0] : vector<8x32xf32> to vector<32xf32>
    %85 = vector.shape_cast %84 : vector<32xf32> to vector<1x32xf32>
    %c1_88 = arith.constant 1 : index
    %c0_89 = arith.constant 0 : index
    %c0_90 = arith.constant 0 : index
    %86 = vector.load %arg7[%c1_88, %c0_89, %c0_90] : memref<4x8x32xf32, #tpu.memory_space<vmem>>, vector<1x8x32xf32>
    %87 = vector.shape_cast %86 : vector<1x8x32xf32> to vector<8x32xf32>
    %88 = vector.broadcast %78 : vector<1x32xf32> to vector<8x32xf32>
    %89 = arith.subf %87, %88 : vector<8x32xf32>
    %90 = arith.mulf %89, %89 : vector<8x32xf32>
    %cst_91 = arith.constant dense<0.000000e+00> : vector<32xf32>
    %91 = vector.multi_reduction <add>, %90, %cst_91 [0] : vector<8x32xf32> to vector<32xf32>
    %92 = vector.shape_cast %91 : vector<32xf32> to vector<1x32xf32>
    %93 = arith.addf %85, %92 : vector<1x32xf32>
    %c2_92 = arith.constant 2 : index
    %c0_93 = arith.constant 0 : index
    %c0_94 = arith.constant 0 : index
    %94 = vector.load %arg7[%c2_92, %c0_93, %c0_94] : memref<4x8x32xf32, #tpu.memory_space<vmem>>, vector<1x8x32xf32>
    %95 = vector.shape_cast %94 : vector<1x8x32xf32> to vector<8x32xf32>
    %96 = vector.broadcast %78 : vector<1x32xf32> to vector<8x32xf32>
    %97 = arith.subf %95, %96 : vector<8x32xf32>
    %98 = arith.mulf %97, %97 : vector<8x32xf32>
    %cst_95 = arith.constant dense<0.000000e+00> : vector<32xf32>
    %99 = vector.multi_reduction <add>, %98, %cst_95 [0] : vector<8x32xf32> to vector<32xf32>
    %100 = vector.shape_cast %99 : vector<32xf32> to vector<1x32xf32>
    %101 = arith.addf %93, %100 : vector<1x32xf32>
    %c3_96 = arith.constant 3 : index
    %c0_97 = arith.constant 0 : index
    %c0_98 = arith.constant 0 : index
    %102 = vector.load %arg7[%c3_96, %c0_97, %c0_98] : memref<4x8x32xf32, #tpu.memory_space<vmem>>, vector<1x8x32xf32>
    %103 = vector.shape_cast %102 : vector<1x8x32xf32> to vector<8x32xf32>
    %104 = vector.broadcast %78 : vector<1x32xf32> to vector<8x32xf32>
    %105 = arith.subf %103, %104 : vector<8x32xf32>
    %106 = arith.mulf %105, %105 : vector<8x32xf32>
    %cst_99 = arith.constant dense<0.000000e+00> : vector<32xf32>
    %107 = vector.multi_reduction <add>, %106, %cst_99 [0] : vector<8x32xf32> to vector<32xf32>
    %108 = vector.shape_cast %107 : vector<32xf32> to vector<1x32xf32>
    %109 = arith.addf %101, %108 : vector<1x32xf32>
    %cst_100 = arith.constant 3.125000e-02 : f32
    %110 = vector.broadcast %cst_100 : f32 to vector<1x32xf32>
    %111 = arith.mulf %109, %110 : vector<1x32xf32>
    %cst_101 = arith.constant 9.99999974E-6 : f32
    %112 = vector.broadcast %cst_101 : f32 to vector<1x32xf32>
    %113 = arith.addf %111, %112 : vector<1x32xf32>
    %114 = math.rsqrt %113 : vector<1x32xf32>
    %115 = arith.mulf %114, %56 : vector<1x32xf32>
    %116 = arith.mulf %78, %115 : vector<1x32xf32>
    %117 = arith.subf %57, %116 : vector<1x32xf32>
    %c0_102 = arith.constant 0 : index
    %c0_103 = arith.constant 0 : index
    %c0_104 = arith.constant 0 : index
    %118 = vector.load %arg7[%c0_102, %c0_103, %c0_104] : memref<4x8x32xf32, #tpu.memory_space<vmem>>, vector<1x8x32xf32>
    %119 = vector.shape_cast %118 : vector<1x8x32xf32> to vector<8x32xf32>
    %120 = vector.broadcast %115 : vector<1x32xf32> to vector<8x32xf32>
    %121 = arith.mulf %119, %120 : vector<8x32xf32>
    %122 = vector.broadcast %117 : vector<1x32xf32> to vector<8x32xf32>
    %123 = arith.addf %121, %122 : vector<8x32xf32>
    %cst_105 = arith.constant 0.000000e+00 : f32
    %124 = vector.broadcast %cst_105 : f32 to vector<8x32xf32>
    %125 = arith.maximumf %123, %124 : vector<8x32xf32>
    %126 = arith.truncf %125 : vector<8x32xf32> to vector<8x32xbf16>
    %c0_106 = arith.constant 0 : index
    %c0_107 = arith.constant 0 : index
    %c0_108 = arith.constant 0 : index
    %127 = vector.load %arg6[%c0_106, %c0_107, %c0_108] : memref<4x8x32xbf16, #tpu.memory_space<vmem>>, vector<1x8x32xbf16>
    %128 = vector.shape_cast %127 : vector<1x8x32xbf16> to vector<8x32xbf16>
    %129 = vector.shape_cast %126 : vector<8x32xbf16> to vector<1x8x32xbf16>
    tpu.vector_store %arg6[%c0_106, %c0_107, %c0_108], %129 {strides = array<i32>} : memref<4x8x32xbf16, #tpu.memory_space<vmem>>, vector<1x8x32xbf16>,
    %c1_109 = arith.constant 1 : index
    %c0_110 = arith.constant 0 : index
    %c0_111 = arith.constant 0 : index
    %130 = vector.load %arg7[%c1_109, %c0_110, %c0_111] : memref<4x8x32xf32, #tpu.memory_space<vmem>>, vector<1x8x32xf32>
    %131 = vector.shape_cast %130 : vector<1x8x32xf32> to vector<8x32xf32>
    %132 = vector.broadcast %115 : vector<1x32xf32> to vector<8x32xf32>
    %133 = arith.mulf %131, %132 : vector<8x32xf32>
    %134 = vector.broadcast %117 : vector<1x32xf32> to vector<8x32xf32>
    %135 = arith.addf %133, %134 : vector<8x32xf32>
    %cst_112 = arith.constant 0.000000e+00 : f32
    %136 = vector.broadcast %cst_112 : f32 to vector<8x32xf32>
    %137 = arith.maximumf %135, %136 : vector<8x32xf32>
    %138 = arith.truncf %137 : vector<8x32xf32> to vector<8x32xbf16>
    %c1_113 = arith.constant 1 : index
    %c0_114 = arith.constant 0 : index
    %c0_115 = arith.constant 0 : index
    %139 = vector.load %arg6[%c1_113, %c0_114, %c0_115] : memref<4x8x32xbf16, #tpu.memory_space<vmem>>, vector<1x8x32xbf16>
    %140 = vector.shape_cast %139 : vector<1x8x32xbf16> to vector<8x32xbf16>
    %141 = vector.shape_cast %138 : vector<8x32xbf16> to vector<1x8x32xbf16>
    tpu.vector_store %arg6[%c1_113, %c0_114, %c0_115], %141 {strides = array<i32>} : memref<4x8x32xbf16, #tpu.memory_space<vmem>>, vector<1x8x32xbf16>,
    %c2_116 = arith.constant 2 : index
    %c0_117 = arith.constant 0 : index
    %c0_118 = arith.constant 0 : index
    %142 = vector.load %arg7[%c2_116, %c0_117, %c0_118] : memref<4x8x32xf32, #tpu.memory_space<vmem>>, vector<1x8x32xf32>
    %143 = vector.shape_cast %142 : vector<1x8x32xf32> to vector<8x32xf32>
    %144 = vector.broadcast %115 : vector<1x32xf32> to vector<8x32xf32>
    %145 = arith.mulf %143, %144 : vector<8x32xf32>
    %146 = vector.broadcast %117 : vector<1x32xf32> to vector<8x32xf32>
    %147 = arith.addf %145, %146 : vector<8x32xf32>
    %cst_119 = arith.constant 0.000000e+00 : f32
    %148 = vector.broadcast %cst_119 : f32 to vector<8x32xf32>
    %149 = arith.maximumf %147, %148 : vector<8x32xf32>
    %150 = arith.truncf %149 : vector<8x32xf32> to vector<8x32xbf16>
    %c2_120 = arith.constant 2 : index
    %c0_121 = arith.constant 0 : index
    %c0_122 = arith.constant 0 : index
    %151 = vector.load %arg6[%c2_120, %c0_121, %c0_122] : memref<4x8x32xbf16, #tpu.memory_space<vmem>>, vector<1x8x32xbf16>
    %152 = vector.shape_cast %151 : vector<1x8x32xbf16> to vector<8x32xbf16>
    %153 = vector.shape_cast %150 : vector<8x32xbf16> to vector<1x8x32xbf16>
    tpu.vector_store %arg6[%c2_120, %c0_121, %c0_122], %153 {strides = array<i32>} : memref<4x8x32xbf16, #tpu.memory_space<vmem>>, vector<1x8x32xbf16>,
    %c3_123 = arith.constant 3 : index
    %c0_124 = arith.constant 0 : index
    %c0_125 = arith.constant 0 : index
    %154 = vector.load %arg7[%c3_123, %c0_124, %c0_125] : memref<4x8x32xf32, #tpu.memory_space<vmem>>, vector<1x8x32xf32>
    %155 = vector.shape_cast %154 : vector<1x8x32xf32> to vector<8x32xf32>
    %156 = vector.broadcast %115 : vector<1x32xf32> to vector<8x32xf32>
    %157 = arith.mulf %155, %156 : vector<8x32xf32>
    %158 = vector.broadcast %117 : vector<1x32xf32> to vector<8x32xf32>
    %159 = arith.addf %157, %158 : vector<8x32xf32>
    %cst_126 = arith.constant 0.000000e+00 : f32
    %160 = vector.broadcast %cst_126 : f32 to vector<8x32xf32>
    %161 = arith.maximumf %159, %160 : vector<8x32xf32>
    %162 = arith.truncf %161 : vector<8x32xf32> to vector<8x32xbf16>
    %c3_127 = arith.constant 3 : index
    %c0_128 = arith.constant 0 : index
    %c0_129 = arith.constant 0 : index
    %163 = vector.load %arg6[%c3_127, %c0_128, %c0_129] : memref<4x8x32xbf16, #tpu.memory_space<vmem>>, vector<1x8x32xbf16>
    %164 = vector.shape_cast %163 : vector<1x8x32xbf16> to vector<8x32xbf16>
    %165 = vector.shape_cast %162 : vector<8x32xbf16> to vector<1x8x32xbf16>
    tpu.vector_store %arg6[%c3_127, %c0_128, %c0_129], %165 {strides = array<i32>} : memref<4x8x32xbf16, #tpu.memory_space<vmem>>, vector<1x8x32xbf16>,
    return
  }
  func.func @transform_0(%arg0: i32) -> (i32, i32, i32) {
    %c0_i32 = arith.constant 0 : i32
    %c0_i32_0 = arith.constant 0 : i32
    %c0_i32_1 = arith.constant 0 : i32
    %c0_i32_2 = arith.constant 0 : i32
    return %c0_i32, %c0_i32_0, %c0_i32_1 : i32, i32, i32
  }
  func.func @transform_1(%arg0: i32) -> (i32, i32, i32) {
    %c0_i32 = arith.constant 0 : i32
    %c0_i32_0 = arith.constant 0 : i32
    %c0_i32_1 = arith.constant 0 : i32
    %c0_i32_2 = arith.constant 0 : i32
    return %c0_i32, %c0_i32_0, %c0_i32_1 : i32, i32, i32
  }
  func.func @transform_2(%arg0: i32) -> (i32, i32, i32) {
    %c0_i32 = arith.constant 0 : i32
    %c0_i32_0 = arith.constant 0 : i32
    %c0_i32_1 = arith.constant 0 : i32
    %c0_i32_2 = arith.constant 0 : i32
    return %c0_i32, %c0_i32_0, %c0_i32_1 : i32, i32, i32
  }
  func.func @transform_3(%arg0: i32) -> (i32, i32, i32) {
    %c0_i32 = arith.constant 0 : i32
    %c0_i32_0 = arith.constant 0 : i32
    %c0_i32_1 = arith.constant 0 : i32
    %c0_i32_2 = arith.constant 0 : i32
    return %c0_i32, %c0_i32_0, %c0_i32_1 : i32, i32, i32
  }
  func.func @transform_4(%arg0: i32) -> (i32, i32) {
    %c0_i32 = arith.constant 0 : i32
    %c0_i32_0 = arith.constant 0 : i32
    %c0_i32_1 = arith.constant 0 : i32
    return %c0_i32, %c0_i32_0 : i32, i32
  }
  func.func @transform_5(%arg0: i32) -> (i32, i32, i32) {
    %c0_i32 = arith.constant 0 : i32
    %c0_i32_0 = arith.constant 0 : i32
    %c0_i32_1 = arith.constant 0 : i32
    %c0_i32_2 = arith.constant 0 : i32
    return %c0_i32, %c0_i32_0, %c0_i32_1 : i32, i32, i32
  }
}

module attributes {stable_mosaic.version = 11 : i64} {
  func.func @kernel(%arg0: i32, %arg1: memref<4x16x128xbf16, #tpu.memory_space<vmem>>, %arg2: memref<4x16x128xbf16, #tpu.memory_space<vmem>>, %arg3: memref<4x128x32xbf16, #tpu.memory_space<vmem>>, %arg4: memref<4x128x32xbf16, #tpu.memory_space<vmem>>, %arg5: memref<16x2xf32, #tpu.memory_space<vmem>>, %arg6: memref<4x16x32xbf16, #tpu.memory_space<vmem>>, %arg7: memref<4x16x32xf32, #tpu.memory_space<vmem>>) attributes {dimension_semantics = [#tpu.dimension_semantics<parallel>], iteration_bounds = array<i64: 1>, scalar_prefetch = 0 : i64, scratch_operands = 1 : i64, tpu.core_type = #tpu.core_type<tc>, window_params = [{pipeline_mode = #tpu.pipeline_mode<synchronous>, transform_indices = @transform_0, window_bounds = array<i64: 4, 16, 128>}, {pipeline_mode = #tpu.pipeline_mode<synchronous>, transform_indices = @transform_1, window_bounds = array<i64: 4, 16, 128>}, {transform_indices = @transform_2, window_bounds = array<i64: 4, 128, 32>}, {transform_indices = @transform_3, window_bounds = array<i64: 4, 128, 32>}, {pipeline_mode = #tpu.pipeline_mode<synchronous>, transform_indices = @transform_4, window_bounds = array<i64: 16, 2>}, {transform_indices = @transform_5, window_bounds = array<i64: 4, 16, 32>}]} {
    %c0 = arith.constant 0 : index
    %c0_0 = arith.constant 0 : index
    %c0_1 = arith.constant 0 : index
    %0 = vector.load %arg1[%c0, %c0_0, %c0_1] : memref<4x16x128xbf16, #tpu.memory_space<vmem>>, vector<1x16x128xbf16>
    %1 = vector.shape_cast %0 : vector<1x16x128xbf16> to vector<16x128xbf16>
    %c0_2 = arith.constant 0 : index
    %c0_3 = arith.constant 0 : index
    %c0_4 = arith.constant 0 : index
    %2 = vector.load %arg3[%c0_2, %c0_3, %c0_4] : memref<4x128x32xbf16, #tpu.memory_space<vmem>>, vector<1x128x32xbf16>
    %3 = vector.shape_cast %2 : vector<1x128x32xbf16> to vector<128x32xbf16>
    %cst = arith.constant dense<0.000000e+00> : vector<16x32xf32>
    %4 = tpu.matmul %1, %3, %cst {dimension_numbers = #tpu.dot_dimension_numbers<[1], [0], [0], [1], [0, 0, 1, 1], [], []>} : vector<16x128xbf16>, vector<128x32xbf16>, vector<16x32xf32> -> vector<16x32xf32>
    %c0_5 = arith.constant 0 : index
    %c0_6 = arith.constant 0 : index
    %c0_7 = arith.constant 0 : index
    %5 = vector.load %arg2[%c0_5, %c0_6, %c0_7] : memref<4x16x128xbf16, #tpu.memory_space<vmem>>, vector<1x16x128xbf16>
    %6 = vector.shape_cast %5 : vector<1x16x128xbf16> to vector<16x128xbf16>
    %c0_8 = arith.constant 0 : index
    %c0_9 = arith.constant 0 : index
    %c0_10 = arith.constant 0 : index
    %7 = vector.load %arg4[%c0_8, %c0_9, %c0_10] : memref<4x128x32xbf16, #tpu.memory_space<vmem>>, vector<1x128x32xbf16>
    %8 = vector.shape_cast %7 : vector<1x128x32xbf16> to vector<128x32xbf16>
    %cst_11 = arith.constant dense<0.000000e+00> : vector<16x32xf32>
    %9 = tpu.matmul %6, %8, %cst_11 {dimension_numbers = #tpu.dot_dimension_numbers<[1], [0], [0], [1], [0, 0, 1, 1], [], []>} : vector<16x128xbf16>, vector<128x32xbf16>, vector<16x32xf32> -> vector<16x32xf32>
    %10 = arith.addf %4, %9 : vector<16x32xf32>
    %c0_12 = arith.constant 0 : index
    %c0_13 = arith.constant 0 : index
    %c0_14 = arith.constant 0 : index
    %11 = vector.load %arg7[%c0_12, %c0_13, %c0_14] : memref<4x16x32xf32, #tpu.memory_space<vmem>>, vector<1x16x32xf32>
    %12 = vector.shape_cast %11 : vector<1x16x32xf32> to vector<16x32xf32>
    %13 = vector.shape_cast %10 : vector<16x32xf32> to vector<1x16x32xf32>
    tpu.vector_store %arg7[%c0_12, %c0_13, %c0_14], %13 {strides = array<i32>} : memref<4x16x32xf32, #tpu.memory_space<vmem>>, vector<1x16x32xf32>,
    %c1 = arith.constant 1 : index
    %c0_15 = arith.constant 0 : index
    %c0_16 = arith.constant 0 : index
    %14 = vector.load %arg1[%c1, %c0_15, %c0_16] : memref<4x16x128xbf16, #tpu.memory_space<vmem>>, vector<1x16x128xbf16>
    %15 = vector.shape_cast %14 : vector<1x16x128xbf16> to vector<16x128xbf16>
    %c1_17 = arith.constant 1 : index
    %c0_18 = arith.constant 0 : index
    %c0_19 = arith.constant 0 : index
    %16 = vector.load %arg3[%c1_17, %c0_18, %c0_19] : memref<4x128x32xbf16, #tpu.memory_space<vmem>>, vector<1x128x32xbf16>
    %17 = vector.shape_cast %16 : vector<1x128x32xbf16> to vector<128x32xbf16>
    %cst_20 = arith.constant dense<0.000000e+00> : vector<16x32xf32>
    %18 = tpu.matmul %15, %17, %cst_20 {dimension_numbers = #tpu.dot_dimension_numbers<[1], [0], [0], [1], [0, 0, 1, 1], [], []>} : vector<16x128xbf16>, vector<128x32xbf16>, vector<16x32xf32> -> vector<16x32xf32>
    %c1_21 = arith.constant 1 : index
    %c0_22 = arith.constant 0 : index
    %c0_23 = arith.constant 0 : index
    %19 = vector.load %arg2[%c1_21, %c0_22, %c0_23] : memref<4x16x128xbf16, #tpu.memory_space<vmem>>, vector<1x16x128xbf16>
    %20 = vector.shape_cast %19 : vector<1x16x128xbf16> to vector<16x128xbf16>
    %c1_24 = arith.constant 1 : index
    %c0_25 = arith.constant 0 : index
    %c0_26 = arith.constant 0 : index
    %21 = vector.load %arg4[%c1_24, %c0_25, %c0_26] : memref<4x128x32xbf16, #tpu.memory_space<vmem>>, vector<1x128x32xbf16>
    %22 = vector.shape_cast %21 : vector<1x128x32xbf16> to vector<128x32xbf16>
    %cst_27 = arith.constant dense<0.000000e+00> : vector<16x32xf32>
    %23 = tpu.matmul %20, %22, %cst_27 {dimension_numbers = #tpu.dot_dimension_numbers<[1], [0], [0], [1], [0, 0, 1, 1], [], []>} : vector<16x128xbf16>, vector<128x32xbf16>, vector<16x32xf32> -> vector<16x32xf32>
    %24 = arith.addf %18, %23 : vector<16x32xf32>
    %c1_28 = arith.constant 1 : index
    %c0_29 = arith.constant 0 : index
    %c0_30 = arith.constant 0 : index
    %25 = vector.load %arg7[%c1_28, %c0_29, %c0_30] : memref<4x16x32xf32, #tpu.memory_space<vmem>>, vector<1x16x32xf32>
    %26 = vector.shape_cast %25 : vector<1x16x32xf32> to vector<16x32xf32>
    %27 = vector.shape_cast %24 : vector<16x32xf32> to vector<1x16x32xf32>
    tpu.vector_store %arg7[%c1_28, %c0_29, %c0_30], %27 {strides = array<i32>} : memref<4x16x32xf32, #tpu.memory_space<vmem>>, vector<1x16x32xf32>,
    %c2 = arith.constant 2 : index
    %c0_31 = arith.constant 0 : index
    %c0_32 = arith.constant 0 : index
    %28 = vector.load %arg1[%c2, %c0_31, %c0_32] : memref<4x16x128xbf16, #tpu.memory_space<vmem>>, vector<1x16x128xbf16>
    %29 = vector.shape_cast %28 : vector<1x16x128xbf16> to vector<16x128xbf16>
    %c2_33 = arith.constant 2 : index
    %c0_34 = arith.constant 0 : index
    %c0_35 = arith.constant 0 : index
    %30 = vector.load %arg3[%c2_33, %c0_34, %c0_35] : memref<4x128x32xbf16, #tpu.memory_space<vmem>>, vector<1x128x32xbf16>
    %31 = vector.shape_cast %30 : vector<1x128x32xbf16> to vector<128x32xbf16>
    %cst_36 = arith.constant dense<0.000000e+00> : vector<16x32xf32>
    %32 = tpu.matmul %29, %31, %cst_36 {dimension_numbers = #tpu.dot_dimension_numbers<[1], [0], [0], [1], [0, 0, 1, 1], [], []>} : vector<16x128xbf16>, vector<128x32xbf16>, vector<16x32xf32> -> vector<16x32xf32>
    %c2_37 = arith.constant 2 : index
    %c0_38 = arith.constant 0 : index
    %c0_39 = arith.constant 0 : index
    %33 = vector.load %arg2[%c2_37, %c0_38, %c0_39] : memref<4x16x128xbf16, #tpu.memory_space<vmem>>, vector<1x16x128xbf16>
    %34 = vector.shape_cast %33 : vector<1x16x128xbf16> to vector<16x128xbf16>
    %c2_40 = arith.constant 2 : index
    %c0_41 = arith.constant 0 : index
    %c0_42 = arith.constant 0 : index
    %35 = vector.load %arg4[%c2_40, %c0_41, %c0_42] : memref<4x128x32xbf16, #tpu.memory_space<vmem>>, vector<1x128x32xbf16>
    %36 = vector.shape_cast %35 : vector<1x128x32xbf16> to vector<128x32xbf16>
    %cst_43 = arith.constant dense<0.000000e+00> : vector<16x32xf32>
    %37 = tpu.matmul %34, %36, %cst_43 {dimension_numbers = #tpu.dot_dimension_numbers<[1], [0], [0], [1], [0, 0, 1, 1], [], []>} : vector<16x128xbf16>, vector<128x32xbf16>, vector<16x32xf32> -> vector<16x32xf32>
    %38 = arith.addf %32, %37 : vector<16x32xf32>
    %c2_44 = arith.constant 2 : index
    %c0_45 = arith.constant 0 : index
    %c0_46 = arith.constant 0 : index
    %39 = vector.load %arg7[%c2_44, %c0_45, %c0_46] : memref<4x16x32xf32, #tpu.memory_space<vmem>>, vector<1x16x32xf32>
    %40 = vector.shape_cast %39 : vector<1x16x32xf32> to vector<16x32xf32>
    %41 = vector.shape_cast %38 : vector<16x32xf32> to vector<1x16x32xf32>
    tpu.vector_store %arg7[%c2_44, %c0_45, %c0_46], %41 {strides = array<i32>} : memref<4x16x32xf32, #tpu.memory_space<vmem>>, vector<1x16x32xf32>,
    %c3 = arith.constant 3 : index
    %c0_47 = arith.constant 0 : index
    %c0_48 = arith.constant 0 : index
    %42 = vector.load %arg1[%c3, %c0_47, %c0_48] : memref<4x16x128xbf16, #tpu.memory_space<vmem>>, vector<1x16x128xbf16>
    %43 = vector.shape_cast %42 : vector<1x16x128xbf16> to vector<16x128xbf16>
    %c3_49 = arith.constant 3 : index
    %c0_50 = arith.constant 0 : index
    %c0_51 = arith.constant 0 : index
    %44 = vector.load %arg3[%c3_49, %c0_50, %c0_51] : memref<4x128x32xbf16, #tpu.memory_space<vmem>>, vector<1x128x32xbf16>
    %45 = vector.shape_cast %44 : vector<1x128x32xbf16> to vector<128x32xbf16>
    %cst_52 = arith.constant dense<0.000000e+00> : vector<16x32xf32>
    %46 = tpu.matmul %43, %45, %cst_52 {dimension_numbers = #tpu.dot_dimension_numbers<[1], [0], [0], [1], [0, 0, 1, 1], [], []>} : vector<16x128xbf16>, vector<128x32xbf16>, vector<16x32xf32> -> vector<16x32xf32>
    %c3_53 = arith.constant 3 : index
    %c0_54 = arith.constant 0 : index
    %c0_55 = arith.constant 0 : index
    %47 = vector.load %arg2[%c3_53, %c0_54, %c0_55] : memref<4x16x128xbf16, #tpu.memory_space<vmem>>, vector<1x16x128xbf16>
    %48 = vector.shape_cast %47 : vector<1x16x128xbf16> to vector<16x128xbf16>
    %c3_56 = arith.constant 3 : index
    %c0_57 = arith.constant 0 : index
    %c0_58 = arith.constant 0 : index
    %49 = vector.load %arg4[%c3_56, %c0_57, %c0_58] : memref<4x128x32xbf16, #tpu.memory_space<vmem>>, vector<1x128x32xbf16>
    %50 = vector.shape_cast %49 : vector<1x128x32xbf16> to vector<128x32xbf16>
    %cst_59 = arith.constant dense<0.000000e+00> : vector<16x32xf32>
    %51 = tpu.matmul %48, %50, %cst_59 {dimension_numbers = #tpu.dot_dimension_numbers<[1], [0], [0], [1], [0, 0, 1, 1], [], []>} : vector<16x128xbf16>, vector<128x32xbf16>, vector<16x32xf32> -> vector<16x32xf32>
    %52 = arith.addf %46, %51 : vector<16x32xf32>
    %c3_60 = arith.constant 3 : index
    %c0_61 = arith.constant 0 : index
    %c0_62 = arith.constant 0 : index
    %53 = vector.load %arg7[%c3_60, %c0_61, %c0_62] : memref<4x16x32xf32, #tpu.memory_space<vmem>>, vector<1x16x32xf32>
    %54 = vector.shape_cast %53 : vector<1x16x32xf32> to vector<16x32xf32>
    %55 = vector.shape_cast %52 : vector<16x32xf32> to vector<1x16x32xf32>
    tpu.vector_store %arg7[%c3_60, %c0_61, %c0_62], %55 {strides = array<i32>} : memref<4x16x32xf32, #tpu.memory_space<vmem>>, vector<1x16x32xf32>,
    %c0_63 = arith.constant 0 : index
    %c0_64 = arith.constant 0 : index
    %56 = vector.load %arg5[%c0_63, %c0_64] : memref<16x2xf32, #tpu.memory_space<vmem>>, vector<16x1xf32>
    %c0_65 = arith.constant 0 : index
    %c1_66 = arith.constant 1 : index
    %57 = vector.load %arg5[%c0_65, %c1_66] : memref<16x2xf32, #tpu.memory_space<vmem>>, vector<16x1xf32>
    %c0_67 = arith.constant 0 : index
    %c0_68 = arith.constant 0 : index
    %c0_69 = arith.constant 0 : index
    %58 = vector.load %arg7[%c0_67, %c0_68, %c0_69] : memref<4x16x32xf32, #tpu.memory_space<vmem>>, vector<1x16x32xf32>
    %59 = vector.shape_cast %58 : vector<1x16x32xf32> to vector<16x32xf32>
    %cst_70 = arith.constant dense<0.000000e+00> : vector<16xf32>
    %60 = vector.multi_reduction <add>, %59, %cst_70 [1] : vector<16x32xf32> to vector<16xf32>
    %61 = vector.shape_cast %60 : vector<16xf32> to vector<16x1xf32>
    %c1_71 = arith.constant 1 : index
    %c0_72 = arith.constant 0 : index
    %c0_73 = arith.constant 0 : index
    %62 = vector.load %arg7[%c1_71, %c0_72, %c0_73] : memref<4x16x32xf32, #tpu.memory_space<vmem>>, vector<1x16x32xf32>
    %63 = vector.shape_cast %62 : vector<1x16x32xf32> to vector<16x32xf32>
    %cst_74 = arith.constant dense<0.000000e+00> : vector<16xf32>
    %64 = vector.multi_reduction <add>, %63, %cst_74 [1] : vector<16x32xf32> to vector<16xf32>
    %65 = vector.shape_cast %64 : vector<16xf32> to vector<16x1xf32>
    %66 = arith.addf %61, %65 : vector<16x1xf32>
    %c2_75 = arith.constant 2 : index
    %c0_76 = arith.constant 0 : index
    %c0_77 = arith.constant 0 : index
    %67 = vector.load %arg7[%c2_75, %c0_76, %c0_77] : memref<4x16x32xf32, #tpu.memory_space<vmem>>, vector<1x16x32xf32>
    %68 = vector.shape_cast %67 : vector<1x16x32xf32> to vector<16x32xf32>
    %cst_78 = arith.constant dense<0.000000e+00> : vector<16xf32>
    %69 = vector.multi_reduction <add>, %68, %cst_78 [1] : vector<16x32xf32> to vector<16xf32>
    %70 = vector.shape_cast %69 : vector<16xf32> to vector<16x1xf32>
    %71 = arith.addf %66, %70 : vector<16x1xf32>
    %c3_79 = arith.constant 3 : index
    %c0_80 = arith.constant 0 : index
    %c0_81 = arith.constant 0 : index
    %72 = vector.load %arg7[%c3_79, %c0_80, %c0_81] : memref<4x16x32xf32, #tpu.memory_space<vmem>>, vector<1x16x32xf32>
    %73 = vector.shape_cast %72 : vector<1x16x32xf32> to vector<16x32xf32>
    %cst_82 = arith.constant dense<0.000000e+00> : vector<16xf32>
    %74 = vector.multi_reduction <add>, %73, %cst_82 [1] : vector<16x32xf32> to vector<16xf32>
    %75 = vector.shape_cast %74 : vector<16xf32> to vector<16x1xf32>
    %76 = arith.addf %71, %75 : vector<16x1xf32>
    %cst_83 = arith.constant 7.812500e-03 : f32
    %77 = vector.broadcast %cst_83 : f32 to vector<16x1xf32>
    %78 = arith.mulf %76, %77 : vector<16x1xf32>
    %c0_84 = arith.constant 0 : index
    %c0_85 = arith.constant 0 : index
    %c0_86 = arith.constant 0 : index
    %79 = vector.load %arg7[%c0_84, %c0_85, %c0_86] : memref<4x16x32xf32, #tpu.memory_space<vmem>>, vector<1x16x32xf32>
    %80 = vector.shape_cast %79 : vector<1x16x32xf32> to vector<16x32xf32>
    %81 = vector.broadcast %78 : vector<16x1xf32> to vector<16x32xf32>
    %82 = arith.subf %80, %81 : vector<16x32xf32>
    %83 = arith.mulf %82, %82 : vector<16x32xf32>
    %cst_87 = arith.constant dense<0.000000e+00> : vector<16xf32>
    %84 = vector.multi_reduction <add>, %83, %cst_87 [1] : vector<16x32xf32> to vector<16xf32>
    %85 = vector.shape_cast %84 : vector<16xf32> to vector<16x1xf32>
    %c1_88 = arith.constant 1 : index
    %c0_89 = arith.constant 0 : index
    %c0_90 = arith.constant 0 : index
    %86 = vector.load %arg7[%c1_88, %c0_89, %c0_90] : memref<4x16x32xf32, #tpu.memory_space<vmem>>, vector<1x16x32xf32>
    %87 = vector.shape_cast %86 : vector<1x16x32xf32> to vector<16x32xf32>
    %88 = vector.broadcast %78 : vector<16x1xf32> to vector<16x32xf32>
    %89 = arith.subf %87, %88 : vector<16x32xf32>
    %90 = arith.mulf %89, %89 : vector<16x32xf32>
    %cst_91 = arith.constant dense<0.000000e+00> : vector<16xf32>
    %91 = vector.multi_reduction <add>, %90, %cst_91 [1] : vector<16x32xf32> to vector<16xf32>
    %92 = vector.shape_cast %91 : vector<16xf32> to vector<16x1xf32>
    %93 = arith.addf %85, %92 : vector<16x1xf32>
    %c2_92 = arith.constant 2 : index
    %c0_93 = arith.constant 0 : index
    %c0_94 = arith.constant 0 : index
    %94 = vector.load %arg7[%c2_92, %c0_93, %c0_94] : memref<4x16x32xf32, #tpu.memory_space<vmem>>, vector<1x16x32xf32>
    %95 = vector.shape_cast %94 : vector<1x16x32xf32> to vector<16x32xf32>
    %96 = vector.broadcast %78 : vector<16x1xf32> to vector<16x32xf32>
    %97 = arith.subf %95, %96 : vector<16x32xf32>
    %98 = arith.mulf %97, %97 : vector<16x32xf32>
    %cst_95 = arith.constant dense<0.000000e+00> : vector<16xf32>
    %99 = vector.multi_reduction <add>, %98, %cst_95 [1] : vector<16x32xf32> to vector<16xf32>
    %100 = vector.shape_cast %99 : vector<16xf32> to vector<16x1xf32>
    %101 = arith.addf %93, %100 : vector<16x1xf32>
    %c3_96 = arith.constant 3 : index
    %c0_97 = arith.constant 0 : index
    %c0_98 = arith.constant 0 : index
    %102 = vector.load %arg7[%c3_96, %c0_97, %c0_98] : memref<4x16x32xf32, #tpu.memory_space<vmem>>, vector<1x16x32xf32>
    %103 = vector.shape_cast %102 : vector<1x16x32xf32> to vector<16x32xf32>
    %104 = vector.broadcast %78 : vector<16x1xf32> to vector<16x32xf32>
    %105 = arith.subf %103, %104 : vector<16x32xf32>
    %106 = arith.mulf %105, %105 : vector<16x32xf32>
    %cst_99 = arith.constant dense<0.000000e+00> : vector<16xf32>
    %107 = vector.multi_reduction <add>, %106, %cst_99 [1] : vector<16x32xf32> to vector<16xf32>
    %108 = vector.shape_cast %107 : vector<16xf32> to vector<16x1xf32>
    %109 = arith.addf %101, %108 : vector<16x1xf32>
    %cst_100 = arith.constant 7.812500e-03 : f32
    %110 = vector.broadcast %cst_100 : f32 to vector<16x1xf32>
    %111 = arith.mulf %109, %110 : vector<16x1xf32>
    %cst_101 = arith.constant 9.99999974E-6 : f32
    %112 = vector.broadcast %cst_101 : f32 to vector<16x1xf32>
    %113 = arith.addf %111, %112 : vector<16x1xf32>
    %114 = math.rsqrt %113 : vector<16x1xf32>
    %115 = arith.mulf %114, %56 : vector<16x1xf32>
    %116 = arith.mulf %78, %115 : vector<16x1xf32>
    %117 = arith.subf %57, %116 : vector<16x1xf32>
    %c0_102 = arith.constant 0 : index
    %c0_103 = arith.constant 0 : index
    %c0_104 = arith.constant 0 : index
    %118 = vector.load %arg7[%c0_102, %c0_103, %c0_104] : memref<4x16x32xf32, #tpu.memory_space<vmem>>, vector<1x16x32xf32>
    %119 = vector.shape_cast %118 : vector<1x16x32xf32> to vector<16x32xf32>
    %120 = vector.broadcast %115 : vector<16x1xf32> to vector<16x32xf32>
    %121 = arith.mulf %119, %120 : vector<16x32xf32>
    %122 = vector.broadcast %117 : vector<16x1xf32> to vector<16x32xf32>
    %123 = arith.addf %121, %122 : vector<16x32xf32>
    %cst_105 = arith.constant 0.000000e+00 : f32
    %124 = vector.broadcast %cst_105 : f32 to vector<16x32xf32>
    %125 = arith.maximumf %123, %124 : vector<16x32xf32>
    %126 = arith.truncf %125 : vector<16x32xf32> to vector<16x32xbf16>
    %c0_106 = arith.constant 0 : index
    %c0_107 = arith.constant 0 : index
    %c0_108 = arith.constant 0 : index
    %127 = vector.load %arg6[%c0_106, %c0_107, %c0_108] : memref<4x16x32xbf16, #tpu.memory_space<vmem>>, vector<1x16x32xbf16>
    %128 = vector.shape_cast %127 : vector<1x16x32xbf16> to vector<16x32xbf16>
    %129 = vector.shape_cast %126 : vector<16x32xbf16> to vector<1x16x32xbf16>
    tpu.vector_store %arg6[%c0_106, %c0_107, %c0_108], %129 {strides = array<i32>} : memref<4x16x32xbf16, #tpu.memory_space<vmem>>, vector<1x16x32xbf16>,
    %c1_109 = arith.constant 1 : index
    %c0_110 = arith.constant 0 : index
    %c0_111 = arith.constant 0 : index
    %130 = vector.load %arg7[%c1_109, %c0_110, %c0_111] : memref<4x16x32xf32, #tpu.memory_space<vmem>>, vector<1x16x32xf32>
    %131 = vector.shape_cast %130 : vector<1x16x32xf32> to vector<16x32xf32>
    %132 = vector.broadcast %115 : vector<16x1xf32> to vector<16x32xf32>
    %133 = arith.mulf %131, %132 : vector<16x32xf32>
    %134 = vector.broadcast %117 : vector<16x1xf32> to vector<16x32xf32>
    %135 = arith.addf %133, %134 : vector<16x32xf32>
    %cst_112 = arith.constant 0.000000e+00 : f32
    %136 = vector.broadcast %cst_112 : f32 to vector<16x32xf32>
    %137 = arith.maximumf %135, %136 : vector<16x32xf32>
    %138 = arith.truncf %137 : vector<16x32xf32> to vector<16x32xbf16>
    %c1_113 = arith.constant 1 : index
    %c0_114 = arith.constant 0 : index
    %c0_115 = arith.constant 0 : index
    %139 = vector.load %arg6[%c1_113, %c0_114, %c0_115] : memref<4x16x32xbf16, #tpu.memory_space<vmem>>, vector<1x16x32xbf16>
    %140 = vector.shape_cast %139 : vector<1x16x32xbf16> to vector<16x32xbf16>
    %141 = vector.shape_cast %138 : vector<16x32xbf16> to vector<1x16x32xbf16>
    tpu.vector_store %arg6[%c1_113, %c0_114, %c0_115], %141 {strides = array<i32>} : memref<4x16x32xbf16, #tpu.memory_space<vmem>>, vector<1x16x32xbf16>,
    %c2_116 = arith.constant 2 : index
    %c0_117 = arith.constant 0 : index
    %c0_118 = arith.constant 0 : index
    %142 = vector.load %arg7[%c2_116, %c0_117, %c0_118] : memref<4x16x32xf32, #tpu.memory_space<vmem>>, vector<1x16x32xf32>
    %143 = vector.shape_cast %142 : vector<1x16x32xf32> to vector<16x32xf32>
    %144 = vector.broadcast %115 : vector<16x1xf32> to vector<16x32xf32>
    %145 = arith.mulf %143, %144 : vector<16x32xf32>
    %146 = vector.broadcast %117 : vector<16x1xf32> to vector<16x32xf32>
    %147 = arith.addf %145, %146 : vector<16x32xf32>
    %cst_119 = arith.constant 0.000000e+00 : f32
    %148 = vector.broadcast %cst_119 : f32 to vector<16x32xf32>
    %149 = arith.maximumf %147, %148 : vector<16x32xf32>
    %150 = arith.truncf %149 : vector<16x32xf32> to vector<16x32xbf16>
    %c2_120 = arith.constant 2 : index
    %c0_121 = arith.constant 0 : index
    %c0_122 = arith.constant 0 : index
    %151 = vector.load %arg6[%c2_120, %c0_121, %c0_122] : memref<4x16x32xbf16, #tpu.memory_space<vmem>>, vector<1x16x32xbf16>
    %152 = vector.shape_cast %151 : vector<1x16x32xbf16> to vector<16x32xbf16>
    %153 = vector.shape_cast %150 : vector<16x32xbf16> to vector<1x16x32xbf16>
    tpu.vector_store %arg6[%c2_120, %c0_121, %c0_122], %153 {strides = array<i32>} : memref<4x16x32xbf16, #tpu.memory_space<vmem>>, vector<1x16x32xbf16>,
    %c3_123 = arith.constant 3 : index
    %c0_124 = arith.constant 0 : index
    %c0_125 = arith.constant 0 : index
    %154 = vector.load %arg7[%c3_123, %c0_124, %c0_125] : memref<4x16x32xf32, #tpu.memory_space<vmem>>, vector<1x16x32xf32>
    %155 = vector.shape_cast %154 : vector<1x16x32xf32> to vector<16x32xf32>
    %156 = vector.broadcast %115 : vector<16x1xf32> to vector<16x32xf32>
    %157 = arith.mulf %155, %156 : vector<16x32xf32>
    %158 = vector.broadcast %117 : vector<16x1xf32> to vector<16x32xf32>
    %159 = arith.addf %157, %158 : vector<16x32xf32>
    %cst_126 = arith.constant 0.000000e+00 : f32
    %160 = vector.broadcast %cst_126 : f32 to vector<16x32xf32>
    %161 = arith.maximumf %159, %160 : vector<16x32xf32>
    %162 = arith.truncf %161 : vector<16x32xf32> to vector<16x32xbf16>
    %c3_127 = arith.constant 3 : index
    %c0_128 = arith.constant 0 : index
    %c0_129 = arith.constant 0 : index
    %163 = vector.load %arg6[%c3_127, %c0_128, %c0_129] : memref<4x16x32xbf16, #tpu.memory_space<vmem>>, vector<1x16x32xbf16>
    %164 = vector.shape_cast %163 : vector<1x16x32xbf16> to vector<16x32xbf16>
    %165 = vector.shape_cast %162 : vector<16x32xbf16> to vector<1x16x32xbf16>
    tpu.vector_store %arg6[%c3_127, %c0_128, %c0_129], %165 {strides = array<i32>} : memref<4x16x32xbf16, #tpu.memory_space<vmem>>, vector<1x16x32xbf16>,
    return
  }
  func.func @transform_0(%arg0: i32) -> (i32, i32, i32) {
    %c0_i32 = arith.constant 0 : i32
    %c0_i32_0 = arith.constant 0 : i32
    %c0_i32_1 = arith.constant 0 : i32
    %c0_i32_2 = arith.constant 0 : i32
    return %c0_i32, %c0_i32_0, %c0_i32_1 : i32, i32, i32
  }
  func.func @transform_1(%arg0: i32) -> (i32, i32, i32) {
    %c0_i32 = arith.constant 0 : i32
    %c0_i32_0 = arith.constant 0 : i32
    %c0_i32_1 = arith.constant 0 : i32
    %c0_i32_2 = arith.constant 0 : i32
    return %c0_i32, %c0_i32_0, %c0_i32_1 : i32, i32, i32
  }
  func.func @transform_2(%arg0: i32) -> (i32, i32, i32) {
    %c0_i32 = arith.constant 0 : i32
    %c0_i32_0 = arith.constant 0 : i32
    %c0_i32_1 = arith.constant 0 : i32
    return %c0_i32, %c0_i32_0, %arg0 : i32, i32, i32
  }
  func.func @transform_3(%arg0: i32) -> (i32, i32, i32) {
    %c0_i32 = arith.constant 0 : i32
    %c0_i32_0 = arith.constant 0 : i32
    %c0_i32_1 = arith.constant 0 : i32
    return %c0_i32, %c0_i32_0, %arg0 : i32, i32, i32
  }
  func.func @transform_4(%arg0: i32) -> (i32, i32) {
    %c0_i32 = arith.constant 0 : i32
    %c0_i32_0 = arith.constant 0 : i32
    %c0_i32_1 = arith.constant 0 : i32
    return %c0_i32, %c0_i32_0 : i32, i32
  }
  func.func @transform_5(%arg0: i32) -> (i32, i32, i32) {
    %c0_i32 = arith.constant 0 : i32
    %c0_i32_0 = arith.constant 0 : i32
    %c0_i32_1 = arith.constant 0 : i32
    return %c0_i32, %c0_i32_0, %arg0 : i32, i32, i32
  }
}

module attributes {stable_mosaic.version = 11 : i64} {
  func.func @kernel(%arg0: i32, %arg1: memref<4x8x64xbf16, #tpu.memory_space<vmem>>, %arg2: memref<4x8x64xbf16, #tpu.memory_space<vmem>>, %arg3: memref<4x64x128xbf16, #tpu.memory_space<vmem>>, %arg4: memref<4x64x128xbf16, #tpu.memory_space<vmem>>, %arg5: memref<8x2xf32, #tpu.memory_space<vmem>>, %arg6: memref<4x8x128xbf16, #tpu.memory_space<vmem>>, %arg7: memref<4x8x128xf32, #tpu.memory_space<vmem>>) attributes {dimension_semantics = [#tpu.dimension_semantics<parallel>], iteration_bounds = array<i64: 1>, scalar_prefetch = 0 : i64, scratch_operands = 1 : i64, tpu.core_type = #tpu.core_type<tc>, window_params = [{pipeline_mode = #tpu.pipeline_mode<synchronous>, transform_indices = @transform_0, window_bounds = array<i64: 4, 8, 64>}, {pipeline_mode = #tpu.pipeline_mode<synchronous>, transform_indices = @transform_1, window_bounds = array<i64: 4, 8, 64>}, {transform_indices = @transform_2, window_bounds = array<i64: 4, 64, 128>}, {transform_indices = @transform_3, window_bounds = array<i64: 4, 64, 128>}, {pipeline_mode = #tpu.pipeline_mode<synchronous>, transform_indices = @transform_4, window_bounds = array<i64: 8, 2>}, {transform_indices = @transform_5, window_bounds = array<i64: 4, 8, 128>}]} {
    %c0 = arith.constant 0 : index
    %c0_0 = arith.constant 0 : index
    %c0_1 = arith.constant 0 : index
    %0 = vector.load %arg1[%c0, %c0_0, %c0_1] : memref<4x8x64xbf16, #tpu.memory_space<vmem>>, vector<1x8x64xbf16>
    %1 = vector.shape_cast %0 : vector<1x8x64xbf16> to vector<8x64xbf16>
    %c0_2 = arith.constant 0 : index
    %c0_3 = arith.constant 0 : index
    %c0_4 = arith.constant 0 : index
    %2 = vector.load %arg3[%c0_2, %c0_3, %c0_4] : memref<4x64x128xbf16, #tpu.memory_space<vmem>>, vector<1x64x128xbf16>
    %3 = vector.shape_cast %2 : vector<1x64x128xbf16> to vector<64x128xbf16>
    %cst = arith.constant dense<0.000000e+00> : vector<8x128xf32>
    %4 = tpu.matmul %1, %3, %cst {dimension_numbers = #tpu.dot_dimension_numbers<[1], [0], [0], [1], [0, 0, 1, 1], [], []>} : vector<8x64xbf16>, vector<64x128xbf16>, vector<8x128xf32> -> vector<8x128xf32>
    %c0_5 = arith.constant 0 : index
    %c0_6 = arith.constant 0 : index
    %c0_7 = arith.constant 0 : index
    %5 = vector.load %arg2[%c0_5, %c0_6, %c0_7] : memref<4x8x64xbf16, #tpu.memory_space<vmem>>, vector<1x8x64xbf16>
    %6 = vector.shape_cast %5 : vector<1x8x64xbf16> to vector<8x64xbf16>
    %c0_8 = arith.constant 0 : index
    %c0_9 = arith.constant 0 : index
    %c0_10 = arith.constant 0 : index
    %7 = vector.load %arg4[%c0_8, %c0_9, %c0_10] : memref<4x64x128xbf16, #tpu.memory_space<vmem>>, vector<1x64x128xbf16>
    %8 = vector.shape_cast %7 : vector<1x64x128xbf16> to vector<64x128xbf16>
    %cst_11 = arith.constant dense<0.000000e+00> : vector<8x128xf32>
    %9 = tpu.matmul %6, %8, %cst_11 {dimension_numbers = #tpu.dot_dimension_numbers<[1], [0], [0], [1], [0, 0, 1, 1], [], []>} : vector<8x64xbf16>, vector<64x128xbf16>, vector<8x128xf32> -> vector<8x128xf32>
    %10 = arith.addf %4, %9 : vector<8x128xf32>
    %c0_12 = arith.constant 0 : index
    %c0_13 = arith.constant 0 : index
    %c0_14 = arith.constant 0 : index
    %11 = vector.load %arg7[%c0_12, %c0_13, %c0_14] : memref<4x8x128xf32, #tpu.memory_space<vmem>>, vector<1x8x128xf32>
    %12 = vector.shape_cast %11 : vector<1x8x128xf32> to vector<8x128xf32>
    %13 = vector.shape_cast %10 : vector<8x128xf32> to vector<1x8x128xf32>
    tpu.vector_store %arg7[%c0_12, %c0_13, %c0_14], %13 {strides = array<i32>} : memref<4x8x128xf32, #tpu.memory_space<vmem>>, vector<1x8x128xf32>,
    %c1 = arith.constant 1 : index
    %c0_15 = arith.constant 0 : index
    %c0_16 = arith.constant 0 : index
    %14 = vector.load %arg1[%c1, %c0_15, %c0_16] : memref<4x8x64xbf16, #tpu.memory_space<vmem>>, vector<1x8x64xbf16>
    %15 = vector.shape_cast %14 : vector<1x8x64xbf16> to vector<8x64xbf16>
    %c1_17 = arith.constant 1 : index
    %c0_18 = arith.constant 0 : index
    %c0_19 = arith.constant 0 : index
    %16 = vector.load %arg3[%c1_17, %c0_18, %c0_19] : memref<4x64x128xbf16, #tpu.memory_space<vmem>>, vector<1x64x128xbf16>
    %17 = vector.shape_cast %16 : vector<1x64x128xbf16> to vector<64x128xbf16>
    %cst_20 = arith.constant dense<0.000000e+00> : vector<8x128xf32>
    %18 = tpu.matmul %15, %17, %cst_20 {dimension_numbers = #tpu.dot_dimension_numbers<[1], [0], [0], [1], [0, 0, 1, 1], [], []>} : vector<8x64xbf16>, vector<64x128xbf16>, vector<8x128xf32> -> vector<8x128xf32>
    %c1_21 = arith.constant 1 : index
    %c0_22 = arith.constant 0 : index
    %c0_23 = arith.constant 0 : index
    %19 = vector.load %arg2[%c1_21, %c0_22, %c0_23] : memref<4x8x64xbf16, #tpu.memory_space<vmem>>, vector<1x8x64xbf16>
    %20 = vector.shape_cast %19 : vector<1x8x64xbf16> to vector<8x64xbf16>
    %c1_24 = arith.constant 1 : index
    %c0_25 = arith.constant 0 : index
    %c0_26 = arith.constant 0 : index
    %21 = vector.load %arg4[%c1_24, %c0_25, %c0_26] : memref<4x64x128xbf16, #tpu.memory_space<vmem>>, vector<1x64x128xbf16>
    %22 = vector.shape_cast %21 : vector<1x64x128xbf16> to vector<64x128xbf16>
    %cst_27 = arith.constant dense<0.000000e+00> : vector<8x128xf32>
    %23 = tpu.matmul %20, %22, %cst_27 {dimension_numbers = #tpu.dot_dimension_numbers<[1], [0], [0], [1], [0, 0, 1, 1], [], []>} : vector<8x64xbf16>, vector<64x128xbf16>, vector<8x128xf32> -> vector<8x128xf32>
    %24 = arith.addf %18, %23 : vector<8x128xf32>
    %c1_28 = arith.constant 1 : index
    %c0_29 = arith.constant 0 : index
    %c0_30 = arith.constant 0 : index
    %25 = vector.load %arg7[%c1_28, %c0_29, %c0_30] : memref<4x8x128xf32, #tpu.memory_space<vmem>>, vector<1x8x128xf32>
    %26 = vector.shape_cast %25 : vector<1x8x128xf32> to vector<8x128xf32>
    %27 = vector.shape_cast %24 : vector<8x128xf32> to vector<1x8x128xf32>
    tpu.vector_store %arg7[%c1_28, %c0_29, %c0_30], %27 {strides = array<i32>} : memref<4x8x128xf32, #tpu.memory_space<vmem>>, vector<1x8x128xf32>,
    %c2 = arith.constant 2 : index
    %c0_31 = arith.constant 0 : index
    %c0_32 = arith.constant 0 : index
    %28 = vector.load %arg1[%c2, %c0_31, %c0_32] : memref<4x8x64xbf16, #tpu.memory_space<vmem>>, vector<1x8x64xbf16>
    %29 = vector.shape_cast %28 : vector<1x8x64xbf16> to vector<8x64xbf16>
    %c2_33 = arith.constant 2 : index
    %c0_34 = arith.constant 0 : index
    %c0_35 = arith.constant 0 : index
    %30 = vector.load %arg3[%c2_33, %c0_34, %c0_35] : memref<4x64x128xbf16, #tpu.memory_space<vmem>>, vector<1x64x128xbf16>
    %31 = vector.shape_cast %30 : vector<1x64x128xbf16> to vector<64x128xbf16>
    %cst_36 = arith.constant dense<0.000000e+00> : vector<8x128xf32>
    %32 = tpu.matmul %29, %31, %cst_36 {dimension_numbers = #tpu.dot_dimension_numbers<[1], [0], [0], [1], [0, 0, 1, 1], [], []>} : vector<8x64xbf16>, vector<64x128xbf16>, vector<8x128xf32> -> vector<8x128xf32>
    %c2_37 = arith.constant 2 : index
    %c0_38 = arith.constant 0 : index
    %c0_39 = arith.constant 0 : index
    %33 = vector.load %arg2[%c2_37, %c0_38, %c0_39] : memref<4x8x64xbf16, #tpu.memory_space<vmem>>, vector<1x8x64xbf16>
    %34 = vector.shape_cast %33 : vector<1x8x64xbf16> to vector<8x64xbf16>
    %c2_40 = arith.constant 2 : index
    %c0_41 = arith.constant 0 : index
    %c0_42 = arith.constant 0 : index
    %35 = vector.load %arg4[%c2_40, %c0_41, %c0_42] : memref<4x64x128xbf16, #tpu.memory_space<vmem>>, vector<1x64x128xbf16>
    %36 = vector.shape_cast %35 : vector<1x64x128xbf16> to vector<64x128xbf16>
    %cst_43 = arith.constant dense<0.000000e+00> : vector<8x128xf32>
    %37 = tpu.matmul %34, %36, %cst_43 {dimension_numbers = #tpu.dot_dimension_numbers<[1], [0], [0], [1], [0, 0, 1, 1], [], []>} : vector<8x64xbf16>, vector<64x128xbf16>, vector<8x128xf32> -> vector<8x128xf32>
    %38 = arith.addf %32, %37 : vector<8x128xf32>
    %c2_44 = arith.constant 2 : index
    %c0_45 = arith.constant 0 : index
    %c0_46 = arith.constant 0 : index
    %39 = vector.load %arg7[%c2_44, %c0_45, %c0_46] : memref<4x8x128xf32, #tpu.memory_space<vmem>>, vector<1x8x128xf32>
    %40 = vector.shape_cast %39 : vector<1x8x128xf32> to vector<8x128xf32>
    %41 = vector.shape_cast %38 : vector<8x128xf32> to vector<1x8x128xf32>
    tpu.vector_store %arg7[%c2_44, %c0_45, %c0_46], %41 {strides = array<i32>} : memref<4x8x128xf32, #tpu.memory_space<vmem>>, vector<1x8x128xf32>,
    %c3 = arith.constant 3 : index
    %c0_47 = arith.constant 0 : index
    %c0_48 = arith.constant 0 : index
    %42 = vector.load %arg1[%c3, %c0_47, %c0_48] : memref<4x8x64xbf16, #tpu.memory_space<vmem>>, vector<1x8x64xbf16>
    %43 = vector.shape_cast %42 : vector<1x8x64xbf16> to vector<8x64xbf16>
    %c3_49 = arith.constant 3 : index
    %c0_50 = arith.constant 0 : index
    %c0_51 = arith.constant 0 : index
    %44 = vector.load %arg3[%c3_49, %c0_50, %c0_51] : memref<4x64x128xbf16, #tpu.memory_space<vmem>>, vector<1x64x128xbf16>
    %45 = vector.shape_cast %44 : vector<1x64x128xbf16> to vector<64x128xbf16>
    %cst_52 = arith.constant dense<0.000000e+00> : vector<8x128xf32>
    %46 = tpu.matmul %43, %45, %cst_52 {dimension_numbers = #tpu.dot_dimension_numbers<[1], [0], [0], [1], [0, 0, 1, 1], [], []>} : vector<8x64xbf16>, vector<64x128xbf16>, vector<8x128xf32> -> vector<8x128xf32>
    %c3_53 = arith.constant 3 : index
    %c0_54 = arith.constant 0 : index
    %c0_55 = arith.constant 0 : index
    %47 = vector.load %arg2[%c3_53, %c0_54, %c0_55] : memref<4x8x64xbf16, #tpu.memory_space<vmem>>, vector<1x8x64xbf16>
    %48 = vector.shape_cast %47 : vector<1x8x64xbf16> to vector<8x64xbf16>
    %c3_56 = arith.constant 3 : index
    %c0_57 = arith.constant 0 : index
    %c0_58 = arith.constant 0 : index
    %49 = vector.load %arg4[%c3_56, %c0_57, %c0_58] : memref<4x64x128xbf16, #tpu.memory_space<vmem>>, vector<1x64x128xbf16>
    %50 = vector.shape_cast %49 : vector<1x64x128xbf16> to vector<64x128xbf16>
    %cst_59 = arith.constant dense<0.000000e+00> : vector<8x128xf32>
    %51 = tpu.matmul %48, %50, %cst_59 {dimension_numbers = #tpu.dot_dimension_numbers<[1], [0], [0], [1], [0, 0, 1, 1], [], []>} : vector<8x64xbf16>, vector<64x128xbf16>, vector<8x128xf32> -> vector<8x128xf32>
    %52 = arith.addf %46, %51 : vector<8x128xf32>
    %c3_60 = arith.constant 3 : index
    %c0_61 = arith.constant 0 : index
    %c0_62 = arith.constant 0 : index
    %53 = vector.load %arg7[%c3_60, %c0_61, %c0_62] : memref<4x8x128xf32, #tpu.memory_space<vmem>>, vector<1x8x128xf32>
    %54 = vector.shape_cast %53 : vector<1x8x128xf32> to vector<8x128xf32>
    %55 = vector.shape_cast %52 : vector<8x128xf32> to vector<1x8x128xf32>
    tpu.vector_store %arg7[%c3_60, %c0_61, %c0_62], %55 {strides = array<i32>} : memref<4x8x128xf32, #tpu.memory_space<vmem>>, vector<1x8x128xf32>,
    %c0_63 = arith.constant 0 : index
    %c0_64 = arith.constant 0 : index
    %56 = vector.load %arg5[%c0_63, %c0_64] : memref<8x2xf32, #tpu.memory_space<vmem>>, vector<8x1xf32>
    %c0_65 = arith.constant 0 : index
    %c1_66 = arith.constant 1 : index
    %57 = vector.load %arg5[%c0_65, %c1_66] : memref<8x2xf32, #tpu.memory_space<vmem>>, vector<8x1xf32>
    %c0_67 = arith.constant 0 : index
    %c0_68 = arith.constant 0 : index
    %c0_69 = arith.constant 0 : index
    %58 = vector.load %arg7[%c0_67, %c0_68, %c0_69] : memref<4x8x128xf32, #tpu.memory_space<vmem>>, vector<1x8x128xf32>
    %59 = vector.shape_cast %58 : vector<1x8x128xf32> to vector<8x128xf32>
    %cst_70 = arith.constant dense<0.000000e+00> : vector<8xf32>
    %60 = vector.multi_reduction <add>, %59, %cst_70 [1] : vector<8x128xf32> to vector<8xf32>
    %61 = vector.shape_cast %60 : vector<8xf32> to vector<8x1xf32>
    %c1_71 = arith.constant 1 : index
    %c0_72 = arith.constant 0 : index
    %c0_73 = arith.constant 0 : index
    %62 = vector.load %arg7[%c1_71, %c0_72, %c0_73] : memref<4x8x128xf32, #tpu.memory_space<vmem>>, vector<1x8x128xf32>
    %63 = vector.shape_cast %62 : vector<1x8x128xf32> to vector<8x128xf32>
    %cst_74 = arith.constant dense<0.000000e+00> : vector<8xf32>
    %64 = vector.multi_reduction <add>, %63, %cst_74 [1] : vector<8x128xf32> to vector<8xf32>
    %65 = vector.shape_cast %64 : vector<8xf32> to vector<8x1xf32>
    %66 = arith.addf %61, %65 : vector<8x1xf32>
    %c2_75 = arith.constant 2 : index
    %c0_76 = arith.constant 0 : index
    %c0_77 = arith.constant 0 : index
    %67 = vector.load %arg7[%c2_75, %c0_76, %c0_77] : memref<4x8x128xf32, #tpu.memory_space<vmem>>, vector<1x8x128xf32>
    %68 = vector.shape_cast %67 : vector<1x8x128xf32> to vector<8x128xf32>
    %cst_78 = arith.constant dense<0.000000e+00> : vector<8xf32>
    %69 = vector.multi_reduction <add>, %68, %cst_78 [1] : vector<8x128xf32> to vector<8xf32>
    %70 = vector.shape_cast %69 : vector<8xf32> to vector<8x1xf32>
    %71 = arith.addf %66, %70 : vector<8x1xf32>
    %c3_79 = arith.constant 3 : index
    %c0_80 = arith.constant 0 : index
    %c0_81 = arith.constant 0 : index
    %72 = vector.load %arg7[%c3_79, %c0_80, %c0_81] : memref<4x8x128xf32, #tpu.memory_space<vmem>>, vector<1x8x128xf32>
    %73 = vector.shape_cast %72 : vector<1x8x128xf32> to vector<8x128xf32>
    %cst_82 = arith.constant dense<0.000000e+00> : vector<8xf32>
    %74 = vector.multi_reduction <add>, %73, %cst_82 [1] : vector<8x128xf32> to vector<8xf32>
    %75 = vector.shape_cast %74 : vector<8xf32> to vector<8x1xf32>
    %76 = arith.addf %71, %75 : vector<8x1xf32>
    %cst_83 = arith.constant 0.001953125 : f32
    %77 = vector.broadcast %cst_83 : f32 to vector<8x1xf32>
    %78 = arith.mulf %76, %77 : vector<8x1xf32>
    %c0_84 = arith.constant 0 : index
    %c0_85 = arith.constant 0 : index
    %c0_86 = arith.constant 0 : index
    %79 = vector.load %arg7[%c0_84, %c0_85, %c0_86] : memref<4x8x128xf32, #tpu.memory_space<vmem>>, vector<1x8x128xf32>
    %80 = vector.shape_cast %79 : vector<1x8x128xf32> to vector<8x128xf32>
    %81 = vector.broadcast %78 : vector<8x1xf32> to vector<8x128xf32>
    %82 = arith.subf %80, %81 : vector<8x128xf32>
    %83 = arith.mulf %82, %82 : vector<8x128xf32>
    %cst_87 = arith.constant dense<0.000000e+00> : vector<8xf32>
    %84 = vector.multi_reduction <add>, %83, %cst_87 [1] : vector<8x128xf32> to vector<8xf32>
    %85 = vector.shape_cast %84 : vector<8xf32> to vector<8x1xf32>
    %c1_88 = arith.constant 1 : index
    %c0_89 = arith.constant 0 : index
    %c0_90 = arith.constant 0 : index
    %86 = vector.load %arg7[%c1_88, %c0_89, %c0_90] : memref<4x8x128xf32, #tpu.memory_space<vmem>>, vector<1x8x128xf32>
    %87 = vector.shape_cast %86 : vector<1x8x128xf32> to vector<8x128xf32>
    %88 = vector.broadcast %78 : vector<8x1xf32> to vector<8x128xf32>
    %89 = arith.subf %87, %88 : vector<8x128xf32>
    %90 = arith.mulf %89, %89 : vector<8x128xf32>
    %cst_91 = arith.constant dense<0.000000e+00> : vector<8xf32>
    %91 = vector.multi_reduction <add>, %90, %cst_91 [1] : vector<8x128xf32> to vector<8xf32>
    %92 = vector.shape_cast %91 : vector<8xf32> to vector<8x1xf32>
    %93 = arith.addf %85, %92 : vector<8x1xf32>
    %c2_92 = arith.constant 2 : index
    %c0_93 = arith.constant 0 : index
    %c0_94 = arith.constant 0 : index
    %94 = vector.load %arg7[%c2_92, %c0_93, %c0_94] : memref<4x8x128xf32, #tpu.memory_space<vmem>>, vector<1x8x128xf32>
    %95 = vector.shape_cast %94 : vector<1x8x128xf32> to vector<8x128xf32>
    %96 = vector.broadcast %78 : vector<8x1xf32> to vector<8x128xf32>
    %97 = arith.subf %95, %96 : vector<8x128xf32>
    %98 = arith.mulf %97, %97 : vector<8x128xf32>
    %cst_95 = arith.constant dense<0.000000e+00> : vector<8xf32>
    %99 = vector.multi_reduction <add>, %98, %cst_95 [1] : vector<8x128xf32> to vector<8xf32>
    %100 = vector.shape_cast %99 : vector<8xf32> to vector<8x1xf32>
    %101 = arith.addf %93, %100 : vector<8x1xf32>
    %c3_96 = arith.constant 3 : index
    %c0_97 = arith.constant 0 : index
    %c0_98 = arith.constant 0 : index
    %102 = vector.load %arg7[%c3_96, %c0_97, %c0_98] : memref<4x8x128xf32, #tpu.memory_space<vmem>>, vector<1x8x128xf32>
    %103 = vector.shape_cast %102 : vector<1x8x128xf32> to vector<8x128xf32>
    %104 = vector.broadcast %78 : vector<8x1xf32> to vector<8x128xf32>
    %105 = arith.subf %103, %104 : vector<8x128xf32>
    %106 = arith.mulf %105, %105 : vector<8x128xf32>
    %cst_99 = arith.constant dense<0.000000e+00> : vector<8xf32>
    %107 = vector.multi_reduction <add>, %106, %cst_99 [1] : vector<8x128xf32> to vector<8xf32>
    %108 = vector.shape_cast %107 : vector<8xf32> to vector<8x1xf32>
    %109 = arith.addf %101, %108 : vector<8x1xf32>
    %cst_100 = arith.constant 0.001953125 : f32
    %110 = vector.broadcast %cst_100 : f32 to vector<8x1xf32>
    %111 = arith.mulf %109, %110 : vector<8x1xf32>
    %cst_101 = arith.constant 9.99999974E-6 : f32
    %112 = vector.broadcast %cst_101 : f32 to vector<8x1xf32>
    %113 = arith.addf %111, %112 : vector<8x1xf32>
    %114 = math.rsqrt %113 : vector<8x1xf32>
    %115 = arith.mulf %114, %56 : vector<8x1xf32>
    %116 = arith.mulf %78, %115 : vector<8x1xf32>
    %117 = arith.subf %57, %116 : vector<8x1xf32>
    %c0_102 = arith.constant 0 : index
    %c0_103 = arith.constant 0 : index
    %c0_104 = arith.constant 0 : index
    %118 = vector.load %arg7[%c0_102, %c0_103, %c0_104] : memref<4x8x128xf32, #tpu.memory_space<vmem>>, vector<1x8x128xf32>
    %119 = vector.shape_cast %118 : vector<1x8x128xf32> to vector<8x128xf32>
    %120 = vector.broadcast %115 : vector<8x1xf32> to vector<8x128xf32>
    %121 = arith.mulf %119, %120 : vector<8x128xf32>
    %122 = vector.broadcast %117 : vector<8x1xf32> to vector<8x128xf32>
    %123 = arith.addf %121, %122 : vector<8x128xf32>
    %cst_105 = arith.constant 0.000000e+00 : f32
    %124 = vector.broadcast %cst_105 : f32 to vector<8x128xf32>
    %125 = arith.maximumf %123, %124 : vector<8x128xf32>
    %126 = arith.truncf %125 : vector<8x128xf32> to vector<8x128xbf16>
    %c0_106 = arith.constant 0 : index
    %c0_107 = arith.constant 0 : index
    %c0_108 = arith.constant 0 : index
    %127 = vector.load %arg6[%c0_106, %c0_107, %c0_108] : memref<4x8x128xbf16, #tpu.memory_space<vmem>>, vector<1x8x128xbf16>
    %128 = vector.shape_cast %127 : vector<1x8x128xbf16> to vector<8x128xbf16>
    %129 = vector.shape_cast %126 : vector<8x128xbf16> to vector<1x8x128xbf16>
    tpu.vector_store %arg6[%c0_106, %c0_107, %c0_108], %129 {strides = array<i32>} : memref<4x8x128xbf16, #tpu.memory_space<vmem>>, vector<1x8x128xbf16>,
    %c1_109 = arith.constant 1 : index
    %c0_110 = arith.constant 0 : index
    %c0_111 = arith.constant 0 : index
    %130 = vector.load %arg7[%c1_109, %c0_110, %c0_111] : memref<4x8x128xf32, #tpu.memory_space<vmem>>, vector<1x8x128xf32>
    %131 = vector.shape_cast %130 : vector<1x8x128xf32> to vector<8x128xf32>
    %132 = vector.broadcast %115 : vector<8x1xf32> to vector<8x128xf32>
    %133 = arith.mulf %131, %132 : vector<8x128xf32>
    %134 = vector.broadcast %117 : vector<8x1xf32> to vector<8x128xf32>
    %135 = arith.addf %133, %134 : vector<8x128xf32>
    %cst_112 = arith.constant 0.000000e+00 : f32
    %136 = vector.broadcast %cst_112 : f32 to vector<8x128xf32>
    %137 = arith.maximumf %135, %136 : vector<8x128xf32>
    %138 = arith.truncf %137 : vector<8x128xf32> to vector<8x128xbf16>
    %c1_113 = arith.constant 1 : index
    %c0_114 = arith.constant 0 : index
    %c0_115 = arith.constant 0 : index
    %139 = vector.load %arg6[%c1_113, %c0_114, %c0_115] : memref<4x8x128xbf16, #tpu.memory_space<vmem>>, vector<1x8x128xbf16>
    %140 = vector.shape_cast %139 : vector<1x8x128xbf16> to vector<8x128xbf16>
    %141 = vector.shape_cast %138 : vector<8x128xbf16> to vector<1x8x128xbf16>
    tpu.vector_store %arg6[%c1_113, %c0_114, %c0_115], %141 {strides = array<i32>} : memref<4x8x128xbf16, #tpu.memory_space<vmem>>, vector<1x8x128xbf16>,
    %c2_116 = arith.constant 2 : index
    %c0_117 = arith.constant 0 : index
    %c0_118 = arith.constant 0 : index
    %142 = vector.load %arg7[%c2_116, %c0_117, %c0_118] : memref<4x8x128xf32, #tpu.memory_space<vmem>>, vector<1x8x128xf32>
    %143 = vector.shape_cast %142 : vector<1x8x128xf32> to vector<8x128xf32>
    %144 = vector.broadcast %115 : vector<8x1xf32> to vector<8x128xf32>
    %145 = arith.mulf %143, %144 : vector<8x128xf32>
    %146 = vector.broadcast %117 : vector<8x1xf32> to vector<8x128xf32>
    %147 = arith.addf %145, %146 : vector<8x128xf32>
    %cst_119 = arith.constant 0.000000e+00 : f32
    %148 = vector.broadcast %cst_119 : f32 to vector<8x128xf32>
    %149 = arith.maximumf %147, %148 : vector<8x128xf32>
    %150 = arith.truncf %149 : vector<8x128xf32> to vector<8x128xbf16>
    %c2_120 = arith.constant 2 : index
    %c0_121 = arith.constant 0 : index
    %c0_122 = arith.constant 0 : index
    %151 = vector.load %arg6[%c2_120, %c0_121, %c0_122] : memref<4x8x128xbf16, #tpu.memory_space<vmem>>, vector<1x8x128xbf16>
    %152 = vector.shape_cast %151 : vector<1x8x128xbf16> to vector<8x128xbf16>
    %153 = vector.shape_cast %150 : vector<8x128xbf16> to vector<1x8x128xbf16>
    tpu.vector_store %arg6[%c2_120, %c0_121, %c0_122], %153 {strides = array<i32>} : memref<4x8x128xbf16, #tpu.memory_space<vmem>>, vector<1x8x128xbf16>,
    %c3_123 = arith.constant 3 : index
    %c0_124 = arith.constant 0 : index
    %c0_125 = arith.constant 0 : index
    %154 = vector.load %arg7[%c3_123, %c0_124, %c0_125] : memref<4x8x128xf32, #tpu.memory_space<vmem>>, vector<1x8x128xf32>
    %155 = vector.shape_cast %154 : vector<1x8x128xf32> to vector<8x128xf32>
    %156 = vector.broadcast %115 : vector<8x1xf32> to vector<8x128xf32>
    %157 = arith.mulf %155, %156 : vector<8x128xf32>
    %158 = vector.broadcast %117 : vector<8x1xf32> to vector<8x128xf32>
    %159 = arith.addf %157, %158 : vector<8x128xf32>
    %cst_126 = arith.constant 0.000000e+00 : f32
    %160 = vector.broadcast %cst_126 : f32 to vector<8x128xf32>
    %161 = arith.maximumf %159, %160 : vector<8x128xf32>
    %162 = arith.truncf %161 : vector<8x128xf32> to vector<8x128xbf16>
    %c3_127 = arith.constant 3 : index
    %c0_128 = arith.constant 0 : index
    %c0_129 = arith.constant 0 : index
    %163 = vector.load %arg6[%c3_127, %c0_128, %c0_129] : memref<4x8x128xbf16, #tpu.memory_space<vmem>>, vector<1x8x128xbf16>
    %164 = vector.shape_cast %163 : vector<1x8x128xbf16> to vector<8x128xbf16>
    %165 = vector.shape_cast %162 : vector<8x128xbf16> to vector<1x8x128xbf16>
    tpu.vector_store %arg6[%c3_127, %c0_128, %c0_129], %165 {strides = array<i32>} : memref<4x8x128xbf16, #tpu.memory_space<vmem>>, vector<1x8x128xbf16>,
    return
  }
  func.func @transform_0(%arg0: i32) -> (i32, i32, i32) {
    %c0_i32 = arith.constant 0 : i32
    %c0_i32_0 = arith.constant 0 : i32
    %c0_i32_1 = arith.constant 0 : i32
    %c0_i32_2 = arith.constant 0 : i32
    return %c0_i32, %c0_i32_0, %c0_i32_1 : i32, i32, i32
  }
  func.func @transform_1(%arg0: i32) -> (i32, i32, i32) {
    %c0_i32 = arith.constant 0 : i32
    %c0_i32_0 = arith.constant 0 : i32
    %c0_i32_1 = arith.constant 0 : i32
    %c0_i32_2 = arith.constant 0 : i32
    return %c0_i32, %c0_i32_0, %c0_i32_1 : i32, i32, i32
  }
  func.func @transform_2(%arg0: i32) -> (i32, i32, i32) {
    %c0_i32 = arith.constant 0 : i32
    %c0_i32_0 = arith.constant 0 : i32
    %c0_i32_1 = arith.constant 0 : i32
    return %c0_i32, %c0_i32_0, %arg0 : i32, i32, i32
  }
  func.func @transform_3(%arg0: i32) -> (i32, i32, i32) {
    %c0_i32 = arith.constant 0 : i32
    %c0_i32_0 = arith.constant 0 : i32
    %c0_i32_1 = arith.constant 0 : i32
    return %c0_i32, %c0_i32_0, %arg0 : i32, i32, i32
  }
  func.func @transform_4(%arg0: i32) -> (i32, i32) {
    %c0_i32 = arith.constant 0 : i32
    %c0_i32_0 = arith.constant 0 : i32
    %c0_i32_1 = arith.constant 0 : i32
    return %c0_i32, %c0_i32_0 : i32, i32
  }
  func.func @transform_5(%arg0: i32) -> (i32, i32, i32) {
    %c0_i32 = arith.constant 0 : i32
    %c0_i32_0 = arith.constant 0 : i32
    %c0_i32_1 = arith.constant 0 : i32
    return %c0_i32, %c0_i32_0, %arg0 : i32, i32, i32
  }
}

module attributes {stable_mosaic.version = 11 : i64} {
  func.func @kernel(%arg0: i32, %arg1: memref<4x4x32xbf16, #tpu.memory_space<vmem>>, %arg2: memref<4x4x32xbf16, #tpu.memory_space<vmem>>, %arg3: memref<4x32x512xbf16, #tpu.memory_space<vmem>>, %arg4: memref<4x32x512xbf16, #tpu.memory_space<vmem>>, %arg5: memref<4x1xf32, #tpu.memory_space<vmem>>, %arg6: memref<4x4x512xf32, #tpu.memory_space<vmem>>) attributes {dimension_semantics = [#tpu.dimension_semantics<parallel>], iteration_bounds = array<i64: 1>, scalar_prefetch = 0 : i64, scratch_operands = 0 : i64, tpu.core_type = #tpu.core_type<tc>, window_params = [{pipeline_mode = #tpu.pipeline_mode<synchronous>, transform_indices = @transform_0, window_bounds = array<i64: 4, 4, 32>}, {pipeline_mode = #tpu.pipeline_mode<synchronous>, transform_indices = @transform_1, window_bounds = array<i64: 4, 4, 32>}, {transform_indices = @transform_2, window_bounds = array<i64: 4, 32, 512>}, {transform_indices = @transform_3, window_bounds = array<i64: 4, 32, 512>}, {pipeline_mode = #tpu.pipeline_mode<synchronous>, transform_indices = @transform_4, window_bounds = array<i64: 4, 1>}, {transform_indices = @transform_5, window_bounds = array<i64: 4, 4, 512>}]} {
    %c0 = arith.constant 0 : index
    %c0_0 = arith.constant 0 : index
    %c0_1 = arith.constant 0 : index
    %0 = vector.load %arg1[%c0, %c0_0, %c0_1] : memref<4x4x32xbf16, #tpu.memory_space<vmem>>, vector<1x4x32xbf16>
    %1 = vector.shape_cast %0 : vector<1x4x32xbf16> to vector<4x32xbf16>
    %c0_2 = arith.constant 0 : index
    %c0_3 = arith.constant 0 : index
    %c0_4 = arith.constant 0 : index
    %2 = vector.load %arg3[%c0_2, %c0_3, %c0_4] : memref<4x32x512xbf16, #tpu.memory_space<vmem>>, vector<1x32x512xbf16>
    %3 = vector.shape_cast %2 : vector<1x32x512xbf16> to vector<32x512xbf16>
    %cst = arith.constant dense<0.000000e+00> : vector<4x512xf32>
    %4 = tpu.matmul %1, %3, %cst {dimension_numbers = #tpu.dot_dimension_numbers<[1], [0], [0], [1], [0, 0, 1, 1], [], []>} : vector<4x32xbf16>, vector<32x512xbf16>, vector<4x512xf32> -> vector<4x512xf32>
    %c0_5 = arith.constant 0 : index
    %c0_6 = arith.constant 0 : index
    %c0_7 = arith.constant 0 : index
    %5 = vector.load %arg2[%c0_5, %c0_6, %c0_7] : memref<4x4x32xbf16, #tpu.memory_space<vmem>>, vector<1x4x32xbf16>
    %6 = vector.shape_cast %5 : vector<1x4x32xbf16> to vector<4x32xbf16>
    %c0_8 = arith.constant 0 : index
    %c0_9 = arith.constant 0 : index
    %c0_10 = arith.constant 0 : index
    %7 = vector.load %arg4[%c0_8, %c0_9, %c0_10] : memref<4x32x512xbf16, #tpu.memory_space<vmem>>, vector<1x32x512xbf16>
    %8 = vector.shape_cast %7 : vector<1x32x512xbf16> to vector<32x512xbf16>
    %cst_11 = arith.constant dense<0.000000e+00> : vector<4x512xf32>
    %9 = tpu.matmul %6, %8, %cst_11 {dimension_numbers = #tpu.dot_dimension_numbers<[1], [0], [0], [1], [0, 0, 1, 1], [], []>} : vector<4x32xbf16>, vector<32x512xbf16>, vector<4x512xf32> -> vector<4x512xf32>
    %10 = arith.addf %4, %9 : vector<4x512xf32>
    %c0_12 = arith.constant 0 : index
    %c0_13 = arith.constant 0 : index
    %11 = vector.load %arg5[%c0_12, %c0_13] : memref<4x1xf32, #tpu.memory_space<vmem>>, vector<4x1xf32>
    %12 = vector.broadcast %11 : vector<4x1xf32> to vector<4x512xf32>
    %13 = arith.addf %10, %12 : vector<4x512xf32>
    %14 = math.tanh %13 : vector<4x512xf32>
    %c0_14 = arith.constant 0 : index
    %c0_15 = arith.constant 0 : index
    %c0_16 = arith.constant 0 : index
    %15 = vector.load %arg6[%c0_14, %c0_15, %c0_16] : memref<4x4x512xf32, #tpu.memory_space<vmem>>, vector<1x4x512xf32>
    %16 = vector.shape_cast %15 : vector<1x4x512xf32> to vector<4x512xf32>
    %17 = vector.shape_cast %14 : vector<4x512xf32> to vector<1x4x512xf32>
    tpu.vector_store %arg6[%c0_14, %c0_15, %c0_16], %17 {strides = array<i32>} : memref<4x4x512xf32, #tpu.memory_space<vmem>>, vector<1x4x512xf32>,
    %c1 = arith.constant 1 : index
    %c0_17 = arith.constant 0 : index
    %c0_18 = arith.constant 0 : index
    %18 = vector.load %arg1[%c1, %c0_17, %c0_18] : memref<4x4x32xbf16, #tpu.memory_space<vmem>>, vector<1x4x32xbf16>
    %19 = vector.shape_cast %18 : vector<1x4x32xbf16> to vector<4x32xbf16>
    %c1_19 = arith.constant 1 : index
    %c0_20 = arith.constant 0 : index
    %c0_21 = arith.constant 0 : index
    %20 = vector.load %arg3[%c1_19, %c0_20, %c0_21] : memref<4x32x512xbf16, #tpu.memory_space<vmem>>, vector<1x32x512xbf16>
    %21 = vector.shape_cast %20 : vector<1x32x512xbf16> to vector<32x512xbf16>
    %cst_22 = arith.constant dense<0.000000e+00> : vector<4x512xf32>
    %22 = tpu.matmul %19, %21, %cst_22 {dimension_numbers = #tpu.dot_dimension_numbers<[1], [0], [0], [1], [0, 0, 1, 1], [], []>} : vector<4x32xbf16>, vector<32x512xbf16>, vector<4x512xf32> -> vector<4x512xf32>
    %c1_23 = arith.constant 1 : index
    %c0_24 = arith.constant 0 : index
    %c0_25 = arith.constant 0 : index
    %23 = vector.load %arg2[%c1_23, %c0_24, %c0_25] : memref<4x4x32xbf16, #tpu.memory_space<vmem>>, vector<1x4x32xbf16>
    %24 = vector.shape_cast %23 : vector<1x4x32xbf16> to vector<4x32xbf16>
    %c1_26 = arith.constant 1 : index
    %c0_27 = arith.constant 0 : index
    %c0_28 = arith.constant 0 : index
    %25 = vector.load %arg4[%c1_26, %c0_27, %c0_28] : memref<4x32x512xbf16, #tpu.memory_space<vmem>>, vector<1x32x512xbf16>
    %26 = vector.shape_cast %25 : vector<1x32x512xbf16> to vector<32x512xbf16>
    %cst_29 = arith.constant dense<0.000000e+00> : vector<4x512xf32>
    %27 = tpu.matmul %24, %26, %cst_29 {dimension_numbers = #tpu.dot_dimension_numbers<[1], [0], [0], [1], [0, 0, 1, 1], [], []>} : vector<4x32xbf16>, vector<32x512xbf16>, vector<4x512xf32> -> vector<4x512xf32>
    %28 = arith.addf %22, %27 : vector<4x512xf32>
    %c0_30 = arith.constant 0 : index
    %c0_31 = arith.constant 0 : index
    %29 = vector.load %arg5[%c0_30, %c0_31] : memref<4x1xf32, #tpu.memory_space<vmem>>, vector<4x1xf32>
    %30 = vector.broadcast %29 : vector<4x1xf32> to vector<4x512xf32>
    %31 = arith.addf %28, %30 : vector<4x512xf32>
    %32 = math.tanh %31 : vector<4x512xf32>
    %c1_32 = arith.constant 1 : index
    %c0_33 = arith.constant 0 : index
    %c0_34 = arith.constant 0 : index
    %33 = vector.load %arg6[%c1_32, %c0_33, %c0_34] : memref<4x4x512xf32, #tpu.memory_space<vmem>>, vector<1x4x512xf32>
    %34 = vector.shape_cast %33 : vector<1x4x512xf32> to vector<4x512xf32>
    %35 = vector.shape_cast %32 : vector<4x512xf32> to vector<1x4x512xf32>
    tpu.vector_store %arg6[%c1_32, %c0_33, %c0_34], %35 {strides = array<i32>} : memref<4x4x512xf32, #tpu.memory_space<vmem>>, vector<1x4x512xf32>,
    %c2 = arith.constant 2 : index
    %c0_35 = arith.constant 0 : index
    %c0_36 = arith.constant 0 : index
    %36 = vector.load %arg1[%c2, %c0_35, %c0_36] : memref<4x4x32xbf16, #tpu.memory_space<vmem>>, vector<1x4x32xbf16>
    %37 = vector.shape_cast %36 : vector<1x4x32xbf16> to vector<4x32xbf16>
    %c2_37 = arith.constant 2 : index
    %c0_38 = arith.constant 0 : index
    %c0_39 = arith.constant 0 : index
    %38 = vector.load %arg3[%c2_37, %c0_38, %c0_39] : memref<4x32x512xbf16, #tpu.memory_space<vmem>>, vector<1x32x512xbf16>
    %39 = vector.shape_cast %38 : vector<1x32x512xbf16> to vector<32x512xbf16>
    %cst_40 = arith.constant dense<0.000000e+00> : vector<4x512xf32>
    %40 = tpu.matmul %37, %39, %cst_40 {dimension_numbers = #tpu.dot_dimension_numbers<[1], [0], [0], [1], [0, 0, 1, 1], [], []>} : vector<4x32xbf16>, vector<32x512xbf16>, vector<4x512xf32> -> vector<4x512xf32>
    %c2_41 = arith.constant 2 : index
    %c0_42 = arith.constant 0 : index
    %c0_43 = arith.constant 0 : index
    %41 = vector.load %arg2[%c2_41, %c0_42, %c0_43] : memref<4x4x32xbf16, #tpu.memory_space<vmem>>, vector<1x4x32xbf16>
    %42 = vector.shape_cast %41 : vector<1x4x32xbf16> to vector<4x32xbf16>
    %c2_44 = arith.constant 2 : index
    %c0_45 = arith.constant 0 : index
    %c0_46 = arith.constant 0 : index
    %43 = vector.load %arg4[%c2_44, %c0_45, %c0_46] : memref<4x32x512xbf16, #tpu.memory_space<vmem>>, vector<1x32x512xbf16>
    %44 = vector.shape_cast %43 : vector<1x32x512xbf16> to vector<32x512xbf16>
    %cst_47 = arith.constant dense<0.000000e+00> : vector<4x512xf32>
    %45 = tpu.matmul %42, %44, %cst_47 {dimension_numbers = #tpu.dot_dimension_numbers<[1], [0], [0], [1], [0, 0, 1, 1], [], []>} : vector<4x32xbf16>, vector<32x512xbf16>, vector<4x512xf32> -> vector<4x512xf32>
    %46 = arith.addf %40, %45 : vector<4x512xf32>
    %c0_48 = arith.constant 0 : index
    %c0_49 = arith.constant 0 : index
    %47 = vector.load %arg5[%c0_48, %c0_49] : memref<4x1xf32, #tpu.memory_space<vmem>>, vector<4x1xf32>
    %48 = vector.broadcast %47 : vector<4x1xf32> to vector<4x512xf32>
    %49 = arith.addf %46, %48 : vector<4x512xf32>
    %50 = math.tanh %49 : vector<4x512xf32>
    %c2_50 = arith.constant 2 : index
    %c0_51 = arith.constant 0 : index
    %c0_52 = arith.constant 0 : index
    %51 = vector.load %arg6[%c2_50, %c0_51, %c0_52] : memref<4x4x512xf32, #tpu.memory_space<vmem>>, vector<1x4x512xf32>
    %52 = vector.shape_cast %51 : vector<1x4x512xf32> to vector<4x512xf32>
    %53 = vector.shape_cast %50 : vector<4x512xf32> to vector<1x4x512xf32>
    tpu.vector_store %arg6[%c2_50, %c0_51, %c0_52], %53 {strides = array<i32>} : memref<4x4x512xf32, #tpu.memory_space<vmem>>, vector<1x4x512xf32>,
    %c3 = arith.constant 3 : index
    %c0_53 = arith.constant 0 : index
    %c0_54 = arith.constant 0 : index
    %54 = vector.load %arg1[%c3, %c0_53, %c0_54] : memref<4x4x32xbf16, #tpu.memory_space<vmem>>, vector<1x4x32xbf16>
    %55 = vector.shape_cast %54 : vector<1x4x32xbf16> to vector<4x32xbf16>
    %c3_55 = arith.constant 3 : index
    %c0_56 = arith.constant 0 : index
    %c0_57 = arith.constant 0 : index
    %56 = vector.load %arg3[%c3_55, %c0_56, %c0_57] : memref<4x32x512xbf16, #tpu.memory_space<vmem>>, vector<1x32x512xbf16>
    %57 = vector.shape_cast %56 : vector<1x32x512xbf16> to vector<32x512xbf16>
    %cst_58 = arith.constant dense<0.000000e+00> : vector<4x512xf32>
    %58 = tpu.matmul %55, %57, %cst_58 {dimension_numbers = #tpu.dot_dimension_numbers<[1], [0], [0], [1], [0, 0, 1, 1], [], []>} : vector<4x32xbf16>, vector<32x512xbf16>, vector<4x512xf32> -> vector<4x512xf32>
    %c3_59 = arith.constant 3 : index
    %c0_60 = arith.constant 0 : index
    %c0_61 = arith.constant 0 : index
    %59 = vector.load %arg2[%c3_59, %c0_60, %c0_61] : memref<4x4x32xbf16, #tpu.memory_space<vmem>>, vector<1x4x32xbf16>
    %60 = vector.shape_cast %59 : vector<1x4x32xbf16> to vector<4x32xbf16>
    %c3_62 = arith.constant 3 : index
    %c0_63 = arith.constant 0 : index
    %c0_64 = arith.constant 0 : index
    %61 = vector.load %arg4[%c3_62, %c0_63, %c0_64] : memref<4x32x512xbf16, #tpu.memory_space<vmem>>, vector<1x32x512xbf16>
    %62 = vector.shape_cast %61 : vector<1x32x512xbf16> to vector<32x512xbf16>
    %cst_65 = arith.constant dense<0.000000e+00> : vector<4x512xf32>
    %63 = tpu.matmul %60, %62, %cst_65 {dimension_numbers = #tpu.dot_dimension_numbers<[1], [0], [0], [1], [0, 0, 1, 1], [], []>} : vector<4x32xbf16>, vector<32x512xbf16>, vector<4x512xf32> -> vector<4x512xf32>
    %64 = arith.addf %58, %63 : vector<4x512xf32>
    %c0_66 = arith.constant 0 : index
    %c0_67 = arith.constant 0 : index
    %65 = vector.load %arg5[%c0_66, %c0_67] : memref<4x1xf32, #tpu.memory_space<vmem>>, vector<4x1xf32>
    %66 = vector.broadcast %65 : vector<4x1xf32> to vector<4x512xf32>
    %67 = arith.addf %64, %66 : vector<4x512xf32>
    %68 = math.tanh %67 : vector<4x512xf32>
    %c3_68 = arith.constant 3 : index
    %c0_69 = arith.constant 0 : index
    %c0_70 = arith.constant 0 : index
    %69 = vector.load %arg6[%c3_68, %c0_69, %c0_70] : memref<4x4x512xf32, #tpu.memory_space<vmem>>, vector<1x4x512xf32>
    %70 = vector.shape_cast %69 : vector<1x4x512xf32> to vector<4x512xf32>
    %71 = vector.shape_cast %68 : vector<4x512xf32> to vector<1x4x512xf32>
    tpu.vector_store %arg6[%c3_68, %c0_69, %c0_70], %71 {strides = array<i32>} : memref<4x4x512xf32, #tpu.memory_space<vmem>>, vector<1x4x512xf32>,
    return
  }
  func.func @transform_0(%arg0: i32) -> (i32, i32, i32) {
    %c0_i32 = arith.constant 0 : i32
    %c0_i32_0 = arith.constant 0 : i32
    %c0_i32_1 = arith.constant 0 : i32
    %c0_i32_2 = arith.constant 0 : i32
    return %c0_i32, %c0_i32_0, %c0_i32_1 : i32, i32, i32
  }
  func.func @transform_1(%arg0: i32) -> (i32, i32, i32) {
    %c0_i32 = arith.constant 0 : i32
    %c0_i32_0 = arith.constant 0 : i32
    %c0_i32_1 = arith.constant 0 : i32
    %c0_i32_2 = arith.constant 0 : i32
    return %c0_i32, %c0_i32_0, %c0_i32_1 : i32, i32, i32
  }
  func.func @transform_2(%arg0: i32) -> (i32, i32, i32) {
    %c0_i32 = arith.constant 0 : i32
    %c0_i32_0 = arith.constant 0 : i32
    %c0_i32_1 = arith.constant 0 : i32
    return %c0_i32, %c0_i32_0, %arg0 : i32, i32, i32
  }
  func.func @transform_3(%arg0: i32) -> (i32, i32, i32) {
    %c0_i32 = arith.constant 0 : i32
    %c0_i32_0 = arith.constant 0 : i32
    %c0_i32_1 = arith.constant 0 : i32
    return %c0_i32, %c0_i32_0, %arg0 : i32, i32, i32
  }
  func.func @transform_4(%arg0: i32) -> (i32, i32) {
    %c0_i32 = arith.constant 0 : i32
    %c0_i32_0 = arith.constant 0 : i32
    %c0_i32_1 = arith.constant 0 : i32
    return %c0_i32, %c0_i32_0 : i32, i32
  }
  func.func @transform_5(%arg0: i32) -> (i32, i32, i32) {
    %c0_i32 = arith.constant 0 : i32
    %c0_i32_0 = arith.constant 0 : i32
    %c0_i32_1 = arith.constant 0 : i32
    return %c0_i32, %c0_i32_0, %arg0 : i32, i32, i32
  }
}

</mosaic_0001>

<bundles_post_ra>
// kernel: unet_forward.10
= control target key start
LH: loop header
LB: loop body
LE: loop exit
PB: predicated region body
PF: predicated region fallthrough
CT: control target
= control target key end

     0   :  { %v264_v1 = vmov 0   ;;  %vm109_vm0 = vcmask 523264   ;;  %s337_s1 = inlined_call_operand.vmem [shape: bf16[1,64,512], index: 1, kind: input, shape index: {}]   ;;  %s338_s0 = inlined_call_operand.vmem [shape: bf16[1,8,64], index: 0, kind: input, shape index: {}]   ;;  %s339_s2 = inlined_call_operand.vmem [shape: bf16[1,8,512], index: 2, kind: output, shape index: {}]  }
   0x1   :  { %v240_v0 = vld [vmem:[%s337_s1 + $0x64] ss:$16 sps:$4 sm:$0xff]   ;;  %145 = vmatprep.mubr.bf16.mxu0 %v264_v1  ;;  %186 = vmatprep.mubr.bf16.mxu1 %v264_v1  ;;  %v242_v2 = vld [vmem:[%s337_s1 + $0x6c] ss:$16 sps:$4 sm:$0xff]   ;;  %v244_v3 = vld [vmem:[%s337_s1 + $0x60] ss:$16 sps:$4 sm:$0xff]  }
   0x2   :  { %121 = vmatprep.subr.bf16.mxu0 %v240_v0  ;;  %v245_v4 = vld [vmem:[%s337_s1 + $0x68] ss:$16 sps:$4 sm:$0xff]   ;;  %162 = vmatprep.subr.bf16.mxu1 %v242_v2  ;;  %v246_v5 = vld [vmem:[%s337_s1 + $0x44] ss:$16 sps:$4 sm:$0xff]   ;;  %v248_v6 = vld [vmem:[%s337_s1 + $0x4c] ss:$16 sps:$4 sm:$0xff]  }
   0x3   :  { %122 = vmatpush1.bf16.msra.mxu0 %v244_v3  ;;  %163 = vmatpush1.bf16.msra.mxu1 %v245_v4  ;;  %v250_v7 = vld [vmem:[%s337_s1 + $0x40] ss:$16 sps:$4 sm:$0xff]   ;;  %v251_v8 = vld [vmem:[%s337_s1 + $0x48] ss:$16 sps:$4 sm:$0xff]   ;;  %v252_v9 = vld [vmem:[%s337_s1 + $0x24] ss:$16 sps:$4 sm:$0xff]  }
   0x4   :  { %123 = vmatprep.subr.bf16.mxu0 %v246_v5  ;;  %164 = vmatprep.subr.bf16.mxu1 %v248_v6  ;;  %v254_v10 = vld [vmem:[%s337_s1 + $0x2c] ss:$16 sps:$4 sm:$0xff]   ;;  %v256_v11 = vld [vmem:[%s337_s1 + $0x20] ss:$16 sps:$4 sm:$0xff]   ;;  %v257_v12 = vld [vmem:[%s337_s1 + $0x28] ss:$16 sps:$4 sm:$0xff]  }
   0x5   :  { %v258_v13 = vld [vmem:[%s337_s1 + $0x4] ss:$16 sps:$4 sm:$0xff]   ;;  %v260_v14 = vld [vmem:[%s337_s1 + $0xc] ss:$16 sps:$4 sm:$0xff]   ;;  %v262_v15 = vld [vmem:[%s337_s1] ss:$16 sps:$4 sm:$0xff]  }
   0x6   :  { %v263_v16 = vld [vmem:[%s337_s1 + $0x8] ss:$16 sps:$4 sm:$0xff]   ;;  %v12_v17 = vld [vmem:[%s338_s0] sm:$0xf] }
   0x7   :  { %124 = vmatpush1.bf16.msra.mxu0 %v250_v7  ;;  %165 = vmatpush1.bf16.msra.mxu1 %v251_v8 }
   0x8   :  { %125 = vmatprep.subr.bf16.mxu0 %v252_v9  ;;  %166 = vmatprep.subr.bf16.mxu1 %v254_v10 }
   0xb   :  { %126 = vmatpush1.bf16.msra.mxu0 %v256_v11  ;;  %167 = vmatpush1.bf16.msra.mxu1 %v257_v12 }
   0xc   :  { %127 = vmatprep.subr.bf16.mxu0 %v258_v13  ;;  %168 = vmatprep.subr.bf16.mxu1 %v260_v14 }
   0xf   :  { %128 = vmatpush1.bf16.msra.mxu0 %v262_v15  ;;  %169 = vmatpush1.bf16.msra.mxu1 %v263_v16 }
  0x12   :  { %233 = vmatmul.mubr.msk.bf16.vlgmr.msra.gmra.mxu0 %vm109_vm0, %v12_v17  ;;  %234 = vmatmul.mubr.msk.bf16.vlgmr.msra.gmra.mxu1 %vm109_vm0, %v12_v17 }
  0xd2   :  { %v147_v18 = vpop.f32.mrf.mxu0  ;;  %v188_v19 = vpop.f32.mrf.mxu1 }
  0xd4   :  { %v149_v20 = vpop.f32.mrf.mxu0  ;;  %v190_v21 = vpop.f32.mrf.mxu1 }
  0xd5   :  { %v237_v22 = vpack.c.bf16 %v149_v20, %v147_v18  ;;  %v238_v23 = vpack.c.bf16 %v190_v21, %v188_v19 }
  0xd6   :  { %v151_v24 = vpop.f32.mrf.mxu0  ;;  %v192_v25 = vpop.f32.mrf.mxu1 }
  0xd7   :  { %211 = vst [vmem:[%s339_s2] sm:$0xff] %v237_v22  ;;  %212 = vst [vmem:[%s339_s2 + $0x8] sm:$0xff] %v238_v23 }
  0xd8   :  { %v152_v26 = vpop.f32.mrf.mxu0  ;;  %v193_v27 = vpop.f32.mrf.mxu1 }

// kernel: unet_forward.11
= control target key start
LH: loop header
LB: loop body
LE: loop exit
PB: predicated region body
PF: predicated region fallthrough
CT: control target
= control target key end

     0   :  { %v274_v0 = vmov 0.0   ;;  %vm275_vm0 = vmmov 0   ;;  %v276_v22 = vmov 0   ;;  %v277_v29 = vmov 1   ;;  %s278_s5 = smov 1   ;;  %s335_s1 = inlined_call_operand.vmem [shape: bf16[1,128,128], index: 1, kind: input, shape index: {}]   ;;  %s336_s0 = inlined_call_operand.vmem [shape: bf16[1,16,128], index: 0, kind: input, shape index: {}]   ;;  %s337_s2 = inlined_call_operand.vmem [shape: f32[16,2], index: 2, kind: input, shape index: {}]   ;;  %s338_s3 = inlined_call_operand.vmem [shape: bf16[1,16,128], index: 3, kind: output, shape index: {}]  }
   0x1   :  { %233 = vmatprep.subr.bf16.mxu0 %v274_v0  ;;  %v261_v1 = vld [vmem:[%s335_s1 + $0x38] sm:$0xff]   ;;  %249 = vmatprep.mubr.msk.bf16.mxu0 %vm275_vm0, %v274_v0  ;;  %v262_v2 = vld [vmem:[%s335_s1 + $0x30] sm:$0xff]   ;;  %v263_v3 = vld [vmem:[%s335_s1 + $0x28] sm:$0xff]  }
   0x2   :  { %234 = vmatpush3.bf16.msra.mxu0 %v261_v1  ;;  %v264_v4 = vld [vmem:[%s335_s1 + $0x20] sm:$0xff]   ;;  %v265_v5 = vld [vmem:[%s335_s1 + $0x18] sm:$0xff]   ;;  %v266_v6 = vld [vmem:[%s335_s1 + $0x10] sm:$0xff]   ;;  %258 = vset.pattern.permute.xlu1 %v276_v22 }
   0x3   :  { %235 = vmatprep.subr.bf16.mxu0 %v274_v0  ;;  %v267_v7 = vld [vmem:[%s335_s1 + $0x8] sm:$0xff]   ;;  %v268_v8 = vld [vmem:[%s335_s1] sm:$0xff]   ;;  %259 = vset.pattern.permute.xlu0 %v277_v29 }
   0x4   :  { %v269_v9 = vld [vmem:[%s336_s0] sm:$0xff]   ;;  %v131_v33 = vld [vmem:[%s337_s2 + $0x8] sm:$0xff] }
   0x5   :  { %v130_v30 = vld [vmem:[%s337_s2] sm:$0xff] }
   0x6   :  { %236 = vmatpush3.bf16.msra.mxu0 %v262_v2 }
   0x7   :  { %237 = vmatprep.subr.bf16.mxu0 %v274_v0 }
   0xa   :  { %238 = vmatpush3.bf16.msra.mxu0 %v263_v3 }
   0xb   :  { %239 = vmatprep.subr.bf16.mxu0 %v274_v0 }
   0xe   :  { %240 = vmatpush3.bf16.msra.mxu0 %v264_v4 }
   0xf   :  { %241 = vmatprep.subr.bf16.mxu0 %v274_v0 }
  0x12   :  { %242 = vmatpush3.bf16.msra.mxu0 %v265_v5 }
  0x13   :  { %243 = vmatprep.subr.bf16.mxu0 %v274_v0 }
  0x16   :  { %244 = vmatpush3.bf16.msra.mxu0 %v266_v6 }
  0x17   :  { %245 = vmatprep.subr.bf16.mxu0 %v274_v0 }
  0x1a   :  { %246 = vmatpush3.bf16.msra.mxu0 %v267_v7 }
  0x1b   :  { %247 = vmatprep.subr.bf16.mxu0 %v274_v0 }
  0x1e   :  { %248 = vmatpush3.bf16.msra.mxu0 %v268_v8 }
  0x21   :  { %250 = vmatmul.mubr.bf16.vlgmr.msra.gmra.mxu0 %v269_v9 }
  0xe1   :  { %v121_v10 = vpop.f32.mrf.mxu0 }
  0xe2   :  { %134 = vadd.xlane.f32.xlu0 %v121_v10 }
  0xe3   :  { %v251_v11 = vpop.f32.mrf.mxu0 }
  0xe5   :  { %v124_v12 = vpop.f32.mrf.mxu0 }
  0xe6   :  { %136 = vadd.xlane.f32.xlu0 %v124_v12 }
  0xe7   :  { %v252_v13 = vpop.f32.mrf.mxu0 }
 0x16b   :  { %v135_v14 = vpop.xlane.xlu0 %134 }
 0x16c   :  { %v138_v15 = vmul.f32 0.0078125, %v135_v14 }
 0x16e   :  { %v140_v16 = vsub.f32 %v121_v10, %v138_v15 }
 0x16f   :  { %v137_v17 = vpop.xlane.xlu0 %136 }
 0x170   :  { %v139_v18 = vmul.f32 0.0078125, %v137_v17  ;;  %v142_v19 = vmul.f32 %v140_v16, %v140_v16 }
 0x172   :  { %144 = vadd.xlane.f32.xlu1 %v142_v19  ;;  %v141_v20 = vsub.f32 %v124_v12, %v139_v18 }
 0x174   :  { %v143_v21 = vmul.f32 %v141_v20, %v141_v20 }
 0x176   :  { %146 = vadd.xlane.f32.xlu1 %v143_v21 }
 0x1fb   :  { %v145_v23 = vpop.xlane.xlu1 %144 }
 0x1fc   :  { %v148_v24 = vmul.f32 0.0078125, %v145_v23 }
 0x1fe   :  { %v150_v25 = vadd.f32 1e-05, %v148_v24 }
 0x1ff   :  { %v147_v26 = vpop.xlane.xlu1 %146 }
 0x200   :  { %270 = vrsqrt.f32 %v150_v25  ;;  %v149_v27 = vmul.f32 0.0078125, %v147_v26 }
 0x202   :  { %v151_v28 = vadd.f32 1e-05, %v149_v27 }
 0x204   :  { %272 = vrsqrt.f32 %v151_v28 }
 0x20d   :  { %v271_v31 = vpop.eup %270 }
 0x20e   :  { %v154_v32 = vmul.f32 %v271_v31, %v130_v30 }
 0x210   :  { %v156_v34 = vmul.f32 %v154_v32, %v138_v15 }
 0x211   :  { %v273_v35 = vpop.eup %272 }
 0x212   :  { %160 = vrot.lane.b32.xlu0 %v156_v34, %s278_s5  ;;  %v155_v36 = vmul.f32 %v273_v35, %v131_v33 }
 0x214   :  { %v157_v37 = vmul.f32 %v155_v36, %v139_v18 }
 0x216   :  { %162 = vrot.lane.b32.xlu1 %v157_v37, %s278_s5 }
 0x21a   :  { %170 = vperm.xlu1 %258, %v154_v32  }
 0x21e   :  { %175 = vperm.xlu1 %258, %v155_v36  }
 0x222   :  { %260 = vset.pattern.permute.xlu1 %v277_v29 }
 0x284   :  { %v161_v38 = vpop.permute.xlu0 %160 }
 0x285   :  { %v166_v39 = vsub.f32 %v130_v30, %v161_v38 }
 0x287   :  { %182 = vperm.xlu0 %259, %v166_v39  }
 0x288   :  { %v163_v40 = vpop.permute.xlu1 %162 }
 0x289   :  { %v167_v41 = vsub.f32 %v131_v33, %v163_v40 }
 0x28b   :  { %187 = vperm.xlu1 %260, %v167_v41  }
 0x295   :  { %v171_v42 = vpop.permute.xlu1 %170 }
 0x296   :  { %v178_v45 = vmul.f32 %v171_v42, %v121_v10 }
 0x299   :  { %v176_v43 = vpop.permute.xlu1 %175 }
 0x29a   :  { %v179_v46 = vmul.f32 %v176_v43, %v124_v12 }
 0x302   :  { %v183_v44 = vpop.permute.xlu0 %182 }
 0x303   :  { %v190_v48 = vadd.f32 %v183_v44, %v178_v45 }
 0x306   :  { %v188_v47 = vpop.permute.xlu1 %187 }
 0x307   :  { %v191_v49 = vadd.f32 %v188_v47, %v179_v46 }
 0x309   :  { %v222_v50 = vpack.c.bf16 %v191_v49, %v190_v48 }
 0x30b   :  { %223 = vst [vmem:[%s338_s3] sm:$0xff] %v222_v50  }

// kernel: unet_forward.12
= control target key start
LH: loop header
LB: loop body
LE: loop exit
PB: predicated region body
PF: predicated region fallthrough
CT: control target
= control target key end

     0   :  { %vm216_vm0 = vcmask 261120   ;;  %v487_v60 = vmov 0   ;;  %s488_s27 = smov 1   ;;  %vm369_vm1 = vcmask 257024   ;;  %s630_s1 = inlined_call_operand.vmem [shape: bf16[1,256,32], index: 1, kind: input, shape index: {}]   ;;  %s631_s0 = inlined_call_operand.vmem [shape: bf16[1,32,256], index: 0, kind: input, shape index: {}]   ;;  %s632_s2 = inlined_call_operand.vmem [shape: f32[32,2], index: 2, kind: input, shape index: {}]   ;;  %s633_s3 = inlined_call_operand.vmem [shape: bf16[1,32,32], index: 3, kind: output, shape index: {}]  }
   0x1   :  { %v457_v0 = vld [vmem:[%s630_s1 + $0x78] sm:$0xff]   ;;  %v459_v2 = vld [vmem:[%s630_s1 + $0x70] sm:$0xff]   ;;  %v461_v4 = vld [vmem:[%s630_s1 + $0x68] sm:$0xff]   ;;  %453 = vset.pattern.permute.xlu0 %v487_v60  ;;  %454 = vset.pattern.permute.xlu1 %v487_v60 }
   0x2   :  { %v458_v1 = vld [vmem:[%s630_s1 + $0x38] sm:$0xff]   ;;  %406 = vmatprep.subr.bf16.mxu0 %v457_v0  ;;  %434 = vmatprep.subr.bf16.mxu1 %v457_v0  ;;  %v460_v3 = vld [vmem:[%s630_s1 + $0x30] sm:$0xff]   ;;  %v462_v5 = vld [vmem:[%s630_s1 + $0x28] sm:$0xff]  }
   0x3   :  { %407 = vmatpush3.bf16.msra.mxu0 %v458_v1  ;;  %442 = vmatpush3.bf16.msra.mxu1 %v458_v1  ;;  %v463_v6 = vld [vmem:[%s630_s1 + $0x60] sm:$0xff]   ;;  %v465_v8 = vld [vmem:[%s630_s1 + $0x58] sm:$0xff]   ;;  %v467_v10 = vld [vmem:[%s630_s1 + $0x50] sm:$0xff]  }
   0x4   :  { %408 = vmatprep.subr.bf16.mxu0 %v459_v2  ;;  %435 = vmatprep.subr.bf16.mxu1 %v459_v2  ;;  %v464_v7 = vld [vmem:[%s630_s1 + $0x20] sm:$0xff]   ;;  %v466_v9 = vld [vmem:[%s630_s1 + $0x18] sm:$0xff]   ;;  %v468_v13 = vld [vmem:[%s630_s1 + $0x10] sm:$0xff]  }
   0x5   :  { %v475_v11 = vld [vmem:[%s631_s0 + $0x4] ss:$8 sps:$4 sm:$0xff]   ;;  %v478_v12 = vld [vmem:[%s631_s0 + $0x14] ss:$8 sps:$4 sm:$0xff]   ;;  %v473_v18 = vld [vmem:[%s631_s0] ss:$8 sps:$4 sm:$0xff]  }
   0x6   :  { %v469_v14 = vld [vmem:[%s630_s1 + $0x48] sm:$0xff]   ;;  %199 = vmatprep.mubr.bf16.mxu0 %v475_v11  ;;  %207 = vmatprep.mubr.bf16.mxu1 %v478_v12  ;;  %v471_v16 = vld [vmem:[%s630_s1 + $0x40] sm:$0xff]   ;;  %v476_v19 = vld [vmem:[%s631_s0 + $0x10] ss:$8 sps:$4 sm:$0xff]  }
   0x7   :  { %409 = vmatpush3.bf16.msra.mxu0 %v460_v3  ;;  %443 = vmatpush3.bf16.msra.mxu1 %v460_v3  ;;  %v470_v15 = vld [vmem:[%s630_s1 + $0x8] sm:$0xff]   ;;  %v472_v17 = vld [vmem:[%s630_s1] sm:$0xff]  }
   0x8   :  { %410 = vmatprep.subr.bf16.mxu0 %v461_v4  ;;  %436 = vmatprep.subr.bf16.mxu1 %v461_v4 }
   0xb   :  { %411 = vmatpush3.bf16.msra.mxu0 %v462_v5  ;;  %444 = vmatpush3.bf16.msra.mxu1 %v462_v5 }
   0xc   :  { %412 = vmatprep.subr.bf16.mxu0 %v463_v6  ;;  %437 = vmatprep.subr.bf16.mxu1 %v463_v6 }
   0xf   :  { %413 = vmatpush3.bf16.msra.mxu0 %v464_v7  ;;  %445 = vmatpush3.bf16.msra.mxu1 %v464_v7 }
  0x10   :  { %414 = vmatprep.subr.bf16.mxu0 %v465_v8  ;;  %438 = vmatprep.subr.bf16.mxu1 %v465_v8 }
  0x13   :  { %415 = vmatpush3.bf16.msra.mxu0 %v466_v9  ;;  %446 = vmatpush3.bf16.msra.mxu1 %v466_v9  ;;  %v221_v9 = vld [vmem:[%s632_s2] sm:$0xff] }
  0x14   :  { %416 = vmatprep.subr.bf16.mxu0 %v467_v10  ;;  %439 = vmatprep.subr.bf16.mxu1 %v467_v10 }
  0x17   :  { %417 = vmatpush3.bf16.msra.mxu0 %v468_v13  ;;  %447 = vmatpush3.bf16.msra.mxu1 %v468_v13  ;;  %v223_v13 = vld [vmem:[%s632_s2 + $0x10] sm:$0xff] }
  0x18   :  { %418 = vmatprep.subr.bf16.mxu0 %v469_v14  ;;  %440 = vmatprep.subr.bf16.mxu1 %v469_v14 }
  0x1b   :  { %419 = vmatpush3.bf16.msra.mxu0 %v470_v15  ;;  %448 = vmatpush3.bf16.msra.mxu1 %v470_v15 }
  0x1c   :  { %420 = vmatprep.subr.bf16.mxu0 %v471_v16  ;;  %441 = vmatprep.subr.bf16.mxu1 %v471_v16  ;;  %v222_v16 = vld [vmem:[%s632_s2 + $0x8] sm:$0xff] }
  0x1f   :  { %421 = vmatpush3.bf16.msra.mxu0 %v472_v17  ;;  %449 = vmatpush3.bf16.msra.mxu1 %v472_v17 }
  0x22   :  { %200 = vmatmul.mubr.bf16.vlgmr.msra.gmra.mxu0 %v473_v18  ;;  %208 = vmatmul.mubr.bf16.vlgmr.msra.gmra.mxu1 %v476_v19 }
  0xe2   :  { %v422_v20 = vpop.f32.mrf.mxu0  ;;  %v428_v21 = vpop.f32.mrf.mxu1 }
  0xe4   :  { %v423_v22 = vpop.f32.mrf.mxu0  ;;  %v429_v23 = vpop.f32.mrf.mxu1 }
  0xe5   :  { %v424_v24 = vadd.f32 %v423_v22, %v422_v20  ;;  %v430_v25 = vadd.f32 %v429_v23, %v428_v21  ;;  %v224_v20 = vld [vmem:[%s632_s2 + $0x18] sm:$0xff] }
  0xe6   :  { %v425_v26 = vpop.f32.mrf.mxu0  ;;  %v431_v27 = vpop.f32.mrf.mxu1 }
  0xe7   :  { %217 = vst.msk [vmem:[#allocation2] sm:$0xff] %vm216_vm0, %v424_v24  ;;  %219 = vst.msk [vmem:[#allocation2 + $0x10] sm:$0xff] %vm216_vm0, %v430_v25  ;;  %v489_v25 = vmov 1  }
  0xe8   :  { %v426_v28 = vpop.f32.mrf.mxu0  ;;  %v432_v29 = vpop.f32.mrf.mxu1 }
  0xe9   :  { %v427_v30 = vadd.f32 %v426_v28, %v425_v26  ;;  %v433_v31 = vadd.f32 %v432_v29, %v431_v27 }
  0xeb   :  { %218 = vst.msk [vmem:[#allocation2 + $0x8] sm:$0xff] %vm216_vm0, %v427_v30  ;;  %220 = vst.msk [vmem:[#allocation2 + $0x18] sm:$0xff] %vm216_vm0, %v433_v31 }
  0xee   :  { %v574_v32 = vld [vmem:[#allocation2 + $0x10] sm:$0xff]  ;;  %v576_v33 = vld [vmem:[#allocation2] sm:$0xff] }
  0xef   :  { %v235_v34 = vsel %vm216_vm0, %v574_v32, 0.0  ;;  %v229_v35 = vsel %vm216_vm0, %v576_v33, 0.0 }
  0xf0   :  { %236 = vadd.xlane.f32.xlu1 %v235_v34  ;;  %230 = vadd.xlane.f32.xlu0 %v229_v35 }
  0xf2   :  { %v582_v36 = vld [vmem:[#allocation2 + $0x18] sm:$0xff]  ;;  %v584_v37 = vld [vmem:[#allocation2 + $0x8] sm:$0xff] }
  0xf3   :  { %v238_v38 = vsel %vm216_vm0, %v582_v36, 0.0  ;;  %v232_v39 = vsel %vm216_vm0, %v584_v37, 0.0 }
  0xf4   :  { %239 = vadd.xlane.f32.xlu1 %v238_v38  ;;  %233 = vadd.xlane.f32.xlu0 %v232_v39 }
 0x179   :  { %v237_v40 = vpop.xlane.xlu1 %236  ;;  %v231_v41 = vpop.xlane.xlu0 %230 }
 0x17a   :  { %v243_v42 = vmul.f32 0.03125, %v237_v40  ;;  %v241_v43 = vmul.f32 0.03125, %v231_v41 }
 0x17c   :  { %v247_v44 = vsub.f32 %v574_v32, %v243_v42  ;;  %v245_v45 = vsub.f32 %v576_v33, %v241_v43 }
 0x17d   :  { %v240_v46 = vpop.xlane.xlu1 %239  ;;  %v234_v47 = vpop.xlane.xlu0 %233 }
 0x17e   :  { %v244_v48 = vmul.f32 0.03125, %v240_v46  ;;  %v242_v49 = vmul.f32 0.03125, %v234_v47  ;;  %v249_v50 = vmul.f32 %v245_v45, %v245_v45  ;;  %v251_v54 = vmul.f32 %v247_v44, %v247_v44 }
 0x180   :  { %v248_v51 = vsub.f32 %v582_v36, %v244_v48  ;;  %v246_v52 = vsub.f32 %v584_v37, %v242_v49  ;;  %v253_v53 = vsel %vm216_vm0, %v249_v50, 0.0  ;;  %v259_v56 = vsel %vm216_vm0, %v251_v54, 0.0 }
 0x181   :  { %254 = vadd.xlane.f32.xlu0 %v253_v53 }
 0x182   :  { %v250_v55 = vmul.f32 %v246_v52, %v246_v52  ;;  %v252_v58 = vmul.f32 %v248_v51, %v248_v51 }
 0x184   :  { %v256_v57 = vsel %vm216_vm0, %v250_v55, 0.0  ;;  %v262_v59 = vsel %vm216_vm0, %v252_v58, 0.0 }
 0x185   :  { %260 = vadd.xlane.f32.xlu0 %v259_v56  ;;  %257 = vadd.xlane.f32.xlu1 %v256_v57 }
 0x189   :  { %263 = vadd.xlane.f32.xlu1 %v262_v59 }
 0x20a   :  { %v255_v61 = vpop.xlane.xlu0 %254 }
 0x20b   :  { %v265_v62 = vmul.f32 0.03125, %v255_v61 }
 0x20d   :  { %v269_v63 = vadd.f32 1e-05, %v265_v62 }
 0x20e   :  { %v258_v0 = vpop.xlane.xlu1 %257  ;;  %v261_v1 = vpop.xlane.xlu0 %260 }
 0x20f   :  { %479 = vrsqrt.f32 %v269_v63  ;;  %v266_v2 = vmul.f32 0.03125, %v258_v0  ;;  %v267_v3 = vmul.f32 0.03125, %v261_v1 }
 0x211   :  { %v270_v4 = vadd.f32 1e-05, %v266_v2  ;;  %v271_v5 = vadd.f32 1e-05, %v267_v3 }
 0x212   :  { %v264_v6 = vpop.xlane.xlu1 %263 }
 0x213   :  { %481 = vrsqrt.f32 %v270_v4  ;;  %v268_v7 = vmul.f32 0.03125, %v264_v6 }
 0x214   :  { %483 = vrsqrt.f32 %v271_v5 }
 0x215   :  { %v272_v8 = vadd.f32 1e-05, %v268_v7 }
 0x217   :  { %485 = vrsqrt.f32 %v272_v8 }
 0x21c   :  { %v480_v10 = vpop.eup %479 }
 0x21d   :  { %v277_v11 = vmul.f32 %v480_v10, %v221_v9 }
 0x21f   :  { %v281_v12 = vmul.f32 %v277_v11, %v241_v43 }
 0x220   :  { %v482_v14 = vpop.eup %481 }
 0x221   :  { %v484_v15 = vpop.eup %483  ;;  %289 = vrot.lane.b32.xlu0 %v281_v12, %s488_s27  ;;  %v278_v21 = vmul.f32 %v482_v14, %v222_v16 }
 0x222   :  { %v279_v17 = vmul.f32 %v484_v15, %v223_v13 }
 0x223   :  { %v282_v23 = vmul.f32 %v278_v21, %v242_v49 }
 0x224   :  { %v486_v18 = vpop.eup %485  ;;  %v283_v19 = vmul.f32 %v279_v17, %v243_v42 }
 0x225   :  { %307 = vperm.xlu0 %453, %v277_v11   ;;  %v280_v22 = vmul.f32 %v486_v18, %v224_v20 }
 0x226   :  { %293 = vrot.lane.b32.xlu1 %v283_v19, %s488_s27 }
 0x227   :  { %v284_v24 = vmul.f32 %v280_v22, %v244_v48 }
 0x229   :  { %322 = vperm.xlu0 %453, %v280_v22  }
 0x22a   :  { %291 = vrot.lane.b32.xlu1 %v282_v23, %s488_s27 }
 0x22d   :  { %456 = vset.pattern.permute.xlu0 %v489_v25 }
 0x22e   :  { %295 = vrot.lane.b32.xlu1 %v284_v24, %s488_s27 }
 0x232   :  { %312 = vperm.xlu1 %454, %v278_v21  }
 0x236   :  { %317 = vperm.xlu1 %454, %v279_v17  }
 0x23a   :  { %455 = vset.pattern.permute.xlu1 %v489_v25 }
 0x293   :  { %v290_v26 = vpop.permute.xlu0 %289 }
 0x294   :  { %v301_v27 = vsub.f32 %v221_v9, %v290_v26 }
 0x296   :  { %331 = vperm.xlu1 %455, %v301_v27  }
 0x298   :  { %v294_v28 = vpop.permute.xlu1 %293 }
 0x299   :  { %v303_v29 = vsub.f32 %v223_v13, %v294_v28 }
 0x29b   :  { %341 = vperm.xlu1 %455, %v303_v29  }
 0x29c   :  { %v292_v30 = vpop.permute.xlu1 %291 }
 0x29d   :  { %v302_v31 = vsub.f32 %v222_v16, %v292_v30 }
 0x29f   :  { %336 = vperm.xlu0 %456, %v302_v31  }
 0x2a0   :  { %v296_v34 = vpop.permute.xlu1 %295  ;;  %v308_v39 = vpop.permute.xlu0 %307 }
 0x2a1   :  { %v304_v35 = vsub.f32 %v224_v20, %v296_v34  ;;  %v325_v41 = vmul.f32 %v308_v39, %v576_v33 }
 0x2a3   :  { %346 = vperm.xlu1 %455, %v304_v35  }
 0x2a4   :  { %v323_v46 = vpop.permute.xlu0 %322 }
 0x2ad   :  { %v313_v38 = vpop.permute.xlu1 %312 }
 0x2ae   :  { %v326_v49 = vmul.f32 %v313_v38, %v584_v37 }
 0x2b1   :  { %v318_v40 = vpop.permute.xlu1 %317 }
 0x2b2   :  { %v327_v45 = vmul.f32 %v318_v40, %v574_v32  ;;  %v328_v32 = vmul.f32 %v323_v46, %v582_v36 }
 0x311   :  { %v332_v42 = vpop.permute.xlu1 %331 }
 0x312   :  { %v349_v43 = vadd.f32 %v332_v42, %v325_v41 }
 0x314   :  { %v402_v44 = vpack.c.bf16 %v349_v43, %v349_v43 }
 0x316   :  { %370 = vst.msk [vmem:[%s633_s3] sm:$0xf] %vm369_vm1, %v402_v44  ;;  %v342_v47 = vpop.permute.xlu1 %341 }
 0x317   :  { %v351_v48 = vadd.f32 %v342_v47, %v327_v45 }
 0x319   :  { %v404_v50 = vpack.c.bf16 %v351_v48, %v351_v48 }
 0x31a   :  { %v337_v51 = vpop.permute.xlu0 %336 }
 0x31b   :  { %372 = vst.msk [vmem:[%s633_s3 + $0x8] sm:$0xf] %vm369_vm1, %v404_v50  ;;  %v350_v33 = vadd.f32 %v337_v51, %v326_v49 }
 0x31d   :  { %v403_v52 = vpack.c.bf16 %v350_v33, %v350_v33 }
 0x31e   :  { %v347_v53 = vpop.permute.xlu1 %346 }
 0x31f   :  { %371 = vst.msk [vmem:[%s633_s3 + $0x4] sm:$0xf] %vm369_vm1, %v403_v52  ;;  %v352_v54 = vadd.f32 %v347_v53, %v328_v32 }
 0x321   :  { %v405_v55 = vpack.c.bf16 %v352_v54, %v352_v54 }
 0x323   :  { %373 = vst.msk [vmem:[%s633_s3 + $0xc] sm:$0xf] %vm369_vm1, %v405_v55 }

// kernel: unet_forward.13
= control target key start
LH: loop header
LB: loop body
LE: loop exit
PB: predicated region body
PF: predicated region fallthrough
CT: control target
= control target key end

     0   :  { %vm367_vm0 = vcmask 523264   ;;  %vm406_vm1 = vcmask 519168   ;;  %s664_s1 = inlined_call_operand.vmem [shape: bf16[1,512,64], index: 1, kind: input, shape index: {}]   ;;  %s665_s0 = inlined_call_operand.vmem [shape: bf16[1,8,512], index: 0, kind: input, shape index: {}]   ;;  %s666_s2 = inlined_call_operand.vmem [shape: f32[2,64], index: 2, kind: input, shape index: {}]   ;;  %s667_s3 = inlined_call_operand.vmem [shape: bf16[1,8,64], index: 3, kind: output, shape index: {}]  }
   0x1   :  { %v492_v0 = vld [vmem:[%s664_s1 + $0x78] sm:$0xff]   ;;  %v496_v4 = vld [vmem:[%s664_s1 + $0x70] sm:$0xff]   ;;  %v500_v8 = vld [vmem:[%s664_s1 + $0x68] sm:$0xff]  }
   0x2   :  { %v493_v1 = vld [vmem:[%s664_s1 + $0xf8] sm:$0xff]   ;;  %448 = vmatprep.subr.bf16.mxu0 %v492_v0  ;;  %v497_v5 = vld [vmem:[%s664_s1 + $0xf0] sm:$0xff]   ;;  %v501_v9 = vld [vmem:[%s664_s1 + $0xe8] sm:$0xff]  }
   0x3   :  { %v494_v2 = vld [vmem:[%s664_s1 + $0x38] sm:$0xff]   ;;  %470 = vmatprep.subr.bf16.mxu1 %v493_v1  ;;  %v498_v6 = vld [vmem:[%s664_s1 + $0x30] sm:$0xff]   ;;  %v502_v10 = vld [vmem:[%s664_s1 + $0x28] sm:$0xff]  }
   0x4   :  { %v495_v3 = vld [vmem:[%s664_s1 + $0xb8] sm:$0xff]   ;;  %449 = vmatpush3.bf16.msra.mxu0 %v494_v2  ;;  %v499_v7 = vld [vmem:[%s664_s1 + $0xb0] sm:$0xff]   ;;  %v503_v11 = vld [vmem:[%s664_s1 + $0xa8] sm:$0xff]  }
   0x5   :  { %471 = vmatpush3.bf16.msra.mxu1 %v495_v3  ;;  %450 = vmatprep.subr.bf16.mxu0 %v496_v4  ;;  %v504_v12 = vld [vmem:[%s664_s1 + $0x60] sm:$0xff]   ;;  %v508_v16 = vld [vmem:[%s664_s1 + $0x58] sm:$0xff]   ;;  %v512_v20 = vld [vmem:[%s664_s1 + $0x50] sm:$0xff]  }
   0x6   :  { %472 = vmatprep.subr.bf16.mxu1 %v497_v5  ;;  %v505_v13 = vld [vmem:[%s664_s1 + $0xe0] sm:$0xff]   ;;  %v509_v17 = vld [vmem:[%s664_s1 + $0xd8] sm:$0xff]   ;;  %v513_v21 = vld [vmem:[%s664_s1 + $0xd0] sm:$0xff]   ;;  %v395_v5 = vlaneseq }
   0x7   :  { %v506_v14 = vld [vmem:[%s664_s1 + $0x20] sm:$0xff]   ;;  %v510_v18 = vld [vmem:[%s664_s1 + $0x18] sm:$0xff]   ;;  %v514_v22 = vld [vmem:[%s664_s1 + $0x10] sm:$0xff]  }
   0x8   :  { %451 = vmatpush3.bf16.msra.mxu0 %v498_v6  ;;  %v507_v15 = vld [vmem:[%s664_s1 + $0xa0] sm:$0xff]   ;;  %v511_v19 = vld [vmem:[%s664_s1 + $0x98] sm:$0xff]   ;;  %v515_v23 = vld [vmem:[%s664_s1 + $0x90] sm:$0xff]   ;;  %v396_v6 = vshrl.u32 %v395_v5, 7 }
   0x9   :  { %473 = vmatpush3.bf16.msra.mxu1 %v499_v7  ;;  %452 = vmatprep.subr.bf16.mxu0 %v500_v8  ;;  %v516_v24 = vld [vmem:[%s664_s1 + $0x48] sm:$0xff]   ;;  %v520_v28 = vld [vmem:[%s664_s1 + $0x40] sm:$0xff]  }
   0xa   :  { %474 = vmatprep.subr.bf16.mxu1 %v501_v9  ;;  %v517_v25 = vld [vmem:[%s664_s1 + $0xc8] sm:$0xff]   ;;  %v521_v29 = vld [vmem:[%s664_s1 + $0xc0] sm:$0xff]   ;;  %v397_v8 = vsub.s32 0, %v396_v6 }
   0xb   :  { %v518_v26 = vld [vmem:[%s664_s1 + $0x8] sm:$0xff]   ;;  %v522_v30 = vld [vmem:[%s664_s1] sm:$0xff]  }
   0xc   :  { %453 = vmatpush3.bf16.msra.mxu0 %v502_v10  ;;  %v519_v27 = vld [vmem:[%s664_s1 + $0x88] sm:$0xff]   ;;  %v523_v31 = vld [vmem:[%s664_s1 + $0x80] sm:$0xff]  }
   0xd   :  { %475 = vmatpush3.bf16.msra.mxu1 %v503_v11  ;;  %454 = vmatprep.subr.bf16.mxu0 %v504_v12  ;;  %v15_v32 = vld [vmem:[%s665_s0] sm:$0xff]  ;;  %v16_v33 = vld [vmem:[%s665_s0 + $0x8] sm:$0xff] }
   0xe   :  { %476 = vmatprep.subr.bf16.mxu1 %v505_v13  ;;  %v412_v34 = vcombine.low %v15_v32, %v15_v32  ;;  %v413_v35 = vcombine.high %v15_v32, %v15_v32  ;;  %v414_v36 = vcombine.low %v16_v33, %v16_v33  ;;  %v415_v37 = vcombine.high %v16_v33, %v16_v33  ;;  %v369_v7 = vld [vmem:[%s666_s2] sm:$0x1]  ;;  %v370_v11 = vld [vmem:[%s666_s2 + $0x1] sm:$0x1] }
  0x10   :  { %455 = vmatpush3.bf16.msra.mxu0 %v506_v14  ;;  %319 = vmatprep.mubr.bf16.mxu0 %v413_v35 }
  0x11   :  { %477 = vmatpush3.bf16.msra.mxu1 %v507_v15  ;;  %456 = vmatprep.subr.bf16.mxu0 %v508_v16 }
  0x12   :  { %478 = vmatprep.subr.bf16.mxu1 %v509_v17  ;;  %359 = vmatprep.mubr.bf16.mxu1 %v415_v37 }
  0x14   :  { %457 = vmatpush3.bf16.msra.mxu0 %v510_v18 }
  0x15   :  { %479 = vmatpush3.bf16.msra.mxu1 %v511_v19  ;;  %458 = vmatprep.subr.bf16.mxu0 %v512_v20 }
  0x16   :  { %480 = vmatprep.subr.bf16.mxu1 %v513_v21 }
  0x18   :  { %459 = vmatpush3.bf16.msra.mxu0 %v514_v22 }
  0x19   :  { %481 = vmatpush3.bf16.msra.mxu1 %v515_v23  ;;  %460 = vmatprep.subr.bf16.mxu0 %v516_v24 }
  0x1a   :  { %482 = vmatprep.subr.bf16.mxu1 %v517_v25 }
  0x1c   :  { %461 = vmatpush3.bf16.msra.mxu0 %v518_v26 }
  0x1d   :  { %483 = vmatpush3.bf16.msra.mxu1 %v519_v27  ;;  %462 = vmatprep.subr.bf16.mxu0 %v520_v28 }
  0x1e   :  { %484 = vmatprep.subr.bf16.mxu1 %v521_v29 }
  0x20   :  { %463 = vmatpush3.bf16.msra.mxu0 %v522_v30 }
  0x21   :  { %485 = vmatpush3.bf16.msra.mxu1 %v523_v31 }
  0x23   :  { %320 = vmatmul.mubr.bf16.vlgmr.msra.gmra.mxu0 %v412_v34 }
  0x24   :  { %360 = vmatmul.mubr.bf16.vlgmr.msra.gmra.mxu1 %v414_v36 }
  0xe3   :  { %v464_v38 = vpop.f32.mrf.mxu0 }
  0xe4   :  { %v486_v39 = vpop.f32.mrf.mxu1 }
  0xe5   :  { %v465_v40 = vpop.f32.mrf.mxu0 }
  0xe6   :  { %v487_v41 = vpop.f32.mrf.mxu1  ;;  %v466_v42 = vadd.f32 %v465_v40, %v464_v38 }
  0xe7   :  { %v488_v43 = vadd.f32 %v487_v41, %v486_v39  ;;  %v467_v44 = vpop.f32.mrf.mxu0 }
  0xe8   :  { %v489_v45 = vpop.f32.mrf.mxu1 }
  0xe9   :  { %v362_v46 = vadd.f32 %v488_v43, %v466_v42  ;;  %v468_v47 = vpop.f32.mrf.mxu0 }
  0xea   :  { %v490_v48 = vpop.f32.mrf.mxu1 }
  0xeb   :  { %368 = vst.msk [vmem:[#allocation2] sm:$0xff] %vm367_vm0, %v362_v46 }
  0xf2   :  { %v371_v49 = vld [vmem:[#allocation2] sm:$0xff] }
  0xf3   :  { %v372_v50 = vsel %vm367_vm0, %v371_v49, 0.0 }
  0xf4   :  { %v373_v51 = vrot.slane %v372_v50, 4 }
  0xf6   :  { %v374_v52 = vadd.f32 %v373_v51, %v372_v50 }
  0xf8   :  { %v375_v53 = vrot.slane %v374_v52, 2 }
  0xfa   :  { %v376_v54 = vadd.f32 %v375_v53, %v374_v52 }
  0xfc   :  { %v377_v55 = vrot.slane %v376_v54, 1 }
  0xfe   :  { %v378_v56 = vadd.f32 %v377_v55, %v376_v54 }
 0x100   :  { %v379_v57 = vmul.f32 0.125, %v378_v56 }
 0x102   :  { %v380_v58 = vsub.f32 %v371_v49, %v379_v57 }
 0x104   :  { %v381_v59 = vmul.f32 %v380_v58, %v380_v58 }
 0x106   :  { %v382_v60 = vsel %vm367_vm0, %v381_v59, 0.0 }
 0x107   :  { %v383_v61 = vrot.slane %v382_v60, 4 }
 0x109   :  { %v384_v62 = vadd.f32 %v383_v61, %v382_v60 }
 0x10b   :  { %v385_v63 = vrot.slane %v384_v62, 2 }
 0x10d   :  { %v386_v0 = vadd.f32 %v385_v63, %v384_v62 }
 0x10f   :  { %v387_v1 = vrot.slane %v386_v0, 1 }
 0x111   :  { %v388_v2 = vadd.f32 %v387_v1, %v386_v0 }
 0x113   :  { %v389_v3 = vmul.f32 0.125, %v388_v2 }
 0x115   :  { %v390_v4 = vadd.f32 1e-05, %v389_v3 }
 0x117   :  { %528 = vrsqrt.f32 %v390_v4 }
 0x124   :  { %v529_v9 = vpop.eup %528 }
 0x125   :  { %v392_v10 = vmul.f32 %v529_v9, %v369_v7 }
 0x127   :  { %v393_v12 = vmul.f32 %v392_v10, %v379_v57  ;;  %v398_v13 = vrot.slane %v392_v10, %v397_v8 }
 0x129   :  { %v394_v14 = vsub.f32 %v370_v11, %v393_v12  ;;  %v399_v15 = vmul.f32 %v398_v13, %v371_v49 }
 0x12b   :  { %v403_v16 = vrot.slane %v394_v14, %v397_v8 }
 0x12d   :  { %v404_v17 = vadd.f32 %v403_v16, %v399_v15 }
 0x12f   :  { %v405_v18 = vpack.c.bf16 %v404_v17, %v404_v17 }
 0x131   :  { %407 = vst.msk [vmem:[%s667_s3] sm:$0xf] %vm406_vm1, %v405_v18 }

// kernel: unet_forward.14
= control target key start
LH: loop header
LB: loop body
LE: loop exit
PB: predicated region body
PF: predicated region fallthrough
CT: control target
= control target key end

     0   :  { %v969_v22 = vmov 1966171168   ;;  %v146_v24 = vlaneseq  ;;  %vm745_vm0 = vcmask 516096   ;;  %s1196_s1 = inlined_call_operand.vmem [shape: bf16[1,1024,64], index: 1, kind: input, shape index: {}]   ;;  %s1197_s0 = inlined_call_operand.vmem [shape: bf16[1,2,1024], index: 0, kind: input, shape index: {}]   ;;  %s1198_s2 = inlined_call_operand.vmem [shape: bf16[1,2,64], index: 2, kind: output, shape index: {}]  }
   0x1   :  { %v904_v0 = vld [vmem:[%s1196_s1 + $0x78] sm:$0xff]   ;;  %v908_v4 = vld [vmem:[%s1196_s1 + $0x70] sm:$0xff]   ;;  %v912_v8 = vld [vmem:[%s1196_s1 + $0x68] sm:$0xff]   ;;  %v144_v23 = vunpack.c.l.s4 %v969_v22 }
   0x2   :  { %v905_v1 = vld [vmem:[%s1196_s1 + $0xf8] sm:$0xff]   ;;  %815 = vmatprep.subr.bf16.mxu0 %v904_v0  ;;  %v909_v5 = vld [vmem:[%s1196_s1 + $0xf0] sm:$0xff]   ;;  %v913_v9 = vld [vmem:[%s1196_s1 + $0xe8] sm:$0xff]   ;;  %v147_v30 = vshrl.u32 %v146_v24, 7 }
   0x3   :  { %v906_v2 = vld [vmem:[%s1196_s1 + $0x38] sm:$0xff]   ;;  %837 = vmatprep.subr.bf16.mxu1 %v905_v1  ;;  %v910_v6 = vld [vmem:[%s1196_s1 + $0x30] sm:$0xff]   ;;  %v914_v10 = vld [vmem:[%s1196_s1 + $0x28] sm:$0xff]   ;;  %v145_v29 = vunpack.c.0.s8 %v144_v23 }
   0x4   :  { %v907_v3 = vld [vmem:[%s1196_s1 + $0xb8] sm:$0xff]   ;;  %816 = vmatpush3.bf16.msra.mxu0 %v906_v2  ;;  %v911_v7 = vld [vmem:[%s1196_s1 + $0xb0] sm:$0xff]   ;;  %v915_v11 = vld [vmem:[%s1196_s1 + $0xa8] sm:$0xff]  }
   0x5   :  { %838 = vmatpush3.bf16.msra.mxu1 %v907_v3  ;;  %817 = vmatprep.subr.bf16.mxu0 %v908_v4  ;;  %v916_v12 = vld [vmem:[%s1196_s1 + $0x60] sm:$0xff]   ;;  %v920_v16 = vld [vmem:[%s1196_s1 + $0x58] sm:$0xff]   ;;  %v924_v20 = vld [vmem:[%s1196_s1 + $0x50] sm:$0xff]   ;;  %v1075_v35 = vsub.s32 %v145_v29, %v147_v30 }
   0x6   :  { %839 = vmatprep.subr.bf16.mxu1 %v909_v5  ;;  %v917_v13 = vld [vmem:[%s1196_s1 + $0xe0] sm:$0xff]   ;;  %v921_v17 = vld [vmem:[%s1196_s1 + $0xd8] sm:$0xff]   ;;  %v925_v21 = vld [vmem:[%s1196_s1 + $0xd0] sm:$0xff]  }
   0x7   :  { %v918_v14 = vld [vmem:[%s1196_s1 + $0x20] sm:$0xff]   ;;  %v922_v18 = vld [vmem:[%s1196_s1 + $0x18] sm:$0xff]   ;;  %v926_v25 = vld [vmem:[%s1196_s1 + $0x10] sm:$0xff]  }
   0x8   :  { %818 = vmatpush3.bf16.msra.mxu0 %v910_v6  ;;  %v919_v15 = vld [vmem:[%s1196_s1 + $0xa0] sm:$0xff]   ;;  %v923_v19 = vld [vmem:[%s1196_s1 + $0x98] sm:$0xff]   ;;  %v927_v26 = vld [vmem:[%s1196_s1 + $0x90] sm:$0xff]  }
   0x9   :  { %840 = vmatpush3.bf16.msra.mxu1 %v911_v7  ;;  %819 = vmatprep.subr.bf16.mxu0 %v912_v8  ;;  %v928_v27 = vld [vmem:[%s1196_s1 + $0x48] sm:$0xff]   ;;  %v932_v33 = vld [vmem:[%s1196_s1 + $0x40] sm:$0xff]   ;;  %v937_v41 = vld [vmem:[%s1196_s1 + $0x178] sm:$0xff]  }
   0xa   :  { %841 = vmatprep.subr.bf16.mxu1 %v913_v9  ;;  %v929_v28 = vld [vmem:[%s1196_s1 + $0xc8] sm:$0xff]   ;;  %v933_v34 = vld [vmem:[%s1196_s1 + $0xc0] sm:$0xff]   ;;  %v938_v42 = vld [vmem:[%s1196_s1 + $0x1f8] sm:$0xff]  }
   0xb   :  { %v930_v31 = vld [vmem:[%s1196_s1 + $0x8] sm:$0xff]   ;;  %v934_v36 = vld [vmem:[%s1196_s1] sm:$0xff]   ;;  %v939_v47 = vld [vmem:[%s1196_s1 + $0x138] sm:$0xff]  }
   0xc   :  { %820 = vmatpush3.bf16.msra.mxu0 %v914_v10  ;;  %v931_v32 = vld [vmem:[%s1196_s1 + $0x88] sm:$0xff]   ;;  %v935_v37 = vld [vmem:[%s1196_s1 + $0x80] sm:$0xff]   ;;  %v941_v50 = vld [vmem:[%s1196_s1 + $0x170] sm:$0xff]  }
   0xd   :  { %842 = vmatpush3.bf16.msra.mxu1 %v915_v11  ;;  %821 = vmatprep.subr.bf16.mxu0 %v916_v12  ;;  %v12_v38 = vld [vmem:[%s1197_s0] sm:$0xff]  ;;  %v940_v52 = vld [vmem:[%s1196_s1 + $0x1b8] sm:$0xff]   ;;  %v942_v54 = vld [vmem:[%s1196_s1 + $0x1f0] sm:$0xff]  }
   0xe   :  { %843 = vmatprep.subr.bf16.mxu1 %v917_v13  ;;  %v142_v39 = vcombine.high %v12_v38, %v12_v38  ;;  %v149_v40 = vrot.slane %v12_v38, %v1075_v35  ;;  %v943_v55 = vld [vmem:[%s1196_s1 + $0x130] sm:$0xff]   ;;  %v945_v57 = vld [vmem:[%s1196_s1 + $0x168] sm:$0xff]   ;;  %v949_v61 = vld [vmem:[%s1196_s1 + $0x160] sm:$0xff]  }
   0xf   :  { %v944_v58 = vld [vmem:[%s1196_s1 + $0x1b0] sm:$0xff]   ;;  %v946_v59 = vld [vmem:[%s1196_s1 + $0x1e8] sm:$0xff]   ;;  %v950_v63 = vld [vmem:[%s1196_s1 + $0x1e0] sm:$0xff]  }
  0x10   :  { %822 = vmatpush3.bf16.msra.mxu0 %v918_v14  ;;  %v157_v43 = vcombine.high %v149_v40, %v149_v40  ;;  %v165_v44 = vrot.slane %v149_v40, %v1075_v35  ;;  %v1095_v45 = vrot.slane %v142_v39, %v1075_v35  ;;  %v947_v60 = vld [vmem:[%s1196_s1 + $0x128] sm:$0xff]   ;;  %v951_v0 = vld [vmem:[%s1196_s1 + $0x120] sm:$0xff]   ;;  %v953_v1 = vld [vmem:[%s1196_s1 + $0x158] sm:$0xff]  }
  0x11   :  { %844 = vmatpush3.bf16.msra.mxu1 %v919_v15  ;;  %823 = vmatprep.subr.bf16.mxu0 %v920_v16  ;;  %v948_v62 = vld [vmem:[%s1196_s1 + $0x1a8] sm:$0xff]   ;;  %v952_v2 = vld [vmem:[%s1196_s1 + $0x1a0] sm:$0xff]   ;;  %v954_v3 = vld [vmem:[%s1196_s1 + $0x1d8] sm:$0xff]  }
  0x12   :  { %845 = vmatprep.subr.bf16.mxu1 %v921_v17  ;;  %v179_v46 = vrot.slane %v157_v43, %v1075_v35  ;;  %v158_v48 = vcombine.high %v1095_v45, %v1095_v45  ;;  %v187_v49 = vcombine.high %v165_v44, %v165_v44  ;;  %v955_v4 = vld [vmem:[%s1196_s1 + $0x118] sm:$0xff]   ;;  %v957_v5 = vld [vmem:[%s1196_s1 + $0x150] sm:$0xff]   ;;  %v961_v9 = vld [vmem:[%s1196_s1 + $0x148] sm:$0xff]   ;;  %v172_v17 = vrot.slane %v1095_v45, %v1075_v35 }
  0x13   :  { %v956_v6 = vld [vmem:[%s1196_s1 + $0x198] sm:$0xff]   ;;  %v958_v7 = vld [vmem:[%s1196_s1 + $0x1d0] sm:$0xff]   ;;  %v962_v11 = vld [vmem:[%s1196_s1 + $0x1c8] sm:$0xff]  }
  0x14   :  { %824 = vmatpush3.bf16.msra.mxu0 %v922_v18  ;;  %615 = vmatprep.mubr.bf16.mxu0 %v179_v46  ;;  %v189_v51 = vcombine.high %v179_v46, %v179_v46  ;;  %v186_v53 = vrot.slane %v158_v48, %v1075_v35  ;;  %v959_v8 = vld [vmem:[%s1196_s1 + $0x110] sm:$0xff]   ;;  %v963_v12 = vld [vmem:[%s1196_s1 + $0x108] sm:$0xff]   ;;  %v965_v13 = vld [vmem:[%s1196_s1 + $0x140] sm:$0xff]  }
  0x15   :  { %846 = vmatpush3.bf16.msra.mxu1 %v923_v19  ;;  %825 = vmatprep.subr.bf16.mxu0 %v924_v20  ;;  %v960_v10 = vld [vmem:[%s1196_s1 + $0x190] sm:$0xff]   ;;  %v964_v14 = vld [vmem:[%s1196_s1 + $0x188] sm:$0xff]   ;;  %v966_v15 = vld [vmem:[%s1196_s1 + $0x1c0] sm:$0xff]   ;;  %v188_v19 = vcombine.high %v172_v17, %v172_v17 }
  0x16   :  { %847 = vmatprep.subr.bf16.mxu1 %v925_v21  ;;  %655 = vmatprep.mubr.bf16.mxu1 %v189_v51  ;;  %v190_v56 = vcombine.high %v186_v53, %v186_v53  ;;  %v967_v16 = vld [vmem:[%s1196_s1 + $0x100] sm:$0xff]  }
  0x17   :  { %v968_v18 = vld [vmem:[%s1196_s1 + $0x180] sm:$0xff]  }
  0x18   :  { %826 = vmatpush3.bf16.msra.mxu0 %v926_v25 }
  0x19   :  { %848 = vmatpush3.bf16.msra.mxu1 %v927_v26  ;;  %827 = vmatprep.subr.bf16.mxu0 %v928_v27 }
  0x1a   :  { %849 = vmatprep.subr.bf16.mxu1 %v929_v28 }
  0x1c   :  { %828 = vmatpush3.bf16.msra.mxu0 %v930_v31 }
  0x1d   :  { %850 = vmatpush3.bf16.msra.mxu1 %v931_v32  ;;  %829 = vmatprep.subr.bf16.mxu0 %v932_v33 }
  0x1e   :  { %851 = vmatprep.subr.bf16.mxu1 %v933_v34 }
  0x20   :  { %830 = vmatpush3.bf16.msra.mxu0 %v934_v36 }
  0x21   :  { %852 = vmatpush3.bf16.msra.mxu1 %v935_v37  ;;  %859 = vmatprep.subr.bf16.mxu0 %v937_v41 }
  0x22   :  { %881 = vmatprep.subr.bf16.mxu1 %v938_v42 }
  0x23   :  { %616 = vmatmul.mubr.bf16.vlgmr.msra.gmra.mxu0 %v165_v44 }
  0x24   :  { %860 = vmatpush3.bf16.msra.mxu0 %v939_v47  ;;  %656 = vmatmul.mubr.bf16.vlgmr.msra.gmra.mxu1 %v187_v49 }
  0x25   :  { %861 = vmatprep.subr.bf16.mxu0 %v941_v50  ;;  %882 = vmatpush3.bf16.msra.mxu1 %v940_v52 }
  0x26   :  { %695 = vmatprep.mubr.bf16.mxu0 %v186_v53  ;;  %883 = vmatprep.subr.bf16.mxu1 %v942_v54 }
  0x27   :  { %735 = vmatprep.mubr.bf16.mxu1 %v190_v56 }
  0x28   :  { %862 = vmatpush3.bf16.msra.mxu0 %v943_v55 }
  0x29   :  { %863 = vmatprep.subr.bf16.mxu0 %v945_v57  ;;  %884 = vmatpush3.bf16.msra.mxu1 %v944_v58 }
  0x2a   :  { %885 = vmatprep.subr.bf16.mxu1 %v946_v59 }
  0x2c   :  { %864 = vmatpush3.bf16.msra.mxu0 %v947_v60 }
  0x2d   :  { %865 = vmatprep.subr.bf16.mxu0 %v949_v61  ;;  %886 = vmatpush3.bf16.msra.mxu1 %v948_v62 }
  0x2e   :  { %887 = vmatprep.subr.bf16.mxu1 %v950_v63 }
  0x30   :  { %866 = vmatpush3.bf16.msra.mxu0 %v951_v0 }
  0x31   :  { %867 = vmatprep.subr.bf16.mxu0 %v953_v1  ;;  %888 = vmatpush3.bf16.msra.mxu1 %v952_v2 }
  0x32   :  { %889 = vmatprep.subr.bf16.mxu1 %v954_v3 }
  0x34   :  { %868 = vmatpush3.bf16.msra.mxu0 %v955_v4 }
  0x35   :  { %869 = vmatprep.subr.bf16.mxu0 %v957_v5  ;;  %890 = vmatpush3.bf16.msra.mxu1 %v956_v6 }
  0x36   :  { %891 = vmatprep.subr.bf16.mxu1 %v958_v7 }
  0x38   :  { %870 = vmatpush3.bf16.msra.mxu0 %v959_v8 }
  0x39   :  { %871 = vmatprep.subr.bf16.mxu0 %v961_v9  ;;  %892 = vmatpush3.bf16.msra.mxu1 %v960_v10 }
  0x3a   :  { %893 = vmatprep.subr.bf16.mxu1 %v962_v11 }
  0x3c   :  { %872 = vmatpush3.bf16.msra.mxu0 %v963_v12 }
  0x3d   :  { %873 = vmatprep.subr.bf16.mxu0 %v965_v13  ;;  %894 = vmatpush3.bf16.msra.mxu1 %v964_v14 }
  0x3e   :  { %895 = vmatprep.subr.bf16.mxu1 %v966_v15 }
  0x40   :  { %874 = vmatpush3.bf16.msra.mxu0 %v967_v16 }
  0x41   :  { %896 = vmatpush3.bf16.msra.mxu1 %v968_v18 }
  0x43   :  { %696 = vmatmul.mubr.bf16.vlgmr.msra.gmra.mxu0 %v172_v17 }
  0x44   :  { %736 = vmatmul.mubr.bf16.vlgmr.msra.gmra.mxu1 %v188_v19 }
  0xe3   :  { %v831_v20 = vpop.f32.mrf.mxu0 }
  0xe4   :  { %v853_v21 = vpop.f32.mrf.mxu1 }
  0xe5   :  { %v832_v22 = vpop.f32.mrf.mxu0 }
  0xe6   :  { %v854_v23 = vpop.f32.mrf.mxu1  ;;  %v833_v28 = vadd.f32 %v832_v22, %v831_v20 }
  0xe7   :  { %v834_v24 = vpop.f32.mrf.mxu0  ;;  %v855_v29 = vadd.f32 %v854_v23, %v853_v21 }
  0xe8   :  { %v856_v25 = vpop.f32.mrf.mxu1 }
  0xe9   :  { %v835_v26 = vpop.f32.mrf.mxu0  ;;  %v658_v33 = vadd.f32 %v855_v29, %v833_v28 }
  0xea   :  { %v857_v27 = vpop.f32.mrf.mxu1 }
 0x103   :  { %v875_v30 = vpop.f32.mrf.mxu0 }
 0x104   :  { %v897_v31 = vpop.f32.mrf.mxu1 }
 0x105   :  { %v876_v32 = vpop.f32.mrf.mxu0 }
 0x106   :  { %v877_v34 = vadd.f32 %v876_v32, %v875_v30  ;;  %v898_v35 = vpop.f32.mrf.mxu1 }
 0x107   :  { %v878_v36 = vpop.f32.mrf.mxu0  ;;  %v899_v38 = vadd.f32 %v898_v35, %v897_v31 }
 0x108   :  { %v698_v37 = vadd.f32 %v877_v34, %v658_v33  ;;  %v900_v39 = vpop.f32.mrf.mxu1 }
 0x109   :  { %v879_v40 = vpop.f32.mrf.mxu0 }
 0x10a   :  { %v738_v41 = vadd.f32 %v899_v38, %v698_v37  ;;  %v901_v42 = vpop.f32.mrf.mxu1 }
 0x10c   :  { %v743_v43 = vmax.f32 %v738_v41, 0.0 }
 0x10e   :  { %v744_v44 = vpack.c.bf16 %v743_v43, %v743_v43 }
 0x110   :  { %746 = vst.msk [vmem:[%s1198_s2] sm:$0x1] %vm745_vm0, %v744_v44 }

// kernel: unet_forward.15
= control target key start
LH: loop header
LB: loop body
LE: loop exit
PB: predicated region body
PF: predicated region fallthrough
CT: control target
= control target key end

     0   :  { %v1252_v23 = vmov 1966171168   ;;  %v60_v25 = vlaneseq  ;;  %vm209_vm0 = vcmask 517120   ;;  %vm900_vm1 = vcmask 516096   ;;  %s1526_s1 = inlined_call_operand.vmem [shape: bf16[4,256,64], index: 1, kind: input, shape index: {}]   ;;  %s1527_s0 = inlined_call_operand.vmem [shape: bf16[4,2,256], index: 0, kind: input, shape index: {}]   ;;  %s1528_s2 = inlined_call_operand.vmem [shape: f32[2,64], index: 2, kind: input, shape index: {}]   ;;  %s1529_s3 = inlined_call_operand.vmem [shape: bf16[4,2,64], index: 3, kind: output, shape index: {}]  }
   0x1   :  { %v1186_v0 = vld [vmem:[%s1526_s1 + $0x78] sm:$0xff]   ;;  %v1190_v4 = vld [vmem:[%s1526_s1 + $0x70] sm:$0xff]   ;;  %v1194_v8 = vld [vmem:[%s1526_s1 + $0x68] sm:$0xff]   ;;  %v58_v24 = vunpack.c.l.s4 %v1252_v23 }
   0x2   :  { %v1187_v1 = vld [vmem:[%s1526_s1 + $0xf8] sm:$0xff]   ;;  %1097 = vmatprep.subr.bf16.mxu0 %v1186_v0  ;;  %v1191_v5 = vld [vmem:[%s1526_s1 + $0xf0] sm:$0xff]   ;;  %v1195_v9 = vld [vmem:[%s1526_s1 + $0xe8] sm:$0xff]   ;;  %v1354_v31 = vshrl.u32 %v60_v25, 7 }
   0x3   :  { %v1188_v2 = vld [vmem:[%s1526_s1 + $0x38] sm:$0xff]   ;;  %1119 = vmatprep.subr.bf16.mxu1 %v1187_v1  ;;  %v1192_v6 = vld [vmem:[%s1526_s1 + $0x30] sm:$0xff]   ;;  %v1196_v10 = vld [vmem:[%s1526_s1 + $0x28] sm:$0xff]   ;;  %v59_v30 = vunpack.c.0.s8 %v58_v24 }
   0x4   :  { %v1189_v3 = vld [vmem:[%s1526_s1 + $0xb8] sm:$0xff]   ;;  %1098 = vmatpush3.bf16.msra.mxu0 %v1188_v2  ;;  %v1193_v7 = vld [vmem:[%s1526_s1 + $0xb0] sm:$0xff]   ;;  %v1197_v11 = vld [vmem:[%s1526_s1 + $0xa8] sm:$0xff]  }
   0x5   :  { %1120 = vmatpush3.bf16.msra.mxu1 %v1189_v3  ;;  %1099 = vmatprep.subr.bf16.mxu0 %v1190_v4  ;;  %v1198_v12 = vld [vmem:[%s1526_s1 + $0x60] sm:$0xff]   ;;  %v1202_v16 = vld [vmem:[%s1526_s1 + $0x58] sm:$0xff]   ;;  %v1206_v20 = vld [vmem:[%s1526_s1 + $0x50] sm:$0xff]   ;;  %v1369_v36 = vsub.s32 %v59_v30, %v1354_v31 }
   0x6   :  { %1121 = vmatprep.subr.bf16.mxu1 %v1191_v5  ;;  %v1199_v13 = vld [vmem:[%s1526_s1 + $0xe0] sm:$0xff]   ;;  %v1203_v17 = vld [vmem:[%s1526_s1 + $0xd8] sm:$0xff]   ;;  %v1207_v21 = vld [vmem:[%s1526_s1 + $0xd0] sm:$0xff]  }
   0x7   :  { %v1200_v14 = vld [vmem:[%s1526_s1 + $0x20] sm:$0xff]   ;;  %v1204_v18 = vld [vmem:[%s1526_s1 + $0x18] sm:$0xff]   ;;  %v1208_v22 = vld [vmem:[%s1526_s1 + $0x10] sm:$0xff]  }
   0x8   :  { %1100 = vmatpush3.bf16.msra.mxu0 %v1192_v6  ;;  %v1201_v15 = vld [vmem:[%s1526_s1 + $0xa0] sm:$0xff]   ;;  %v1205_v19 = vld [vmem:[%s1526_s1 + $0x98] sm:$0xff]   ;;  %v1209_v26 = vld [vmem:[%s1526_s1 + $0x90] sm:$0xff]  }
   0x9   :  { %1122 = vmatpush3.bf16.msra.mxu1 %v1193_v7  ;;  %1101 = vmatprep.subr.bf16.mxu0 %v1194_v8  ;;  %v1210_v27 = vld [vmem:[%s1526_s1 + $0x48] sm:$0xff]   ;;  %v1214_v33 = vld [vmem:[%s1526_s1 + $0x40] sm:$0xff]   ;;  %v1218_v43 = vld [vmem:[%s1526_s1 + $0x178] sm:$0xff]  }
   0xa   :  { %1123 = vmatprep.subr.bf16.mxu1 %v1195_v9  ;;  %v1211_v28 = vld [vmem:[%s1526_s1 + $0xc8] sm:$0xff]   ;;  %v1215_v34 = vld [vmem:[%s1526_s1 + $0xc0] sm:$0xff]   ;;  %v1219_v46 = vld [vmem:[%s1526_s1 + $0x1f8] sm:$0xff]  }
   0xb   :  { %v1212_v29 = vld [vmem:[%s1526_s1 + $0x8] sm:$0xff]   ;;  %v1216_v35 = vld [vmem:[%s1526_s1] sm:$0xff]   ;;  %v1220_v48 = vld [vmem:[%s1526_s1 + $0x138] sm:$0xff]  }
   0xc   :  { %1102 = vmatpush3.bf16.msra.mxu0 %v1196_v10  ;;  %v1213_v32 = vld [vmem:[%s1526_s1 + $0x88] sm:$0xff]   ;;  %v1217_v37 = vld [vmem:[%s1526_s1 + $0x80] sm:$0xff]   ;;  %v1221_v49 = vld [vmem:[%s1526_s1 + $0x1b8] sm:$0xff]  }
   0xd   :  { %1124 = vmatpush3.bf16.msra.mxu1 %v1197_v11  ;;  %1103 = vmatprep.subr.bf16.mxu0 %v1198_v12  ;;  %v927_v38 = vld.sshfl [vmem:[%s1527_s0] sm:$0x11 pattern:$0x75316420]  ;;  %v1222_v50 = vld [vmem:[%s1526_s1 + $0x170] sm:$0xff]   ;;  %v1226_v54 = vld [vmem:[%s1526_s1 + $0x168] sm:$0xff]  }
   0xe   :  { %1125 = vmatprep.subr.bf16.mxu1 %v1199_v13  ;;  %v56_v39 = vcombine.high %v927_v38, %v927_v38  ;;  %v977_v40 = vld.sshfl [vmem:[%s1527_s0 + $0x2] sm:$0x11 pattern:$0x75316420]  ;;  %v63_v42 = vrot.slane %v927_v38, %v1369_v36  ;;  %v1223_v51 = vld [vmem:[%s1526_s1 + $0x1f0] sm:$0xff]   ;;  %v1227_v55 = vld [vmem:[%s1526_s1 + $0x1e8] sm:$0xff]  }
   0xf   :  { %v254_v41 = vcombine.high %v977_v40, %v977_v40  ;;  %v261_v45 = vrot.slane %v977_v40, %v1369_v36  ;;  %v1224_v52 = vld [vmem:[%s1526_s1 + $0x130] sm:$0xff]   ;;  %v1228_v56 = vld [vmem:[%s1526_s1 + $0x128] sm:$0xff]   ;;  %v1230_v58 = vld [vmem:[%s1526_s1 + $0x160] sm:$0xff]  }
  0x10   :  { %1104 = vmatpush3.bf16.msra.mxu0 %v1200_v14  ;;  %v70_v44 = vrot.slane %v56_v39, %v1369_v36  ;;  %v1225_v53 = vld [vmem:[%s1526_s1 + $0x1b0] sm:$0xff]   ;;  %v1229_v57 = vld [vmem:[%s1526_s1 + $0x1a8] sm:$0xff]   ;;  %v1231_v59 = vld [vmem:[%s1526_s1 + $0x1e0] sm:$0xff]  }
  0x11   :  { %1126 = vmatpush3.bf16.msra.mxu1 %v1201_v15  ;;  %1105 = vmatprep.subr.bf16.mxu0 %v1202_v16  ;;  %v268_v47 = vrot.slane %v254_v41, %v1369_v36  ;;  %v1232_v60 = vld [vmem:[%s1526_s1 + $0x120] sm:$0xff]   ;;  %v1234_v62 = vld [vmem:[%s1526_s1 + $0x158] sm:$0xff]   ;;  %v1238_v2 = vld [vmem:[%s1526_s1 + $0x150] sm:$0xff]  }
  0x12   :  { %1127 = vmatprep.subr.bf16.mxu1 %v1203_v17  ;;  %201 = vmatprep.mubr.bf16.mxu0 %v70_v44  ;;  %v1233_v61 = vld [vmem:[%s1526_s1 + $0x1a0] sm:$0xff]   ;;  %v1235_v63 = vld [vmem:[%s1526_s1 + $0x1d8] sm:$0xff]   ;;  %v1239_v3 = vld [vmem:[%s1526_s1 + $0x1d0] sm:$0xff]  }
  0x13   :  { %399 = vmatprep.mubr.bf16.mxu1 %v268_v47  ;;  %v1236_v0 = vld [vmem:[%s1526_s1 + $0x118] sm:$0xff]   ;;  %v1240_v4 = vld [vmem:[%s1526_s1 + $0x110] sm:$0xff]   ;;  %v1242_v6 = vld [vmem:[%s1526_s1 + $0x148] sm:$0xff]  }
  0x14   :  { %1106 = vmatpush3.bf16.msra.mxu0 %v1204_v18  ;;  %v1237_v1 = vld [vmem:[%s1526_s1 + $0x198] sm:$0xff]   ;;  %v1241_v5 = vld [vmem:[%s1526_s1 + $0x190] sm:$0xff]   ;;  %v1243_v7 = vld [vmem:[%s1526_s1 + $0x1c8] sm:$0xff]  }
  0x15   :  { %1128 = vmatpush3.bf16.msra.mxu1 %v1205_v19  ;;  %1107 = vmatprep.subr.bf16.mxu0 %v1206_v20  ;;  %v1244_v8 = vld [vmem:[%s1526_s1 + $0x108] sm:$0xff]   ;;  %v1246_v10 = vld [vmem:[%s1526_s1 + $0x140] sm:$0xff]  }
  0x16   :  { %1129 = vmatprep.subr.bf16.mxu1 %v1207_v21  ;;  %v1245_v9 = vld [vmem:[%s1526_s1 + $0x188] sm:$0xff]   ;;  %v1247_v11 = vld [vmem:[%s1526_s1 + $0x1c0] sm:$0xff]  }
  0x17   :  { %v1248_v12 = vld [vmem:[%s1526_s1 + $0x100] sm:$0xff]  }
  0x18   :  { %1108 = vmatpush3.bf16.msra.mxu0 %v1208_v22  ;;  %v1249_v13 = vld [vmem:[%s1526_s1 + $0x180] sm:$0xff]  }
  0x19   :  { %1130 = vmatpush3.bf16.msra.mxu1 %v1209_v26  ;;  %1109 = vmatprep.subr.bf16.mxu0 %v1210_v27  ;;  %v1027_v14 = vld.sshfl [vmem:[%s1527_s0 + $0x4] sm:$0x11 pattern:$0x75316420] }
  0x1a   :  { %1131 = vmatprep.subr.bf16.mxu1 %v1211_v28  ;;  %v452_v15 = vcombine.high %v1027_v14, %v1027_v14  ;;  %v1077_v16 = vld.sshfl [vmem:[%s1527_s0 + $0x6] sm:$0x11 pattern:$0x75316420]  ;;  %v459_v18 = vrot.slane %v1027_v14, %v1369_v36 }
  0x1b   :  { %v650_v17 = vcombine.high %v1077_v16, %v1077_v16  ;;  %v657_v20 = vrot.slane %v1077_v16, %v1369_v36 }
  0x1c   :  { %1110 = vmatpush3.bf16.msra.mxu0 %v1212_v29  ;;  %v466_v19 = vrot.slane %v452_v15, %v1369_v36 }
  0x1d   :  { %1132 = vmatpush3.bf16.msra.mxu1 %v1213_v32  ;;  %1111 = vmatprep.subr.bf16.mxu0 %v1214_v33  ;;  %v664_v21 = vrot.slane %v650_v17, %v1369_v36 }
  0x1e   :  { %1133 = vmatprep.subr.bf16.mxu1 %v1215_v34 }
  0x20   :  { %1112 = vmatpush3.bf16.msra.mxu0 %v1216_v35 }
  0x21   :  { %1134 = vmatpush3.bf16.msra.mxu1 %v1217_v37  ;;  %1141 = vmatprep.subr.bf16.mxu0 %v1218_v43 }
  0x22   :  { %1163 = vmatprep.subr.bf16.mxu1 %v1219_v46 }
  0x23   :  { %202 = vmatmul.mubr.bf16.vlgmr.msra.gmra.mxu0 %v63_v42 }
  0x24   :  { %400 = vmatmul.mubr.bf16.vlgmr.msra.gmra.mxu1 %v261_v45  ;;  %1142 = vmatpush3.bf16.msra.mxu0 %v1220_v48 }
  0x25   :  { %1164 = vmatpush3.bf16.msra.mxu1 %v1221_v49  ;;  %1143 = vmatprep.subr.bf16.mxu0 %v1222_v50 }
  0x26   :  { %1165 = vmatprep.subr.bf16.mxu1 %v1223_v51  ;;  %597 = vmatprep.mubr.bf16.mxu0 %v466_v19 }
  0x27   :  { %795 = vmatprep.mubr.bf16.mxu1 %v664_v21 }
  0x28   :  { %1144 = vmatpush3.bf16.msra.mxu0 %v1224_v52 }
  0x29   :  { %1166 = vmatpush3.bf16.msra.mxu1 %v1225_v53  ;;  %1145 = vmatprep.subr.bf16.mxu0 %v1226_v54 }
  0x2a   :  { %1167 = vmatprep.subr.bf16.mxu1 %v1227_v55 }
  0x2c   :  { %1146 = vmatpush3.bf16.msra.mxu0 %v1228_v56 }
  0x2d   :  { %1168 = vmatpush3.bf16.msra.mxu1 %v1229_v57  ;;  %1147 = vmatprep.subr.bf16.mxu0 %v1230_v58 }
  0x2e   :  { %1169 = vmatprep.subr.bf16.mxu1 %v1231_v59 }
  0x30   :  { %1148 = vmatpush3.bf16.msra.mxu0 %v1232_v60 }
  0x31   :  { %1170 = vmatpush3.bf16.msra.mxu1 %v1233_v61  ;;  %1149 = vmatprep.subr.bf16.mxu0 %v1234_v62 }
  0x32   :  { %1171 = vmatprep.subr.bf16.mxu1 %v1235_v63 }
  0x34   :  { %1150 = vmatpush3.bf16.msra.mxu0 %v1236_v0 }
  0x35   :  { %1172 = vmatpush3.bf16.msra.mxu1 %v1237_v1  ;;  %1151 = vmatprep.subr.bf16.mxu0 %v1238_v2 }
  0x36   :  { %1173 = vmatprep.subr.bf16.mxu1 %v1239_v3 }
  0x38   :  { %1152 = vmatpush3.bf16.msra.mxu0 %v1240_v4 }
  0x39   :  { %1174 = vmatpush3.bf16.msra.mxu1 %v1241_v5  ;;  %1153 = vmatprep.subr.bf16.mxu0 %v1242_v6 }
  0x3a   :  { %1175 = vmatprep.subr.bf16.mxu1 %v1243_v7 }
  0x3c   :  { %1154 = vmatpush3.bf16.msra.mxu0 %v1244_v8 }
  0x3d   :  { %1176 = vmatpush3.bf16.msra.mxu1 %v1245_v9  ;;  %1155 = vmatprep.subr.bf16.mxu0 %v1246_v10 }
  0x3e   :  { %1177 = vmatprep.subr.bf16.mxu1 %v1247_v11 }
  0x40   :  { %1156 = vmatpush3.bf16.msra.mxu0 %v1248_v12 }
  0x41   :  { %1178 = vmatpush3.bf16.msra.mxu1 %v1249_v13 }
  0x43   :  { %598 = vmatmul.mubr.bf16.vlgmr.msra.gmra.mxu0 %v459_v18 }
  0x44   :  { %796 = vmatmul.mubr.bf16.vlgmr.msra.gmra.mxu1 %v657_v20 }
  0xe3   :  { %v1113_v22 = vpop.f32.mrf.mxu0 }
  0xe4   :  { %v1135_v23 = vpop.f32.mrf.mxu1 }
  0xe5   :  { %v1114_v24 = vpop.f32.mrf.mxu0 }
  0xe6   :  { %v1115_v25 = vadd.f32 %v1114_v24, %v1113_v22  ;;  %v1136_v26 = vpop.f32.mrf.mxu1 }
  0xe7   :  { %v1137_v27 = vadd.f32 %v1136_v26, %v1135_v23  ;;  %v1116_v28 = vpop.f32.mrf.mxu0 }
  0xe8   :  { %210 = vst.msk [vmem:[#allocation2] sm:$0x3] %vm209_vm0, %v1115_v25  ;;  %v1138_v29 = vpop.f32.mrf.mxu1 }
  0xe9   :  { %408 = vst.msk [vmem:[#allocation2 + $0x2] sm:$0x3] %vm209_vm0, %v1137_v27  ;;  %v1117_v30 = vpop.f32.mrf.mxu0 }
  0xea   :  { %v1139_v32 = vpop.f32.mrf.mxu1 }
  0xef   :  { %v1492_v33 = vld [vmem:[#allocation2] sm:$0x3] }
  0xf0   :  { %v815_v34 = vld [vmem:[#allocation2 + $0x2] sm:$0x3]  ;;  %v808_v35 = vsel %vm209_vm0, %v1492_v33, 0.0 }
  0xf1   :  { %v816_v36 = vsel %vm209_vm0, %v815_v34, 0.0  ;;  %v809_v37 = vrot.slane %v808_v35, 4 }
  0xf2   :  { %v817_v38 = vrot.slane %v816_v36, 4 }
  0xf3   :  { %v810_v44 = vadd.f32 %v809_v37, %v808_v35 }
  0xf4   :  { %v818_v45 = vadd.f32 %v817_v38, %v816_v36 }
  0xf5   :  { %v811_v51 = vrot.slane %v810_v44, 2 }
  0xf6   :  { %v819_v52 = vrot.slane %v818_v45, 2 }
  0xf7   :  { %v812_v53 = vadd.f32 %v811_v51, %v810_v44 }
  0xf8   :  { %v820_v54 = vadd.f32 %v819_v52, %v818_v45 }
  0xf9   :  { %v813_v61 = vrot.slane %v812_v53, 1 }
  0xfa   :  { %v821_v62 = vrot.slane %v820_v54, 1 }
  0xfb   :  { %v814_v3 = vadd.f32 %v813_v61, %v812_v53 }
  0xfc   :  { %v822_v4 = vadd.f32 %v821_v62, %v820_v54  ;;  %v806_v62 = vld [vmem:[%s1528_s2 + $0x1] sm:$0x1] }
  0xfe   :  { %v823_v9 = vadd.f32 %v822_v4, %v814_v3 }
 0x103   :  { %v1157_v39 = vpop.f32.mrf.mxu0 }
 0x104   :  { %v1179_v40 = vpop.f32.mrf.mxu1 }
 0x105   :  { %v1158_v41 = vpop.f32.mrf.mxu0 }
 0x106   :  { %v1159_v42 = vadd.f32 %v1158_v41, %v1157_v39  ;;  %v1180_v43 = vpop.f32.mrf.mxu1 }
 0x107   :  { %v1181_v46 = vadd.f32 %v1180_v43, %v1179_v40  ;;  %v1160_v47 = vpop.f32.mrf.mxu0 }
 0x108   :  { %606 = vst.msk [vmem:[#allocation2 + $0x4] sm:$0x3] %vm209_vm0, %v1159_v42  ;;  %v1182_v48 = vpop.f32.mrf.mxu1 }
 0x109   :  { %804 = vst.msk [vmem:[#allocation2 + $0x6] sm:$0x3] %vm209_vm0, %v1181_v46  ;;  %v1161_v49 = vpop.f32.mrf.mxu0 }
 0x10a   :  { %v1183_v50 = vpop.f32.mrf.mxu1 }
 0x10f   :  { %v824_v55 = vld [vmem:[#allocation2 + $0x4] sm:$0x3] }
 0x110   :  { %v825_v56 = vsel %vm209_vm0, %v824_v55, 0.0  ;;  %v833_v57 = vld [vmem:[#allocation2 + $0x6] sm:$0x3]  ;;  %v909_v3 = vld [vmem:[#allocation2 + $0x4] sm:$0x3] }
 0x111   :  { %v826_v58 = vrot.slane %v825_v56, 4  ;;  %v834_v59 = vsel %vm209_vm0, %v833_v57, 0.0 }
 0x112   :  { %v835_v60 = vrot.slane %v834_v59, 4 }
 0x113   :  { %v827_v63 = vadd.f32 %v826_v58, %v825_v56  ;;  %v805_v58 = vld [vmem:[%s1528_s2] sm:$0x1] }
 0x114   :  { %v836_v0 = vadd.f32 %v835_v60, %v834_v59  ;;  %v890_v59 = vsub.s32 0, %v1354_v31 }
 0x115   :  { %v828_v1 = vrot.slane %v827_v63, 2 }
 0x116   :  { %v837_v2 = vrot.slane %v836_v0, 2 }
 0x117   :  { %v829_v5 = vadd.f32 %v828_v1, %v827_v63 }
 0x118   :  { %v838_v6 = vadd.f32 %v837_v2, %v836_v0  ;;  %v902_v2 = vld [vmem:[#allocation2 + $0x2] sm:$0x3] }
 0x119   :  { %v830_v7 = vrot.slane %v829_v5, 1 }
 0x11a   :  { %v839_v8 = vrot.slane %v838_v6, 1 }
 0x11b   :  { %v831_v10 = vadd.f32 %v830_v7, %v829_v5  ;;  %v916_v5 = vld [vmem:[#allocation2 + $0x6] sm:$0x3] }
 0x11c   :  { %v840_v12 = vadd.f32 %v839_v8, %v838_v6 }
 0x11d   :  { %v832_v11 = vadd.f32 %v831_v10, %v823_v9 }
 0x11f   :  { %v841_v13 = vadd.f32 %v840_v12, %v832_v11 }
 0x121   :  { %v842_v14 = vmul.f32 0.125, %v841_v13 }
 0x123   :  { %v843_v15 = vsub.f32 %v1492_v33, %v842_v14  ;;  %v852_v16 = vsub.f32 %v815_v34, %v842_v14  ;;  %v862_v17 = vsub.f32 %v824_v55, %v842_v14  ;;  %v872_v18 = vsub.f32 %v833_v57, %v842_v14 }
 0x125   :  { %v844_v19 = vmul.f32 %v843_v15, %v843_v15  ;;  %v853_v20 = vmul.f32 %v852_v16, %v852_v16  ;;  %v863_v21 = vmul.f32 %v862_v17, %v862_v17  ;;  %v873_v22 = vmul.f32 %v872_v18, %v872_v18 }
 0x127   :  { %v845_v23 = vsel %vm209_vm0, %v844_v19, 0.0  ;;  %v854_v24 = vsel %vm209_vm0, %v853_v20, 0.0  ;;  %v864_v25 = vsel %vm209_vm0, %v863_v21, 0.0  ;;  %v874_v26 = vsel %vm209_vm0, %v873_v22, 0.0 }
 0x128   :  { %v846_v27 = vrot.slane %v845_v23, 4  ;;  %v855_v28 = vrot.slane %v854_v24, 4  ;;  %v865_v29 = vrot.slane %v864_v25, 4  ;;  %v875_v30 = vrot.slane %v874_v26, 4 }
 0x12a   :  { %v847_v32 = vadd.f32 %v846_v27, %v845_v23  ;;  %v856_v34 = vadd.f32 %v855_v28, %v854_v24  ;;  %v866_v35 = vadd.f32 %v865_v29, %v864_v25  ;;  %v876_v36 = vadd.f32 %v875_v30, %v874_v26 }
 0x12c   :  { %v848_v37 = vrot.slane %v847_v32, 2  ;;  %v857_v38 = vrot.slane %v856_v34, 2  ;;  %v867_v39 = vrot.slane %v866_v35, 2  ;;  %v877_v40 = vrot.slane %v876_v36, 2 }
 0x12e   :  { %v849_v41 = vadd.f32 %v848_v37, %v847_v32  ;;  %v858_v42 = vadd.f32 %v857_v38, %v856_v34  ;;  %v868_v43 = vadd.f32 %v867_v39, %v866_v35  ;;  %v878_v44 = vadd.f32 %v877_v40, %v876_v36 }
 0x130   :  { %v850_v45 = vrot.slane %v849_v41, 1  ;;  %v859_v46 = vrot.slane %v858_v42, 1  ;;  %v869_v47 = vrot.slane %v868_v43, 1  ;;  %v879_v50 = vrot.slane %v878_v44, 1 }
 0x132   :  { %v851_v48 = vadd.f32 %v850_v45, %v849_v41  ;;  %v860_v49 = vadd.f32 %v859_v46, %v858_v42  ;;  %v870_v52 = vadd.f32 %v869_v47, %v868_v43  ;;  %v880_v54 = vadd.f32 %v879_v50, %v878_v44 }
 0x134   :  { %v861_v51 = vadd.f32 %v860_v49, %v851_v48 }
 0x136   :  { %v871_v53 = vadd.f32 %v870_v52, %v861_v51 }
 0x138   :  { %v881_v55 = vadd.f32 %v880_v54, %v871_v53 }
 0x13a   :  { %v882_v56 = vmul.f32 0.125, %v881_v55 }
 0x13c   :  { %v883_v57 = vadd.f32 1e-05, %v882_v56 }
 0x13e   :  { %1250 = vrsqrt.f32 %v883_v57 }
 0x14b   :  { %v1251_v60 = vpop.eup %1250 }
 0x14c   :  { %v885_v61 = vmul.f32 %v1251_v60, %v805_v58 }
 0x14e   :  { %v886_v63 = vmul.f32 %v885_v61, %v842_v14  ;;  %v891_v0 = vrot.slane %v885_v61, %v890_v59 }
 0x150   :  { %v887_v1 = vsub.f32 %v806_v62, %v886_v63  ;;  %v892_v4 = vmul.f32 %v891_v0, %v1492_v33  ;;  %v903_v7 = vmul.f32 %v902_v2, %v891_v0  ;;  %v910_v8 = vmul.f32 %v909_v3, %v891_v0 }
 0x151   :  { %v917_v9 = vmul.f32 %v916_v5, %v891_v0 }
 0x152   :  { %v896_v6 = vrot.slane %v887_v1, %v890_v59 }
 0x154   :  { %v897_v10 = vadd.f32 %v896_v6, %v892_v4  ;;  %v904_v31 = vadd.f32 %v903_v7, %v896_v6  ;;  %v911_v11 = vadd.f32 %v910_v8, %v896_v6  ;;  %v918_v12 = vadd.f32 %v917_v9, %v896_v6 }
 0x156   :  { %v898_v13 = vmax.f32 %v897_v10, 0.0  ;;  %v905_v15 = vmax.f32 %v904_v31, 0.0  ;;  %v912_v16 = vmax.f32 %v911_v11, 0.0  ;;  %v919_v17 = vmax.f32 %v918_v12, 0.0 }
 0x158   :  { %v899_v14 = vpack.c.bf16 %v898_v13, %v898_v13  ;;  %v906_v18 = vpack.c.bf16 %v905_v15, %v905_v15  ;;  %v913_v19 = vpack.c.bf16 %v912_v16, %v912_v16  ;;  %v920_v20 = vpack.c.bf16 %v919_v17, %v919_v17 }
 0x15a   :  { %901 = vst.msk [vmem:[%s1529_s3] sm:$0x1] %vm900_vm1, %v899_v14  ;;  %1094 = vst.msk [vmem:[%s1529_s3 + $0x1] sm:$0x1] %vm900_vm1, %v906_v18 }
 0x15b   :  { %1095 = vst.msk [vmem:[%s1529_s3 + $0x2] sm:$0x1] %vm900_vm1, %v913_v19  ;;  %1096 = vst.msk [vmem:[%s1529_s3 + $0x3] sm:$0x1] %vm900_vm1, %v920_v20 }

// kernel: unet_forward.16
= control target key start
LH: loop header
LB: loop body
LE: loop exit
PB: predicated region body
PF: predicated region fallthrough
CT: control target
= control target key end

     0   :  { %vm373_vm0 = vcmask 261120   ;;  %vm1544_vm1 = vcmask 257024   ;;  %s2726_s3 = inlined_call_operand.vmem [shape: bf16[4,256,32], index: 3, kind: input, shape index: {}]   ;;  %s2727_s2 = inlined_call_operand.vmem [shape: bf16[4,256,32], index: 2, kind: input, shape index: {}]   ;;  %s2728_s1 = inlined_call_operand.vmem [shape: bf16[4,8,256], index: 1, kind: input, shape index: {}]   ;;  %s2729_s0 = inlined_call_operand.vmem [shape: bf16[4,8,256], index: 0, kind: input, shape index: {}]   ;;  %s2730_s4 = inlined_call_operand.vmem [shape: f32[2,32], index: 4, kind: input, shape index: {}]   ;;  %s2731_s5 = inlined_call_operand.vmem [shape: bf16[4,8,32], index: 5, kind: output, shape index: {}]  }
   0x1   :  { %v2092_v0 = vld [vmem:[%s2726_s3 + $0x78] sm:$0xff]   ;;  %v2096_v4 = vld [vmem:[%s2726_s3 + $0x70] sm:$0xff]   ;;  %v2100_v8 = vld [vmem:[%s2726_s3 + $0x68] sm:$0xff]  }
   0x2   :  { %v2093_v1 = vld [vmem:[%s2727_s2 + $0x78] sm:$0xff]   ;;  %1916 = vmatprep.subr.bf16.mxu0 %v2092_v0  ;;  %v2097_v5 = vld [vmem:[%s2727_s2 + $0x70] sm:$0xff]   ;;  %v2101_v9 = vld [vmem:[%s2727_s2 + $0x68] sm:$0xff]  }
   0x3   :  { %v2094_v2 = vld [vmem:[%s2726_s3 + $0x38] sm:$0xff]   ;;  %1938 = vmatprep.subr.bf16.mxu1 %v2093_v1  ;;  %v2098_v6 = vld [vmem:[%s2726_s3 + $0x30] sm:$0xff]   ;;  %v2102_v10 = vld [vmem:[%s2726_s3 + $0x28] sm:$0xff]  }
   0x4   :  { %v2095_v3 = vld [vmem:[%s2727_s2 + $0x38] sm:$0xff]   ;;  %1917 = vmatpush3.bf16.msra.mxu0 %v2094_v2  ;;  %v2099_v7 = vld [vmem:[%s2727_s2 + $0x30] sm:$0xff]   ;;  %v2103_v11 = vld [vmem:[%s2727_s2 + $0x28] sm:$0xff]  }
   0x5   :  { %1939 = vmatpush3.bf16.msra.mxu1 %v2095_v3  ;;  %1918 = vmatprep.subr.bf16.mxu0 %v2096_v4  ;;  %v2104_v12 = vld [vmem:[%s2726_s3 + $0x60] sm:$0xff]   ;;  %v2108_v16 = vld [vmem:[%s2726_s3 + $0x58] sm:$0xff]   ;;  %v2112_v20 = vld [vmem:[%s2726_s3 + $0x50] sm:$0xff]  }
   0x6   :  { %1940 = vmatprep.subr.bf16.mxu1 %v2097_v5  ;;  %v2105_v13 = vld [vmem:[%s2727_s2 + $0x60] sm:$0xff]   ;;  %v2109_v17 = vld [vmem:[%s2727_s2 + $0x58] sm:$0xff]   ;;  %v2113_v21 = vld [vmem:[%s2727_s2 + $0x50] sm:$0xff]  }
   0x7   :  { %v2106_v14 = vld [vmem:[%s2726_s3 + $0x20] sm:$0xff]   ;;  %v2110_v18 = vld [vmem:[%s2726_s3 + $0x18] sm:$0xff]   ;;  %v2114_v22 = vld [vmem:[%s2726_s3 + $0x10] sm:$0xff]  }
   0x8   :  { %1919 = vmatpush3.bf16.msra.mxu0 %v2098_v6  ;;  %v2107_v15 = vld [vmem:[%s2727_s2 + $0x20] sm:$0xff]   ;;  %v2111_v19 = vld [vmem:[%s2727_s2 + $0x18] sm:$0xff]   ;;  %v2115_v23 = vld [vmem:[%s2727_s2 + $0x10] sm:$0xff]  }
   0x9   :  { %1941 = vmatpush3.bf16.msra.mxu1 %v2099_v7  ;;  %1920 = vmatprep.subr.bf16.mxu0 %v2100_v8  ;;  %v2116_v24 = vld [vmem:[%s2726_s3 + $0x48] sm:$0xff]   ;;  %v2120_v28 = vld [vmem:[%s2726_s3 + $0x40] sm:$0xff]   ;;  %v2128_v38 = vld [vmem:[%s2726_s3 + $0xf8] sm:$0xff]  }
   0xa   :  { %1942 = vmatprep.subr.bf16.mxu1 %v2101_v9  ;;  %v2117_v25 = vld [vmem:[%s2727_s2 + $0x48] sm:$0xff]   ;;  %v2121_v29 = vld [vmem:[%s2727_s2 + $0x40] sm:$0xff]   ;;  %v2129_v39 = vld [vmem:[%s2727_s2 + $0xf8] sm:$0xff]  }
   0xb   :  { %v2118_v26 = vld [vmem:[%s2726_s3 + $0x8] sm:$0xff]   ;;  %v2122_v30 = vld [vmem:[%s2726_s3] sm:$0xff]   ;;  %v2130_v40 = vld [vmem:[%s2726_s3 + $0xb8] sm:$0xff]  }
   0xc   :  { %1921 = vmatpush3.bf16.msra.mxu0 %v2102_v10  ;;  %v2119_v27 = vld [vmem:[%s2727_s2 + $0x8] sm:$0xff]   ;;  %v2123_v31 = vld [vmem:[%s2727_s2] sm:$0xff]   ;;  %v2131_v41 = vld [vmem:[%s2727_s2 + $0xb8] sm:$0xff]  }
   0xd   :  { %1943 = vmatpush3.bf16.msra.mxu1 %v2103_v11  ;;  %1922 = vmatprep.subr.bf16.mxu0 %v2104_v12  ;;  %v54_v32 = vld [vmem:[%s2728_s1] sm:$0xff]  ;;  %v2132_v42 = vld [vmem:[%s2726_s3 + $0xf0] sm:$0xff]   ;;  %v2136_v46 = vld [vmem:[%s2726_s3 + $0xe8] sm:$0xff]  }
   0xe   :  { %1944 = vmatprep.subr.bf16.mxu1 %v2105_v13  ;;  %v21_v33 = vld [vmem:[%s2729_s0] sm:$0xff]  ;;  %v1571_v34 = vcombine.low %v54_v32, %v54_v32  ;;  %v1572_v35 = vcombine.high %v54_v32, %v54_v32  ;;  %v2133_v43 = vld [vmem:[%s2727_s2 + $0xf0] sm:$0xff]   ;;  %v2137_v47 = vld [vmem:[%s2727_s2 + $0xe8] sm:$0xff]  }
   0xf   :  { %v1589_v36 = vcombine.low %v21_v33, %v21_v33  ;;  %v1590_v37 = vcombine.high %v21_v33, %v21_v33  ;;  %v2134_v44 = vld [vmem:[%s2726_s3 + $0xb0] sm:$0xff]   ;;  %v2138_v48 = vld [vmem:[%s2726_s3 + $0xa8] sm:$0xff]   ;;  %v2140_v50 = vld [vmem:[%s2726_s3 + $0xe0] sm:$0xff]  }
  0x10   :  { %1923 = vmatpush3.bf16.msra.mxu0 %v2106_v14  ;;  %222 = vmatprep.mubr.bf16.mxu0 %v1572_v35  ;;  %v2135_v45 = vld [vmem:[%s2727_s2 + $0xb0] sm:$0xff]   ;;  %v2139_v49 = vld [vmem:[%s2727_s2 + $0xa8] sm:$0xff]   ;;  %v2141_v51 = vld [vmem:[%s2727_s2 + $0xe0] sm:$0xff]  }
  0x11   :  { %1945 = vmatpush3.bf16.msra.mxu1 %v2107_v15  ;;  %1924 = vmatprep.subr.bf16.mxu0 %v2108_v16  ;;  %v2142_v52 = vld [vmem:[%s2726_s3 + $0xa0] sm:$0xff]   ;;  %v2144_v54 = vld [vmem:[%s2726_s3 + $0xd8] sm:$0xff]   ;;  %v2148_v58 = vld [vmem:[%s2726_s3 + $0xd0] sm:$0xff]  }
  0x12   :  { %1946 = vmatprep.subr.bf16.mxu1 %v2109_v17  ;;  %365 = vmatprep.mubr.bf16.mxu1 %v1590_v37  ;;  %v2143_v53 = vld [vmem:[%s2727_s2 + $0xa0] sm:$0xff]   ;;  %v2145_v55 = vld [vmem:[%s2727_s2 + $0xd8] sm:$0xff]   ;;  %v2149_v59 = vld [vmem:[%s2727_s2 + $0xd0] sm:$0xff]  }
  0x13   :  { %v2146_v56 = vld [vmem:[%s2726_s3 + $0x98] sm:$0xff]   ;;  %v2150_v60 = vld [vmem:[%s2726_s3 + $0x90] sm:$0xff]   ;;  %v2152_v62 = vld [vmem:[%s2726_s3 + $0xc8] sm:$0xff]  }
  0x14   :  { %1925 = vmatpush3.bf16.msra.mxu0 %v2110_v18  ;;  %v2147_v57 = vld [vmem:[%s2727_s2 + $0x98] sm:$0xff]   ;;  %v2151_v61 = vld [vmem:[%s2727_s2 + $0x90] sm:$0xff]   ;;  %v2153_v63 = vld [vmem:[%s2727_s2 + $0xc8] sm:$0xff]  }
  0x15   :  { %1947 = vmatpush3.bf16.msra.mxu1 %v2111_v19  ;;  %1926 = vmatprep.subr.bf16.mxu0 %v2112_v20  ;;  %v2154_v0 = vld [vmem:[%s2726_s3 + $0x88] sm:$0xff]   ;;  %v2156_v2 = vld [vmem:[%s2726_s3 + $0xc0] sm:$0xff]   ;;  %v2164_v12 = vld [vmem:[%s2726_s3 + $0x178] sm:$0xff]  }
  0x16   :  { %1948 = vmatprep.subr.bf16.mxu1 %v2113_v21  ;;  %v2155_v1 = vld [vmem:[%s2727_s2 + $0x88] sm:$0xff]   ;;  %v2157_v3 = vld [vmem:[%s2727_s2 + $0xc0] sm:$0xff]   ;;  %v2165_v13 = vld [vmem:[%s2727_s2 + $0x178] sm:$0xff]  }
  0x17   :  { %v2158_v4 = vld [vmem:[%s2726_s3 + $0x80] sm:$0xff]   ;;  %v1640_v6 = vld [vmem:[%s2728_s1 + $0x8] sm:$0xff]  ;;  %v2166_v14 = vld [vmem:[%s2726_s3 + $0x138] sm:$0xff]  }
  0x18   :  { %1927 = vmatpush3.bf16.msra.mxu0 %v2114_v22  ;;  %v2159_v5 = vld [vmem:[%s2727_s2 + $0x80] sm:$0xff]   ;;  %v1673_v7 = vcombine.low %v1640_v6, %v1640_v6  ;;  %v1674_v8 = vcombine.high %v1640_v6, %v1640_v6  ;;  %v1607_v9 = vld [vmem:[%s2729_s0 + $0x8] sm:$0xff]  ;;  %v2167_v15 = vld [vmem:[%s2727_s2 + $0x138] sm:$0xff]  }
  0x19   :  { %1949 = vmatpush3.bf16.msra.mxu1 %v2115_v23  ;;  %1928 = vmatprep.subr.bf16.mxu0 %v2116_v24  ;;  %v1691_v10 = vcombine.low %v1607_v9, %v1607_v9  ;;  %v1692_v11 = vcombine.high %v1607_v9, %v1607_v9  ;;  %v2168_v16 = vld [vmem:[%s2726_s3 + $0x170] sm:$0xff]   ;;  %v2172_v20 = vld [vmem:[%s2726_s3 + $0x168] sm:$0xff]   ;;  %v2176_v24 = vld [vmem:[%s2726_s3 + $0x160] sm:$0xff]  }
  0x1a   :  { %1950 = vmatprep.subr.bf16.mxu1 %v2117_v25  ;;  %v2169_v17 = vld [vmem:[%s2727_s2 + $0x170] sm:$0xff]   ;;  %v2173_v21 = vld [vmem:[%s2727_s2 + $0x168] sm:$0xff]   ;;  %v2177_v25 = vld [vmem:[%s2727_s2 + $0x160] sm:$0xff]  }
  0x1b   :  { %v2170_v18 = vld [vmem:[%s2726_s3 + $0x130] sm:$0xff]   ;;  %v2174_v22 = vld [vmem:[%s2726_s3 + $0x128] sm:$0xff]  }
  0x1c   :  { %1929 = vmatpush3.bf16.msra.mxu0 %v2118_v26  ;;  %v2171_v19 = vld [vmem:[%s2727_s2 + $0x130] sm:$0xff]   ;;  %v2175_v23 = vld [vmem:[%s2727_s2 + $0x128] sm:$0xff]   ;;  %v2178_v26 = vld [vmem:[%s2726_s3 + $0x120] sm:$0xff]  }
  0x1d   :  { %1951 = vmatpush3.bf16.msra.mxu1 %v2119_v27  ;;  %1930 = vmatprep.subr.bf16.mxu0 %v2120_v28  ;;  %v2179_v27 = vld [vmem:[%s2727_s2 + $0x120] sm:$0xff]   ;;  %v2180_v28 = vld [vmem:[%s2726_s3 + $0x158] sm:$0xff]   ;;  %v2184_v32 = vld [vmem:[%s2726_s3 + $0x150] sm:$0xff]  }
  0x1e   :  { %1952 = vmatprep.subr.bf16.mxu1 %v2121_v29  ;;  %v2181_v29 = vld [vmem:[%s2727_s2 + $0x158] sm:$0xff]   ;;  %v2185_v33 = vld [vmem:[%s2727_s2 + $0x150] sm:$0xff]   ;;  %v2189_v37 = vld [vmem:[%s2727_s2 + $0x148] sm:$0xff]  }
  0x1f   :  { %v2187_v35 = vld [vmem:[%s2727_s2 + $0x110] sm:$0xff]  }
  0x20   :  { %1931 = vmatpush3.bf16.msra.mxu0 %v2122_v30  ;;  %v2182_v30 = vld [vmem:[%s2726_s3 + $0x118] sm:$0xff]   ;;  %v2220_v6 = vld [vmem:[%s2726_s3 + $0x1d0] sm:$0xff]  }
  0x21   :  { %1953 = vmatpush3.bf16.msra.mxu1 %v2123_v31  ;;  %1960 = vmatprep.subr.bf16.mxu0 %v2128_v38  ;;  %v2183_v31 = vld [vmem:[%s2727_s2 + $0x118] sm:$0xff]   ;;  %v2190_v38 = vld [vmem:[%s2726_s3 + $0x108] sm:$0xff]   ;;  %v2223_v9 = vld [vmem:[%s2727_s2 + $0x190] sm:$0xff]  }
  0x22   :  { %1982 = vmatprep.subr.bf16.mxu1 %v2129_v39  ;;  %v2191_v39 = vld [vmem:[%s2727_s2 + $0x108] sm:$0xff]  }
  0x23   :  { %223 = vmatmul.mubr.bf16.vlgmr.msra.gmra.mxu0 %v1571_v34  ;;  %v2186_v34 = vld [vmem:[%s2726_s3 + $0x110] sm:$0xff]  }
  0x24   :  { %366 = vmatmul.mubr.bf16.vlgmr.msra.gmra.mxu1 %v1589_v36  ;;  %1961 = vmatpush3.bf16.msra.mxu0 %v2130_v40  ;;  %v2188_v36 = vld [vmem:[%s2726_s3 + $0x148] sm:$0xff]   ;;  %v2192_v40 = vld [vmem:[%s2726_s3 + $0x140] sm:$0xff]  }
  0x25   :  { %1983 = vmatpush3.bf16.msra.mxu1 %v2131_v41  ;;  %1962 = vmatprep.subr.bf16.mxu0 %v2132_v42  ;;  %v2193_v41 = vld [vmem:[%s2727_s2 + $0x140] sm:$0xff]  }
  0x26   :  { %1984 = vmatprep.subr.bf16.mxu1 %v2133_v43  ;;  %580 = vmatprep.mubr.bf16.mxu0 %v1674_v8  ;;  %v2194_v42 = vld [vmem:[%s2726_s3 + $0x100] sm:$0xff]   ;;  %v2222_v8 = vld [vmem:[%s2726_s3 + $0x190] sm:$0xff]  }
  0x27   :  { %723 = vmatprep.mubr.bf16.mxu1 %v1692_v11  ;;  %v2195_v43 = vld [vmem:[%s2727_s2 + $0x100] sm:$0xff]   ;;  %v2225_v11 = vld [vmem:[%s2727_s2 + $0x1c8] sm:$0xff]  }
  0x28   :  { %1963 = vmatpush3.bf16.msra.mxu0 %v2134_v44  ;;  %v1742_v44 = vld [vmem:[%s2728_s1 + $0x10] sm:$0xff] }
  0x29   :  { %1985 = vmatpush3.bf16.msra.mxu1 %v2135_v45  ;;  %1964 = vmatprep.subr.bf16.mxu0 %v2136_v46  ;;  %v1709_v45 = vld [vmem:[%s2729_s0 + $0x10] sm:$0xff]  ;;  %v1775_v46 = vcombine.low %v1742_v44, %v1742_v44 }
  0x2a   :  { %1986 = vmatprep.subr.bf16.mxu1 %v2137_v47  ;;  %v1776_v47 = vcombine.high %v1742_v44, %v1742_v44 }
  0x2c   :  { %1965 = vmatpush3.bf16.msra.mxu0 %v2138_v48  ;;  %v1793_v48 = vcombine.low %v1709_v45, %v1709_v45 }
  0x2d   :  { %1987 = vmatpush3.bf16.msra.mxu1 %v2139_v49  ;;  %1966 = vmatprep.subr.bf16.mxu0 %v2140_v50  ;;  %v1794_v49 = vcombine.high %v1709_v45, %v1709_v45  ;;  %v2200_v50 = vld [vmem:[%s2726_s3 + $0x1f8] sm:$0xff]  }
  0x2e   :  { %1988 = vmatprep.subr.bf16.mxu1 %v2141_v51  ;;  %v2201_v51 = vld [vmem:[%s2727_s2 + $0x1f8] sm:$0xff]  }
  0x30   :  { %1967 = vmatpush3.bf16.msra.mxu0 %v2142_v52  ;;  %v2202_v52 = vld [vmem:[%s2726_s3 + $0x1b8] sm:$0xff]  }
  0x31   :  { %1989 = vmatpush3.bf16.msra.mxu1 %v2143_v53  ;;  %1968 = vmatprep.subr.bf16.mxu0 %v2144_v54  ;;  %v2203_v53 = vld [vmem:[%s2727_s2 + $0x1b8] sm:$0xff]   ;;  %v2204_v54 = vld [vmem:[%s2726_s3 + $0x1f0] sm:$0xff]  }
  0x32   :  { %1990 = vmatprep.subr.bf16.mxu1 %v2145_v55  ;;  %v2205_v55 = vld [vmem:[%s2727_s2 + $0x1f0] sm:$0xff]  }
  0x34   :  { %1969 = vmatpush3.bf16.msra.mxu0 %v2146_v56  ;;  %v2206_v56 = vld [vmem:[%s2726_s3 + $0x1b0] sm:$0xff]  }
  0x35   :  { %1991 = vmatpush3.bf16.msra.mxu1 %v2147_v57  ;;  %1970 = vmatprep.subr.bf16.mxu0 %v2148_v58  ;;  %v2207_v57 = vld [vmem:[%s2727_s2 + $0x1b0] sm:$0xff]   ;;  %v2208_v58 = vld [vmem:[%s2726_s3 + $0x1e8] sm:$0xff]  }
  0x36   :  { %1992 = vmatprep.subr.bf16.mxu1 %v2149_v59  ;;  %v2209_v59 = vld [vmem:[%s2727_s2 + $0x1e8] sm:$0xff]  }
  0x38   :  { %1971 = vmatpush3.bf16.msra.mxu0 %v2150_v60  ;;  %v2210_v60 = vld [vmem:[%s2726_s3 + $0x1a8] sm:$0xff]  }
  0x39   :  { %1993 = vmatpush3.bf16.msra.mxu1 %v2151_v61  ;;  %1972 = vmatprep.subr.bf16.mxu0 %v2152_v62  ;;  %v2211_v61 = vld [vmem:[%s2727_s2 + $0x1a8] sm:$0xff]   ;;  %v2212_v62 = vld [vmem:[%s2726_s3 + $0x1e0] sm:$0xff]  }
  0x3a   :  { %1994 = vmatprep.subr.bf16.mxu1 %v2153_v63  ;;  %v2213_v63 = vld [vmem:[%s2727_s2 + $0x1e0] sm:$0xff]  }
  0x3c   :  { %1973 = vmatpush3.bf16.msra.mxu0 %v2154_v0  ;;  %v2214_v0 = vld [vmem:[%s2726_s3 + $0x1a0] sm:$0xff]  }
  0x3d   :  { %1995 = vmatpush3.bf16.msra.mxu1 %v2155_v1  ;;  %1974 = vmatprep.subr.bf16.mxu0 %v2156_v2  ;;  %v2215_v1 = vld [vmem:[%s2727_s2 + $0x1a0] sm:$0xff]   ;;  %v2216_v2 = vld [vmem:[%s2726_s3 + $0x1d8] sm:$0xff]  }
  0x3e   :  { %1996 = vmatprep.subr.bf16.mxu1 %v2157_v3  ;;  %v2217_v3 = vld [vmem:[%s2727_s2 + $0x1d8] sm:$0xff]  }
  0x40   :  { %1975 = vmatpush3.bf16.msra.mxu0 %v2158_v4  ;;  %v2218_v4 = vld [vmem:[%s2726_s3 + $0x198] sm:$0xff]  }
  0x41   :  { %1997 = vmatpush3.bf16.msra.mxu1 %v2159_v5  ;;  %2004 = vmatprep.subr.bf16.mxu0 %v2164_v12  ;;  %v2219_v5 = vld [vmem:[%s2727_s2 + $0x198] sm:$0xff]   ;;  %v2226_v12 = vld [vmem:[%s2726_s3 + $0x188] sm:$0xff]  }
  0x42   :  { %2026 = vmatprep.subr.bf16.mxu1 %v2165_v13  ;;  %v2227_v13 = vld [vmem:[%s2727_s2 + $0x188] sm:$0xff]  }
  0x43   :  { %581 = vmatmul.mubr.bf16.vlgmr.msra.gmra.mxu0 %v1673_v7  ;;  %v2221_v7 = vld [vmem:[%s2727_s2 + $0x1d0] sm:$0xff]  }
  0x44   :  { %724 = vmatmul.mubr.bf16.vlgmr.msra.gmra.mxu1 %v1691_v10  ;;  %2005 = vmatpush3.bf16.msra.mxu0 %v2166_v14  ;;  %v2224_v10 = vld [vmem:[%s2726_s3 + $0x1c8] sm:$0xff]   ;;  %v2228_v14 = vld [vmem:[%s2726_s3 + $0x1c0] sm:$0xff]  }
  0x45   :  { %2027 = vmatpush3.bf16.msra.mxu1 %v2167_v15  ;;  %2006 = vmatprep.subr.bf16.mxu0 %v2168_v16  ;;  %v2229_v15 = vld [vmem:[%s2727_s2 + $0x1c0] sm:$0xff]  }
  0x46   :  { %2028 = vmatprep.subr.bf16.mxu1 %v2169_v17  ;;  %938 = vmatprep.mubr.bf16.mxu0 %v1776_v47  ;;  %v2230_v16 = vld [vmem:[%s2726_s3 + $0x180] sm:$0xff]  }
  0x47   :  { %1081 = vmatprep.mubr.bf16.mxu1 %v1794_v49  ;;  %v2231_v17 = vld [vmem:[%s2727_s2 + $0x180] sm:$0xff]  }
  0x48   :  { %2007 = vmatpush3.bf16.msra.mxu0 %v2170_v18  ;;  %v1844_v18 = vld [vmem:[%s2728_s1 + $0x18] sm:$0xff] }
  0x49   :  { %2029 = vmatpush3.bf16.msra.mxu1 %v2171_v19  ;;  %2008 = vmatprep.subr.bf16.mxu0 %v2172_v20  ;;  %v1811_v19 = vld [vmem:[%s2729_s0 + $0x18] sm:$0xff]  ;;  %v1877_v20 = vcombine.low %v1844_v18, %v1844_v18 }
  0x4a   :  { %2030 = vmatprep.subr.bf16.mxu1 %v2173_v21  ;;  %v1878_v21 = vcombine.high %v1844_v18, %v1844_v18 }
  0x4c   :  { %2009 = vmatpush3.bf16.msra.mxu0 %v2174_v22  ;;  %v1895_v22 = vcombine.low %v1811_v19, %v1811_v19 }
  0x4d   :  { %2031 = vmatpush3.bf16.msra.mxu1 %v2175_v23  ;;  %2010 = vmatprep.subr.bf16.mxu0 %v2176_v24  ;;  %v1896_v23 = vcombine.high %v1811_v19, %v1811_v19 }
  0x4e   :  { %2032 = vmatprep.subr.bf16.mxu1 %v2177_v25 }
  0x50   :  { %2011 = vmatpush3.bf16.msra.mxu0 %v2178_v26 }
  0x51   :  { %2033 = vmatpush3.bf16.msra.mxu1 %v2179_v27  ;;  %2012 = vmatprep.subr.bf16.mxu0 %v2180_v28 }
  0x52   :  { %2034 = vmatprep.subr.bf16.mxu1 %v2181_v29 }
  0x54   :  { %2013 = vmatpush3.bf16.msra.mxu0 %v2182_v30 }
  0x55   :  { %2035 = vmatpush3.bf16.msra.mxu1 %v2183_v31  ;;  %2014 = vmatprep.subr.bf16.mxu0 %v2184_v32 }
  0x56   :  { %2036 = vmatprep.subr.bf16.mxu1 %v2185_v33 }
  0x58   :  { %2015 = vmatpush3.bf16.msra.mxu0 %v2186_v34 }
  0x59   :  { %2037 = vmatpush3.bf16.msra.mxu1 %v2187_v35  ;;  %2016 = vmatprep.subr.bf16.mxu0 %v2188_v36 }
  0x5a   :  { %2038 = vmatprep.subr.bf16.mxu1 %v2189_v37 }
  0x5c   :  { %2017 = vmatpush3.bf16.msra.mxu0 %v2190_v38 }
  0x5d   :  { %2039 = vmatpush3.bf16.msra.mxu1 %v2191_v39  ;;  %2018 = vmatprep.subr.bf16.mxu0 %v2192_v40 }
  0x5e   :  { %2040 = vmatprep.subr.bf16.mxu1 %v2193_v41 }
  0x60   :  { %2019 = vmatpush3.bf16.msra.mxu0 %v2194_v42 }
  0x61   :  { %2041 = vmatpush3.bf16.msra.mxu1 %v2195_v43  ;;  %2048 = vmatprep.subr.bf16.mxu0 %v2200_v50 }
  0x62   :  { %2070 = vmatprep.subr.bf16.mxu1 %v2201_v51 }
  0x63   :  { %939 = vmatmul.mubr.bf16.vlgmr.msra.gmra.mxu0 %v1775_v46 }
  0x64   :  { %1082 = vmatmul.mubr.bf16.vlgmr.msra.gmra.mxu1 %v1793_v48  ;;  %2049 = vmatpush3.bf16.msra.mxu0 %v2202_v52 }
  0x65   :  { %2071 = vmatpush3.bf16.msra.mxu1 %v2203_v53  ;;  %2050 = vmatprep.subr.bf16.mxu0 %v2204_v54 }
  0x66   :  { %2072 = vmatprep.subr.bf16.mxu1 %v2205_v55  ;;  %1296 = vmatprep.mubr.bf16.mxu0 %v1878_v21 }
  0x67   :  { %1439 = vmatprep.mubr.bf16.mxu1 %v1896_v23 }
  0x68   :  { %2051 = vmatpush3.bf16.msra.mxu0 %v2206_v56 }
  0x69   :  { %2073 = vmatpush3.bf16.msra.mxu1 %v2207_v57  ;;  %2052 = vmatprep.subr.bf16.mxu0 %v2208_v58 }
  0x6a   :  { %2074 = vmatprep.subr.bf16.mxu1 %v2209_v59 }
  0x6c   :  { %2053 = vmatpush3.bf16.msra.mxu0 %v2210_v60 }
  0x6d   :  { %2075 = vmatpush3.bf16.msra.mxu1 %v2211_v61  ;;  %2054 = vmatprep.subr.bf16.mxu0 %v2212_v62 }
  0x6e   :  { %2076 = vmatprep.subr.bf16.mxu1 %v2213_v63 }
  0x70   :  { %2055 = vmatpush3.bf16.msra.mxu0 %v2214_v0 }
  0x71   :  { %2077 = vmatpush3.bf16.msra.mxu1 %v2215_v1  ;;  %2056 = vmatprep.subr.bf16.mxu0 %v2216_v2 }
  0x72   :  { %2078 = vmatprep.subr.bf16.mxu1 %v2217_v3 }
  0x74   :  { %2057 = vmatpush3.bf16.msra.mxu0 %v2218_v4 }
  0x75   :  { %2079 = vmatpush3.bf16.msra.mxu1 %v2219_v5  ;;  %2058 = vmatprep.subr.bf16.mxu0 %v2220_v6 }
  0x76   :  { %2080 = vmatprep.subr.bf16.mxu1 %v2221_v7 }
  0x78   :  { %2059 = vmatpush3.bf16.msra.mxu0 %v2222_v8 }
  0x79   :  { %2081 = vmatpush3.bf16.msra.mxu1 %v2223_v9  ;;  %2060 = vmatprep.subr.bf16.mxu0 %v2224_v10 }
  0x7a   :  { %2082 = vmatprep.subr.bf16.mxu1 %v2225_v11 }
  0x7c   :  { %2061 = vmatpush3.bf16.msra.mxu0 %v2226_v12 }
  0x7d   :  { %2083 = vmatpush3.bf16.msra.mxu1 %v2227_v13  ;;  %2062 = vmatprep.subr.bf16.mxu0 %v2228_v14 }
  0x7e   :  { %2084 = vmatprep.subr.bf16.mxu1 %v2229_v15 }
  0x80   :  { %2063 = vmatpush3.bf16.msra.mxu0 %v2230_v16 }
  0x81   :  { %2085 = vmatpush3.bf16.msra.mxu1 %v2231_v17 }
  0x83   :  { %1297 = vmatmul.mubr.bf16.vlgmr.msra.gmra.mxu0 %v1877_v20 }
  0x84   :  { %1440 = vmatmul.mubr.bf16.vlgmr.msra.gmra.mxu1 %v1895_v22 }
  0xe3   :  { %v1932_v24 = vpop.f32.mrf.mxu0 }
  0xe4   :  { %v1954_v25 = vpop.f32.mrf.mxu1 }
  0xe5   :  { %v1933_v26 = vpop.f32.mrf.mxu0 }
  0xe6   :  { %v1955_v27 = vpop.f32.mrf.mxu1  ;;  %v1934_v28 = vadd.f32 %v1933_v26, %v1932_v24 }
  0xe7   :  { %v1956_v29 = vadd.f32 %v1955_v27, %v1954_v25  ;;  %v1935_v30 = vpop.f32.mrf.mxu0 }
  0xe8   :  { %v1957_v31 = vpop.f32.mrf.mxu1 }
  0xe9   :  { %v368_v32 = vadd.f32 %v1956_v29, %v1934_v28  ;;  %v1936_v33 = vpop.f32.mrf.mxu0 }
  0xea   :  { %v1958_v34 = vpop.f32.mrf.mxu1 }
  0xeb   :  { %374 = vst.msk [vmem:[#allocation2] sm:$0xff] %vm373_vm0, %v368_v32 }
  0xf2   :  { %v2681_v58 = vld [vmem:[#allocation2] sm:$0xff] }
  0xf3   :  { %v1452_v61 = vsel %vm373_vm0, %v2681_v58, 0.0 }
  0xf4   :  { %v1453_v3 = vrot.slane %v1452_v61, 4 }
  0xf6   :  { %v1454_v13 = vadd.f32 %v1453_v3, %v1452_v61 }
  0xf8   :  { %v1455_v17 = vrot.slane %v1454_v13, 2 }
  0xfa   :  { %v1456_v20 = vadd.f32 %v1455_v17, %v1454_v13 }
  0xfc   :  { %v1457_v26 = vrot.slane %v1456_v20, 1 }
  0xfe   :  { %v1458_v31 = vadd.f32 %v1457_v26, %v1456_v20  ;;  %v1532_v20 = vlaneseq }
 0x103   :  { %v1976_v35 = vpop.f32.mrf.mxu0 }
 0x104   :  { %v1998_v36 = vpop.f32.mrf.mxu1 }
 0x105   :  { %v1977_v37 = vpop.f32.mrf.mxu0 }
 0x106   :  { %v1999_v38 = vpop.f32.mrf.mxu1  ;;  %v1978_v39 = vadd.f32 %v1977_v37, %v1976_v35 }
 0x107   :  { %v2000_v40 = vadd.f32 %v1999_v38, %v1998_v36  ;;  %v1979_v41 = vpop.f32.mrf.mxu0 }
 0x108   :  { %v2001_v42 = vpop.f32.mrf.mxu1 }
 0x109   :  { %v726_v43 = vadd.f32 %v2000_v40, %v1978_v39  ;;  %v1980_v44 = vpop.f32.mrf.mxu0 }
 0x10a   :  { %v2002_v45 = vpop.f32.mrf.mxu1 }
 0x10b   :  { %732 = vst.msk [vmem:[#allocation2 + $0x8] sm:$0xff] %vm373_vm0, %v726_v43 }
 0x112   :  { %v2679_v57 = vld [vmem:[#allocation2 + $0x8] sm:$0xff] }
 0x113   :  { %v1460_v60 = vsel %vm373_vm0, %v2679_v57, 0.0 }
 0x114   :  { %v1461_v0 = vrot.slane %v1460_v60, 4 }
 0x116   :  { %v1462_v9 = vadd.f32 %v1461_v0, %v1460_v60 }
 0x118   :  { %v1463_v16 = vrot.slane %v1462_v9, 2 }
 0x11a   :  { %v1464_v19 = vadd.f32 %v1463_v16, %v1462_v9 }
 0x11c   :  { %v1465_v24 = vrot.slane %v1464_v19, 1 }
 0x11e   :  { %v1466_v29 = vadd.f32 %v1465_v24, %v1464_v19 }
 0x120   :  { %v1467_v34 = vadd.f32 %v1466_v29, %v1458_v31 }
 0x123   :  { %v2020_v46 = vpop.f32.mrf.mxu0 }
 0x124   :  { %v2042_v47 = vpop.f32.mrf.mxu1 }
 0x125   :  { %v2021_v48 = vpop.f32.mrf.mxu0 }
 0x126   :  { %v2022_v49 = vadd.f32 %v2021_v48, %v2020_v46  ;;  %v2043_v50 = vpop.f32.mrf.mxu1 }
 0x127   :  { %v2044_v51 = vadd.f32 %v2043_v50, %v2042_v47  ;;  %v2023_v52 = vpop.f32.mrf.mxu0 }
 0x128   :  { %v2045_v53 = vpop.f32.mrf.mxu1 }
 0x129   :  { %v1084_v54 = vadd.f32 %v2044_v51, %v2022_v49  ;;  %v2024_v55 = vpop.f32.mrf.mxu0 }
 0x12a   :  { %v2046_v56 = vpop.f32.mrf.mxu1 }
 0x12b   :  { %1090 = vst.msk [vmem:[#allocation2 + $0x10] sm:$0xff] %vm373_vm0, %v1084_v54 }
 0x132   :  { %v2683_v59 = vld [vmem:[#allocation2 + $0x10] sm:$0xff] }
 0x133   :  { %v1469_v62 = vsel %vm373_vm0, %v2683_v59, 0.0 }
 0x134   :  { %v1470_v4 = vrot.slane %v1469_v62, 4 }
 0x136   :  { %v1471_v14 = vadd.f32 %v1470_v4, %v1469_v62 }
 0x138   :  { %v1472_v18 = vrot.slane %v1471_v14, 2 }
 0x13a   :  { %v1473_v21 = vadd.f32 %v1472_v18, %v1471_v14 }
 0x13c   :  { %v1474_v27 = vrot.slane %v1473_v21, 1 }
 0x13e   :  { %v1475_v32 = vadd.f32 %v1474_v27, %v1473_v21  ;;  %v1533_v21 = vshrl.u32 %v1532_v20, 7  ;;  %v1450_v27 = vld [vmem:[%s2730_s4 + $0x1] sm:$0x1] }
 0x140   :  { %v1476_v36 = vadd.f32 %v1475_v32, %v1467_v34  ;;  %v1534_v24 = vsub.s32 0, %v1533_v21 }
 0x143   :  { %v2064_v63 = vpop.f32.mrf.mxu0 }
 0x144   :  { %v2086_v1 = vpop.f32.mrf.mxu1 }
 0x145   :  { %v2065_v2 = vpop.f32.mrf.mxu0 }
 0x146   :  { %v2066_v5 = vadd.f32 %v2065_v2, %v2064_v63  ;;  %v2087_v6 = vpop.f32.mrf.mxu1 }
 0x147   :  { %v2088_v7 = vadd.f32 %v2087_v6, %v2086_v1  ;;  %v2067_v8 = vpop.f32.mrf.mxu0 }
 0x148   :  { %v2089_v10 = vpop.f32.mrf.mxu1 }
 0x149   :  { %v1442_v11 = vadd.f32 %v2088_v7, %v2066_v5  ;;  %v2068_v12 = vpop.f32.mrf.mxu0 }
 0x14a   :  { %v2090_v15 = vpop.f32.mrf.mxu1 }
 0x14b   :  { %1448 = vst.msk [vmem:[#allocation2 + $0x18] sm:$0xff] %vm373_vm0, %v1442_v11 }
 0x152   :  { %v2692_v22 = vld [vmem:[#allocation2 + $0x18] sm:$0xff] }
 0x153   :  { %v1478_v23 = vsel %vm373_vm0, %v2692_v22, 0.0 }
 0x154   :  { %v1479_v25 = vrot.slane %v1478_v23, 4 }
 0x156   :  { %v1480_v28 = vadd.f32 %v1479_v25, %v1478_v23  ;;  %v1449_v23 = vld [vmem:[%s2730_s4] sm:$0x1] }
 0x158   :  { %v1481_v30 = vrot.slane %v1480_v28, 2 }
 0x15a   :  { %v1482_v33 = vadd.f32 %v1481_v30, %v1480_v28 }
 0x15c   :  { %v1483_v35 = vrot.slane %v1482_v33, 1 }
 0x15e   :  { %v1484_v37 = vadd.f32 %v1483_v35, %v1482_v33 }
 0x160   :  { %v1485_v38 = vadd.f32 %v1484_v37, %v1476_v36 }
 0x162   :  { %v1486_v39 = vmul.f32 0.03125, %v1485_v38 }
 0x164   :  { %v1487_v40 = vsub.f32 %v2681_v58, %v1486_v39  ;;  %v1496_v41 = vsub.f32 %v2679_v57, %v1486_v39  ;;  %v1506_v42 = vsub.f32 %v2683_v59, %v1486_v39  ;;  %v1516_v43 = vsub.f32 %v2692_v22, %v1486_v39 }
 0x166   :  { %v1488_v44 = vmul.f32 %v1487_v40, %v1487_v40  ;;  %v1497_v45 = vmul.f32 %v1496_v41, %v1496_v41  ;;  %v1507_v46 = vmul.f32 %v1506_v42, %v1506_v42  ;;  %v1517_v47 = vmul.f32 %v1516_v43, %v1516_v43 }
 0x168   :  { %v1489_v48 = vsel %vm373_vm0, %v1488_v44, 0.0  ;;  %v1498_v49 = vsel %vm373_vm0, %v1497_v45, 0.0  ;;  %v1508_v50 = vsel %vm373_vm0, %v1507_v46, 0.0  ;;  %v1518_v51 = vsel %vm373_vm0, %v1517_v47, 0.0 }
 0x169   :  { %v1490_v52 = vrot.slane %v1489_v48, 4  ;;  %v1499_v53 = vrot.slane %v1498_v49, 4  ;;  %v1509_v54 = vrot.slane %v1508_v50, 4  ;;  %v1519_v55 = vrot.slane %v1518_v51, 4 }
 0x16b   :  { %v1491_v56 = vadd.f32 %v1490_v52, %v1489_v48  ;;  %v1500_v60 = vadd.f32 %v1499_v53, %v1498_v49  ;;  %v1510_v61 = vadd.f32 %v1509_v54, %v1508_v50  ;;  %v1520_v62 = vadd.f32 %v1519_v55, %v1518_v51 }
 0x16d   :  { %v1492_v63 = vrot.slane %v1491_v56, 2  ;;  %v1501_v0 = vrot.slane %v1500_v60, 2  ;;  %v1511_v1 = vrot.slane %v1510_v61, 2  ;;  %v1521_v2 = vrot.slane %v1520_v62, 2 }
 0x16f   :  { %v1493_v3 = vadd.f32 %v1492_v63, %v1491_v56  ;;  %v1502_v4 = vadd.f32 %v1501_v0, %v1500_v60  ;;  %v1512_v5 = vadd.f32 %v1511_v1, %v1510_v61  ;;  %v1522_v6 = vadd.f32 %v1521_v2, %v1520_v62 }
 0x171   :  { %v1494_v7 = vrot.slane %v1493_v3, 1  ;;  %v1503_v8 = vrot.slane %v1502_v4, 1  ;;  %v1513_v9 = vrot.slane %v1512_v5, 1  ;;  %v1523_v12 = vrot.slane %v1522_v6, 1 }
 0x173   :  { %v1495_v10 = vadd.f32 %v1494_v7, %v1493_v3  ;;  %v1504_v11 = vadd.f32 %v1503_v8, %v1502_v4  ;;  %v1514_v14 = vadd.f32 %v1513_v9, %v1512_v5  ;;  %v1524_v16 = vadd.f32 %v1523_v12, %v1522_v6 }
 0x175   :  { %v1505_v13 = vadd.f32 %v1504_v11, %v1495_v10 }
 0x177   :  { %v1515_v15 = vadd.f32 %v1514_v14, %v1505_v13 }
 0x179   :  { %v1525_v17 = vadd.f32 %v1524_v16, %v1515_v15 }
 0x17b   :  { %v1526_v18 = vmul.f32 0.03125, %v1525_v17 }
 0x17d   :  { %v1527_v19 = vadd.f32 1e-05, %v1526_v18 }
 0x17f   :  { %2236 = vrsqrt.f32 %v1527_v19 }
 0x18c   :  { %v2237_v25 = vpop.eup %2236 }
 0x18d   :  { %v1529_v26 = vmul.f32 %v2237_v25, %v1449_v23 }
 0x18f   :  { %v1530_v28 = vmul.f32 %v1529_v26, %v1486_v39  ;;  %v1535_v29 = vrot.slane %v1529_v26, %v1534_v24 }
 0x191   :  { %v1531_v30 = vsub.f32 %v1450_v27, %v1530_v28  ;;  %v1536_v31 = vmul.f32 %v1535_v29, %v2681_v58  ;;  %v1547_v33 = vmul.f32 %v1535_v29, %v2679_v57  ;;  %v1554_v34 = vmul.f32 %v1535_v29, %v2683_v59 }
 0x192   :  { %v1561_v35 = vmul.f32 %v1535_v29, %v2692_v22 }
 0x193   :  { %v1540_v32 = vrot.slane %v1531_v30, %v1534_v24 }
 0x195   :  { %v1541_v36 = vadd.f32 %v1540_v32, %v1536_v31  ;;  %v1548_v37 = vadd.f32 %v1547_v33, %v1540_v32  ;;  %v1555_v38 = vadd.f32 %v1554_v34, %v1540_v32  ;;  %v1562_v40 = vadd.f32 %v1561_v35, %v1540_v32 }
 0x197   :  { %v1542_v41 = vmax.f32 %v1541_v36, 0.0  ;;  %v1549_v42 = vmax.f32 %v1548_v37, 0.0  ;;  %v1556_v43 = vmax.f32 %v1555_v38, 0.0  ;;  %v1563_v44 = vmax.f32 %v1562_v40, 0.0 }
 0x199   :  { %v1543_v39 = vpack.c.bf16 %v1542_v41, %v1542_v41  ;;  %v1550_v45 = vpack.c.bf16 %v1549_v42, %v1549_v42  ;;  %v1557_v46 = vpack.c.bf16 %v1556_v43, %v1556_v43  ;;  %v1564_v58 = vpack.c.bf16 %v1563_v44, %v1563_v44 }
 0x19b   :  { %1545 = vst.msk [vmem:[%s2731_s5] sm:$0xf] %vm1544_vm1, %v1543_v39  ;;  %1913 = vst.msk [vmem:[%s2731_s5 + $0x4] sm:$0xf] %vm1544_vm1, %v1550_v45 }
 0x19c   :  { %1914 = vst.msk [vmem:[%s2731_s5 + $0x8] sm:$0xf] %vm1544_vm1, %v1557_v46  ;;  %1915 = vst.msk [vmem:[%s2731_s5 + $0xc] sm:$0xf] %vm1544_vm1, %v1564_v58 }

// kernel: unet_forward.17
= control target key start
LH: loop header
LB: loop body
LE: loop exit
PB: predicated region body
PF: predicated region fallthrough
CT: control target
= control target key end

     0   :  { %v1673_v0 = vmov 0.0   ;;  %vm1674_vm0 = vmmov 0   ;;  %vm247_vm1 = vcmask 261120   ;;  %s1677_s12 = smov 1   ;;  %vm1091_vm2 = vcmask 257024   ;;  %s2120_s3 = inlined_call_operand.vmem [shape: bf16[4,128,32], index: 3, kind: input, shape index: {}]   ;;  %s2121_s2 = inlined_call_operand.vmem [shape: bf16[4,128,32], index: 2, kind: input, shape index: {}]   ;;  %s2122_s1 = inlined_call_operand.vmem [shape: bf16[4,16,128], index: 1, kind: input, shape index: {}]   ;;  %s2123_s0 = inlined_call_operand.vmem [shape: bf16[4,16,128], index: 0, kind: input, shape index: {}]   ;;  %s2124_s4 = inlined_call_operand.vmem [shape: f32[16,2], index: 4, kind: input, shape index: {}]   ;;  %s2125_s5 = inlined_call_operand.vmem [shape: bf16[4,16,32], index: 5, kind: output, shape index: {}]  }
   0x1   :  { %1429 = vmatprep.subr.bf16.mxu0 %v1673_v0  ;;  %1449 = vmatprep.subr.bf16.mxu1 %v1673_v0  ;;  %v1597_v1 = vld [vmem:[%s2120_s3 + $0x38] sm:$0xff]   ;;  %v1599_v3 = vld [vmem:[%s2120_s3 + $0x30] sm:$0xff]   ;;  %v1601_v5 = vld [vmem:[%s2120_s3 + $0x28] sm:$0xff]  }
   0x2   :  { %v1598_v2 = vld [vmem:[%s2121_s2 + $0x38] sm:$0xff]   ;;  %1445 = vmatprep.mubr.msk.bf16.mxu0 %vm1674_vm0, %v1673_v0  ;;  %1465 = vmatprep.mubr.msk.bf16.mxu1 %vm1674_vm0, %v1673_v0  ;;  %v1600_v4 = vld [vmem:[%s2121_s2 + $0x30] sm:$0xff]   ;;  %v1602_v6 = vld [vmem:[%s2121_s2 + $0x28] sm:$0xff]  }
   0x3   :  { %1430 = vmatpush3.bf16.msra.mxu0 %v1597_v1  ;;  %1450 = vmatpush3.bf16.msra.mxu1 %v1598_v2  ;;  %v1603_v7 = vld [vmem:[%s2120_s3 + $0x20] sm:$0xff]   ;;  %v1605_v9 = vld [vmem:[%s2120_s3 + $0x18] sm:$0xff]   ;;  %v1607_v11 = vld [vmem:[%s2120_s3 + $0x10] sm:$0xff]  }
   0x4   :  { %1431 = vmatprep.subr.bf16.mxu0 %v1673_v0  ;;  %1451 = vmatprep.subr.bf16.mxu1 %v1673_v0  ;;  %v1604_v8 = vld [vmem:[%s2121_s2 + $0x20] sm:$0xff]   ;;  %v1606_v10 = vld [vmem:[%s2121_s2 + $0x18] sm:$0xff]   ;;  %v1608_v12 = vld [vmem:[%s2121_s2 + $0x10] sm:$0xff]  }
   0x5   :  { %v1609_v13 = vld [vmem:[%s2120_s3 + $0x8] sm:$0xff]   ;;  %v1611_v15 = vld [vmem:[%s2120_s3] sm:$0xff]   ;;  %v1615_v19 = vld [vmem:[%s2120_s3 + $0x78] sm:$0xff]  }
   0x6   :  { %v1610_v14 = vld [vmem:[%s2121_s2 + $0x8] sm:$0xff]   ;;  %v1612_v16 = vld [vmem:[%s2121_s2] sm:$0xff]   ;;  %v1616_v20 = vld [vmem:[%s2121_s2 + $0x78] sm:$0xff]  }
   0x7   :  { %1432 = vmatpush3.bf16.msra.mxu0 %v1599_v3  ;;  %1452 = vmatpush3.bf16.msra.mxu1 %v1600_v4  ;;  %v1613_v17 = vld [vmem:[%s2122_s1] sm:$0xff]   ;;  %v1617_v21 = vld [vmem:[%s2120_s3 + $0x70] sm:$0xff]   ;;  %v1619_v23 = vld [vmem:[%s2120_s3 + $0x68] sm:$0xff]  }
   0x8   :  { %1433 = vmatprep.subr.bf16.mxu0 %v1673_v0  ;;  %1453 = vmatprep.subr.bf16.mxu1 %v1673_v0  ;;  %v1614_v18 = vld [vmem:[%s2123_s0] sm:$0xff]   ;;  %v1618_v22 = vld [vmem:[%s2121_s2 + $0x70] sm:$0xff]   ;;  %v1620_v24 = vld [vmem:[%s2121_s2 + $0x68] sm:$0xff]  }
   0x9   :  { %v1621_v25 = vld [vmem:[%s2120_s3 + $0x60] sm:$0xff]   ;;  %v1623_v27 = vld [vmem:[%s2120_s3 + $0x58] sm:$0xff]   ;;  %v1625_v29 = vld [vmem:[%s2120_s3 + $0x50] sm:$0xff]  }
   0xa   :  { %v1622_v26 = vld [vmem:[%s2121_s2 + $0x60] sm:$0xff]   ;;  %v1624_v28 = vld [vmem:[%s2121_s2 + $0x58] sm:$0xff]   ;;  %v1626_v30 = vld [vmem:[%s2121_s2 + $0x50] sm:$0xff]  }
   0xb   :  { %1434 = vmatpush3.bf16.msra.mxu0 %v1601_v5  ;;  %1454 = vmatpush3.bf16.msra.mxu1 %v1602_v6  ;;  %v1627_v31 = vld [vmem:[%s2120_s3 + $0x48] sm:$0xff]   ;;  %v1629_v33 = vld [vmem:[%s2120_s3 + $0x40] sm:$0xff]   ;;  %v1633_v37 = vld [vmem:[%s2120_s3 + $0xb8] sm:$0xff]  }
   0xc   :  { %1435 = vmatprep.subr.bf16.mxu0 %v1673_v0  ;;  %1455 = vmatprep.subr.bf16.mxu1 %v1673_v0  ;;  %v1628_v32 = vld [vmem:[%s2121_s2 + $0x48] sm:$0xff]   ;;  %v1630_v34 = vld [vmem:[%s2121_s2 + $0x40] sm:$0xff]   ;;  %v1634_v38 = vld [vmem:[%s2121_s2 + $0xb8] sm:$0xff]  }
   0xd   :  { %v1631_v35 = vld [vmem:[%s2122_s1 + $0x8] sm:$0xff]   ;;  %v1635_v39 = vld [vmem:[%s2120_s3 + $0xb0] sm:$0xff]   ;;  %v1639_v43 = vld [vmem:[%s2120_s3 + $0xa0] sm:$0xff]  }
   0xe   :  { %v1632_v36 = vld [vmem:[%s2123_s0 + $0x8] sm:$0xff]   ;;  %v1636_v40 = vld [vmem:[%s2121_s2 + $0xb0] sm:$0xff]   ;;  %v1640_v44 = vld [vmem:[%s2121_s2 + $0xa0] sm:$0xff]  }
   0xf   :  { %1436 = vmatpush3.bf16.msra.mxu0 %v1603_v7  ;;  %1456 = vmatpush3.bf16.msra.mxu1 %v1604_v8  ;;  %v1637_v41 = vld [vmem:[%s2120_s3 + $0xa8] sm:$0xff]   ;;  %v1641_v45 = vld [vmem:[%s2120_s3 + $0x98] sm:$0xff]   ;;  %v1643_v47 = vld [vmem:[%s2120_s3 + $0x90] sm:$0xff]  }
  0x10   :  { %1437 = vmatprep.subr.bf16.mxu0 %v1673_v0  ;;  %1457 = vmatprep.subr.bf16.mxu1 %v1673_v0  ;;  %v1638_v42 = vld [vmem:[%s2121_s2 + $0xa8] sm:$0xff]   ;;  %v1642_v46 = vld [vmem:[%s2121_s2 + $0x98] sm:$0xff]   ;;  %v1644_v48 = vld [vmem:[%s2121_s2 + $0x90] sm:$0xff]  }
  0x11   :  { %v1645_v49 = vld [vmem:[%s2120_s3 + $0x88] sm:$0xff]   ;;  %v1647_v51 = vld [vmem:[%s2120_s3 + $0x80] sm:$0xff]   ;;  %v1649_v53 = vld [vmem:[%s2122_s1 + $0x10] sm:$0xff]  }
  0x12   :  { %v1646_v50 = vld [vmem:[%s2121_s2 + $0x88] sm:$0xff]   ;;  %v1648_v52 = vld [vmem:[%s2121_s2 + $0x80] sm:$0xff]   ;;  %v1650_v54 = vld [vmem:[%s2123_s0 + $0x10] sm:$0xff]  }
  0x13   :  { %1438 = vmatpush3.bf16.msra.mxu0 %v1605_v9  ;;  %1458 = vmatpush3.bf16.msra.mxu1 %v1606_v10  ;;  %v1651_v55 = vld [vmem:[%s2120_s3 + $0xf8] sm:$0xff]   ;;  %v1653_v57 = vld [vmem:[%s2120_s3 + $0xf0] sm:$0xff]   ;;  %v1655_v59 = vld [vmem:[%s2120_s3 + $0xe8] sm:$0xff]  }
  0x14   :  { %1439 = vmatprep.subr.bf16.mxu0 %v1673_v0  ;;  %1459 = vmatprep.subr.bf16.mxu1 %v1673_v0  ;;  %v1652_v56 = vld [vmem:[%s2121_s2 + $0xf8] sm:$0xff]   ;;  %v1654_v58 = vld [vmem:[%s2121_s2 + $0xf0] sm:$0xff]   ;;  %v1656_v60 = vld [vmem:[%s2121_s2 + $0xe8] sm:$0xff]  }
  0x15   :  { %v1657_v61 = vld [vmem:[%s2120_s3 + $0xe0] sm:$0xff]   ;;  %v1659_v63 = vld [vmem:[%s2120_s3 + $0xd8] sm:$0xff]   ;;  %v1661_v2 = vld [vmem:[%s2120_s3 + $0xd0] sm:$0xff]  }
  0x16   :  { %v1658_v62 = vld [vmem:[%s2121_s2 + $0xe0] sm:$0xff]   ;;  %v1660_v1 = vld [vmem:[%s2121_s2 + $0xd8] sm:$0xff]   ;;  %v1662_v3 = vld [vmem:[%s2121_s2 + $0xd0] sm:$0xff]  }
  0x17   :  { %1440 = vmatpush3.bf16.msra.mxu0 %v1607_v11  ;;  %1460 = vmatpush3.bf16.msra.mxu1 %v1608_v12  ;;  %v1663_v4 = vld [vmem:[%s2120_s3 + $0xc8] sm:$0xff]   ;;  %v1665_v6 = vld [vmem:[%s2120_s3 + $0xc0] sm:$0xff]   ;;  %v1667_v8 = vld [vmem:[%s2122_s1 + $0x18] sm:$0xff]  }
  0x18   :  { %1441 = vmatprep.subr.bf16.mxu0 %v1673_v0  ;;  %1461 = vmatprep.subr.bf16.mxu1 %v1673_v0  ;;  %v1664_v5 = vld [vmem:[%s2121_s2 + $0xc8] sm:$0xff]   ;;  %v1666_v7 = vld [vmem:[%s2121_s2 + $0xc0] sm:$0xff]   ;;  %v1668_v9 = vld [vmem:[%s2123_s0 + $0x18] sm:$0xff]  }
  0x1b   :  { %1442 = vmatpush3.bf16.msra.mxu0 %v1609_v13  ;;  %1462 = vmatpush3.bf16.msra.mxu1 %v1610_v14 }
  0x1c   :  { %1443 = vmatprep.subr.bf16.mxu0 %v1673_v0  ;;  %1463 = vmatprep.subr.bf16.mxu1 %v1673_v0 }
  0x1f   :  { %1444 = vmatpush3.bf16.msra.mxu0 %v1611_v15  ;;  %1464 = vmatpush3.bf16.msra.mxu1 %v1612_v16 }
  0x20   :  { %1469 = vmatprep.subr.bf16.mxu0 %v1673_v0  ;;  %1489 = vmatprep.subr.bf16.mxu1 %v1673_v0 }
  0x22   :  { %1446 = vmatmul.mubr.bf16.vlgmr.msra.gmra.mxu0 %v1613_v17  ;;  %1466 = vmatmul.mubr.bf16.vlgmr.msra.gmra.mxu1 %v1614_v18 }
  0x23   :  { %1470 = vmatpush3.bf16.msra.mxu0 %v1615_v19  ;;  %1490 = vmatpush3.bf16.msra.mxu1 %v1616_v20 }
  0x24   :  { %1471 = vmatprep.subr.bf16.mxu0 %v1673_v0  ;;  %1491 = vmatprep.subr.bf16.mxu1 %v1673_v0 }
  0x25   :  { %1485 = vmatprep.mubr.msk.bf16.mxu0 %vm1674_vm0, %v1673_v0  ;;  %1505 = vmatprep.mubr.msk.bf16.mxu1 %vm1674_vm0, %v1673_v0 }
  0x27   :  { %1472 = vmatpush3.bf16.msra.mxu0 %v1617_v21  ;;  %1492 = vmatpush3.bf16.msra.mxu1 %v1618_v22 }
  0x28   :  { %1473 = vmatprep.subr.bf16.mxu0 %v1673_v0  ;;  %1493 = vmatprep.subr.bf16.mxu1 %v1673_v0 }
  0x2b   :  { %1474 = vmatpush3.bf16.msra.mxu0 %v1619_v23  ;;  %1494 = vmatpush3.bf16.msra.mxu1 %v1620_v24 }
  0x2c   :  { %1475 = vmatprep.subr.bf16.mxu0 %v1673_v0  ;;  %1495 = vmatprep.subr.bf16.mxu1 %v1673_v0 }
  0x2f   :  { %1476 = vmatpush3.bf16.msra.mxu0 %v1621_v25  ;;  %1496 = vmatpush3.bf16.msra.mxu1 %v1622_v26 }
  0x30   :  { %1477 = vmatprep.subr.bf16.mxu0 %v1673_v0  ;;  %1497 = vmatprep.subr.bf16.mxu1 %v1673_v0 }
  0x33   :  { %1478 = vmatpush3.bf16.msra.mxu0 %v1623_v27  ;;  %1498 = vmatpush3.bf16.msra.mxu1 %v1624_v28 }
  0x34   :  { %1479 = vmatprep.subr.bf16.mxu0 %v1673_v0  ;;  %1499 = vmatprep.subr.bf16.mxu1 %v1673_v0 }
  0x37   :  { %1480 = vmatpush3.bf16.msra.mxu0 %v1625_v29  ;;  %1500 = vmatpush3.bf16.msra.mxu1 %v1626_v30 }
  0x38   :  { %1481 = vmatprep.subr.bf16.mxu0 %v1673_v0  ;;  %1501 = vmatprep.subr.bf16.mxu1 %v1673_v0 }
  0x3b   :  { %1482 = vmatpush3.bf16.msra.mxu0 %v1627_v31  ;;  %1502 = vmatpush3.bf16.msra.mxu1 %v1628_v32 }
  0x3c   :  { %1483 = vmatprep.subr.bf16.mxu0 %v1673_v0  ;;  %1503 = vmatprep.subr.bf16.mxu1 %v1673_v0 }
  0x3f   :  { %1484 = vmatpush3.bf16.msra.mxu0 %v1629_v33  ;;  %1504 = vmatpush3.bf16.msra.mxu1 %v1630_v34 }
  0x40   :  { %1509 = vmatprep.subr.bf16.mxu0 %v1673_v0  ;;  %1529 = vmatprep.subr.bf16.mxu1 %v1673_v0 }
  0x42   :  { %1486 = vmatmul.mubr.bf16.vlgmr.msra.gmra.mxu0 %v1631_v35  ;;  %1506 = vmatmul.mubr.bf16.vlgmr.msra.gmra.mxu1 %v1632_v36 }
  0x43   :  { %1510 = vmatpush3.bf16.msra.mxu0 %v1633_v37  ;;  %1530 = vmatpush3.bf16.msra.mxu1 %v1634_v38 }
  0x44   :  { %1511 = vmatprep.subr.bf16.mxu0 %v1673_v0  ;;  %1531 = vmatprep.subr.bf16.mxu1 %v1673_v0 }
  0x45   :  { %1525 = vmatprep.mubr.msk.bf16.mxu0 %vm1674_vm0, %v1673_v0  ;;  %1545 = vmatprep.mubr.msk.bf16.mxu1 %vm1674_vm0, %v1673_v0 }
  0x47   :  { %1512 = vmatpush3.bf16.msra.mxu0 %v1635_v39  ;;  %1532 = vmatpush3.bf16.msra.mxu1 %v1636_v40 }
  0x48   :  { %1513 = vmatprep.subr.bf16.mxu0 %v1673_v0  ;;  %1533 = vmatprep.subr.bf16.mxu1 %v1673_v0 }
  0x4b   :  { %1514 = vmatpush3.bf16.msra.mxu0 %v1637_v41  ;;  %1534 = vmatpush3.bf16.msra.mxu1 %v1638_v42 }
  0x4c   :  { %1515 = vmatprep.subr.bf16.mxu0 %v1673_v0  ;;  %1535 = vmatprep.subr.bf16.mxu1 %v1673_v0 }
  0x4f   :  { %1516 = vmatpush3.bf16.msra.mxu0 %v1639_v43  ;;  %1536 = vmatpush3.bf16.msra.mxu1 %v1640_v44 }
  0x50   :  { %1517 = vmatprep.subr.bf16.mxu0 %v1673_v0  ;;  %1537 = vmatprep.subr.bf16.mxu1 %v1673_v0 }
  0x53   :  { %1518 = vmatpush3.bf16.msra.mxu0 %v1641_v45  ;;  %1538 = vmatpush3.bf16.msra.mxu1 %v1642_v46 }
  0x54   :  { %1519 = vmatprep.subr.bf16.mxu0 %v1673_v0  ;;  %1539 = vmatprep.subr.bf16.mxu1 %v1673_v0 }
  0x57   :  { %1520 = vmatpush3.bf16.msra.mxu0 %v1643_v47  ;;  %1540 = vmatpush3.bf16.msra.mxu1 %v1644_v48 }
  0x58   :  { %1521 = vmatprep.subr.bf16.mxu0 %v1673_v0  ;;  %1541 = vmatprep.subr.bf16.mxu1 %v1673_v0 }
  0x5b   :  { %1522 = vmatpush3.bf16.msra.mxu0 %v1645_v49  ;;  %1542 = vmatpush3.bf16.msra.mxu1 %v1646_v50 }
  0x5c   :  { %1523 = vmatprep.subr.bf16.mxu0 %v1673_v0  ;;  %1543 = vmatprep.subr.bf16.mxu1 %v1673_v0 }
  0x5f   :  { %1524 = vmatpush3.bf16.msra.mxu0 %v1647_v51  ;;  %1544 = vmatpush3.bf16.msra.mxu1 %v1648_v52 }
  0x60   :  { %1549 = vmatprep.subr.bf16.mxu0 %v1673_v0  ;;  %1569 = vmatprep.subr.bf16.mxu1 %v1673_v0 }
  0x62   :  { %1526 = vmatmul.mubr.bf16.vlgmr.msra.gmra.mxu0 %v1649_v53  ;;  %1546 = vmatmul.mubr.bf16.vlgmr.msra.gmra.mxu1 %v1650_v54 }
  0x63   :  { %1550 = vmatpush3.bf16.msra.mxu0 %v1651_v55  ;;  %1570 = vmatpush3.bf16.msra.mxu1 %v1652_v56 }
  0x64   :  { %1551 = vmatprep.subr.bf16.mxu0 %v1673_v0  ;;  %1571 = vmatprep.subr.bf16.mxu1 %v1673_v0 }
  0x65   :  { %1565 = vmatprep.mubr.msk.bf16.mxu0 %vm1674_vm0, %v1673_v0  ;;  %1585 = vmatprep.mubr.msk.bf16.mxu1 %vm1674_vm0, %v1673_v0 }
  0x67   :  { %1552 = vmatpush3.bf16.msra.mxu0 %v1653_v57  ;;  %1572 = vmatpush3.bf16.msra.mxu1 %v1654_v58 }
  0x68   :  { %1553 = vmatprep.subr.bf16.mxu0 %v1673_v0  ;;  %1573 = vmatprep.subr.bf16.mxu1 %v1673_v0 }
  0x6b   :  { %1554 = vmatpush3.bf16.msra.mxu0 %v1655_v59  ;;  %1574 = vmatpush3.bf16.msra.mxu1 %v1656_v60 }
  0x6c   :  { %1555 = vmatprep.subr.bf16.mxu0 %v1673_v0  ;;  %1575 = vmatprep.subr.bf16.mxu1 %v1673_v0 }
  0x6f   :  { %1556 = vmatpush3.bf16.msra.mxu0 %v1657_v61  ;;  %1576 = vmatpush3.bf16.msra.mxu1 %v1658_v62 }
  0x70   :  { %1557 = vmatprep.subr.bf16.mxu0 %v1673_v0  ;;  %1577 = vmatprep.subr.bf16.mxu1 %v1673_v0 }
  0x73   :  { %1558 = vmatpush3.bf16.msra.mxu0 %v1659_v63  ;;  %1578 = vmatpush3.bf16.msra.mxu1 %v1660_v1 }
  0x74   :  { %1559 = vmatprep.subr.bf16.mxu0 %v1673_v0  ;;  %1579 = vmatprep.subr.bf16.mxu1 %v1673_v0 }
  0x77   :  { %1560 = vmatpush3.bf16.msra.mxu0 %v1661_v2  ;;  %1580 = vmatpush3.bf16.msra.mxu1 %v1662_v3 }
  0x78   :  { %1561 = vmatprep.subr.bf16.mxu0 %v1673_v0  ;;  %1581 = vmatprep.subr.bf16.mxu1 %v1673_v0 }
  0x7b   :  { %1562 = vmatpush3.bf16.msra.mxu0 %v1663_v4  ;;  %1582 = vmatpush3.bf16.msra.mxu1 %v1664_v5 }
  0x7c   :  { %1563 = vmatprep.subr.bf16.mxu0 %v1673_v0  ;;  %1583 = vmatprep.subr.bf16.mxu1 %v1673_v0 }
  0x7f   :  { %1564 = vmatpush3.bf16.msra.mxu0 %v1665_v6  ;;  %1584 = vmatpush3.bf16.msra.mxu1 %v1666_v7 }
  0x82   :  { %1566 = vmatmul.mubr.bf16.vlgmr.msra.gmra.mxu0 %v1667_v8  ;;  %1586 = vmatmul.mubr.bf16.vlgmr.msra.gmra.mxu1 %v1668_v9 }
  0xe2   :  { %v145_v10 = vpop.f32.mrf.mxu0  ;;  %v240_v11 = vpop.f32.mrf.mxu1 }
  0xe3   :  { %v241_v12 = vadd.f32 %v240_v11, %v145_v10 }
  0xe4   :  { %v1447_v13 = vpop.f32.mrf.mxu0  ;;  %v1467_v14 = vpop.f32.mrf.mxu1 }
  0xe5   :  { %248 = vst.msk [vmem:[#allocation2] sm:$0xff] %vm247_vm1, %v241_v12 }
  0xe6   :  { %v148_v0 = vpop.f32.mrf.mxu0  ;;  %v243_v15 = vpop.f32.mrf.mxu1 }
  0xe7   :  { %v244_v16 = vadd.f32 %v243_v15, %v148_v0 }
  0xe8   :  { %v1448_v17 = vpop.f32.mrf.mxu0  ;;  %v1468_v18 = vpop.f32.mrf.mxu1 }
  0xe9   :  { %249 = vst.msk [vmem:[#allocation2 + $0x8] sm:$0xff] %vm247_vm1, %v244_v16 }
  0xec   :  { %v2006_v19 = vld [vmem:[#allocation2] sm:$0xff] }
  0xed   :  { %v953_v20 = vsel %vm247_vm1, %v2006_v19, 0.0 }
  0xee   :  { %954 = vadd.xlane.f32.xlu0 %v953_v20 }
  0xf0   :  { %v2010_v21 = vld [vmem:[#allocation2 + $0x8] sm:$0xff] }
  0xf1   :  { %v956_v22 = vsel %vm247_vm1, %v2010_v21, 0.0 }
  0xf2   :  { %957 = vadd.xlane.f32.xlu0 %v956_v22 }
 0x102   :  { %v378_v23 = vpop.f32.mrf.mxu0  ;;  %v473_v24 = vpop.f32.mrf.mxu1 }
 0x103   :  { %v474_v25 = vadd.f32 %v473_v24, %v378_v23 }
 0x104   :  { %v1487_v26 = vpop.f32.mrf.mxu0  ;;  %v1507_v27 = vpop.f32.mrf.mxu1 }
 0x105   :  { %481 = vst.msk [vmem:[#allocation2 + $0x10] sm:$0xff] %vm247_vm1, %v474_v25 }
 0x106   :  { %v381_v28 = vpop.f32.mrf.mxu0  ;;  %v476_v29 = vpop.f32.mrf.mxu1 }
 0x107   :  { %v477_v30 = vadd.f32 %v476_v29, %v381_v28 }
 0x108   :  { %v1488_v31 = vpop.f32.mrf.mxu0  ;;  %v1508_v32 = vpop.f32.mrf.mxu1 }
 0x109   :  { %482 = vst.msk [vmem:[#allocation2 + $0x18] sm:$0xff] %vm247_vm1, %v477_v30 }
 0x10c   :  { %v2016_v33 = vld [vmem:[#allocation2 + $0x10] sm:$0xff] }
 0x10d   :  { %v961_v34 = vsel %vm247_vm1, %v2016_v33, 0.0 }
 0x10e   :  { %962 = vadd.xlane.f32.xlu1 %v961_v34 }
 0x110   :  { %v2020_v35 = vld [vmem:[#allocation2 + $0x18] sm:$0xff] }
 0x111   :  { %v964_v36 = vsel %vm247_vm1, %v2020_v35, 0.0 }
 0x112   :  { %965 = vadd.xlane.f32.xlu1 %v964_v36 }
 0x122   :  { %v611_v37 = vpop.f32.mrf.mxu0  ;;  %v706_v38 = vpop.f32.mrf.mxu1 }
 0x123   :  { %v707_v39 = vadd.f32 %v706_v38, %v611_v37 }
 0x124   :  { %v1527_v40 = vpop.f32.mrf.mxu0  ;;  %v1547_v41 = vpop.f32.mrf.mxu1 }
 0x125   :  { %714 = vst.msk [vmem:[#allocation2 + $0x20] sm:$0xff] %vm247_vm1, %v707_v39 }
 0x126   :  { %v614_v42 = vpop.f32.mrf.mxu0  ;;  %v709_v43 = vpop.f32.mrf.mxu1 }
 0x127   :  { %v710_v44 = vadd.f32 %v709_v43, %v614_v42 }
 0x128   :  { %v1528_v45 = vpop.f32.mrf.mxu0  ;;  %v1548_v46 = vpop.f32.mrf.mxu1 }
 0x129   :  { %715 = vst.msk [vmem:[#allocation2 + $0x28] sm:$0xff] %vm247_vm1, %v710_v44  ;;  %v1675_v45 = vmov 0  }
 0x12a   :  { %1594 = vset.pattern.permute.xlu1 %v1675_v45 }
 0x12c   :  { %v2026_v47 = vld [vmem:[#allocation2 + $0x20] sm:$0xff] }
 0x12d   :  { %v971_v48 = vsel %vm247_vm1, %v2026_v47, 0.0 }
 0x12e   :  { %972 = vadd.xlane.f32.xlu0 %v971_v48 }
 0x130   :  { %v2030_v49 = vld [vmem:[#allocation2 + $0x28] sm:$0xff] }
 0x131   :  { %v974_v50 = vsel %vm247_vm1, %v2030_v49, 0.0 }
 0x132   :  { %975 = vadd.xlane.f32.xlu1 %v974_v50 }
 0x142   :  { %v844_v51 = vpop.f32.mrf.mxu0  ;;  %v939_v52 = vpop.f32.mrf.mxu1 }
 0x143   :  { %v940_v53 = vadd.f32 %v939_v52, %v844_v51 }
 0x144   :  { %v1567_v54 = vpop.f32.mrf.mxu0  ;;  %v1587_v55 = vpop.f32.mrf.mxu1 }
 0x145   :  { %947 = vst.msk [vmem:[#allocation2 + $0x30] sm:$0xff] %vm247_vm1, %v940_v53 }
 0x146   :  { %v847_v56 = vpop.f32.mrf.mxu0  ;;  %v942_v57 = vpop.f32.mrf.mxu1 }
 0x147   :  { %v943_v58 = vadd.f32 %v942_v57, %v847_v56 }
 0x148   :  { %v1568_v59 = vpop.f32.mrf.mxu0  ;;  %v1588_v60 = vpop.f32.mrf.mxu1 }
 0x149   :  { %948 = vst.msk [vmem:[#allocation2 + $0x38] sm:$0xff] %vm247_vm1, %v943_v58 }
 0x14c   :  { %v2036_v61 = vld [vmem:[#allocation2 + $0x30] sm:$0xff] }
 0x14d   :  { %v981_v62 = vsel %vm247_vm1, %v2036_v61, 0.0 }
 0x14e   :  { %982 = vadd.xlane.f32.xlu0 %v981_v62 }
 0x150   :  { %v2040_v63 = vld [vmem:[#allocation2 + $0x38] sm:$0xff] }
 0x151   :  { %v984_v1 = vsel %vm247_vm1, %v2040_v63, 0.0 }
 0x152   :  { %985 = vadd.xlane.f32.xlu1 %v984_v1 }
 0x177   :  { %v955_v2 = vpop.xlane.xlu0 %954 }
 0x17b   :  { %v958_v4 = vpop.xlane.xlu0 %957 }
 0x197   :  { %v963_v3 = vpop.xlane.xlu1 %962 }
 0x198   :  { %v967_v7 = vadd.f32 %v963_v3, %v955_v2 }
 0x19b   :  { %v966_v5 = vpop.xlane.xlu1 %965 }
 0x19c   :  { %v968_v11 = vadd.f32 %v966_v5, %v958_v4  ;;  %v1676_v5 = vmov 1  }
 0x19d   :  { %1595 = vset.pattern.permute.xlu0 %v1676_v5 }
 0x1b7   :  { %v973_v6 = vpop.xlane.xlu0 %972 }
 0x1b8   :  { %v977_v8 = vadd.f32 %v973_v6, %v967_v7  ;;  %v949_v6 = vld [vmem:[%s2124_s4] sm:$0xff] }
 0x1bb   :  { %v976_v9 = vpop.xlane.xlu1 %975 }
 0x1bc   :  { %v978_v13 = vadd.f32 %v976_v9, %v968_v11  ;;  %v950_v9 = vld [vmem:[%s2124_s4 + $0x8] sm:$0xff] }
 0x1d7   :  { %v983_v10 = vpop.xlane.xlu0 %982 }
 0x1d8   :  { %v987_v12 = vadd.f32 %v983_v10, %v977_v8 }
 0x1da   :  { %v2044_v14 = vmul.f32 0.0078125, %v987_v12 }
 0x1db   :  { %v986_v0 = vpop.xlane.xlu1 %985 }
 0x1dc   :  { %v988_v15 = vadd.f32 %v986_v0, %v978_v13  ;;  %v991_v16 = vsub.f32 %v2006_v19, %v2044_v14  ;;  %v1001_v17 = vsub.f32 %v2016_v33, %v2044_v14  ;;  %v1013_v22 = vsub.f32 %v2026_v47, %v2044_v14 }
 0x1dd   :  { %v1025_v29 = vsub.f32 %v2036_v61, %v2044_v14 }
 0x1de   :  { %v2050_v18 = vmul.f32 0.0078125, %v988_v15  ;;  %v993_v20 = vmul.f32 %v991_v16, %v991_v16  ;;  %v1003_v24 = vmul.f32 %v1001_v17, %v1001_v17  ;;  %v1015_v28 = vmul.f32 %v1013_v22, %v1013_v22 }
 0x1df   :  { %v1027_v36 = vmul.f32 %v1025_v29, %v1025_v29 }
 0x1e0   :  { %v995_v23 = vsel %vm247_vm1, %v993_v20, 0.0  ;;  %v992_v25 = vsub.f32 %v2010_v21, %v2050_v18  ;;  %v1002_v26 = vsub.f32 %v2020_v35, %v2050_v18  ;;  %v1005_v30 = vsel %vm247_vm1, %v1003_v24, 0.0 }
 0x1e1   :  { %996 = vadd.xlane.f32.xlu0 %v995_v23  ;;  %v1014_v34 = vsub.f32 %v2030_v49, %v2050_v18  ;;  %v1017_v37 = vsel %vm247_vm1, %v1015_v28, 0.0  ;;  %v1026_v40 = vsub.f32 %v2040_v63, %v2050_v18  ;;  %v1029_v41 = vsel %vm247_vm1, %v1027_v36, 0.0 }
 0x1e2   :  { %v994_v27 = vmul.f32 %v992_v25, %v992_v25  ;;  %v1004_v32 = vmul.f32 %v1002_v26, %v1002_v26 }
 0x1e3   :  { %v1016_v39 = vmul.f32 %v1014_v34, %v1014_v34  ;;  %v1028_v43 = vmul.f32 %v1026_v40, %v1026_v40 }
 0x1e4   :  { %v998_v31 = vsel %vm247_vm1, %v994_v27, 0.0  ;;  %v1008_v38 = vsel %vm247_vm1, %v1004_v32, 0.0 }
 0x1e5   :  { %1006 = vadd.xlane.f32.xlu0 %v1005_v30  ;;  %999 = vadd.xlane.f32.xlu1 %v998_v31  ;;  %v1020_v42 = vsel %vm247_vm1, %v1016_v39, 0.0  ;;  %v1032_v44 = vsel %vm247_vm1, %v1028_v43, 0.0 }
 0x1e9   :  { %1018 = vadd.xlane.f32.xlu0 %v1017_v37  ;;  %1009 = vadd.xlane.f32.xlu1 %v1008_v38 }
 0x1ed   :  { %1030 = vadd.xlane.f32.xlu0 %v1029_v41  ;;  %1021 = vadd.xlane.f32.xlu1 %v1020_v42 }
 0x1f1   :  { %1033 = vadd.xlane.f32.xlu1 %v1032_v44 }
 0x26a   :  { %v997_v46 = vpop.xlane.xlu0 %996 }
 0x26e   :  { %v1007_v48 = vpop.xlane.xlu0 %1006  ;;  %v1000_v50 = vpop.xlane.xlu1 %999 }
 0x26f   :  { %v1011_v53 = vadd.f32 %v1007_v48, %v997_v46 }
 0x272   :  { %v1019_v51 = vpop.xlane.xlu0 %1018  ;;  %v1010_v52 = vpop.xlane.xlu1 %1009 }
 0x273   :  { %v1023_v54 = vadd.f32 %v1019_v51, %v1011_v53  ;;  %v1012_v57 = vadd.f32 %v1010_v52, %v1000_v50 }
 0x276   :  { %v1031_v55 = vpop.xlane.xlu0 %1030  ;;  %v1022_v56 = vpop.xlane.xlu1 %1021 }
 0x277   :  { %v1035_v58 = vadd.f32 %v1031_v55, %v1023_v54  ;;  %v1024_v60 = vadd.f32 %v1022_v56, %v1012_v57 }
 0x279   :  { %v1037_v59 = vmul.f32 0.0078125, %v1035_v58 }
 0x27a   :  { %v1034_v62 = vpop.xlane.xlu1 %1033 }
 0x27b   :  { %v1039_v1 = vadd.f32 1e-05, %v1037_v59  ;;  %v1036_v2 = vadd.f32 %v1034_v62, %v1024_v60 }
 0x27d   :  { %1669 = vrsqrt.f32 %v1039_v1  ;;  %v1038_v3 = vmul.f32 0.0078125, %v1036_v2 }
 0x27f   :  { %v1040_v4 = vadd.f32 1e-05, %v1038_v3 }
 0x281   :  { %1671 = vrsqrt.f32 %v1040_v4 }
 0x28a   :  { %v1670_v7 = vpop.eup %1669 }
 0x28b   :  { %v1043_v8 = vmul.f32 %v1670_v7, %v949_v6 }
 0x28d   :  { %v1045_v10 = vmul.f32 %v1043_v8, %v2044_v14 }
 0x28e   :  { %v1672_v11 = vpop.eup %1671 }
 0x28f   :  { %1049 = vrot.lane.b32.xlu0 %v1045_v10, %s1677_s12  ;;  %v1044_v12 = vmul.f32 %v1672_v11, %v950_v9 }
 0x291   :  { %v1046_v13 = vmul.f32 %v1044_v12, %v2050_v18 }
 0x293   :  { %1051 = vrot.lane.b32.xlu1 %v1046_v13, %s1677_s12 }
 0x297   :  { %1059 = vperm.xlu1 %1594, %v1043_v8  }
 0x29b   :  { %1064 = vperm.xlu1 %1594, %v1044_v12  }
 0x29f   :  { %1596 = vset.pattern.permute.xlu1 %v1676_v5 }
 0x301   :  { %v1050_v0 = vpop.permute.xlu0 %1049 }
 0x302   :  { %v1055_v15 = vsub.f32 %v949_v6, %v1050_v0 }
 0x304   :  { %1071 = vperm.xlu0 %1595, %v1055_v15  }
 0x305   :  { %v1052_v16 = vpop.permute.xlu1 %1051 }
 0x306   :  { %v1056_v17 = vsub.f32 %v950_v9, %v1052_v16 }
 0x308   :  { %1076 = vperm.xlu1 %1596, %v1056_v17  }
 0x312   :  { %v1060_v20 = vpop.permute.xlu1 %1059 }
 0x313   :  { %v1067_v22 = vmul.f32 %v1060_v20, %v2006_v19  ;;  %v1096_v14 = vmul.f32 %v1060_v20, %v2016_v33  ;;  %v1115_v23 = vmul.f32 %v1060_v20, %v2026_v47  ;;  %v1134_v24 = vmul.f32 %v1060_v20, %v2036_v61 }
 0x316   :  { %v1065_v18 = vpop.permute.xlu1 %1064 }
 0x317   :  { %v1068_v36 = vmul.f32 %v1065_v18, %v2010_v21  ;;  %v1097_v19 = vmul.f32 %v1065_v18, %v2020_v35  ;;  %v1116_v33 = vmul.f32 %v1065_v18, %v2030_v49  ;;  %v1135_v47 = vmul.f32 %v1065_v18, %v2040_v63 }
 0x37f   :  { %v1072_v25 = vpop.permute.xlu0 %1071 }
 0x380   :  { %v1079_v26 = vadd.f32 %v1072_v25, %v1067_v22  ;;  %v1098_v27 = vadd.f32 %v1096_v14, %v1072_v25  ;;  %v1117_v28 = vadd.f32 %v1115_v23, %v1072_v25  ;;  %v1136_v29 = vadd.f32 %v1134_v24, %v1072_v25 }
 0x382   :  { %v1081_v30 = vmax.f32 %v1079_v26, 0.0  ;;  %v1100_v31 = vmax.f32 %v1098_v27, 0.0  ;;  %v1119_v32 = vmax.f32 %v1117_v28, 0.0  ;;  %v1138_v34 = vmax.f32 %v1136_v29, 0.0 }
 0x383   :  { %v1077_v61 = vpop.permute.xlu1 %1076 }
 0x384   :  { %v1349_v37 = vpack.c.bf16 %v1081_v30, %v1081_v30  ;;  %v1351_v38 = vpack.c.bf16 %v1100_v31, %v1100_v31  ;;  %v1353_v39 = vpack.c.bf16 %v1119_v32, %v1119_v32  ;;  %v1355_v40 = vpack.c.bf16 %v1138_v34, %v1138_v34 }
 0x385   :  { %v1080_v41 = vadd.f32 %v1077_v61, %v1068_v36  ;;  %v1099_v42 = vadd.f32 %v1097_v19, %v1077_v61  ;;  %v1118_v43 = vadd.f32 %v1116_v33, %v1077_v61  ;;  %v1137_v44 = vadd.f32 %v1135_v47, %v1077_v61 }
 0x386   :  { %1092 = vst.msk [vmem:[%s2125_s5] sm:$0xf] %vm1091_vm2, %v1349_v37  ;;  %1339 = vst.msk [vmem:[%s2125_s5 + $0x8] sm:$0xf] %vm1091_vm2, %v1351_v38 }
 0x387   :  { %1343 = vst.msk [vmem:[%s2125_s5 + $0x10] sm:$0xf] %vm1091_vm2, %v1353_v39  ;;  %1347 = vst.msk [vmem:[%s2125_s5 + $0x18] sm:$0xf] %vm1091_vm2, %v1355_v40  ;;  %v1082_v21 = vmax.f32 %v1080_v41, 0.0  ;;  %v1101_v35 = vmax.f32 %v1099_v42, 0.0 }
 0x388   :  { %v1120_v49 = vmax.f32 %v1118_v43, 0.0  ;;  %v1139_v63 = vmax.f32 %v1137_v44, 0.0 }
 0x389   :  { %v1350_v45 = vpack.c.bf16 %v1082_v21, %v1082_v21  ;;  %v1352_v46 = vpack.c.bf16 %v1101_v35, %v1101_v35 }
 0x38a   :  { %v1354_v48 = vpack.c.bf16 %v1120_v49, %v1120_v49  ;;  %v1356_v50 = vpack.c.bf16 %v1139_v63, %v1139_v63 }
 0x38b   :  { %1093 = vst.msk [vmem:[%s2125_s5 + $0x4] sm:$0xf] %vm1091_vm2, %v1350_v45  ;;  %1340 = vst.msk [vmem:[%s2125_s5 + $0xc] sm:$0xf] %vm1091_vm2, %v1352_v46 }
 0x38c   :  { %1344 = vst.msk [vmem:[%s2125_s5 + $0x14] sm:$0xf] %vm1091_vm2, %v1354_v48  ;;  %1348 = vst.msk [vmem:[%s2125_s5 + $0x1c] sm:$0xf] %vm1091_vm2, %v1356_v50 }

// kernel: unet_forward.18
= control target key start
LH: loop header
LB: loop body
LE: loop exit
PB: predicated region body
PF: predicated region fallthrough
CT: control target
= control target key end

     0   :  { %v1010_v0 = vmov 0.0   ;;  %vm1011_vm0 = vmmov 0   ;;  %vm63_vm1 = vcmask 523264   ;;  %s1251_s3 = inlined_call_operand.vmem [shape: bf16[4,64,128], index: 3, kind: input, shape index: {}]   ;;  %s1252_s2 = inlined_call_operand.vmem [shape: bf16[4,64,128], index: 2, kind: input, shape index: {}]   ;;  %s1253_s1 = inlined_call_operand.vmem [shape: bf16[4,8,64], index: 1, kind: input, shape index: {}]   ;;  %s1254_s0 = inlined_call_operand.vmem [shape: bf16[4,8,64], index: 0, kind: input, shape index: {}]   ;;  %s1255_s4 = inlined_call_operand.vmem [shape: f32[8,2], index: 4, kind: input, shape index: {}]   ;;  %s1256_s5 = inlined_call_operand.vmem [shape: bf16[4,8,128], index: 5, kind: output, shape index: {}]  }
   0x1   :  { %872 = vmatprep.subr.bf16.mxu0 %v1010_v0  ;;  %884 = vmatprep.subr.bf16.mxu1 %v1010_v0  ;;  %v976_v1 = vld [vmem:[%s1251_s3 + $0x18] sm:$0xff]   ;;  %v978_v3 = vld [vmem:[%s1251_s3 + $0x10] sm:$0xff]   ;;  %v980_v5 = vld [vmem:[%s1251_s3 + $0x8] sm:$0xff]  }
   0x2   :  { %v977_v2 = vld [vmem:[%s1252_s2 + $0x18] sm:$0xff]   ;;  %880 = vmatprep.mubr.msk.bf16.mxu0 %vm1011_vm0, %v1010_v0  ;;  %892 = vmatprep.mubr.msk.bf16.mxu1 %vm1011_vm0, %v1010_v0  ;;  %v979_v4 = vld [vmem:[%s1252_s2 + $0x10] sm:$0xff]   ;;  %v981_v6 = vld [vmem:[%s1252_s2 + $0x8] sm:$0xff]  }
   0x3   :  { %873 = vmatpush3.bf16.msra.mxu0 %v976_v1  ;;  %885 = vmatpush3.bf16.msra.mxu1 %v977_v2  ;;  %v982_v7 = vld [vmem:[%s1251_s3] sm:$0xff]   ;;  %v984_v11 = vld [vmem:[%s1251_s3 + $0x38] sm:$0xff]   ;;  %v986_v13 = vld [vmem:[%s1251_s3 + $0x30] sm:$0xff]  }
   0x4   :  { %874 = vmatprep.subr.bf16.mxu0 %v1010_v0  ;;  %886 = vmatprep.subr.bf16.mxu1 %v1010_v0  ;;  %v983_v8 = vld [vmem:[%s1252_s2] sm:$0xff]   ;;  %v985_v12 = vld [vmem:[%s1252_s2 + $0x38] sm:$0xff]   ;;  %v987_v14 = vld [vmem:[%s1252_s2 + $0x30] sm:$0xff]  }
   0x5   :  { %v30_v9 = vld [vmem:[%s1253_s1] sm:$0xf]  ;;  %v988_v15 = vld [vmem:[%s1251_s3 + $0x28] sm:$0xff]   ;;  %v754_v19 = vld [vmem:[%s1253_s1 + $0x4] sm:$0xf] }
   0x6   :  { %v21_v10 = vld [vmem:[%s1254_s0] sm:$0xf]  ;;  %v989_v16 = vld [vmem:[%s1252_s2 + $0x28] sm:$0xff]   ;;  %v745_v20 = vld [vmem:[%s1254_s0 + $0x4] sm:$0xf] }
   0x7   :  { %875 = vmatpush3.bf16.msra.mxu0 %v978_v3  ;;  %887 = vmatpush3.bf16.msra.mxu1 %v979_v4  ;;  %v990_v17 = vld [vmem:[%s1251_s3 + $0x20] sm:$0xff]   ;;  %v992_v21 = vld [vmem:[%s1251_s3 + $0x58] sm:$0xff]   ;;  %v994_v23 = vld [vmem:[%s1251_s3 + $0x50] sm:$0xff]  }
   0x8   :  { %876 = vmatprep.subr.bf16.mxu0 %v1010_v0  ;;  %888 = vmatprep.subr.bf16.mxu1 %v1010_v0  ;;  %v991_v18 = vld [vmem:[%s1252_s2 + $0x20] sm:$0xff]   ;;  %v993_v22 = vld [vmem:[%s1252_s2 + $0x58] sm:$0xff]   ;;  %v995_v24 = vld [vmem:[%s1252_s2 + $0x50] sm:$0xff]  }
   0x9   :  { %v996_v25 = vld [vmem:[%s1251_s3 + $0x48] sm:$0xff]   ;;  %v998_v27 = vld [vmem:[%s1251_s3 + $0x40] sm:$0xff]   ;;  %v1000_v30 = vld [vmem:[%s1251_s3 + $0x78] sm:$0xff]  }
   0xa   :  { %v997_v26 = vld [vmem:[%s1252_s2 + $0x48] sm:$0xff]   ;;  %v999_v28 = vld [vmem:[%s1252_s2 + $0x40] sm:$0xff]   ;;  %v1001_v32 = vld [vmem:[%s1252_s2 + $0x78] sm:$0xff]  }
   0xb   :  { %877 = vmatpush3.bf16.msra.mxu0 %v980_v5  ;;  %889 = vmatpush3.bf16.msra.mxu1 %v981_v6  ;;  %v782_v29 = vld [vmem:[%s1253_s1 + $0x8] sm:$0xf]  ;;  %v1002_v33 = vld [vmem:[%s1251_s3 + $0x70] sm:$0xff]   ;;  %v1006_v37 = vld [vmem:[%s1251_s3 + $0x60] sm:$0xff]  }
   0xc   :  { %878 = vmatprep.subr.bf16.mxu0 %v1010_v0  ;;  %890 = vmatprep.subr.bf16.mxu1 %v1010_v0  ;;  %v773_v31 = vld [vmem:[%s1254_s0 + $0x8] sm:$0xf]  ;;  %v1003_v34 = vld [vmem:[%s1252_s2 + $0x70] sm:$0xff]   ;;  %v1007_v38 = vld [vmem:[%s1252_s2 + $0x60] sm:$0xff]  }
   0xd   :  { %v1004_v35 = vld [vmem:[%s1251_s3 + $0x68] sm:$0xff]  }
   0xe   :  { %v1005_v36 = vld [vmem:[%s1252_s2 + $0x68] sm:$0xff]   ;;  %s1014_s2 = smov 1  }
   0xf   :  { %879 = vmatpush3.bf16.msra.mxu0 %v982_v7  ;;  %891 = vmatpush3.bf16.msra.mxu1 %v983_v8  ;;  %v810_v39 = vld [vmem:[%s1253_s1 + $0xc] sm:$0xf] }
  0x10   :  { %896 = vmatprep.subr.bf16.mxu0 %v1010_v0  ;;  %908 = vmatprep.subr.bf16.mxu1 %v1010_v0  ;;  %v801_v40 = vld [vmem:[%s1254_s0 + $0xc] sm:$0xf] }
  0x12   :  { %881 = vmatmul.mubr.msk.bf16.vlgmr.msra.gmra.mxu0 %vm63_vm1, %v30_v9  ;;  %893 = vmatmul.mubr.msk.bf16.vlgmr.msra.gmra.mxu1 %vm63_vm1, %v21_v10 }
  0x13   :  { %897 = vmatpush3.bf16.msra.mxu0 %v984_v11  ;;  %909 = vmatpush3.bf16.msra.mxu1 %v985_v12 }
  0x14   :  { %898 = vmatprep.subr.bf16.mxu0 %v1010_v0  ;;  %910 = vmatprep.subr.bf16.mxu1 %v1010_v0 }
  0x15   :  { %904 = vmatprep.mubr.msk.bf16.mxu0 %vm1011_vm0, %v1010_v0  ;;  %916 = vmatprep.mubr.msk.bf16.mxu1 %vm1011_vm0, %v1010_v0 }
  0x17   :  { %899 = vmatpush3.bf16.msra.mxu0 %v986_v13  ;;  %911 = vmatpush3.bf16.msra.mxu1 %v987_v14 }
  0x18   :  { %900 = vmatprep.subr.bf16.mxu0 %v1010_v0  ;;  %912 = vmatprep.subr.bf16.mxu1 %v1010_v0 }
  0x1b   :  { %901 = vmatpush3.bf16.msra.mxu0 %v988_v15  ;;  %913 = vmatpush3.bf16.msra.mxu1 %v989_v16 }
  0x1c   :  { %902 = vmatprep.subr.bf16.mxu0 %v1010_v0  ;;  %914 = vmatprep.subr.bf16.mxu1 %v1010_v0 }
  0x1f   :  { %903 = vmatpush3.bf16.msra.mxu0 %v990_v17  ;;  %915 = vmatpush3.bf16.msra.mxu1 %v991_v18 }
  0x20   :  { %920 = vmatprep.subr.bf16.mxu0 %v1010_v0  ;;  %932 = vmatprep.subr.bf16.mxu1 %v1010_v0 }
  0x22   :  { %905 = vmatmul.mubr.msk.bf16.vlgmr.msra.gmra.mxu0 %vm63_vm1, %v754_v19  ;;  %917 = vmatmul.mubr.msk.bf16.vlgmr.msra.gmra.mxu1 %vm63_vm1, %v745_v20 }
  0x23   :  { %921 = vmatpush3.bf16.msra.mxu0 %v992_v21  ;;  %933 = vmatpush3.bf16.msra.mxu1 %v993_v22 }
  0x24   :  { %922 = vmatprep.subr.bf16.mxu0 %v1010_v0  ;;  %934 = vmatprep.subr.bf16.mxu1 %v1010_v0 }
  0x25   :  { %928 = vmatprep.mubr.msk.bf16.mxu0 %vm1011_vm0, %v1010_v0  ;;  %940 = vmatprep.mubr.msk.bf16.mxu1 %vm1011_vm0, %v1010_v0 }
  0x27   :  { %923 = vmatpush3.bf16.msra.mxu0 %v994_v23  ;;  %935 = vmatpush3.bf16.msra.mxu1 %v995_v24 }
  0x28   :  { %924 = vmatprep.subr.bf16.mxu0 %v1010_v0  ;;  %936 = vmatprep.subr.bf16.mxu1 %v1010_v0 }
  0x2b   :  { %925 = vmatpush3.bf16.msra.mxu0 %v996_v25  ;;  %937 = vmatpush3.bf16.msra.mxu1 %v997_v26 }
  0x2c   :  { %926 = vmatprep.subr.bf16.mxu0 %v1010_v0  ;;  %938 = vmatprep.subr.bf16.mxu1 %v1010_v0 }
  0x2f   :  { %927 = vmatpush3.bf16.msra.mxu0 %v998_v27  ;;  %939 = vmatpush3.bf16.msra.mxu1 %v999_v28 }
  0x30   :  { %944 = vmatprep.subr.bf16.mxu0 %v1010_v0  ;;  %956 = vmatprep.subr.bf16.mxu1 %v1010_v0 }
  0x32   :  { %929 = vmatmul.mubr.msk.bf16.vlgmr.msra.gmra.mxu0 %vm63_vm1, %v782_v29  ;;  %941 = vmatmul.mubr.msk.bf16.vlgmr.msra.gmra.mxu1 %vm63_vm1, %v773_v31  ;;  %v1012_v29 = vmov 0  }
  0x33   :  { %945 = vmatpush3.bf16.msra.mxu0 %v1000_v30  ;;  %957 = vmatpush3.bf16.msra.mxu1 %v1001_v32 }
  0x34   :  { %946 = vmatprep.subr.bf16.mxu0 %v1010_v0  ;;  %958 = vmatprep.subr.bf16.mxu1 %v1010_v0 }
  0x35   :  { %952 = vmatprep.mubr.msk.bf16.mxu0 %vm1011_vm0, %v1010_v0  ;;  %964 = vmatprep.mubr.msk.bf16.mxu1 %vm1011_vm0, %v1010_v0 }
  0x36   :  { %973 = vset.pattern.permute.xlu1 %v1012_v29 }
  0x37   :  { %947 = vmatpush3.bf16.msra.mxu0 %v1002_v33  ;;  %959 = vmatpush3.bf16.msra.mxu1 %v1003_v34 }
  0x38   :  { %948 = vmatprep.subr.bf16.mxu0 %v1010_v0  ;;  %960 = vmatprep.subr.bf16.mxu1 %v1010_v0 }
  0x3b   :  { %949 = vmatpush3.bf16.msra.mxu0 %v1004_v35  ;;  %961 = vmatpush3.bf16.msra.mxu1 %v1005_v36 }
  0x3c   :  { %950 = vmatprep.subr.bf16.mxu0 %v1010_v0  ;;  %962 = vmatprep.subr.bf16.mxu1 %v1010_v0 }
  0x3f   :  { %951 = vmatpush3.bf16.msra.mxu0 %v1006_v37  ;;  %963 = vmatpush3.bf16.msra.mxu1 %v1007_v38 }
  0x42   :  { %953 = vmatmul.mubr.msk.bf16.vlgmr.msra.gmra.mxu0 %vm63_vm1, %v810_v39  ;;  %965 = vmatmul.mubr.msk.bf16.vlgmr.msra.gmra.mxu1 %vm63_vm1, %v801_v40  ;;  %v1013_v39 = vmov 1   ;;  %v649_v40 = vld [vmem:[%s1255_s4] sm:$0xff] }
  0x43   :  { %975 = vset.pattern.permute.xlu0 %v1013_v39 }
  0xd2   :  { %v101_v41 = vpop.f32.mrf.mxu0  ;;  %v168_v42 = vpop.f32.mrf.mxu1 }
  0xd3   :  { %v1221_v43 = vadd.f32 %v168_v42, %v101_v41 }
  0xd4   :  { %v882_v44 = vpop.f32.mrf.mxu0  ;;  %v894_v45 = vpop.f32.mrf.mxu1 }
  0xd5   :  { %651 = vadd.xlane.f32.xlu0 %v1221_v43 }
  0xd6   :  { %v104_v46 = vpop.f32.mrf.mxu0  ;;  %v171_v47 = vpop.f32.mrf.mxu1 }
  0xd8   :  { %v883_v48 = vpop.f32.mrf.mxu0  ;;  %v895_v49 = vpop.f32.mrf.mxu1 }
  0xe2   :  { %v258_v50 = vpop.f32.mrf.mxu0  ;;  %v325_v51 = vpop.f32.mrf.mxu1 }
  0xe3   :  { %v1224_v52 = vadd.f32 %v325_v51, %v258_v50 }
  0xe4   :  { %v906_v53 = vpop.f32.mrf.mxu0  ;;  %v918_v54 = vpop.f32.mrf.mxu1 }
  0xe5   :  { %654 = vadd.xlane.f32.xlu0 %v1224_v52 }
  0xe6   :  { %v261_v55 = vpop.f32.mrf.mxu0  ;;  %v328_v56 = vpop.f32.mrf.mxu1 }
  0xe8   :  { %v907_v57 = vpop.f32.mrf.mxu0  ;;  %v919_v58 = vpop.f32.mrf.mxu1 }
  0xf2   :  { %v416_v59 = vpop.f32.mrf.mxu0  ;;  %v483_v60 = vpop.f32.mrf.mxu1 }
  0xf3   :  { %v1227_v61 = vadd.f32 %v483_v60, %v416_v59 }
  0xf4   :  { %v930_v62 = vpop.f32.mrf.mxu0  ;;  %v942_v63 = vpop.f32.mrf.mxu1 }
  0xf5   :  { %658 = vadd.xlane.f32.xlu1 %v1227_v61 }
  0xf6   :  { %v419_v0 = vpop.f32.mrf.mxu0  ;;  %v486_v1 = vpop.f32.mrf.mxu1 }
  0xf8   :  { %v931_v2 = vpop.f32.mrf.mxu0  ;;  %v943_v3 = vpop.f32.mrf.mxu1 }
 0x102   :  { %v574_v4 = vpop.f32.mrf.mxu0  ;;  %v641_v5 = vpop.f32.mrf.mxu1 }
 0x103   :  { %v642_v6 = vadd.f32 %v641_v5, %v574_v4 }
 0x104   :  { %v954_v7 = vpop.f32.mrf.mxu0  ;;  %v966_v8 = vpop.f32.mrf.mxu1 }
 0x105   :  { %662 = vadd.xlane.f32.xlu1 %v642_v6 }
 0x106   :  { %v577_v9 = vpop.f32.mrf.mxu0  ;;  %v644_v10 = vpop.f32.mrf.mxu1 }
 0x108   :  { %v955_v11 = vpop.f32.mrf.mxu0  ;;  %v967_v12 = vpop.f32.mrf.mxu1 }
 0x15e   :  { %v652_v13 = vpop.xlane.xlu0 %651 }
 0x16e   :  { %v655_v14 = vpop.xlane.xlu0 %654 }
 0x16f   :  { %v656_v16 = vadd.f32 %v655_v14, %v652_v13 }
 0x17e   :  { %v659_v15 = vpop.xlane.xlu1 %658 }
 0x17f   :  { %v660_v17 = vadd.f32 %v659_v15, %v656_v16 }
 0x18e   :  { %v663_v18 = vpop.xlane.xlu1 %662 }
 0x18f   :  { %v664_v19 = vadd.f32 %v663_v18, %v660_v17 }
 0x191   :  { %v665_v20 = vmul.f32 0.001953125, %v664_v19 }
 0x193   :  { %v670_v21 = vsub.f32 %v1224_v52, %v665_v20  ;;  %v666_v22 = vsub.f32 %v1221_v43, %v665_v20  ;;  %v680_v25 = vsub.f32 %v642_v6, %v665_v20  ;;  %v675_v26 = vsub.f32 %v1227_v61, %v665_v20 }
 0x195   :  { %v671_v23 = vmul.f32 %v670_v21, %v670_v21  ;;  %v667_v24 = vmul.f32 %v666_v22, %v666_v22  ;;  %v681_v27 = vmul.f32 %v680_v25, %v680_v25  ;;  %v676_v28 = vmul.f32 %v675_v26, %v675_v26 }
 0x197   :  { %672 = vadd.xlane.f32.xlu1 %v671_v23  ;;  %668 = vadd.xlane.f32.xlu0 %v667_v24 }
 0x19b   :  { %682 = vadd.xlane.f32.xlu1 %v681_v27  ;;  %677 = vadd.xlane.f32.xlu0 %v676_v28 }
 0x220   :  { %v673_v30 = vpop.xlane.xlu1 %672  ;;  %v669_v31 = vpop.xlane.xlu0 %668 }
 0x221   :  { %v674_v32 = vadd.f32 %v673_v30, %v669_v31 }
 0x224   :  { %v678_v33 = vpop.xlane.xlu0 %677  ;;  %v683_v35 = vpop.xlane.xlu1 %682 }
 0x225   :  { %v679_v34 = vadd.f32 %v678_v33, %v674_v32 }
 0x227   :  { %v684_v36 = vadd.f32 %v683_v35, %v679_v34 }
 0x229   :  { %v685_v37 = vmul.f32 0.001953125, %v684_v36 }
 0x22b   :  { %v686_v38 = vadd.f32 1e-05, %v685_v37 }
 0x22d   :  { %1008 = vrsqrt.f32 %v686_v38 }
 0x23a   :  { %v1009_v41 = vpop.eup %1008 }
 0x23b   :  { %v688_v42 = vmul.f32 %v1009_v41, %v649_v40 }
 0x23d   :  { %697 = vperm.xlu1 %973, %v688_v42   ;;  %v689_v44 = vmul.f32 %v688_v42, %v665_v20 }
 0x23f   :  { %691 = vrot.lane.b32.xlu0 %v689_v44, %s1014_s2 }
 0x241   :  { %974 = vset.pattern.permute.xlu1 %v1013_v39 }
 0x2b1   :  { %v692_v45 = vpop.permute.xlu0 %691 }
 0x2b2   :  { %v694_v46 = vsub.f32 %v649_v40, %v692_v45 }
 0x2b4   :  { %703 = vperm.xlu1 %974, %v694_v46  }
 0x2b8   :  { %v698_v47 = vpop.permute.xlu1 %697 }
 0x2b9   :  { %v700_v48 = vmul.f32 %v698_v47, %v1221_v43  ;;  %v711_v49 = vmul.f32 %v698_v47, %v1224_v52  ;;  %v718_v50 = vmul.f32 %v698_v47, %v1227_v61  ;;  %v725_v51 = vmul.f32 %v698_v47, %v642_v6 }
 0x32f   :  { %v704_v53 = vpop.permute.xlu1 %703 }
 0x330   :  { %v706_v54 = vadd.f32 %v704_v53, %v700_v48  ;;  %v712_v55 = vadd.f32 %v711_v49, %v704_v53  ;;  %v719_v56 = vadd.f32 %v718_v50, %v704_v53  ;;  %v726_v57 = vadd.f32 %v725_v51, %v704_v53 }
 0x332   :  { %v707_v58 = vmax.f32 %v706_v54, 0.0  ;;  %v713_v59 = vmax.f32 %v712_v55, 0.0  ;;  %v720_v60 = vmax.f32 %v719_v56, 0.0  ;;  %v727_v62 = vmax.f32 %v726_v57, 0.0 }
 0x334   :  { %v708_v63 = vpack.c.bf16 %v707_v58, %v707_v58  ;;  %v714_v0 = vpack.c.bf16 %v713_v59, %v713_v59  ;;  %v721_v1 = vpack.c.bf16 %v720_v60, %v720_v60  ;;  %v728_v2 = vpack.c.bf16 %v727_v62, %v727_v62 }
 0x336   :  { %709 = vst [vmem:[%s1256_s5] sm:$0xf] %v708_v63  ;;  %829 = vst [vmem:[%s1256_s5 + $0x4] sm:$0xf] %v714_v0 }
 0x337   :  { %830 = vst [vmem:[%s1256_s5 + $0x8] sm:$0xf] %v721_v1  ;;  %831 = vst [vmem:[%s1256_s5 + $0xc] sm:$0xf] %v728_v2 }

// kernel: unet_forward.19
= control target key start
LH: loop header
LB: loop body
LE: loop exit
PB: predicated region body
PF: predicated region fallthrough
CT: control target
= control target key end

     0   :  { %v1480_v1 = vmov 0   ;;  %vm79_vm0 = vcmask 261120   ;;  %s1797_s3 = inlined_call_operand.vmem [shape: bf16[4,32,512], index: 3, kind: input, shape index: {}]   ;;  %s1798_s1 = inlined_call_operand.vmem [shape: bf16[4,4,32], index: 1, kind: input, shape index: {}]   ;;  %s1799_s2 = inlined_call_operand.vmem [shape: bf16[4,32,512], index: 2, kind: input, shape index: {}]   ;;  %s1800_s0 = inlined_call_operand.vmem [shape: bf16[4,4,32], index: 0, kind: input, shape index: {}]   ;;  %s1801_s4 = inlined_call_operand.vmem [shape: f32[4,1], index: 4, kind: input, shape index: {}]   ;;  %s1802_s5 = inlined_call_operand.vmem [shape: f32[4,4,512], index: 5, kind: output, shape index: {}]  }
   0x1   :  { %v1352_v0 = vld [vmem:[%s1797_s3 + $0x24] ss:$16 sps:$4 sm:$0xff]   ;;  %115 = vmatprep.mubr.bf16.mxu0 %v1480_v1  ;;  %156 = vmatprep.mubr.bf16.mxu1 %v1480_v1  ;;  %v1354_v2 = vld [vmem:[%s1797_s3 + $0x2c] ss:$16 sps:$4 sm:$0xff]   ;;  %v1356_v3 = vld [vmem:[%s1797_s3 + $0x20] ss:$16 sps:$4 sm:$0xff]  }
   0x2   :  { %1350 = vset.pattern.permute.xlu0 %v1480_v1  ;;  %1351 = vset.pattern.permute.xlu1 %v1480_v1  ;;  %v1357_v4 = vld [vmem:[%s1797_s3 + $0x28] ss:$16 sps:$4 sm:$0xff]   ;;  %v1358_v5 = vld [vmem:[%s1797_s3 + $0x4] ss:$16 sps:$4 sm:$0xff]   ;;  %v1360_v6 = vld [vmem:[%s1797_s3 + $0xc] ss:$16 sps:$4 sm:$0xff]  }
   0x3   :  { %95 = vmatprep.subr.bf16.mxu0 %v1352_v0  ;;  %136 = vmatprep.subr.bf16.mxu1 %v1354_v2  ;;  %v1362_v7 = vld [vmem:[%s1797_s3] ss:$16 sps:$4 sm:$0xff]   ;;  %v1363_v8 = vld [vmem:[%s1797_s3 + $0x8] ss:$16 sps:$4 sm:$0xff]   ;;  %v1366_v11 = vld [vmem:[%s1799_s2 + $0x24] ss:$16 sps:$4 sm:$0xff]  }
   0x4   :  { %96 = vmatpush1.bf16.msra.mxu0 %v1356_v3  ;;  %137 = vmatpush1.bf16.msra.mxu1 %v1357_v4  ;;  %v30_v9 = vld [vmem:[%s1798_s1] sm:$0x3]  ;;  %v1367_v12 = vld [vmem:[%s1799_s2 + $0x28] ss:$16 sps:$4 sm:$0xff]   ;;  %v1369_v13 = vld [vmem:[%s1799_s2 + $0x2c] ss:$16 sps:$4 sm:$0xff]  }
   0x5   :  { %97 = vmatprep.subr.bf16.mxu0 %v1358_v5  ;;  %138 = vmatprep.subr.bf16.mxu1 %v1360_v6  ;;  %v1364_v10 = vld [vmem:[%s1799_s2 + $0x20] ss:$16 sps:$4 sm:$0xff]   ;;  %v1372_v14 = vld [vmem:[%s1799_s2 + $0x4] ss:$16 sps:$4 sm:$0xff]   ;;  %v1375_v15 = vld [vmem:[%s1799_s2 + $0xc] ss:$16 sps:$4 sm:$0xff]  }
   0x6   :  { %v1370_v16 = vld [vmem:[%s1799_s2] ss:$16 sps:$4 sm:$0xff]   ;;  %v1373_v17 = vld [vmem:[%s1799_s2 + $0x8] ss:$16 sps:$4 sm:$0xff]   ;;  %v1378_v18 = vld [vmem:[%s1797_s3 + $0x64] ss:$16 sps:$4 sm:$0xff]  }
   0x7   :  { %v1381_v19 = vld [vmem:[%s1797_s3 + $0x6c] ss:$16 sps:$4 sm:$0xff]   ;;  %v21_v20 = vld [vmem:[%s1800_s0] sm:$0x3]  ;;  %v1379_v22 = vld [vmem:[%s1797_s3 + $0x68] ss:$16 sps:$4 sm:$0xff]  }
   0x8   :  { %98 = vmatpush1.bf16.msra.mxu0 %v1362_v7  ;;  %139 = vmatpush1.bf16.msra.mxu1 %v1363_v8  ;;  %v1376_v21 = vld [vmem:[%s1797_s3 + $0x60] ss:$16 sps:$4 sm:$0xff]   ;;  %v1384_v23 = vld [vmem:[%s1797_s3 + $0x44] ss:$16 sps:$4 sm:$0xff]   ;;  %v1387_v24 = vld [vmem:[%s1797_s3 + $0x4c] ss:$16 sps:$4 sm:$0xff]  }
   0x9   :  { %220 = vmatprep.subr.bf16.mxu0 %v1366_v11  ;;  %261 = vmatprep.subr.bf16.mxu1 %v1369_v13  ;;  %v1382_v25 = vld [vmem:[%s1797_s3 + $0x40] ss:$16 sps:$4 sm:$0xff]   ;;  %v1385_v26 = vld [vmem:[%s1797_s3 + $0x48] ss:$16 sps:$4 sm:$0xff]   ;;  %v1390_v27 = vld [vmem:[%s1799_s2 + $0x64] ss:$16 sps:$4 sm:$0xff]  }
   0xa   :  { %v1393_v28 = vld [vmem:[%s1799_s2 + $0x6c] ss:$16 sps:$4 sm:$0xff]   ;;  %v1238_v29 = vld [vmem:[%s1798_s1 + $0x2] sm:$0x3]  ;;  %v1391_v31 = vld [vmem:[%s1799_s2 + $0x68] ss:$16 sps:$4 sm:$0xff]  }
   0xb   :  { %1217 = vmatmul.mubr.msk.bf16.vlgmr.msra.gmra.mxu0 %vm79_vm0, %v30_v9  ;;  %1218 = vmatmul.mubr.msk.bf16.vlgmr.msra.gmra.mxu1 %vm79_vm0, %v30_v9  ;;  %v1388_v30 = vld [vmem:[%s1799_s2 + $0x60] ss:$16 sps:$4 sm:$0xff]   ;;  %v1396_v32 = vld [vmem:[%s1799_s2 + $0x44] ss:$16 sps:$4 sm:$0xff]   ;;  %v1399_v33 = vld [vmem:[%s1799_s2 + $0x4c] ss:$16 sps:$4 sm:$0xff]  }
   0xc   :  { %221 = vmatpush1.bf16.msra.mxu0 %v1364_v10  ;;  %262 = vmatpush1.bf16.msra.mxu1 %v1367_v12  ;;  %v1394_v34 = vld [vmem:[%s1799_s2 + $0x40] ss:$16 sps:$4 sm:$0xff]   ;;  %v1397_v35 = vld [vmem:[%s1799_s2 + $0x48] ss:$16 sps:$4 sm:$0xff]   ;;  %v1402_v36 = vld [vmem:[%s1797_s3 + $0xa4] ss:$16 sps:$4 sm:$0xff]  }
   0xd   :  { %222 = vmatprep.subr.bf16.mxu0 %v1372_v14  ;;  %263 = vmatprep.subr.bf16.mxu1 %v1375_v15  ;;  %v1405_v37 = vld [vmem:[%s1797_s3 + $0xac] ss:$16 sps:$4 sm:$0xff]   ;;  %v1229_v38 = vld [vmem:[%s1800_s0 + $0x2] sm:$0x3]  ;;  %v1403_v40 = vld [vmem:[%s1797_s3 + $0xa8] ss:$16 sps:$4 sm:$0xff]  }
   0xe   :  { %240 = vmatprep.mubr.bf16.mxu0 %v1480_v1  ;;  %281 = vmatprep.mubr.bf16.mxu1 %v1480_v1  ;;  %v1400_v39 = vld [vmem:[%s1797_s3 + $0xa0] ss:$16 sps:$4 sm:$0xff]   ;;  %v1408_v41 = vld [vmem:[%s1797_s3 + $0x84] ss:$16 sps:$4 sm:$0xff]   ;;  %v1411_v42 = vld [vmem:[%s1797_s3 + $0x8c] ss:$16 sps:$4 sm:$0xff]  }
   0xf   :  { %v1406_v43 = vld [vmem:[%s1797_s3 + $0x80] ss:$16 sps:$4 sm:$0xff]   ;;  %v1409_v44 = vld [vmem:[%s1797_s3 + $0x88] ss:$16 sps:$4 sm:$0xff]   ;;  %v1414_v45 = vld [vmem:[%s1799_s2 + $0xa4] ss:$16 sps:$4 sm:$0xff]  }
  0x10   :  { %223 = vmatpush1.bf16.msra.mxu0 %v1370_v16  ;;  %264 = vmatpush1.bf16.msra.mxu1 %v1373_v17  ;;  %v1417_v46 = vld [vmem:[%s1799_s2 + $0xac] ss:$16 sps:$4 sm:$0xff]   ;;  %v1278_v47 = vld [vmem:[%s1798_s1 + $0x4] sm:$0x3]  ;;  %v1412_v48 = vld [vmem:[%s1799_s2 + $0xa0] ss:$16 sps:$4 sm:$0xff]  }
  0x11   :  { %391 = vmatprep.subr.bf16.mxu0 %v1378_v18  ;;  %432 = vmatprep.subr.bf16.mxu1 %v1381_v19  ;;  %v1415_v49 = vld [vmem:[%s1799_s2 + $0xa8] ss:$16 sps:$4 sm:$0xff]   ;;  %v1420_v50 = vld [vmem:[%s1799_s2 + $0x84] ss:$16 sps:$4 sm:$0xff]   ;;  %v1423_v51 = vld [vmem:[%s1799_s2 + $0x8c] ss:$16 sps:$4 sm:$0xff]  }
  0x12   :  { %v1418_v52 = vld [vmem:[%s1799_s2 + $0x80] ss:$16 sps:$4 sm:$0xff]   ;;  %v1421_v53 = vld [vmem:[%s1799_s2 + $0x88] ss:$16 sps:$4 sm:$0xff]   ;;  %v1426_v54 = vld [vmem:[%s1797_s3 + $0xe4] ss:$16 sps:$4 sm:$0xff]  }
  0x13   :  { %1227 = vmatmul.mubr.msk.bf16.vlgmr.msra.gmra.mxu0 %vm79_vm0, %v21_v20  ;;  %1228 = vmatmul.mubr.msk.bf16.vlgmr.msra.gmra.mxu1 %vm79_vm0, %v21_v20  ;;  %v1429_v55 = vld [vmem:[%s1797_s3 + $0xec] ss:$16 sps:$4 sm:$0xff]   ;;  %v290_v56 = vld [vmem:[%s1801_s4] sm:$0xf]  ;;  %v1269_v58 = vld [vmem:[%s1800_s0 + $0x4] sm:$0x3] }
  0x14   :  { %392 = vmatpush1.bf16.msra.mxu0 %v1376_v21  ;;  %433 = vmatpush1.bf16.msra.mxu1 %v1379_v22  ;;  %v883_v57 = vld [vmem:[%s1801_s4] sm:$0xf]  ;;  %v1427_v60 = vld [vmem:[%s1797_s3 + $0xe8] ss:$16 sps:$4 sm:$0xff]   ;;  %v1432_v61 = vld [vmem:[%s1797_s3 + $0xc4] ss:$16 sps:$4 sm:$0xff]  }
  0x15   :  { %393 = vmatprep.subr.bf16.mxu0 %v1384_v23  ;;  %434 = vmatprep.subr.bf16.mxu1 %v1387_v24  ;;  %v1424_v59 = vld [vmem:[%s1797_s3 + $0xe0] ss:$16 sps:$4 sm:$0xff]   ;;  %v1435_v62 = vld [vmem:[%s1797_s3 + $0xcc] ss:$16 sps:$4 sm:$0xff]   ;;  %v1433_v0 = vld [vmem:[%s1797_s3 + $0xc8] ss:$16 sps:$4 sm:$0xff]  }
  0x16   :  { %411 = vmatprep.mubr.bf16.mxu0 %v1480_v1  ;;  %452 = vmatprep.mubr.bf16.mxu1 %v1480_v1  ;;  %v1430_v63 = vld [vmem:[%s1797_s3 + $0xc0] ss:$16 sps:$4 sm:$0xff]   ;;  %v1438_v4 = vld [vmem:[%s1799_s2 + $0xe4] ss:$16 sps:$4 sm:$0xff]   ;;  %v1441_v5 = vld [vmem:[%s1799_s2 + $0xec] ss:$16 sps:$4 sm:$0xff]  }
  0x17   :  { %293 = vperm.xlu0 %1350, %v290_v56   ;;  %886 = vperm.xlu1 %1351, %v883_v57   ;;  %v586_v2 = vld [vmem:[%s1801_s4] sm:$0xf]  ;;  %v1318_v6 = vld [vmem:[%s1798_s1 + $0x6] sm:$0x3]  ;;  %v1439_v8 = vld [vmem:[%s1799_s2 + $0xe8] ss:$16 sps:$4 sm:$0xff]  }
  0x18   :  { %394 = vmatpush1.bf16.msra.mxu0 %v1382_v25  ;;  %435 = vmatpush1.bf16.msra.mxu1 %v1385_v26  ;;  %v1180_v3 = vld [vmem:[%s1801_s4] sm:$0xf]  ;;  %v1444_v9 = vld [vmem:[%s1799_s2 + $0xc4] ss:$16 sps:$4 sm:$0xff]   ;;  %v1447_v10 = vld [vmem:[%s1799_s2 + $0xcc] ss:$16 sps:$4 sm:$0xff]  }
  0x19   :  { %516 = vmatprep.subr.bf16.mxu0 %v1390_v27  ;;  %557 = vmatprep.subr.bf16.mxu1 %v1393_v28  ;;  %v1436_v7 = vld [vmem:[%s1799_s2 + $0xe0] ss:$16 sps:$4 sm:$0xff]   ;;  %v1445_v12 = vld [vmem:[%s1799_s2 + $0xc8] ss:$16 sps:$4 sm:$0xff]   ;;  %v1309_v13 = vld [vmem:[%s1800_s0 + $0x6] sm:$0x3] }
  0x1a   :  { %v1442_v11 = vld [vmem:[%s1799_s2 + $0xc0] ss:$16 sps:$4 sm:$0xff]  }
  0x1b   :  { %1255 = vmatmul.mubr.msk.bf16.vlgmr.msra.gmra.mxu0 %vm79_vm0, %v1238_v29  ;;  %1256 = vmatmul.mubr.msk.bf16.vlgmr.msra.gmra.mxu1 %vm79_vm0, %v1238_v29 }
  0x1c   :  { %517 = vmatpush1.bf16.msra.mxu0 %v1388_v30  ;;  %558 = vmatpush1.bf16.msra.mxu1 %v1391_v31 }
  0x1d   :  { %518 = vmatprep.subr.bf16.mxu0 %v1396_v32  ;;  %559 = vmatprep.subr.bf16.mxu1 %v1399_v33 }
  0x1e   :  { %536 = vmatprep.mubr.bf16.mxu0 %v1480_v1  ;;  %577 = vmatprep.mubr.bf16.mxu1 %v1480_v1 }
  0x1f   :  { %589 = vperm.xlu0 %1350, %v586_v2   ;;  %1183 = vperm.xlu1 %1351, %v1180_v3  }
  0x20   :  { %519 = vmatpush1.bf16.msra.mxu0 %v1394_v34  ;;  %560 = vmatpush1.bf16.msra.mxu1 %v1397_v35 }
  0x21   :  { %688 = vmatprep.subr.bf16.mxu0 %v1402_v36  ;;  %729 = vmatprep.subr.bf16.mxu1 %v1405_v37 }
  0x23   :  { %1265 = vmatmul.mubr.msk.bf16.vlgmr.msra.gmra.mxu0 %vm79_vm0, %v1229_v38  ;;  %1266 = vmatmul.mubr.msk.bf16.vlgmr.msra.gmra.mxu1 %vm79_vm0, %v1229_v38 }
  0x24   :  { %689 = vmatpush1.bf16.msra.mxu0 %v1400_v39  ;;  %730 = vmatpush1.bf16.msra.mxu1 %v1403_v40 }
  0x25   :  { %690 = vmatprep.subr.bf16.mxu0 %v1408_v41  ;;  %731 = vmatprep.subr.bf16.mxu1 %v1411_v42 }
  0x26   :  { %708 = vmatprep.mubr.bf16.mxu0 %v1480_v1  ;;  %749 = vmatprep.mubr.bf16.mxu1 %v1480_v1 }
  0x28   :  { %691 = vmatpush1.bf16.msra.mxu0 %v1406_v43  ;;  %732 = vmatpush1.bf16.msra.mxu1 %v1409_v44 }
  0x29   :  { %813 = vmatprep.subr.bf16.mxu0 %v1414_v45  ;;  %854 = vmatprep.subr.bf16.mxu1 %v1417_v46 }
  0x2b   :  { %1295 = vmatmul.mubr.msk.bf16.vlgmr.msra.gmra.mxu0 %vm79_vm0, %v1278_v47  ;;  %1296 = vmatmul.mubr.msk.bf16.vlgmr.msra.gmra.mxu1 %vm79_vm0, %v1278_v47 }
  0x2c   :  { %814 = vmatpush1.bf16.msra.mxu0 %v1412_v48  ;;  %855 = vmatpush1.bf16.msra.mxu1 %v1415_v49 }
  0x2d   :  { %815 = vmatprep.subr.bf16.mxu0 %v1420_v50  ;;  %856 = vmatprep.subr.bf16.mxu1 %v1423_v51 }
  0x2e   :  { %833 = vmatprep.mubr.bf16.mxu0 %v1480_v1  ;;  %874 = vmatprep.mubr.bf16.mxu1 %v1480_v1 }
  0x30   :  { %816 = vmatpush1.bf16.msra.mxu0 %v1418_v52  ;;  %857 = vmatpush1.bf16.msra.mxu1 %v1421_v53 }
  0x31   :  { %985 = vmatprep.subr.bf16.mxu0 %v1426_v54  ;;  %1026 = vmatprep.subr.bf16.mxu1 %v1429_v55 }
  0x33   :  { %1305 = vmatmul.mubr.msk.bf16.vlgmr.msra.gmra.mxu0 %vm79_vm0, %v1269_v58  ;;  %1306 = vmatmul.mubr.msk.bf16.vlgmr.msra.gmra.mxu1 %vm79_vm0, %v1269_v58 }
  0x34   :  { %986 = vmatpush1.bf16.msra.mxu0 %v1424_v59  ;;  %1027 = vmatpush1.bf16.msra.mxu1 %v1427_v60 }
  0x35   :  { %987 = vmatprep.subr.bf16.mxu0 %v1432_v61  ;;  %1028 = vmatprep.subr.bf16.mxu1 %v1435_v62 }
  0x36   :  { %1005 = vmatprep.mubr.bf16.mxu0 %v1480_v1  ;;  %1046 = vmatprep.mubr.bf16.mxu1 %v1480_v1 }
  0x38   :  { %988 = vmatpush1.bf16.msra.mxu0 %v1430_v63  ;;  %1029 = vmatpush1.bf16.msra.mxu1 %v1433_v0 }
  0x39   :  { %1110 = vmatprep.subr.bf16.mxu0 %v1438_v4  ;;  %1151 = vmatprep.subr.bf16.mxu1 %v1441_v5 }
  0x3b   :  { %1335 = vmatmul.mubr.msk.bf16.vlgmr.msra.gmra.mxu0 %vm79_vm0, %v1318_v6  ;;  %1336 = vmatmul.mubr.msk.bf16.vlgmr.msra.gmra.mxu1 %vm79_vm0, %v1318_v6 }
  0x3c   :  { %1111 = vmatpush1.bf16.msra.mxu0 %v1436_v7  ;;  %1152 = vmatpush1.bf16.msra.mxu1 %v1439_v8 }
  0x3d   :  { %1112 = vmatprep.subr.bf16.mxu0 %v1444_v9  ;;  %1153 = vmatprep.subr.bf16.mxu1 %v1447_v10 }
  0x3e   :  { %1130 = vmatprep.mubr.bf16.mxu0 %v1480_v1  ;;  %1171 = vmatprep.mubr.bf16.mxu1 %v1480_v1 }
  0x40   :  { %1113 = vmatpush1.bf16.msra.mxu0 %v1442_v11  ;;  %1154 = vmatpush1.bf16.msra.mxu1 %v1445_v12 }
  0x43   :  { %1345 = vmatmul.mubr.msk.bf16.vlgmr.msra.gmra.mxu0 %vm79_vm0, %v1309_v13  ;;  %1346 = vmatmul.mubr.msk.bf16.vlgmr.msra.gmra.mxu1 %vm79_vm0, %v1309_v13 }
  0x92   :  { %v294_v22 = vpop.permute.xlu0 %293 }
  0x9a   :  { %v590_v46 = vpop.permute.xlu0 %589 }
  0xcb   :  { %v117_v14 = vpop.f32.mrf.mxu0  ;;  %v158_v15 = vpop.f32.mrf.mxu1 }
  0xcd   :  { %v119_v16 = vpop.f32.mrf.mxu0  ;;  %v160_v17 = vpop.f32.mrf.mxu1 }
  0xcf   :  { %v121_v18 = vpop.f32.mrf.mxu0  ;;  %v162_v19 = vpop.f32.mrf.mxu1 }
  0xd1   :  { %v122_v20 = vpop.f32.mrf.mxu0  ;;  %v163_v21 = vpop.f32.mrf.mxu1 }
  0xd3   :  { %v242_v1 = vpop.f32.mrf.mxu0  ;;  %v283_v23 = vpop.f32.mrf.mxu1 }
  0xd4   :  { %v243_v24 = vadd.f32 %v242_v1, %v117_v14  ;;  %v284_v25 = vadd.f32 %v283_v23, %v158_v15  ;;  %v887_v14 = vpop.permute.xlu1 %886 }
  0xd5   :  { %v244_v26 = vpop.f32.mrf.mxu0  ;;  %v285_v27 = vpop.f32.mrf.mxu1 }
  0xd6   :  { %v296_v28 = vadd.f32 %v294_v22, %v243_v24  ;;  %v298_v29 = vadd.f32 %v294_v22, %v284_v25  ;;  %v245_v30 = vadd.f32 %v244_v26, %v119_v16  ;;  %v286_v31 = vadd.f32 %v285_v27, %v160_v17 }
  0xd7   :  { %v246_v32 = vpop.f32.mrf.mxu0  ;;  %v287_v33 = vpop.f32.mrf.mxu1 }
  0xd8   :  { %1448 = vtanh.f32 %v296_v28  ;;  %v297_v34 = vadd.f32 %v294_v22, %v245_v30  ;;  %v299_v35 = vadd.f32 %v294_v22, %v286_v31 }
  0xd9   :  { %1450 = vtanh.f32 %v298_v29  ;;  %v247_v36 = vpop.f32.mrf.mxu0  ;;  %v288_v37 = vpop.f32.mrf.mxu1 }
  0xda   :  { %1452 = vtanh.f32 %v297_v34 }
  0xdb   :  { %1454 = vtanh.f32 %v299_v35  ;;  %v413_v38 = vpop.f32.mrf.mxu0  ;;  %v454_v39 = vpop.f32.mrf.mxu1 }
  0xdd   :  { %v415_v40 = vpop.f32.mrf.mxu0  ;;  %v456_v41 = vpop.f32.mrf.mxu1 }
  0xdf   :  { %v417_v42 = vpop.f32.mrf.mxu0  ;;  %v458_v43 = vpop.f32.mrf.mxu1 }
  0xe1   :  { %v418_v44 = vpop.f32.mrf.mxu0  ;;  %v459_v45 = vpop.f32.mrf.mxu1 }
  0xe3   :  { %v538_v47 = vpop.f32.mrf.mxu0  ;;  %v579_v48 = vpop.f32.mrf.mxu1 }
  0xe4   :  { %v539_v49 = vadd.f32 %v538_v47, %v413_v38  ;;  %v580_v50 = vadd.f32 %v579_v48, %v454_v39  ;;  %v1184_v48 = vpop.permute.xlu1 %1183 }
  0xe5   :  { %v1449_v51 = vpop.eup %1448  ;;  %v540_v52 = vpop.f32.mrf.mxu0 }
  0xe6   :  { %v581_v53 = vpop.f32.mrf.mxu1  ;;  %v1451_v54 = vpop.eup %1450  ;;  %v592_v55 = vadd.f32 %v590_v46, %v539_v49  ;;  %v594_v56 = vadd.f32 %v590_v46, %v580_v50  ;;  %v541_v57 = vadd.f32 %v540_v52, %v415_v40 }
  0xe7   :  { %v582_v58 = vadd.f32 %v581_v53, %v456_v41  ;;  %v1453_v59 = vpop.eup %1452  ;;  %v542_v60 = vpop.f32.mrf.mxu0 }
  0xe8   :  { %v583_v61 = vpop.f32.mrf.mxu1  ;;  %v1455_v62 = vpop.eup %1454  ;;  %v308_v63 = vcombine.low %v1449_v51, %v1453_v59  ;;  %1456 = vtanh.f32 %v592_v55  ;;  %v593_v0 = vadd.f32 %v590_v46, %v541_v57 }
  0xe9   :  { %v595_v2 = vadd.f32 %v590_v46, %v582_v58  ;;  %v309_v3 = vcombine.low %v1451_v54, %v1455_v62  ;;  %1458 = vtanh.f32 %v594_v56  ;;  %v543_v4 = vpop.f32.mrf.mxu0 }
  0xea   :  { %v584_v5 = vpop.f32.mrf.mxu1  ;;  %312 = vst [vmem:[%s1802_s5] sm:$0xff] %v308_v63  ;;  %1460 = vtanh.f32 %v593_v0 }
  0xeb   :  { %313 = vst [vmem:[%s1802_s5 + $0x8] sm:$0xff] %v309_v3  ;;  %1462 = vtanh.f32 %v595_v2  ;;  %v710_v6 = vpop.f32.mrf.mxu0 }
  0xec   :  { %v751_v7 = vpop.f32.mrf.mxu1 }
  0xed   :  { %v712_v8 = vpop.f32.mrf.mxu0 }
  0xee   :  { %v753_v9 = vpop.f32.mrf.mxu1 }
  0xef   :  { %v714_v10 = vpop.f32.mrf.mxu0 }
  0xf0   :  { %v755_v11 = vpop.f32.mrf.mxu1 }
  0xf1   :  { %v715_v12 = vpop.f32.mrf.mxu0 }
  0xf2   :  { %v756_v13 = vpop.f32.mrf.mxu1 }
  0xf3   :  { %v835_v15 = vpop.f32.mrf.mxu0 }
  0xf4   :  { %v876_v16 = vpop.f32.mrf.mxu1  ;;  %v836_v17 = vadd.f32 %v835_v15, %v710_v6 }
  0xf5   :  { %v877_v18 = vadd.f32 %v876_v16, %v751_v7  ;;  %v1457_v19 = vpop.eup %1456  ;;  %v837_v20 = vpop.f32.mrf.mxu0 }
  0xf6   :  { %v878_v21 = vpop.f32.mrf.mxu1  ;;  %v1459_v22 = vpop.eup %1458  ;;  %v889_v1 = vadd.f32 %v887_v14, %v836_v17  ;;  %v838_v24 = vadd.f32 %v837_v20, %v712_v8 }
  0xf7   :  { %v891_v23 = vadd.f32 %v887_v14, %v877_v18  ;;  %v879_v25 = vadd.f32 %v878_v21, %v753_v9  ;;  %v1461_v26 = vpop.eup %1460  ;;  %v839_v27 = vpop.f32.mrf.mxu0 }
  0xf8   :  { %v880_v28 = vpop.f32.mrf.mxu1  ;;  %v1463_v29 = vpop.eup %1462  ;;  %v604_v30 = vcombine.low %v1457_v19, %v1461_v26  ;;  %1464 = vtanh.f32 %v889_v1  ;;  %v890_v31 = vadd.f32 %v887_v14, %v838_v24 }
  0xf9   :  { %v892_v32 = vadd.f32 %v887_v14, %v879_v25  ;;  %v605_v33 = vcombine.low %v1459_v22, %v1463_v29  ;;  %1466 = vtanh.f32 %v891_v23  ;;  %v840_v34 = vpop.f32.mrf.mxu0 }
  0xfa   :  { %v881_v35 = vpop.f32.mrf.mxu1  ;;  %1267 = vst [vmem:[%s1802_s5 + $0x10] sm:$0xff] %v604_v30  ;;  %1468 = vtanh.f32 %v890_v31 }
  0xfb   :  { %1268 = vst [vmem:[%s1802_s5 + $0x18] sm:$0xff] %v605_v33  ;;  %1470 = vtanh.f32 %v892_v32  ;;  %v1007_v36 = vpop.f32.mrf.mxu0 }
  0xfc   :  { %v1048_v37 = vpop.f32.mrf.mxu1 }
  0xfd   :  { %v1009_v38 = vpop.f32.mrf.mxu0 }
  0xfe   :  { %v1050_v39 = vpop.f32.mrf.mxu1 }
  0xff   :  { %v1011_v40 = vpop.f32.mrf.mxu0 }
 0x100   :  { %v1052_v41 = vpop.f32.mrf.mxu1 }
 0x101   :  { %v1012_v42 = vpop.f32.mrf.mxu0 }
 0x102   :  { %v1053_v43 = vpop.f32.mrf.mxu1 }
 0x103   :  { %v1132_v44 = vpop.f32.mrf.mxu0 }
 0x104   :  { %v1173_v45 = vpop.f32.mrf.mxu1  ;;  %v1133_v46 = vadd.f32 %v1132_v44, %v1007_v36 }
 0x105   :  { %v1174_v47 = vadd.f32 %v1173_v45, %v1048_v37  ;;  %v1465_v49 = vpop.eup %1464  ;;  %v1134_v50 = vpop.f32.mrf.mxu0 }
 0x106   :  { %v1175_v51 = vpop.f32.mrf.mxu1  ;;  %v1467_v52 = vpop.eup %1466  ;;  %v1186_v53 = vadd.f32 %v1184_v48, %v1133_v46  ;;  %v1135_v55 = vadd.f32 %v1134_v50, %v1009_v38 }
 0x107   :  { %v1188_v54 = vadd.f32 %v1184_v48, %v1174_v47  ;;  %v1176_v56 = vadd.f32 %v1175_v51, %v1050_v39  ;;  %v1469_v57 = vpop.eup %1468  ;;  %v1136_v58 = vpop.f32.mrf.mxu0 }
 0x108   :  { %v1177_v59 = vpop.f32.mrf.mxu1  ;;  %v1471_v60 = vpop.eup %1470  ;;  %v901_v61 = vcombine.low %v1465_v49, %v1469_v57  ;;  %1472 = vtanh.f32 %v1186_v53  ;;  %v1187_v62 = vadd.f32 %v1184_v48, %v1135_v55 }
 0x109   :  { %v1189_v63 = vadd.f32 %v1184_v48, %v1176_v56  ;;  %v902_v0 = vcombine.low %v1467_v52, %v1471_v60  ;;  %1474 = vtanh.f32 %v1188_v54  ;;  %v1137_v2 = vpop.f32.mrf.mxu0 }
 0x10a   :  { %v1178_v3 = vpop.f32.mrf.mxu1  ;;  %1307 = vst [vmem:[%s1802_s5 + $0x20] sm:$0xff] %v901_v61  ;;  %1476 = vtanh.f32 %v1187_v62 }
 0x10b   :  { %1308 = vst [vmem:[%s1802_s5 + $0x28] sm:$0xff] %v902_v0  ;;  %1478 = vtanh.f32 %v1189_v63 }
 0x115   :  { %v1473_v4 = vpop.eup %1472 }
 0x116   :  { %v1475_v5 = vpop.eup %1474 }
 0x117   :  { %v1477_v6 = vpop.eup %1476 }
 0x118   :  { %v1479_v7 = vpop.eup %1478  ;;  %v1198_v8 = vcombine.low %v1473_v4, %v1477_v6 }
 0x119   :  { %v1199_v9 = vcombine.low %v1475_v5, %v1479_v7 }
 0x11a   :  { %1347 = vst [vmem:[%s1802_s5 + $0x30] sm:$0xff] %v1198_v8 }
 0x11b   :  { %1348 = vst [vmem:[%s1802_s5 + $0x38] sm:$0xff] %v1199_v9 }

</bundles_post_ra>
